<compile_context>
chip_gen: v5e
topology: v5e:2x2
jax: 0.10.0
libtpu: 0.0.40
codegen_flags: <defaults>
</compile_context>

<pallas_src>
import numpy as np
import jax
import jax.numpy as jnp
from jax import lax
from jax.experimental import pallas as pl
from jax.experimental.pallas import tpu as pltpu

_EPS = 1e-5
_VMEM = pl.BlockSpec(memory_space=pltpu.MemorySpace.VMEM)


# ---------------------------------------------------------------------------
# Static plan: all sequence lengths through the encoder/decoder.
# ---------------------------------------------------------------------------
def _net_plan(l0):
    p1 = (l0 - 4) // 2 + 1          # after maxpool 1
    l1 = p1 - 1                     # after encod2 (k=6, p=2)
    p2 = (l1 - 4) // 2 + 1          # after maxpool 2
    l2 = p2 - 1                     # after encod3
    p3 = (l2 - 4) // 2 + 1          # after maxpool 3
    assert 2 * p1 + 2 == l0 and 2 * p2 + 2 == l1 and 2 * p3 + 2 == l2, (
        "sequence length must round-trip the pool/unpool stack exactly")
    return dict(L0=l0, P1=p1, L1=l1, P2=p2, L2=l2, P3=p3)


# ---------------------------------------------------------------------------
# Host-side constant tables (hoisted out of the kernel — perf review item 6).
# ---------------------------------------------------------------------------
def _pool_selector(l):
    """Even/odd row extractor for MaxPool1d(4,2): rows [0,lh) pick x[2r],
    rows [lh,2lh) pick x[2r+1]."""
    lout = (l - 4) // 2 + 1
    lh = lout + 1
    sel = np.zeros((2 * lh, l), np.float32)
    for r in range(lh):
        sel[r, 2 * r] = 1.0
        sel[lh + r, 2 * r + 1] = 1.0
    return sel


def _unpool_selectors(lp):
    """MaxUnpool1d(4,2): output position l can only be claimed by pooled windows
    j = l//2 (ga, later window wins) and j = l//2 - 1 (gb)."""
    lf = 2 * lp + 2
    ga = np.zeros((lf, lp), np.float32)
    gb = np.zeros((lf, lp), np.float32)
    for l in range(lf):
        j = l // 2
        if 0 <= j < lp:
            ga[l, j] = 1.0
        j = l // 2 - 1
        if 0 <= j < lp:
            gb[l, j] = 1.0
    return ga, gb


def _build_selector_pack(plan):
    """Pack all pool/unpool selector matrices into ONE f32 array (fewer DMAs)."""
    width = plan['L0']
    rows, offs, mats = 0, {}, []

    def add(key, m):
        nonlocal rows
        offs[key] = (rows, m.shape[0], m.shape[1])
        buf = np.zeros((m.shape[0], width), np.float32)
        buf[:, :m.shape[1]] = m
        mats.append(buf)
        rows += m.shape[0]

    for l in (plan['L0'], plan['L1'], plan['L2']):
        add(('pool', l), _pool_selector(l))
    for lp in (plan['P1'], plan['P2'], plan['P3']):
        ga, gb = _unpool_selectors(lp)
        add(('ga', lp), ga)
        add(('gb', lp), gb)
    return np.concatenate(mats, axis=0), offs


def _build_bn_pack():
    """P_C (2C x 2C), P[i,j] = 1 iff i == j (mod C).  One matmul turns a per-lane
    column sum (1, 2C) into batch-combined stats duplicated on both lane halves."""
    mats, offs, rows = [], {}, 0
    for c in (32, 64, 128):
        p = np.zeros((2 * c, 2 * c), np.float32)
        i = np.arange(2 * c)
        p[i, i % c] = 1.0
        p[i, (i % c) + c] = 1.0
        buf = np.zeros((2 * c, 256), np.float32)
        buf[:, :2 * c] = p
        offs[c] = rows
        mats.append(buf)
        rows += 2 * c
    return np.concatenate(mats, axis=0), offs


# ---------------------------------------------------------------------------
# In-kernel helpers — activations are f32 (L, 2*C), lane-stacked batch.
# ---------------------------------------------------------------------------
def _conv(pad_ref, x, w_ref, pad):
    """Stride-1 Conv1d.  w_ref: (K, 2Cin, 2Cout) bf16 block-diagonal taps.
    Zero padding via plain VMEM scratch stores (no gather matmul)."""
    l, c2in = x.shape
    k, _, c2out = w_ref.shape
    lout = l + 2 * pad - k + 1
    if pad > 0:
        lp = l + 2 * pad
        z = jnp.zeros((pad, c2in), jnp.float32)
        pad_ref[0:pad, 0:c2in] = z
        pad_ref[pad + l:lp, 0:c2in] = z
        pad_ref[pad:pad + l, 0:c2in] = x
        xp = pad_ref[0:lp, 0:c2in]
    else:
        xp = x
    acc = jnp.zeros((lout, c2out), jnp.float32)
    for t in range(k):               # K <= 6: one 2-D bf16 MXU matmul per tap
        xs = lax.slice(xp, (t, 0), (t + lout, c2in)).astype(jnp.bfloat16)
        acc = acc + jnp.dot(xs, w_ref[t], preferred_element_type=jnp.float32)
    return acc


def _bn_act(x, pm_ref, p_offs, act, residual=None):
    """BatchNorm1d with batch statistics (gamma=1, beta=0, biased var, eps=1e-5),
    stats combined over the two lane-halves (batch) with a tiny 0/1 matmul."""
    l, c2 = x.shape
    cnt = float(2 * l)               # N * L, N = 2
    po = p_offs[c2 // 2]
    pm = pm_ref[po:po + c2, 0:c2]
    s1 = jnp.dot(jnp.sum(x, axis=0, keepdims=True), pm,
                 preferred_element_type=jnp.float32)
    s2 = jnp.dot(jnp.sum(x * x, axis=0, keepdims=True), pm,
                 preferred_element_type=jnp.float32)
    mean = s1 * (1.0 / cnt)
    var = jnp.maximum(s2 * (1.0 / cnt) - mean * mean, 0.0)   # clamp: no NaN rsqrt
    y = (x - mean) * lax.rsqrt(var + _EPS)
    if residual is not None:
        y = y + residual
    if act == 'tanh':
        y = jnp.tanh(y)
    elif act == 'relu':
        y = jnp.maximum(y, 0.0)
    return y


def _maxpool(x, sel_ref, sel_off):
    """MaxPool1d(4, stride=2, return_indices=True); first-max-wins ties (strict >)."""
    l, c2 = x.shape
    lout = (l - 4) // 2 + 1
    lh = lout + 1
    if lout == 1:                    # window == whole input: plain row slices
        cands = [lax.slice(x, (i, 0), (i + 1, c2)) for i in range(4)]
    else:
        ro, rows, cols = sel_off
        sel = sel_ref[ro:ro + rows, 0:cols]
        xeo = jnp.dot(sel, x, preferred_element_type=jnp.float32)   # [even ; odd]
        xe = lax.slice(xeo, (0, 0), (lh, c2))
        xo = lax.slice(xeo, (lh, 0), (2 * lh, c2))
        cands = [lax.slice(xe, (0, 0), (lout, c2)),        # pos 2j
                 lax.slice(xo, (0, 0), (lout, c2)),        # pos 2j+1
                 lax.slice(xe, (1, 0), (lout + 1, c2)),    # pos 2j+2
                 lax.slice(xo, (1, 0), (lout + 1, c2))]    # pos 2j+3
    base = (2 * lax.broadcasted_iota(jnp.int32, (lout, c2), 0)).astype(jnp.float32)
    best_v, best_i = cands[0], base
    for off in (1, 2, 3):
        v = cands[off]
        i = base + float(off)
        upd = v > best_v
        best_v = jnp.where(upd, v, best_v)
        best_i = jnp.where(upd, i, best_i)
    return best_v, best_i


def _maxunpool(val, idx, sel_ref, ga_off, gb_off):
    """MaxUnpool1d(4, stride=2), output length 2*Lp + 2, last-window-wins."""
    lp, c2 = val.shape
    lf = 2 * lp + 2
    lpos = lax.broadcasted_iota(jnp.int32, (lf, c2), 0).astype(jnp.float32)
    if lp == 1:                      # single window: pure broadcast + compare
        hit = (idx == lpos)
        return jnp.where(hit, jnp.broadcast_to(val, (lf, c2)), 0.0)
    ra, na, ca = ga_off
    rb, nb, cb = gb_off
    ga = sel_ref[ra:ra + na, 0:ca]
    gb = sel_ref[rb:rb + nb, 0:cb]
    val_a = jnp.dot(ga, val, preferred_element_type=jnp.float32)
    idx_a = jnp.dot(ga, idx, preferred_element_type=jnp.float32)
    val_b = jnp.dot(gb, val, preferred_element_type=jnp.float32)
    idx_b = jnp.dot(gb, idx, preferred_element_type=jnp.float32)
    ok_a = (lpos <= float(2 * lp - 1)) & (idx_a == lpos)
    ok_b = (lpos >= 2.0) & (idx_b == lpos)
    return jnp.where(ok_a, val_a, jnp.where(ok_b, val_b, 0.0))


# ---------------------------------------------------------------------------
# The fused kernel.
# ---------------------------------------------------------------------------
def _make_kernel(plan, sel_offs, p_offs):
    def kernel(x2_ref, wenc_ref, benc_ref, e1_ref, l1a_ref, l1b_ref,
               e2_ref, l2a_ref, l2b_ref, e3_ref, d2_ref, d3_ref, d4_ref,
               pm_ref, sel_ref, o_ref, pad_ref):

        def bn(x, act='tanh', residual=None):
            return _bn_act(x, pm_ref, p_offs, act, residual)

        def block(x, wa_ref, wb_ref):
            # Assumed 1-D ResNet BasicBlock (see TODO at top of file).
            h = _conv(pad_ref, x, wa_ref, 1)
            h = bn(h, 'relu')
            h = _conv(pad_ref, h, wb_ref, 1)
            return bn(h, 'relu', residual=x)

        # encod: Conv1d(1,1,k=2,stride=2,bias=True) as a pointwise conv over the
        # (even, odd) sample pair prepared by the wrapper.
        out = _conv(pad_ref, x2_ref[...], wenc_ref, 0) + benc_ref[...]

        # ---------------- encoder ----------------
        out = _conv(pad_ref, out, e1_ref, 2)                  # encod1: 1->32, k5 p2
        out = bn(out, 'tanh')                                 # BN32 + tanh
        out, idx1 = _maxpool(out, sel_ref, sel_offs[('pool', plan['L0'])])
        out = block(out, l1a_ref, l1b_ref)                    # layer1
        out = _conv(pad_ref, out, e2_ref, 2)                  # encod2: 32->64, k6 p2
        out = bn(out, 'tanh')                                 # BN64 + tanh
        out, idx2 = _maxpool(out, sel_ref, sel_offs[('pool', plan['L1'])])
        out = block(out, l2a_ref, l2b_ref)                    # layer2
        out = _conv(pad_ref, out, e3_ref, 2)                  # encod3: 64->128, k6 p2
        out = bn(out, 'tanh')                                 # BN128 + tanh
        out, idx3 = _maxpool(out, sel_ref, sel_offs[('pool', plan['L2'])])

        # ---------------- decoder ---------------- (indices never leave VMEM)
        out = _maxunpool(out, idx3, sel_ref,
                         sel_offs[('ga', plan['P3'])], sel_offs[('gb', plan['P3'])])
        out = bn(out, 'tanh')                                 # BN128 + tanh
        out = _conv(pad_ref, out, d2_ref, 3)                  # decod2: ConvT(128,64,6,p2)
        out = block(out, l2a_ref, l2b_ref)                    # layer2 (shared weights)
        out = _maxunpool(out, idx2, sel_ref,
                         sel_offs[('ga', plan['P2'])], sel_offs[('gb', plan['P2'])])
        out = bn(out, 'tanh')                                 # BN64 + tanh
        out = _conv(pad_ref, out, d3_ref, 3)                  # decod3: ConvT(64,32,6,p2)
        out = block(out, l1a_ref, l1b_ref)                    # layer1 (shared weights)
        out = _maxunpool(out, idx1, sel_ref,
                         sel_offs[('ga', plan['P1'])], sel_offs[('gb', plan['P1'])])
        out = bn(out, 'tanh')                                 # BN32 + tanh
        out = _conv(pad_ref, out, d4_ref, 2)                  # decod4: ConvT(32,1,5,p2)
        o_ref[...] = out
    return kernel


# ---------------------------------------------------------------------------
# Wrapper builder.
# ---------------------------------------------------------------------------
def build_forward(seq_len, batch=2):
    assert batch == 2, "kernel packs exactly 2 batch elements on the lane axis"
    assert seq_len % 2 == 0
    l0 = seq_len // 2
    plan = _net_plan(l0)
    sel_np, sel_offs = _build_selector_pack(plan)
    pm_np, p_offs = _build_bn_pack()
    sel_pack = jnp.asarray(sel_np)
    pm_pack = jnp.asarray(pm_np)
    kernel = _make_kernel(plan, sel_offs, p_offs)

    @jax.jit
    def forward(x, params):
        assert x.shape[0] == 2 and x.shape[1] == 1 and x.shape[2] == seq_len
        n = x.shape[0]
        # Pair even/odd samples -> lanes [b0_even, b0_odd, b1_even, b1_odd].
        xh = x[:, 0, :].reshape(n, l0, 2)
        x2 = jnp.transpose(xh, (1, 0, 2)).reshape(l0, n * 2)
        inputs = (x2, params['w_enc'], params['b_enc'], params['e1'],
                  params['l1a'], params['l1b'], params['e2'],
                  params['l2a'], params['l2b'], params['e3'],
                  params['d2'], params['d3'], params['d4'],
                  pm_pack, sel_pack)
        out = pl.pallas_call(
            kernel,
            out_shape=jax.ShapeDtypeStruct((l0, n), jnp.float32),
            in_specs=[_VMEM] * len(inputs),
            out_specs=_VMEM,
            scratch_shapes=[pltpu.VMEM((l0 + 4, 256), jnp.float32)],
        )(*inputs)
        return jnp.transpose(out).reshape(n, 1, l0)   # back to PyTorch NCW

    return forward


# ---------------------------------------------------------------------------
# Parameter init (PyTorch layouts) + one-time host-side preprocessing.
# ---------------------------------------------------------------------------
def init_params(key):
    """Weights in PyTorch layouts: Conv1d (Cout,Cin,K); ConvTranspose1d (Cin,Cout,K)."""
    def u(k, shape, fan_in):
        b = 1.0 / float(fan_in) ** 0.5
        return jax.random.uniform(k, shape, jnp.float32, -b, b)

    ks = jax.random.split(key, 12)
    return {
        'encod_w': u(ks[0], (1, 1, 2), 2),      # Conv1d(1,1,2,stride=2), bias=True
        'encod_b': u(ks[1], (1,), 2),
        'e1_w': u(ks[2], (32, 1, 5), 5),        # bias=False
        'l1_w1': u(ks[3], (32, 32, 3), 96),
        'l1_w2': u(ks[4], (32, 32, 3), 96),
        'e2_w': u(ks[5], (64, 32, 6), 192),
        'l2_w1': u(ks[6], (64, 64, 3), 192),
        'l2_w2': u(ks[7], (64, 64, 3), 192),
        'e3_w': u(ks[8], (128, 64, 6), 384),
        'd2_w': u(ks[9], (128, 64, 6), 384),    # ConvTranspose1d, bias=False
        'd3_w': u(ks[10], (64, 32, 6), 192),
        'd4_w': u(ks[11], (32, 1, 5), 5),
    }


def preprocess_params(p):
    """One-time host prep: tap-major channels-last taps, ConvTranspose flip+transpose,
    block-diagonal batch-2 fold, bf16 cast (MXU operands)."""
    def conv_taps(w):            # (Cout, Cin, K) -> (K, Cin, Cout)
        return np.transpose(np.asarray(w, np.float32), (2, 1, 0))

    def convT_taps(w):           # (Cin, Cout, K) -> flip K -> (K, Cin, Cout)
        return np.transpose(np.asarray(w, np.float32)[:, :, ::-1], (2, 0, 1))

    def blockdiag(taps):         # (K, Cin, Cout) -> (K, 2Cin, 2Cout) bf16
        k, cin, cout = taps.shape
        bd = np.zeros((k, 2 * cin, 2 * cout), np.float32)
        bd[:, :cin, :cout] = taps
        bd[:, cin:, cout:] = taps
        return jnp.asarray(bd, jnp.bfloat16)

    b = float(np.asarray(p['encod_b'], np.float32)[0])
    return {
        # encod as a K=1 pointwise conv over the (even, odd) pair.
        'w_enc': blockdiag(conv_taps(p['encod_w']).reshape(1, 2, 1)),   # (1,4,2)
        'b_enc': jnp.asarray(np.full((1, 2), b, np.float32)),
        'e1': blockdiag(conv_taps(p['e1_w'])),     # (5,  2,  64)
        'l1a': blockdiag(conv_taps(p['l1_w1'])),   # (3, 64,  64)
        'l1b': blockdiag(conv_taps(p['l1_w2'])),
        'e2': blockdiag(conv_taps(p['e2_w'])),     # (6, 64, 128)
        'l2a': blockdiag(conv_taps(p['l2_w1'])),   # (3,128, 128)
        'l2b': blockdiag(conv_taps(p['l2_w2'])),
        'e3': blockdiag(conv_taps(p['e3_w'])),     # (6,128, 256)
        'd2': blockdiag(convT_taps(p['d2_w'])),    # (6,256, 128)
        'd3': blockdiag(convT_taps(p['d3_w'])),    # (6,128,  64)
        'd4': blockdiag(convT_taps(p['d4_w'])),    # (5, 64,   2)
    }


if __name__ == '__main__':
    key = jax.random.PRNGKey(0)
    k_x, k_p = jax.random.split(key)
    N, L = 2, 56        # L chosen so every pool/unpool round-trip is exact
    x = jax.random.normal(k_x, (N, 1, L), jnp.float32)
    params = preprocess_params(init_params(k_p))
    forward = build_forward(L, batch=N)
    y = forward(x, params)
    y = jax.block_until_ready(y)
    assert y.shape == (N, 1, L // 2), y.shape
    assert bool(jnp.all(jnp.isfinite(y)))
    print("KERNEL_OK")
</pallas_src>

<mosaic_0001>
module attributes {stable_mosaic.version = 11 : i64} {
  func.func @kernel(%arg0: memref<28x4xf32, #tpu.memory_space<vmem>>, %arg1: memref<1x4x2xbf16, #tpu.memory_space<vmem>>, %arg2: memref<1x2xf32, #tpu.memory_space<vmem>>, %arg3: memref<5x2x64xbf16, #tpu.memory_space<vmem>>, %arg4: memref<3x64x64xbf16, #tpu.memory_space<vmem>>, %arg5: memref<3x64x64xbf16, #tpu.memory_space<vmem>>, %arg6: memref<6x64x128xbf16, #tpu.memory_space<vmem>>, %arg7: memref<3x128x128xbf16, #tpu.memory_space<vmem>>, %arg8: memref<3x128x128xbf16, #tpu.memory_space<vmem>>, %arg9: memref<6x128x256xbf16, #tpu.memory_space<vmem>>, %arg10: memref<6x256x128xbf16, #tpu.memory_space<vmem>>, %arg11: memref<6x128x64xbf16, #tpu.memory_space<vmem>>, %arg12: memref<5x64x2xbf16, #tpu.memory_space<vmem>>, %arg13: memref<448x256xf32, #tpu.memory_space<vmem>>, %arg14: memref<132x28xf32, #tpu.memory_space<vmem>>, %arg15: memref<28x2xf32, #tpu.memory_space<vmem>>, %arg16: memref<32x256xf32, #tpu.memory_space<vmem>>) attributes {dimension_semantics = [], scalar_prefetch = 0 : i64, scratch_operands = 1 : i64, tpu.core_type = #tpu.core_type<tc>} {
    %c0 = arith.constant 0 : index
    %c0_0 = arith.constant 0 : index
    %0 = vector.load %arg0[%c0, %c0_0] : memref<28x4xf32, #tpu.memory_space<vmem>>, vector<28x4xf32>
    %cst = arith.constant 0.000000e+00 : f32
    %1 = vector.broadcast %cst : f32 to vector<28x2xf32>
    %2 = vector.extract_strided_slice %0 {offsets = [0, 0], sizes = [28, 4], strides = [1, 1]} : vector<28x4xf32> to vector<28x4xf32>
    %3 = arith.truncf %2 : vector<28x4xf32> to vector<28x4xbf16>
    %c0_1 = arith.constant 0 : index
    %c0_2 = arith.constant 0 : index
    %c0_3 = arith.constant 0 : index
    %4 = vector.load %arg1[%c0_1, %c0_2, %c0_3] : memref<1x4x2xbf16, #tpu.memory_space<vmem>>, vector<1x4x2xbf16>
    %5 = vector.shape_cast %4 : vector<1x4x2xbf16> to vector<4x2xbf16>
    %cst_4 = arith.constant dense<0.000000e+00> : vector<28x2xf32>
    %6 = tpu.matmul %3, %5, %cst_4 {dimension_numbers = #tpu.dot_dimension_numbers<[1], [0], [0], [1], [0, 0, 1, 1], [], []>} : vector<28x4xbf16>, vector<4x2xbf16>, vector<28x2xf32> -> vector<28x2xf32>
    %7 = arith.addf %1, %6 : vector<28x2xf32>
    %c0_5 = arith.constant 0 : index
    %c0_6 = arith.constant 0 : index
    %8 = vector.load %arg2[%c0_5, %c0_6] : memref<1x2xf32, #tpu.memory_space<vmem>>, vector<1x2xf32>
    %9 = vector.broadcast %8 : vector<1x2xf32> to vector<28x2xf32>
    %10 = arith.addf %7, %9 : vector<28x2xf32>
    %cst_7 = arith.constant 0.000000e+00 : f32
    %11 = vector.broadcast %cst_7 : f32 to vector<2x2xf32>
    %c0_8 = arith.constant 0 : index
    %c0_9 = arith.constant 0 : index
    %12 = vector.load %arg16[%c0_8, %c0_9] : memref<32x256xf32, #tpu.memory_space<vmem>>, vector<2x2xf32>
    tpu.vector_store %arg16[%c0_8, %c0_9], %11 {strides = array<i32>} : memref<32x256xf32, #tpu.memory_space<vmem>>, vector<2x2xf32>,
    %c30 = arith.constant 30 : index
    %c0_10 = arith.constant 0 : index
    %13 = vector.load %arg16[%c30, %c0_10] : memref<32x256xf32, #tpu.memory_space<vmem>>, vector<2x2xf32>
    tpu.vector_store %arg16[%c30, %c0_10], %11 {strides = array<i32>} : memref<32x256xf32, #tpu.memory_space<vmem>>, vector<2x2xf32>,
    %c2 = arith.constant 2 : index
    %c0_11 = arith.constant 0 : index
    %14 = vector.load %arg16[%c2, %c0_11] : memref<32x256xf32, #tpu.memory_space<vmem>>, vector<28x2xf32>
    tpu.vector_store %arg16[%c2, %c0_11], %10 {strides = array<i32>} : memref<32x256xf32, #tpu.memory_space<vmem>>, vector<28x2xf32>,
    %c0_12 = arith.constant 0 : index
    %c0_13 = arith.constant 0 : index
    %15 = vector.load %arg16[%c0_12, %c0_13] : memref<32x256xf32, #tpu.memory_space<vmem>>, vector<32x2xf32>
    %cst_14 = arith.constant 0.000000e+00 : f32
    %16 = vector.broadcast %cst_14 : f32 to vector<28x64xf32>
    %17 = vector.extract_strided_slice %15 {offsets = [0, 0], sizes = [28, 2], strides = [1, 1]} : vector<32x2xf32> to vector<28x2xf32>
    %18 = arith.truncf %17 : vector<28x2xf32> to vector<28x2xbf16>
    %c0_15 = arith.constant 0 : index
    %c0_16 = arith.constant 0 : index
    %c0_17 = arith.constant 0 : index
    %19 = vector.load %arg3[%c0_15, %c0_16, %c0_17] : memref<5x2x64xbf16, #tpu.memory_space<vmem>>, vector<1x2x64xbf16>
    %20 = vector.shape_cast %19 : vector<1x2x64xbf16> to vector<2x64xbf16>
    %cst_18 = arith.constant dense<0.000000e+00> : vector<28x64xf32>
    %21 = tpu.matmul %18, %20, %cst_18 {dimension_numbers = #tpu.dot_dimension_numbers<[1], [0], [0], [1], [0, 0, 1, 1], [], []>} : vector<28x2xbf16>, vector<2x64xbf16>, vector<28x64xf32> -> vector<28x64xf32>
    %22 = arith.addf %16, %21 : vector<28x64xf32>
    %23 = vector.extract_strided_slice %15 {offsets = [1, 0], sizes = [28, 2], strides = [1, 1]} : vector<32x2xf32> to vector<28x2xf32>
    %24 = arith.truncf %23 : vector<28x2xf32> to vector<28x2xbf16>
    %c1 = arith.constant 1 : index
    %c0_19 = arith.constant 0 : index
    %c0_20 = arith.constant 0 : index
    %25 = vector.load %arg3[%c1, %c0_19, %c0_20] : memref<5x2x64xbf16, #tpu.memory_space<vmem>>, vector<1x2x64xbf16>
    %26 = vector.shape_cast %25 : vector<1x2x64xbf16> to vector<2x64xbf16>
    %cst_21 = arith.constant dense<0.000000e+00> : vector<28x64xf32>
    %27 = tpu.matmul %24, %26, %cst_21 {dimension_numbers = #tpu.dot_dimension_numbers<[1], [0], [0], [1], [0, 0, 1, 1], [], []>} : vector<28x2xbf16>, vector<2x64xbf16>, vector<28x64xf32> -> vector<28x64xf32>
    %28 = arith.addf %22, %27 : vector<28x64xf32>
    %29 = vector.extract_strided_slice %15 {offsets = [2, 0], sizes = [28, 2], strides = [1, 1]} : vector<32x2xf32> to vector<28x2xf32>
    %30 = arith.truncf %29 : vector<28x2xf32> to vector<28x2xbf16>
    %c2_22 = arith.constant 2 : index
    %c0_23 = arith.constant 0 : index
    %c0_24 = arith.constant 0 : index
    %31 = vector.load %arg3[%c2_22, %c0_23, %c0_24] : memref<5x2x64xbf16, #tpu.memory_space<vmem>>, vector<1x2x64xbf16>
    %32 = vector.shape_cast %31 : vector<1x2x64xbf16> to vector<2x64xbf16>
    %cst_25 = arith.constant dense<0.000000e+00> : vector<28x64xf32>
    %33 = tpu.matmul %30, %32, %cst_25 {dimension_numbers = #tpu.dot_dimension_numbers<[1], [0], [0], [1], [0, 0, 1, 1], [], []>} : vector<28x2xbf16>, vector<2x64xbf16>, vector<28x64xf32> -> vector<28x64xf32>
    %34 = arith.addf %28, %33 : vector<28x64xf32>
    %35 = vector.extract_strided_slice %15 {offsets = [3, 0], sizes = [28, 2], strides = [1, 1]} : vector<32x2xf32> to vector<28x2xf32>
    %36 = arith.truncf %35 : vector<28x2xf32> to vector<28x2xbf16>
    %c3 = arith.constant 3 : index
    %c0_26 = arith.constant 0 : index
    %c0_27 = arith.constant 0 : index
    %37 = vector.load %arg3[%c3, %c0_26, %c0_27] : memref<5x2x64xbf16, #tpu.memory_space<vmem>>, vector<1x2x64xbf16>
    %38 = vector.shape_cast %37 : vector<1x2x64xbf16> to vector<2x64xbf16>
    %cst_28 = arith.constant dense<0.000000e+00> : vector<28x64xf32>
    %39 = tpu.matmul %36, %38, %cst_28 {dimension_numbers = #tpu.dot_dimension_numbers<[1], [0], [0], [1], [0, 0, 1, 1], [], []>} : vector<28x2xbf16>, vector<2x64xbf16>, vector<28x64xf32> -> vector<28x64xf32>
    %40 = arith.addf %34, %39 : vector<28x64xf32>
    %41 = vector.extract_strided_slice %15 {offsets = [4, 0], sizes = [28, 2], strides = [1, 1]} : vector<32x2xf32> to vector<28x2xf32>
    %42 = arith.truncf %41 : vector<28x2xf32> to vector<28x2xbf16>
    %c4 = arith.constant 4 : index
    %c0_29 = arith.constant 0 : index
    %c0_30 = arith.constant 0 : index
    %43 = vector.load %arg3[%c4, %c0_29, %c0_30] : memref<5x2x64xbf16, #tpu.memory_space<vmem>>, vector<1x2x64xbf16>
    %44 = vector.shape_cast %43 : vector<1x2x64xbf16> to vector<2x64xbf16>
    %cst_31 = arith.constant dense<0.000000e+00> : vector<28x64xf32>
    %45 = tpu.matmul %42, %44, %cst_31 {dimension_numbers = #tpu.dot_dimension_numbers<[1], [0], [0], [1], [0, 0, 1, 1], [], []>} : vector<28x2xbf16>, vector<2x64xbf16>, vector<28x64xf32> -> vector<28x64xf32>
    %46 = arith.addf %40, %45 : vector<28x64xf32>
    %c0_32 = arith.constant 0 : index
    %c0_33 = arith.constant 0 : index
    %47 = vector.load %arg13[%c0_32, %c0_33] : memref<448x256xf32, #tpu.memory_space<vmem>>, vector<64x64xf32>
    %cst_34 = arith.constant dense<0.000000e+00> : vector<64xf32>
    %48 = vector.multi_reduction <add>, %46, %cst_34 [0] : vector<28x64xf32> to vector<64xf32>
    %49 = vector.shape_cast %48 : vector<64xf32> to vector<1x64xf32>
    %cst_35 = arith.constant dense<0.000000e+00> : vector<1x64xf32>
    %50 = tpu.matmul %49, %47, %cst_35 {dimension_numbers = #tpu.dot_dimension_numbers<[1], [0], [0], [1], [0, 0, 1, 1], [], []>} : vector<1x64xf32>, vector<64x64xf32>, vector<1x64xf32> -> vector<1x64xf32>
    %51 = arith.mulf %46, %46 : vector<28x64xf32>
    %cst_36 = arith.constant dense<0.000000e+00> : vector<64xf32>
    %52 = vector.multi_reduction <add>, %51, %cst_36 [0] : vector<28x64xf32> to vector<64xf32>
    %53 = vector.shape_cast %52 : vector<64xf32> to vector<1x64xf32>
    %cst_37 = arith.constant dense<0.000000e+00> : vector<1x64xf32>
    %54 = tpu.matmul %53, %47, %cst_37 {dimension_numbers = #tpu.dot_dimension_numbers<[1], [0], [0], [1], [0, 0, 1, 1], [], []>} : vector<1x64xf32>, vector<64x64xf32>, vector<1x64xf32> -> vector<1x64xf32>
    %cst_38 = arith.constant 0.0178571437 : f32
    %55 = vector.broadcast %cst_38 : f32 to vector<1x64xf32>
    %56 = arith.mulf %50, %55 : vector<1x64xf32>
    %cst_39 = arith.constant 0.0178571437 : f32
    %57 = vector.broadcast %cst_39 : f32 to vector<1x64xf32>
    %58 = arith.mulf %54, %57 : vector<1x64xf32>
    %59 = arith.mulf %56, %56 : vector<1x64xf32>
    %60 = arith.subf %58, %59 : vector<1x64xf32>
    %cst_40 = arith.constant 0.000000e+00 : f32
    %61 = vector.broadcast %cst_40 : f32 to vector<1x64xf32>
    %62 = arith.maximumf %60, %61 : vector<1x64xf32>
    %63 = vector.broadcast %56 : vector<1x64xf32> to vector<28x64xf32>
    %64 = arith.subf %46, %63 : vector<28x64xf32>
    %cst_41 = arith.constant 9.99999974E-6 : f32
    %65 = vector.broadcast %cst_41 : f32 to vector<1x64xf32>
    %66 = arith.addf %62, %65 : vector<1x64xf32>
    %67 = math.rsqrt %66 : vector<1x64xf32>
    %68 = vector.broadcast %67 : vector<1x64xf32> to vector<28x64xf32>
    %69 = arith.mulf %64, %68 : vector<28x64xf32>
    %70 = math.tanh %69 : vector<28x64xf32>
    %c0_42 = arith.constant 0 : index
    %c0_43 = arith.constant 0 : index
    %71 = vector.load %arg14[%c0_42, %c0_43] : memref<132x28xf32, #tpu.memory_space<vmem>>, vector<28x28xf32>
    %cst_44 = arith.constant dense<0.000000e+00> : vector<28x64xf32>
    %72 = tpu.matmul %71, %70, %cst_44 {dimension_numbers = #tpu.dot_dimension_numbers<[1], [0], [0], [1], [0, 0, 1, 1], [], []>} : vector<28x28xf32>, vector<28x64xf32>, vector<28x64xf32> -> vector<28x64xf32>
    %73 = vector.extract_strided_slice %72 {offsets = [0, 0], sizes = [14, 64], strides = [1, 1]} : vector<28x64xf32> to vector<14x64xf32>
    %74 = vector.extract_strided_slice %72 {offsets = [14, 0], sizes = [14, 64], strides = [1, 1]} : vector<28x64xf32> to vector<14x64xf32>
    %75 = vector.extract_strided_slice %73 {offsets = [0, 0], sizes = [13, 64], strides = [1, 1]} : vector<14x64xf32> to vector<13x64xf32>
    %76 = vector.extract_strided_slice %74 {offsets = [0, 0], sizes = [13, 64], strides = [1, 1]} : vector<14x64xf32> to vector<13x64xf32>
    %77 = vector.extract_strided_slice %73 {offsets = [1, 0], sizes = [13, 64], strides = [1, 1]} : vector<14x64xf32> to vector<13x64xf32>
    %78 = vector.extract_strided_slice %74 {offsets = [1, 0], sizes = [13, 64], strides = [1, 1]} : vector<14x64xf32> to vector<13x64xf32>
    %79 = tpu.iota {dimensions = array<i32: 0>} : vector<13x64xi32>
    %c2_i32 = arith.constant 2 : i32
    %80 = vector.broadcast %c2_i32 : i32 to vector<13x64xi32>
    %81 = arith.muli %80, %79 : vector<13x64xi32>
    %82 = arith.sitofp %81 : vector<13x64xi32> to vector<13x64xf32>
    %cst_45 = arith.constant 1.000000e+00 : f32
    %83 = vector.broadcast %cst_45 : f32 to vector<13x64xf32>
    %84 = arith.addf %82, %83 : vector<13x64xf32>
    %85 = arith.cmpf ogt, %76, %75 : vector<13x64xf32>
    %86 = arith.select %85, %76, %75 : vector<13x64xi1>, vector<13x64xf32>
    %87 = arith.select %85, %84, %82 : vector<13x64xi1>, vector<13x64xf32>
    %cst_46 = arith.constant 2.000000e+00 : f32
    %88 = vector.broadcast %cst_46 : f32 to vector<13x64xf32>
    %89 = arith.addf %82, %88 : vector<13x64xf32>
    %90 = arith.cmpf ogt, %77, %86 : vector<13x64xf32>
    %91 = arith.select %90, %77, %86 : vector<13x64xi1>, vector<13x64xf32>
    %92 = arith.select %90, %89, %87 : vector<13x64xi1>, vector<13x64xf32>
    %cst_47 = arith.constant 3.000000e+00 : f32
    %93 = vector.broadcast %cst_47 : f32 to vector<13x64xf32>
    %94 = arith.addf %82, %93 : vector<13x64xf32>
    %95 = arith.cmpf ogt, %78, %91 : vector<13x64xf32>
    %96 = arith.select %95, %78, %91 : vector<13x64xi1>, vector<13x64xf32>
    %97 = arith.select %95, %94, %92 : vector<13x64xi1>, vector<13x64xf32>
    %cst_48 = arith.constant 0.000000e+00 : f32
    %98 = vector.broadcast %cst_48 : f32 to vector<1x64xf32>
    %c0_49 = arith.constant 0 : index
    %c0_50 = arith.constant 0 : index
    %99 = vector.load %arg16[%c0_49, %c0_50] : memref<32x256xf32, #tpu.memory_space<vmem>>, vector<1x64xf32>
    tpu.vector_store %arg16[%c0_49, %c0_50], %98 {strides = array<i32>} : memref<32x256xf32, #tpu.memory_space<vmem>>, vector<1x64xf32>,
    %c14 = arith.constant 14 : index
    %c0_51 = arith.constant 0 : index
    %100 = vector.load %arg16[%c14, %c0_51] : memref<32x256xf32, #tpu.memory_space<vmem>>, vector<1x64xf32>
    tpu.vector_store %arg16[%c14, %c0_51], %98 {strides = array<i32>} : memref<32x256xf32, #tpu.memory_space<vmem>>, vector<1x64xf32>,
    %c1_52 = arith.constant 1 : index
    %c0_53 = arith.constant 0 : index
    %101 = vector.load %arg16[%c1_52, %c0_53] : memref<32x256xf32, #tpu.memory_space<vmem>>, vector<13x64xf32>
    tpu.vector_store %arg16[%c1_52, %c0_53], %96 {strides = array<i32>} : memref<32x256xf32, #tpu.memory_space<vmem>>, vector<13x64xf32>,
    %c0_54 = arith.constant 0 : index
    %c0_55 = arith.constant 0 : index
    %102 = vector.load %arg16[%c0_54, %c0_55] : memref<32x256xf32, #tpu.memory_space<vmem>>, vector<15x64xf32>
    %cst_56 = arith.constant 0.000000e+00 : f32
    %103 = vector.broadcast %cst_56 : f32 to vector<13x64xf32>
    %104 = vector.extract_strided_slice %102 {offsets = [0, 0], sizes = [13, 64], strides = [1, 1]} : vector<15x64xf32> to vector<13x64xf32>
    %105 = arith.truncf %104 : vector<13x64xf32> to vector<13x64xbf16>
    %c0_57 = arith.constant 0 : index
    %c0_58 = arith.constant 0 : index
    %c0_59 = arith.constant 0 : index
    %106 = vector.load %arg4[%c0_57, %c0_58, %c0_59] : memref<3x64x64xbf16, #tpu.memory_space<vmem>>, vector<1x64x64xbf16>
    %107 = vector.shape_cast %106 : vector<1x64x64xbf16> to vector<64x64xbf16>
    %cst_60 = arith.constant dense<0.000000e+00> : vector<13x64xf32>
    %108 = tpu.matmul %105, %107, %cst_60 {dimension_numbers = #tpu.dot_dimension_numbers<[1], [0], [0], [1], [0, 0, 1, 1], [], []>} : vector<13x64xbf16>, vector<64x64xbf16>, vector<13x64xf32> -> vector<13x64xf32>
    %109 = arith.addf %103, %108 : vector<13x64xf32>
    %110 = vector.extract_strided_slice %102 {offsets = [1, 0], sizes = [13, 64], strides = [1, 1]} : vector<15x64xf32> to vector<13x64xf32>
    %111 = arith.truncf %110 : vector<13x64xf32> to vector<13x64xbf16>
    %c1_61 = arith.constant 1 : index
    %c0_62 = arith.constant 0 : index
    %c0_63 = arith.constant 0 : index
    %112 = vector.load %arg4[%c1_61, %c0_62, %c0_63] : memref<3x64x64xbf16, #tpu.memory_space<vmem>>, vector<1x64x64xbf16>
    %113 = vector.shape_cast %112 : vector<1x64x64xbf16> to vector<64x64xbf16>
    %cst_64 = arith.constant dense<0.000000e+00> : vector<13x64xf32>
    %114 = tpu.matmul %111, %113, %cst_64 {dimension_numbers = #tpu.dot_dimension_numbers<[1], [0], [0], [1], [0, 0, 1, 1], [], []>} : vector<13x64xbf16>, vector<64x64xbf16>, vector<13x64xf32> -> vector<13x64xf32>
    %115 = arith.addf %109, %114 : vector<13x64xf32>
    %116 = vector.extract_strided_slice %102 {offsets = [2, 0], sizes = [13, 64], strides = [1, 1]} : vector<15x64xf32> to vector<13x64xf32>
    %117 = arith.truncf %116 : vector<13x64xf32> to vector<13x64xbf16>
    %c2_65 = arith.constant 2 : index
    %c0_66 = arith.constant 0 : index
    %c0_67 = arith.constant 0 : index
    %118 = vector.load %arg4[%c2_65, %c0_66, %c0_67] : memref<3x64x64xbf16, #tpu.memory_space<vmem>>, vector<1x64x64xbf16>
    %119 = vector.shape_cast %118 : vector<1x64x64xbf16> to vector<64x64xbf16>
    %cst_68 = arith.constant dense<0.000000e+00> : vector<13x64xf32>
    %120 = tpu.matmul %117, %119, %cst_68 {dimension_numbers = #tpu.dot_dimension_numbers<[1], [0], [0], [1], [0, 0, 1, 1], [], []>} : vector<13x64xbf16>, vector<64x64xbf16>, vector<13x64xf32> -> vector<13x64xf32>
    %121 = arith.addf %115, %120 : vector<13x64xf32>
    %c0_69 = arith.constant 0 : index
    %c0_70 = arith.constant 0 : index
    %122 = vector.load %arg13[%c0_69, %c0_70] : memref<448x256xf32, #tpu.memory_space<vmem>>, vector<64x64xf32>
    %cst_71 = arith.constant dense<0.000000e+00> : vector<64xf32>
    %123 = vector.multi_reduction <add>, %121, %cst_71 [0] : vector<13x64xf32> to vector<64xf32>
    %124 = vector.shape_cast %123 : vector<64xf32> to vector<1x64xf32>
    %cst_72 = arith.constant dense<0.000000e+00> : vector<1x64xf32>
    %125 = tpu.matmul %124, %122, %cst_72 {dimension_numbers = #tpu.dot_dimension_numbers<[1], [0], [0], [1], [0, 0, 1, 1], [], []>} : vector<1x64xf32>, vector<64x64xf32>, vector<1x64xf32> -> vector<1x64xf32>
    %126 = arith.mulf %121, %121 : vector<13x64xf32>
    %cst_73 = arith.constant dense<0.000000e+00> : vector<64xf32>
    %127 = vector.multi_reduction <add>, %126, %cst_73 [0] : vector<13x64xf32> to vector<64xf32>
    %128 = vector.shape_cast %127 : vector<64xf32> to vector<1x64xf32>
    %cst_74 = arith.constant dense<0.000000e+00> : vector<1x64xf32>
    %129 = tpu.matmul %128, %122, %cst_74 {dimension_numbers = #tpu.dot_dimension_numbers<[1], [0], [0], [1], [0, 0, 1, 1], [], []>} : vector<1x64xf32>, vector<64x64xf32>, vector<1x64xf32> -> vector<1x64xf32>
    %cst_75 = arith.constant 0.0384615399 : f32
    %130 = vector.broadcast %cst_75 : f32 to vector<1x64xf32>
    %131 = arith.mulf %125, %130 : vector<1x64xf32>
    %cst_76 = arith.constant 0.0384615399 : f32
    %132 = vector.broadcast %cst_76 : f32 to vector<1x64xf32>
    %133 = arith.mulf %129, %132 : vector<1x64xf32>
    %134 = arith.mulf %131, %131 : vector<1x64xf32>
    %135 = arith.subf %133, %134 : vector<1x64xf32>
    %cst_77 = arith.constant 0.000000e+00 : f32
    %136 = vector.broadcast %cst_77 : f32 to vector<1x64xf32>
    %137 = arith.maximumf %135, %136 : vector<1x64xf32>
    %138 = vector.broadcast %131 : vector<1x64xf32> to vector<13x64xf32>
    %139 = arith.subf %121, %138 : vector<13x64xf32>
    %cst_78 = arith.constant 9.99999974E-6 : f32
    %140 = vector.broadcast %cst_78 : f32 to vector<1x64xf32>
    %141 = arith.addf %137, %140 : vector<1x64xf32>
    %142 = math.rsqrt %141 : vector<1x64xf32>
    %143 = vector.broadcast %142 : vector<1x64xf32> to vector<13x64xf32>
    %144 = arith.mulf %139, %143 : vector<13x64xf32>
    %cst_79 = arith.constant 0.000000e+00 : f32
    %145 = vector.broadcast %cst_79 : f32 to vector<13x64xf32>
    %146 = arith.maximumf %144, %145 : vector<13x64xf32>
    %cst_80 = arith.constant 0.000000e+00 : f32
    %147 = vector.broadcast %cst_80 : f32 to vector<1x64xf32>
    %c0_81 = arith.constant 0 : index
    %c0_82 = arith.constant 0 : index
    %148 = vector.load %arg16[%c0_81, %c0_82] : memref<32x256xf32, #tpu.memory_space<vmem>>, vector<1x64xf32>
    tpu.vector_store %arg16[%c0_81, %c0_82], %147 {strides = array<i32>} : memref<32x256xf32, #tpu.memory_space<vmem>>, vector<1x64xf32>,
    %c14_83 = arith.constant 14 : index
    %c0_84 = arith.constant 0 : index
    %149 = vector.load %arg16[%c14_83, %c0_84] : memref<32x256xf32, #tpu.memory_space<vmem>>, vector<1x64xf32>
    tpu.vector_store %arg16[%c14_83, %c0_84], %147 {strides = array<i32>} : memref<32x256xf32, #tpu.memory_space<vmem>>, vector<1x64xf32>,
    %c1_85 = arith.constant 1 : index
    %c0_86 = arith.constant 0 : index
    %150 = vector.load %arg16[%c1_85, %c0_86] : memref<32x256xf32, #tpu.memory_space<vmem>>, vector<13x64xf32>
    tpu.vector_store %arg16[%c1_85, %c0_86], %146 {strides = array<i32>} : memref<32x256xf32, #tpu.memory_space<vmem>>, vector<13x64xf32>,
    %c0_87 = arith.constant 0 : index
    %c0_88 = arith.constant 0 : index
    %151 = vector.load %arg16[%c0_87, %c0_88] : memref<32x256xf32, #tpu.memory_space<vmem>>, vector<15x64xf32>
    %cst_89 = arith.constant 0.000000e+00 : f32
    %152 = vector.broadcast %cst_89 : f32 to vector<13x64xf32>
    %153 = vector.extract_strided_slice %151 {offsets = [0, 0], sizes = [13, 64], strides = [1, 1]} : vector<15x64xf32> to vector<13x64xf32>
    %154 = arith.truncf %153 : vector<13x64xf32> to vector<13x64xbf16>
    %c0_90 = arith.constant 0 : index
    %c0_91 = arith.constant 0 : index
    %c0_92 = arith.constant 0 : index
    %155 = vector.load %arg5[%c0_90, %c0_91, %c0_92] : memref<3x64x64xbf16, #tpu.memory_space<vmem>>, vector<1x64x64xbf16>
    %156 = vector.shape_cast %155 : vector<1x64x64xbf16> to vector<64x64xbf16>
    %cst_93 = arith.constant dense<0.000000e+00> : vector<13x64xf32>
    %157 = tpu.matmul %154, %156, %cst_93 {dimension_numbers = #tpu.dot_dimension_numbers<[1], [0], [0], [1], [0, 0, 1, 1], [], []>} : vector<13x64xbf16>, vector<64x64xbf16>, vector<13x64xf32> -> vector<13x64xf32>
    %158 = arith.addf %152, %157 : vector<13x64xf32>
    %159 = vector.extract_strided_slice %151 {offsets = [1, 0], sizes = [13, 64], strides = [1, 1]} : vector<15x64xf32> to vector<13x64xf32>
    %160 = arith.truncf %159 : vector<13x64xf32> to vector<13x64xbf16>
    %c1_94 = arith.constant 1 : index
    %c0_95 = arith.constant 0 : index
    %c0_96 = arith.constant 0 : index
    %161 = vector.load %arg5[%c1_94, %c0_95, %c0_96] : memref<3x64x64xbf16, #tpu.memory_space<vmem>>, vector<1x64x64xbf16>
    %162 = vector.shape_cast %161 : vector<1x64x64xbf16> to vector<64x64xbf16>
    %cst_97 = arith.constant dense<0.000000e+00> : vector<13x64xf32>
    %163 = tpu.matmul %160, %162, %cst_97 {dimension_numbers = #tpu.dot_dimension_numbers<[1], [0], [0], [1], [0, 0, 1, 1], [], []>} : vector<13x64xbf16>, vector<64x64xbf16>, vector<13x64xf32> -> vector<13x64xf32>
    %164 = arith.addf %158, %163 : vector<13x64xf32>
    %165 = vector.extract_strided_slice %151 {offsets = [2, 0], sizes = [13, 64], strides = [1, 1]} : vector<15x64xf32> to vector<13x64xf32>
    %166 = arith.truncf %165 : vector<13x64xf32> to vector<13x64xbf16>
    %c2_98 = arith.constant 2 : index
    %c0_99 = arith.constant 0 : index
    %c0_100 = arith.constant 0 : index
    %167 = vector.load %arg5[%c2_98, %c0_99, %c0_100] : memref<3x64x64xbf16, #tpu.memory_space<vmem>>, vector<1x64x64xbf16>
    %168 = vector.shape_cast %167 : vector<1x64x64xbf16> to vector<64x64xbf16>
    %cst_101 = arith.constant dense<0.000000e+00> : vector<13x64xf32>
    %169 = tpu.matmul %166, %168, %cst_101 {dimension_numbers = #tpu.dot_dimension_numbers<[1], [0], [0], [1], [0, 0, 1, 1], [], []>} : vector<13x64xbf16>, vector<64x64xbf16>, vector<13x64xf32> -> vector<13x64xf32>
    %170 = arith.addf %164, %169 : vector<13x64xf32>
    %c0_102 = arith.constant 0 : index
    %c0_103 = arith.constant 0 : index
    %171 = vector.load %arg13[%c0_102, %c0_103] : memref<448x256xf32, #tpu.memory_space<vmem>>, vector<64x64xf32>
    %cst_104 = arith.constant dense<0.000000e+00> : vector<64xf32>
    %172 = vector.multi_reduction <add>, %170, %cst_104 [0] : vector<13x64xf32> to vector<64xf32>
    %173 = vector.shape_cast %172 : vector<64xf32> to vector<1x64xf32>
    %cst_105 = arith.constant dense<0.000000e+00> : vector<1x64xf32>
    %174 = tpu.matmul %173, %171, %cst_105 {dimension_numbers = #tpu.dot_dimension_numbers<[1], [0], [0], [1], [0, 0, 1, 1], [], []>} : vector<1x64xf32>, vector<64x64xf32>, vector<1x64xf32> -> vector<1x64xf32>
    %175 = arith.mulf %170, %170 : vector<13x64xf32>
    %cst_106 = arith.constant dense<0.000000e+00> : vector<64xf32>
    %176 = vector.multi_reduction <add>, %175, %cst_106 [0] : vector<13x64xf32> to vector<64xf32>
    %177 = vector.shape_cast %176 : vector<64xf32> to vector<1x64xf32>
    %cst_107 = arith.constant dense<0.000000e+00> : vector<1x64xf32>
    %178 = tpu.matmul %177, %171, %cst_107 {dimension_numbers = #tpu.dot_dimension_numbers<[1], [0], [0], [1], [0, 0, 1, 1], [], []>} : vector<1x64xf32>, vector<64x64xf32>, vector<1x64xf32> -> vector<1x64xf32>
    %cst_108 = arith.constant 0.0384615399 : f32
    %179 = vector.broadcast %cst_108 : f32 to vector<1x64xf32>
    %180 = arith.mulf %174, %179 : vector<1x64xf32>
    %cst_109 = arith.constant 0.0384615399 : f32
    %181 = vector.broadcast %cst_109 : f32 to vector<1x64xf32>
    %182 = arith.mulf %178, %181 : vector<1x64xf32>
    %183 = arith.mulf %180, %180 : vector<1x64xf32>
    %184 = arith.subf %182, %183 : vector<1x64xf32>
    %cst_110 = arith.constant 0.000000e+00 : f32
    %185 = vector.broadcast %cst_110 : f32 to vector<1x64xf32>
    %186 = arith.maximumf %184, %185 : vector<1x64xf32>
    %187 = vector.broadcast %180 : vector<1x64xf32> to vector<13x64xf32>
    %188 = arith.subf %170, %187 : vector<13x64xf32>
    %cst_111 = arith.constant 9.99999974E-6 : f32
    %189 = vector.broadcast %cst_111 : f32 to vector<1x64xf32>
    %190 = arith.addf %186, %189 : vector<1x64xf32>
    %191 = math.rsqrt %190 : vector<1x64xf32>
    %192 = vector.broadcast %191 : vector<1x64xf32> to vector<13x64xf32>
    %193 = arith.mulf %188, %192 : vector<13x64xf32>
    %194 = arith.addf %193, %96 : vector<13x64xf32>
    %cst_112 = arith.constant 0.000000e+00 : f32
    %195 = vector.broadcast %cst_112 : f32 to vector<13x64xf32>
    %196 = arith.maximumf %194, %195 : vector<13x64xf32>
    %cst_113 = arith.constant 0.000000e+00 : f32
    %197 = vector.broadcast %cst_113 : f32 to vector<2x64xf32>
    %c0_114 = arith.constant 0 : index
    %c0_115 = arith.constant 0 : index
    %198 = vector.load %arg16[%c0_114, %c0_115] : memref<32x256xf32, #tpu.memory_space<vmem>>, vector<2x64xf32>
    tpu.vector_store %arg16[%c0_114, %c0_115], %197 {strides = array<i32>} : memref<32x256xf32, #tpu.memory_space<vmem>>, vector<2x64xf32>,
    %c15 = arith.constant 15 : index
    %c0_116 = arith.constant 0 : index
    %199 = vector.load %arg16[%c15, %c0_116] : memref<32x256xf32, #tpu.memory_space<vmem>>, vector<2x64xf32>
    tpu.vector_store %arg16[%c15, %c0_116], %197 {strides = array<i32>} : memref<32x256xf32, #tpu.memory_space<vmem>>, vector<2x64xf32>,
    %c2_117 = arith.constant 2 : index
    %c0_118 = arith.constant 0 : index
    %200 = vector.load %arg16[%c2_117, %c0_118] : memref<32x256xf32, #tpu.memory_space<vmem>>, vector<13x64xf32>
    tpu.vector_store %arg16[%c2_117, %c0_118], %196 {strides = array<i32>} : memref<32x256xf32, #tpu.memory_space<vmem>>, vector<13x64xf32>,
    %c0_119 = arith.constant 0 : index
    %c0_120 = arith.constant 0 : index
    %201 = vector.load %arg16[%c0_119, %c0_120] : memref<32x256xf32, #tpu.memory_space<vmem>>, vector<17x64xf32>
    %cst_121 = arith.constant 0.000000e+00 : f32
    %202 = vector.broadcast %cst_121 : f32 to vector<12x128xf32>
    %203 = vector.extract_strided_slice %201 {offsets = [0, 0], sizes = [12, 64], strides = [1, 1]} : vector<17x64xf32> to vector<12x64xf32>
    %204 = arith.truncf %203 : vector<12x64xf32> to vector<12x64xbf16>
    %c0_122 = arith.constant 0 : index
    %c0_123 = arith.constant 0 : index
    %c0_124 = arith.constant 0 : index
    %205 = vector.load %arg6[%c0_122, %c0_123, %c0_124] : memref<6x64x128xbf16, #tpu.memory_space<vmem>>, vector<1x64x128xbf16>
    %206 = vector.shape_cast %205 : vector<1x64x128xbf16> to vector<64x128xbf16>
    %cst_125 = arith.constant dense<0.000000e+00> : vector<12x128xf32>
    %207 = tpu.matmul %204, %206, %cst_125 {dimension_numbers = #tpu.dot_dimension_numbers<[1], [0], [0], [1], [0, 0, 1, 1], [], []>} : vector<12x64xbf16>, vector<64x128xbf16>, vector<12x128xf32> -> vector<12x128xf32>
    %208 = arith.addf %202, %207 : vector<12x128xf32>
    %209 = vector.extract_strided_slice %201 {offsets = [1, 0], sizes = [12, 64], strides = [1, 1]} : vector<17x64xf32> to vector<12x64xf32>
    %210 = arith.truncf %209 : vector<12x64xf32> to vector<12x64xbf16>
    %c1_126 = arith.constant 1 : index
    %c0_127 = arith.constant 0 : index
    %c0_128 = arith.constant 0 : index
    %211 = vector.load %arg6[%c1_126, %c0_127, %c0_128] : memref<6x64x128xbf16, #tpu.memory_space<vmem>>, vector<1x64x128xbf16>
    %212 = vector.shape_cast %211 : vector<1x64x128xbf16> to vector<64x128xbf16>
    %cst_129 = arith.constant dense<0.000000e+00> : vector<12x128xf32>
    %213 = tpu.matmul %210, %212, %cst_129 {dimension_numbers = #tpu.dot_dimension_numbers<[1], [0], [0], [1], [0, 0, 1, 1], [], []>} : vector<12x64xbf16>, vector<64x128xbf16>, vector<12x128xf32> -> vector<12x128xf32>
    %214 = arith.addf %208, %213 : vector<12x128xf32>
    %215 = vector.extract_strided_slice %201 {offsets = [2, 0], sizes = [12, 64], strides = [1, 1]} : vector<17x64xf32> to vector<12x64xf32>
    %216 = arith.truncf %215 : vector<12x64xf32> to vector<12x64xbf16>
    %c2_130 = arith.constant 2 : index
    %c0_131 = arith.constant 0 : index
    %c0_132 = arith.constant 0 : index
    %217 = vector.load %arg6[%c2_130, %c0_131, %c0_132] : memref<6x64x128xbf16, #tpu.memory_space<vmem>>, vector<1x64x128xbf16>
    %218 = vector.shape_cast %217 : vector<1x64x128xbf16> to vector<64x128xbf16>
    %cst_133 = arith.constant dense<0.000000e+00> : vector<12x128xf32>
    %219 = tpu.matmul %216, %218, %cst_133 {dimension_numbers = #tpu.dot_dimension_numbers<[1], [0], [0], [1], [0, 0, 1, 1], [], []>} : vector<12x64xbf16>, vector<64x128xbf16>, vector<12x128xf32> -> vector<12x128xf32>
    %220 = arith.addf %214, %219 : vector<12x128xf32>
    %221 = vector.extract_strided_slice %201 {offsets = [3, 0], sizes = [12, 64], strides = [1, 1]} : vector<17x64xf32> to vector<12x64xf32>
    %222 = arith.truncf %221 : vector<12x64xf32> to vector<12x64xbf16>
    %c3_134 = arith.constant 3 : index
    %c0_135 = arith.constant 0 : index
    %c0_136 = arith.constant 0 : index
    %223 = vector.load %arg6[%c3_134, %c0_135, %c0_136] : memref<6x64x128xbf16, #tpu.memory_space<vmem>>, vector<1x64x128xbf16>
    %224 = vector.shape_cast %223 : vector<1x64x128xbf16> to vector<64x128xbf16>
    %cst_137 = arith.constant dense<0.000000e+00> : vector<12x128xf32>
    %225 = tpu.matmul %222, %224, %cst_137 {dimension_numbers = #tpu.dot_dimension_numbers<[1], [0], [0], [1], [0, 0, 1, 1], [], []>} : vector<12x64xbf16>, vector<64x128xbf16>, vector<12x128xf32> -> vector<12x128xf32>
    %226 = arith.addf %220, %225 : vector<12x128xf32>
    %227 = vector.extract_strided_slice %201 {offsets = [4, 0], sizes = [12, 64], strides = [1, 1]} : vector<17x64xf32> to vector<12x64xf32>
    %228 = arith.truncf %227 : vector<12x64xf32> to vector<12x64xbf16>
    %c4_138 = arith.constant 4 : index
    %c0_139 = arith.constant 0 : index
    %c0_140 = arith.constant 0 : index
    %229 = vector.load %arg6[%c4_138, %c0_139, %c0_140] : memref<6x64x128xbf16, #tpu.memory_space<vmem>>, vector<1x64x128xbf16>
    %230 = vector.shape_cast %229 : vector<1x64x128xbf16> to vector<64x128xbf16>
    %cst_141 = arith.constant dense<0.000000e+00> : vector<12x128xf32>
    %231 = tpu.matmul %228, %230, %cst_141 {dimension_numbers = #tpu.dot_dimension_numbers<[1], [0], [0], [1], [0, 0, 1, 1], [], []>} : vector<12x64xbf16>, vector<64x128xbf16>, vector<12x128xf32> -> vector<12x128xf32>
    %232 = arith.addf %226, %231 : vector<12x128xf32>
    %233 = vector.extract_strided_slice %201 {offsets = [5, 0], sizes = [12, 64], strides = [1, 1]} : vector<17x64xf32> to vector<12x64xf32>
    %234 = arith.truncf %233 : vector<12x64xf32> to vector<12x64xbf16>
    %c5 = arith.constant 5 : index
    %c0_142 = arith.constant 0 : index
    %c0_143 = arith.constant 0 : index
    %235 = vector.load %arg6[%c5, %c0_142, %c0_143] : memref<6x64x128xbf16, #tpu.memory_space<vmem>>, vector<1x64x128xbf16>
    %236 = vector.shape_cast %235 : vector<1x64x128xbf16> to vector<64x128xbf16>
    %cst_144 = arith.constant dense<0.000000e+00> : vector<12x128xf32>
    %237 = tpu.matmul %234, %236, %cst_144 {dimension_numbers = #tpu.dot_dimension_numbers<[1], [0], [0], [1], [0, 0, 1, 1], [], []>} : vector<12x64xbf16>, vector<64x128xbf16>, vector<12x128xf32> -> vector<12x128xf32>
    %238 = arith.addf %232, %237 : vector<12x128xf32>
    %c64 = arith.constant 64 : index
    %c0_145 = arith.constant 0 : index
    %239 = vector.load %arg13[%c64, %c0_145] : memref<448x256xf32, #tpu.memory_space<vmem>>, vector<128x128xf32>
    %cst_146 = arith.constant dense<0.000000e+00> : vector<128xf32>
    %240 = vector.multi_reduction <add>, %238, %cst_146 [0] : vector<12x128xf32> to vector<128xf32>
    %241 = vector.shape_cast %240 : vector<128xf32> to vector<1x128xf32>
    %cst_147 = arith.constant dense<0.000000e+00> : vector<1x128xf32>
    %242 = tpu.matmul %241, %239, %cst_147 {dimension_numbers = #tpu.dot_dimension_numbers<[1], [0], [0], [1], [0, 0, 1, 1], [], []>} : vector<1x128xf32>, vector<128x128xf32>, vector<1x128xf32> -> vector<1x128xf32>
    %243 = arith.mulf %238, %238 : vector<12x128xf32>
    %cst_148 = arith.constant dense<0.000000e+00> : vector<128xf32>
    %244 = vector.multi_reduction <add>, %243, %cst_148 [0] : vector<12x128xf32> to vector<128xf32>
    %245 = vector.shape_cast %244 : vector<128xf32> to vector<1x128xf32>
    %cst_149 = arith.constant dense<0.000000e+00> : vector<1x128xf32>
    %246 = tpu.matmul %245, %239, %cst_149 {dimension_numbers = #tpu.dot_dimension_numbers<[1], [0], [0], [1], [0, 0, 1, 1], [], []>} : vector<1x128xf32>, vector<128x128xf32>, vector<1x128xf32> -> vector<1x128xf32>
    %cst_150 = arith.constant 0.0416666679 : f32
    %247 = vector.broadcast %cst_150 : f32 to vector<1x128xf32>
    %248 = arith.mulf %242, %247 : vector<1x128xf32>
    %cst_151 = arith.constant 0.0416666679 : f32
    %249 = vector.broadcast %cst_151 : f32 to vector<1x128xf32>
    %250 = arith.mulf %246, %249 : vector<1x128xf32>
    %251 = arith.mulf %248, %248 : vector<1x128xf32>
    %252 = arith.subf %250, %251 : vector<1x128xf32>
    %cst_152 = arith.constant 0.000000e+00 : f32
    %253 = vector.broadcast %cst_152 : f32 to vector<1x128xf32>
    %254 = arith.maximumf %252, %253 : vector<1x128xf32>
    %255 = vector.broadcast %248 : vector<1x128xf32> to vector<12x128xf32>
    %256 = arith.subf %238, %255 : vector<12x128xf32>
    %cst_153 = arith.constant 9.99999974E-6 : f32
    %257 = vector.broadcast %cst_153 : f32 to vector<1x128xf32>
    %258 = arith.addf %254, %257 : vector<1x128xf32>
    %259 = math.rsqrt %258 : vector<1x128xf32>
    %260 = vector.broadcast %259 : vector<1x128xf32> to vector<12x128xf32>
    %261 = arith.mulf %256, %260 : vector<12x128xf32>
    %262 = math.tanh %261 : vector<12x128xf32>
    %c28 = arith.constant 28 : index
    %c0_154 = arith.constant 0 : index
    %263 = vector.load %arg14[%c28, %c0_154] : memref<132x28xf32, #tpu.memory_space<vmem>>, vector<12x12xf32>
    %cst_155 = arith.constant dense<0.000000e+00> : vector<12x128xf32>
    %264 = tpu.matmul %263, %262, %cst_155 {dimension_numbers = #tpu.dot_dimension_numbers<[1], [0], [0], [1], [0, 0, 1, 1], [], []>} : vector<12x12xf32>, vector<12x128xf32>, vector<12x128xf32> -> vector<12x128xf32>
    %265 = vector.extract_strided_slice %264 {offsets = [0, 0], sizes = [6, 128], strides = [1, 1]} : vector<12x128xf32> to vector<6x128xf32>
    %266 = vector.extract_strided_slice %264 {offsets = [6, 0], sizes = [6, 128], strides = [1, 1]} : vector<12x128xf32> to vector<6x128xf32>
    %267 = vector.extract_strided_slice %265 {offsets = [0, 0], sizes = [5, 128], strides = [1, 1]} : vector<6x128xf32> to vector<5x128xf32>
    %268 = vector.extract_strided_slice %266 {offsets = [0, 0], sizes = [5, 128], strides = [1, 1]} : vector<6x128xf32> to vector<5x128xf32>
    %269 = vector.extract_strided_slice %265 {offsets = [1, 0], sizes = [5, 128], strides = [1, 1]} : vector<6x128xf32> to vector<5x128xf32>
    %270 = vector.extract_strided_slice %266 {offsets = [1, 0], sizes = [5, 128], strides = [1, 1]} : vector<6x128xf32> to vector<5x128xf32>
    %271 = tpu.iota {dimensions = array<i32: 0>} : vector<5x128xi32>
    %c2_i32_156 = arith.constant 2 : i32
    %272 = vector.broadcast %c2_i32_156 : i32 to vector<5x128xi32>
    %273 = arith.muli %272, %271 : vector<5x128xi32>
    %274 = arith.sitofp %273 : vector<5x128xi32> to vector<5x128xf32>
    %cst_157 = arith.constant 1.000000e+00 : f32
    %275 = vector.broadcast %cst_157 : f32 to vector<5x128xf32>
    %276 = arith.addf %274, %275 : vector<5x128xf32>
    %277 = arith.cmpf ogt, %268, %267 : vector<5x128xf32>
    %278 = arith.select %277, %268, %267 : vector<5x128xi1>, vector<5x128xf32>
    %279 = arith.select %277, %276, %274 : vector<5x128xi1>, vector<5x128xf32>
    %cst_158 = arith.constant 2.000000e+00 : f32
    %280 = vector.broadcast %cst_158 : f32 to vector<5x128xf32>
    %281 = arith.addf %274, %280 : vector<5x128xf32>
    %282 = arith.cmpf ogt, %269, %278 : vector<5x128xf32>
    %283 = arith.select %282, %269, %278 : vector<5x128xi1>, vector<5x128xf32>
    %284 = arith.select %282, %281, %279 : vector<5x128xi1>, vector<5x128xf32>
    %cst_159 = arith.constant 3.000000e+00 : f32
    %285 = vector.broadcast %cst_159 : f32 to vector<5x128xf32>
    %286 = arith.addf %274, %285 : vector<5x128xf32>
    %287 = arith.cmpf ogt, %270, %283 : vector<5x128xf32>
    %288 = arith.select %287, %270, %283 : vector<5x128xi1>, vector<5x128xf32>
    %289 = arith.select %287, %286, %284 : vector<5x128xi1>, vector<5x128xf32>
    %cst_160 = arith.constant 0.000000e+00 : f32
    %290 = vector.broadcast %cst_160 : f32 to vector<1x128xf32>
    %c0_161 = arith.constant 0 : index
    %c0_162 = arith.constant 0 : index
    %291 = vector.load %arg16[%c0_161, %c0_162] : memref<32x256xf32, #tpu.memory_space<vmem>>, vector<1x128xf32>
    tpu.vector_store %arg16[%c0_161, %c0_162], %290 {strides = array<i32>} : memref<32x256xf32, #tpu.memory_space<vmem>>, vector<1x128xf32>,
    %c6 = arith.constant 6 : index
    %c0_163 = arith.constant 0 : index
    %292 = vector.load %arg16[%c6, %c0_163] : memref<32x256xf32, #tpu.memory_space<vmem>>, vector<1x128xf32>
    tpu.vector_store %arg16[%c6, %c0_163], %290 {strides = array<i32>} : memref<32x256xf32, #tpu.memory_space<vmem>>, vector<1x128xf32>,
    %c1_164 = arith.constant 1 : index
    %c0_165 = arith.constant 0 : index
    %293 = vector.load %arg16[%c1_164, %c0_165] : memref<32x256xf32, #tpu.memory_space<vmem>>, vector<5x128xf32>
    tpu.vector_store %arg16[%c1_164, %c0_165], %288 {strides = array<i32>} : memref<32x256xf32, #tpu.memory_space<vmem>>, vector<5x128xf32>,
    %c0_166 = arith.constant 0 : index
    %c0_167 = arith.constant 0 : index
    %294 = vector.load %arg16[%c0_166, %c0_167] : memref<32x256xf32, #tpu.memory_space<vmem>>, vector<7x128xf32>
    %cst_168 = arith.constant 0.000000e+00 : f32
    %295 = vector.broadcast %cst_168 : f32 to vector<5x128xf32>
    %296 = vector.extract_strided_slice %294 {offsets = [0, 0], sizes = [5, 128], strides = [1, 1]} : vector<7x128xf32> to vector<5x128xf32>
    %297 = arith.truncf %296 : vector<5x128xf32> to vector<5x128xbf16>
    %c0_169 = arith.constant 0 : index
    %c0_170 = arith.constant 0 : index
    %c0_171 = arith.constant 0 : index
    %298 = vector.load %arg7[%c0_169, %c0_170, %c0_171] : memref<3x128x128xbf16, #tpu.memory_space<vmem>>, vector<1x128x128xbf16>
    %299 = vector.shape_cast %298 : vector<1x128x128xbf16> to vector<128x128xbf16>
    %cst_172 = arith.constant dense<0.000000e+00> : vector<5x128xf32>
    %300 = tpu.matmul %297, %299, %cst_172 {dimension_numbers = #tpu.dot_dimension_numbers<[1], [0], [0], [1], [0, 0, 1, 1], [], []>} : vector<5x128xbf16>, vector<128x128xbf16>, vector<5x128xf32> -> vector<5x128xf32>
    %301 = arith.addf %295, %300 : vector<5x128xf32>
    %302 = vector.extract_strided_slice %294 {offsets = [1, 0], sizes = [5, 128], strides = [1, 1]} : vector<7x128xf32> to vector<5x128xf32>
    %303 = arith.truncf %302 : vector<5x128xf32> to vector<5x128xbf16>
    %c1_173 = arith.constant 1 : index
    %c0_174 = arith.constant 0 : index
    %c0_175 = arith.constant 0 : index
    %304 = vector.load %arg7[%c1_173, %c0_174, %c0_175] : memref<3x128x128xbf16, #tpu.memory_space<vmem>>, vector<1x128x128xbf16>
    %305 = vector.shape_cast %304 : vector<1x128x128xbf16> to vector<128x128xbf16>
    %cst_176 = arith.constant dense<0.000000e+00> : vector<5x128xf32>
    %306 = tpu.matmul %303, %305, %cst_176 {dimension_numbers = #tpu.dot_dimension_numbers<[1], [0], [0], [1], [0, 0, 1, 1], [], []>} : vector<5x128xbf16>, vector<128x128xbf16>, vector<5x128xf32> -> vector<5x128xf32>
    %307 = arith.addf %301, %306 : vector<5x128xf32>
    %308 = vector.extract_strided_slice %294 {offsets = [2, 0], sizes = [5, 128], strides = [1, 1]} : vector<7x128xf32> to vector<5x128xf32>
    %309 = arith.truncf %308 : vector<5x128xf32> to vector<5x128xbf16>
    %c2_177 = arith.constant 2 : index
    %c0_178 = arith.constant 0 : index
    %c0_179 = arith.constant 0 : index
    %310 = vector.load %arg7[%c2_177, %c0_178, %c0_179] : memref<3x128x128xbf16, #tpu.memory_space<vmem>>, vector<1x128x128xbf16>
    %311 = vector.shape_cast %310 : vector<1x128x128xbf16> to vector<128x128xbf16>
    %cst_180 = arith.constant dense<0.000000e+00> : vector<5x128xf32>
    %312 = tpu.matmul %309, %311, %cst_180 {dimension_numbers = #tpu.dot_dimension_numbers<[1], [0], [0], [1], [0, 0, 1, 1], [], []>} : vector<5x128xbf16>, vector<128x128xbf16>, vector<5x128xf32> -> vector<5x128xf32>
    %313 = arith.addf %307, %312 : vector<5x128xf32>
    %c64_181 = arith.constant 64 : index
    %c0_182 = arith.constant 0 : index
    %314 = vector.load %arg13[%c64_181, %c0_182] : memref<448x256xf32, #tpu.memory_space<vmem>>, vector<128x128xf32>
    %cst_183 = arith.constant dense<0.000000e+00> : vector<128xf32>
    %315 = vector.multi_reduction <add>, %313, %cst_183 [0] : vector<5x128xf32> to vector<128xf32>
    %316 = vector.shape_cast %315 : vector<128xf32> to vector<1x128xf32>
    %cst_184 = arith.constant dense<0.000000e+00> : vector<1x128xf32>
    %317 = tpu.matmul %316, %314, %cst_184 {dimension_numbers = #tpu.dot_dimension_numbers<[1], [0], [0], [1], [0, 0, 1, 1], [], []>} : vector<1x128xf32>, vector<128x128xf32>, vector<1x128xf32> -> vector<1x128xf32>
    %318 = arith.mulf %313, %313 : vector<5x128xf32>
    %cst_185 = arith.constant dense<0.000000e+00> : vector<128xf32>
    %319 = vector.multi_reduction <add>, %318, %cst_185 [0] : vector<5x128xf32> to vector<128xf32>
    %320 = vector.shape_cast %319 : vector<128xf32> to vector<1x128xf32>
    %cst_186 = arith.constant dense<0.000000e+00> : vector<1x128xf32>
    %321 = tpu.matmul %320, %314, %cst_186 {dimension_numbers = #tpu.dot_dimension_numbers<[1], [0], [0], [1], [0, 0, 1, 1], [], []>} : vector<1x128xf32>, vector<128x128xf32>, vector<1x128xf32> -> vector<1x128xf32>
    %cst_187 = arith.constant 1.000000e-01 : f32
    %322 = vector.broadcast %cst_187 : f32 to vector<1x128xf32>
    %323 = arith.mulf %317, %322 : vector<1x128xf32>
    %cst_188 = arith.constant 1.000000e-01 : f32
    %324 = vector.broadcast %cst_188 : f32 to vector<1x128xf32>
    %325 = arith.mulf %321, %324 : vector<1x128xf32>
    %326 = arith.mulf %323, %323 : vector<1x128xf32>
    %327 = arith.subf %325, %326 : vector<1x128xf32>
    %cst_189 = arith.constant 0.000000e+00 : f32
    %328 = vector.broadcast %cst_189 : f32 to vector<1x128xf32>
    %329 = arith.maximumf %327, %328 : vector<1x128xf32>
    %330 = vector.broadcast %323 : vector<1x128xf32> to vector<5x128xf32>
    %331 = arith.subf %313, %330 : vector<5x128xf32>
    %cst_190 = arith.constant 9.99999974E-6 : f32
    %332 = vector.broadcast %cst_190 : f32 to vector<1x128xf32>
    %333 = arith.addf %329, %332 : vector<1x128xf32>
    %334 = math.rsqrt %333 : vector<1x128xf32>
    %335 = vector.broadcast %334 : vector<1x128xf32> to vector<5x128xf32>
    %336 = arith.mulf %331, %335 : vector<5x128xf32>
    %cst_191 = arith.constant 0.000000e+00 : f32
    %337 = vector.broadcast %cst_191 : f32 to vector<5x128xf32>
    %338 = arith.maximumf %336, %337 : vector<5x128xf32>
    %cst_192 = arith.constant 0.000000e+00 : f32
    %339 = vector.broadcast %cst_192 : f32 to vector<1x128xf32>
    %c0_193 = arith.constant 0 : index
    %c0_194 = arith.constant 0 : index
    %340 = vector.load %arg16[%c0_193, %c0_194] : memref<32x256xf32, #tpu.memory_space<vmem>>, vector<1x128xf32>
    tpu.vector_store %arg16[%c0_193, %c0_194], %339 {strides = array<i32>} : memref<32x256xf32, #tpu.memory_space<vmem>>, vector<1x128xf32>,
    %c6_195 = arith.constant 6 : index
    %c0_196 = arith.constant 0 : index
    %341 = vector.load %arg16[%c6_195, %c0_196] : memref<32x256xf32, #tpu.memory_space<vmem>>, vector<1x128xf32>
    tpu.vector_store %arg16[%c6_195, %c0_196], %339 {strides = array<i32>} : memref<32x256xf32, #tpu.memory_space<vmem>>, vector<1x128xf32>,
    %c1_197 = arith.constant 1 : index
    %c0_198 = arith.constant 0 : index
    %342 = vector.load %arg16[%c1_197, %c0_198] : memref<32x256xf32, #tpu.memory_space<vmem>>, vector<5x128xf32>
    tpu.vector_store %arg16[%c1_197, %c0_198], %338 {strides = array<i32>} : memref<32x256xf32, #tpu.memory_space<vmem>>, vector<5x128xf32>,
    %c0_199 = arith.constant 0 : index
    %c0_200 = arith.constant 0 : index
    %343 = vector.load %arg16[%c0_199, %c0_200] : memref<32x256xf32, #tpu.memory_space<vmem>>, vector<7x128xf32>
    %cst_201 = arith.constant 0.000000e+00 : f32
    %344 = vector.broadcast %cst_201 : f32 to vector<5x128xf32>
    %345 = vector.extract_strided_slice %343 {offsets = [0, 0], sizes = [5, 128], strides = [1, 1]} : vector<7x128xf32> to vector<5x128xf32>
    %346 = arith.truncf %345 : vector<5x128xf32> to vector<5x128xbf16>
    %c0_202 = arith.constant 0 : index
    %c0_203 = arith.constant 0 : index
    %c0_204 = arith.constant 0 : index
    %347 = vector.load %arg8[%c0_202, %c0_203, %c0_204] : memref<3x128x128xbf16, #tpu.memory_space<vmem>>, vector<1x128x128xbf16>
    %348 = vector.shape_cast %347 : vector<1x128x128xbf16> to vector<128x128xbf16>
    %cst_205 = arith.constant dense<0.000000e+00> : vector<5x128xf32>
    %349 = tpu.matmul %346, %348, %cst_205 {dimension_numbers = #tpu.dot_dimension_numbers<[1], [0], [0], [1], [0, 0, 1, 1], [], []>} : vector<5x128xbf16>, vector<128x128xbf16>, vector<5x128xf32> -> vector<5x128xf32>
    %350 = arith.addf %344, %349 : vector<5x128xf32>
    %351 = vector.extract_strided_slice %343 {offsets = [1, 0], sizes = [5, 128], strides = [1, 1]} : vector<7x128xf32> to vector<5x128xf32>
    %352 = arith.truncf %351 : vector<5x128xf32> to vector<5x128xbf16>
    %c1_206 = arith.constant 1 : index
    %c0_207 = arith.constant 0 : index
    %c0_208 = arith.constant 0 : index
    %353 = vector.load %arg8[%c1_206, %c0_207, %c0_208] : memref<3x128x128xbf16, #tpu.memory_space<vmem>>, vector<1x128x128xbf16>
    %354 = vector.shape_cast %353 : vector<1x128x128xbf16> to vector<128x128xbf16>
    %cst_209 = arith.constant dense<0.000000e+00> : vector<5x128xf32>
    %355 = tpu.matmul %352, %354, %cst_209 {dimension_numbers = #tpu.dot_dimension_numbers<[1], [0], [0], [1], [0, 0, 1, 1], [], []>} : vector<5x128xbf16>, vector<128x128xbf16>, vector<5x128xf32> -> vector<5x128xf32>
    %356 = arith.addf %350, %355 : vector<5x128xf32>
    %357 = vector.extract_strided_slice %343 {offsets = [2, 0], sizes = [5, 128], strides = [1, 1]} : vector<7x128xf32> to vector<5x128xf32>
    %358 = arith.truncf %357 : vector<5x128xf32> to vector<5x128xbf16>
    %c2_210 = arith.constant 2 : index
    %c0_211 = arith.constant 0 : index
    %c0_212 = arith.constant 0 : index
    %359 = vector.load %arg8[%c2_210, %c0_211, %c0_212] : memref<3x128x128xbf16, #tpu.memory_space<vmem>>, vector<1x128x128xbf16>
    %360 = vector.shape_cast %359 : vector<1x128x128xbf16> to vector<128x128xbf16>
    %cst_213 = arith.constant dense<0.000000e+00> : vector<5x128xf32>
    %361 = tpu.matmul %358, %360, %cst_213 {dimension_numbers = #tpu.dot_dimension_numbers<[1], [0], [0], [1], [0, 0, 1, 1], [], []>} : vector<5x128xbf16>, vector<128x128xbf16>, vector<5x128xf32> -> vector<5x128xf32>
    %362 = arith.addf %356, %361 : vector<5x128xf32>
    %c64_214 = arith.constant 64 : index
    %c0_215 = arith.constant 0 : index
    %363 = vector.load %arg13[%c64_214, %c0_215] : memref<448x256xf32, #tpu.memory_space<vmem>>, vector<128x128xf32>
    %cst_216 = arith.constant dense<0.000000e+00> : vector<128xf32>
    %364 = vector.multi_reduction <add>, %362, %cst_216 [0] : vector<5x128xf32> to vector<128xf32>
    %365 = vector.shape_cast %364 : vector<128xf32> to vector<1x128xf32>
    %cst_217 = arith.constant dense<0.000000e+00> : vector<1x128xf32>
    %366 = tpu.matmul %365, %363, %cst_217 {dimension_numbers = #tpu.dot_dimension_numbers<[1], [0], [0], [1], [0, 0, 1, 1], [], []>} : vector<1x128xf32>, vector<128x128xf32>, vector<1x128xf32> -> vector<1x128xf32>
    %367 = arith.mulf %362, %362 : vector<5x128xf32>
    %cst_218 = arith.constant dense<0.000000e+00> : vector<128xf32>
    %368 = vector.multi_reduction <add>, %367, %cst_218 [0] : vector<5x128xf32> to vector<128xf32>
    %369 = vector.shape_cast %368 : vector<128xf32> to vector<1x128xf32>
    %cst_219 = arith.constant dense<0.000000e+00> : vector<1x128xf32>
    %370 = tpu.matmul %369, %363, %cst_219 {dimension_numbers = #tpu.dot_dimension_numbers<[1], [0], [0], [1], [0, 0, 1, 1], [], []>} : vector<1x128xf32>, vector<128x128xf32>, vector<1x128xf32> -> vector<1x128xf32>
    %cst_220 = arith.constant 1.000000e-01 : f32
    %371 = vector.broadcast %cst_220 : f32 to vector<1x128xf32>
    %372 = arith.mulf %366, %371 : vector<1x128xf32>
    %cst_221 = arith.constant 1.000000e-01 : f32
    %373 = vector.broadcast %cst_221 : f32 to vector<1x128xf32>
    %374 = arith.mulf %370, %373 : vector<1x128xf32>
    %375 = arith.mulf %372, %372 : vector<1x128xf32>
    %376 = arith.subf %374, %375 : vector<1x128xf32>
    %cst_222 = arith.constant 0.000000e+00 : f32
    %377 = vector.broadcast %cst_222 : f32 to vector<1x128xf32>
    %378 = arith.maximumf %376, %377 : vector<1x128xf32>
    %379 = vector.broadcast %372 : vector<1x128xf32> to vector<5x128xf32>
    %380 = arith.subf %362, %379 : vector<5x128xf32>
    %cst_223 = arith.constant 9.99999974E-6 : f32
    %381 = vector.broadcast %cst_223 : f32 to vector<1x128xf32>
    %382 = arith.addf %378, %381 : vector<1x128xf32>
    %383 = math.rsqrt %382 : vector<1x128xf32>
    %384 = vector.broadcast %383 : vector<1x128xf32> to vector<5x128xf32>
    %385 = arith.mulf %380, %384 : vector<5x128xf32>
    %386 = arith.addf %385, %288 : vector<5x128xf32>
    %cst_224 = arith.constant 0.000000e+00 : f32
    %387 = vector.broadcast %cst_224 : f32 to vector<5x128xf32>
    %388 = arith.maximumf %386, %387 : vector<5x128xf32>
    %cst_225 = arith.constant 0.000000e+00 : f32
    %389 = vector.broadcast %cst_225 : f32 to vector<2x128xf32>
    %c0_226 = arith.constant 0 : index
    %c0_227 = arith.constant 0 : index
    %390 = vector.load %arg16[%c0_226, %c0_227] : memref<32x256xf32, #tpu.memory_space<vmem>>, vector<2x128xf32>
    tpu.vector_store %arg16[%c0_226, %c0_227], %389 {strides = array<i32>} : memref<32x256xf32, #tpu.memory_space<vmem>>, vector<2x128xf32>,
    %c7 = arith.constant 7 : index
    %c0_228 = arith.constant 0 : index
    %391 = vector.load %arg16[%c7, %c0_228] : memref<32x256xf32, #tpu.memory_space<vmem>>, vector<2x128xf32>
    tpu.vector_store %arg16[%c7, %c0_228], %389 {strides = array<i32>} : memref<32x256xf32, #tpu.memory_space<vmem>>, vector<2x128xf32>,
    %c2_229 = arith.constant 2 : index
    %c0_230 = arith.constant 0 : index
    %392 = vector.load %arg16[%c2_229, %c0_230] : memref<32x256xf32, #tpu.memory_space<vmem>>, vector<5x128xf32>
    tpu.vector_store %arg16[%c2_229, %c0_230], %388 {strides = array<i32>} : memref<32x256xf32, #tpu.memory_space<vmem>>, vector<5x128xf32>,
    %c0_231 = arith.constant 0 : index
    %c0_232 = arith.constant 0 : index
    %393 = vector.load %arg16[%c0_231, %c0_232] : memref<32x256xf32, #tpu.memory_space<vmem>>, vector<9x128xf32>
    %cst_233 = arith.constant 0.000000e+00 : f32
    %394 = vector.broadcast %cst_233 : f32 to vector<4x256xf32>
    %395 = vector.extract_strided_slice %393 {offsets = [0, 0], sizes = [4, 128], strides = [1, 1]} : vector<9x128xf32> to vector<4x128xf32>
    %396 = arith.truncf %395 : vector<4x128xf32> to vector<4x128xbf16>
    %c0_234 = arith.constant 0 : index
    %c0_235 = arith.constant 0 : index
    %c0_236 = arith.constant 0 : index
    %397 = vector.load %arg9[%c0_234, %c0_235, %c0_236] : memref<6x128x256xbf16, #tpu.memory_space<vmem>>, vector<1x128x256xbf16>
    %398 = vector.shape_cast %397 : vector<1x128x256xbf16> to vector<128x256xbf16>
    %cst_237 = arith.constant dense<0.000000e+00> : vector<4x256xf32>
    %399 = tpu.matmul %396, %398, %cst_237 {dimension_numbers = #tpu.dot_dimension_numbers<[1], [0], [0], [1], [0, 0, 1, 1], [], []>} : vector<4x128xbf16>, vector<128x256xbf16>, vector<4x256xf32> -> vector<4x256xf32>
    %400 = arith.addf %394, %399 : vector<4x256xf32>
    %401 = vector.extract_strided_slice %393 {offsets = [1, 0], sizes = [4, 128], strides = [1, 1]} : vector<9x128xf32> to vector<4x128xf32>
    %402 = arith.truncf %401 : vector<4x128xf32> to vector<4x128xbf16>
    %c1_238 = arith.constant 1 : index
    %c0_239 = arith.constant 0 : index
    %c0_240 = arith.constant 0 : index
    %403 = vector.load %arg9[%c1_238, %c0_239, %c0_240] : memref<6x128x256xbf16, #tpu.memory_space<vmem>>, vector<1x128x256xbf16>
    %404 = vector.shape_cast %403 : vector<1x128x256xbf16> to vector<128x256xbf16>
    %cst_241 = arith.constant dense<0.000000e+00> : vector<4x256xf32>
    %405 = tpu.matmul %402, %404, %cst_241 {dimension_numbers = #tpu.dot_dimension_numbers<[1], [0], [0], [1], [0, 0, 1, 1], [], []>} : vector<4x128xbf16>, vector<128x256xbf16>, vector<4x256xf32> -> vector<4x256xf32>
    %406 = arith.addf %400, %405 : vector<4x256xf32>
    %407 = vector.extract_strided_slice %393 {offsets = [2, 0], sizes = [4, 128], strides = [1, 1]} : vector<9x128xf32> to vector<4x128xf32>
    %408 = arith.truncf %407 : vector<4x128xf32> to vector<4x128xbf16>
    %c2_242 = arith.constant 2 : index
    %c0_243 = arith.constant 0 : index
    %c0_244 = arith.constant 0 : index
    %409 = vector.load %arg9[%c2_242, %c0_243, %c0_244] : memref<6x128x256xbf16, #tpu.memory_space<vmem>>, vector<1x128x256xbf16>
    %410 = vector.shape_cast %409 : vector<1x128x256xbf16> to vector<128x256xbf16>
    %cst_245 = arith.constant dense<0.000000e+00> : vector<4x256xf32>
    %411 = tpu.matmul %408, %410, %cst_245 {dimension_numbers = #tpu.dot_dimension_numbers<[1], [0], [0], [1], [0, 0, 1, 1], [], []>} : vector<4x128xbf16>, vector<128x256xbf16>, vector<4x256xf32> -> vector<4x256xf32>
    %412 = arith.addf %406, %411 : vector<4x256xf32>
    %413 = vector.extract_strided_slice %393 {offsets = [3, 0], sizes = [4, 128], strides = [1, 1]} : vector<9x128xf32> to vector<4x128xf32>
    %414 = arith.truncf %413 : vector<4x128xf32> to vector<4x128xbf16>
    %c3_246 = arith.constant 3 : index
    %c0_247 = arith.constant 0 : index
    %c0_248 = arith.constant 0 : index
    %415 = vector.load %arg9[%c3_246, %c0_247, %c0_248] : memref<6x128x256xbf16, #tpu.memory_space<vmem>>, vector<1x128x256xbf16>
    %416 = vector.shape_cast %415 : vector<1x128x256xbf16> to vector<128x256xbf16>
    %cst_249 = arith.constant dense<0.000000e+00> : vector<4x256xf32>
    %417 = tpu.matmul %414, %416, %cst_249 {dimension_numbers = #tpu.dot_dimension_numbers<[1], [0], [0], [1], [0, 0, 1, 1], [], []>} : vector<4x128xbf16>, vector<128x256xbf16>, vector<4x256xf32> -> vector<4x256xf32>
    %418 = arith.addf %412, %417 : vector<4x256xf32>
    %419 = vector.extract_strided_slice %393 {offsets = [4, 0], sizes = [4, 128], strides = [1, 1]} : vector<9x128xf32> to vector<4x128xf32>
    %420 = arith.truncf %419 : vector<4x128xf32> to vector<4x128xbf16>
    %c4_250 = arith.constant 4 : index
    %c0_251 = arith.constant 0 : index
    %c0_252 = arith.constant 0 : index
    %421 = vector.load %arg9[%c4_250, %c0_251, %c0_252] : memref<6x128x256xbf16, #tpu.memory_space<vmem>>, vector<1x128x256xbf16>
    %422 = vector.shape_cast %421 : vector<1x128x256xbf16> to vector<128x256xbf16>
    %cst_253 = arith.constant dense<0.000000e+00> : vector<4x256xf32>
    %423 = tpu.matmul %420, %422, %cst_253 {dimension_numbers = #tpu.dot_dimension_numbers<[1], [0], [0], [1], [0, 0, 1, 1], [], []>} : vector<4x128xbf16>, vector<128x256xbf16>, vector<4x256xf32> -> vector<4x256xf32>
    %424 = arith.addf %418, %423 : vector<4x256xf32>
    %425 = vector.extract_strided_slice %393 {offsets = [5, 0], sizes = [4, 128], strides = [1, 1]} : vector<9x128xf32> to vector<4x128xf32>
    %426 = arith.truncf %425 : vector<4x128xf32> to vector<4x128xbf16>
    %c5_254 = arith.constant 5 : index
    %c0_255 = arith.constant 0 : index
    %c0_256 = arith.constant 0 : index
    %427 = vector.load %arg9[%c5_254, %c0_255, %c0_256] : memref<6x128x256xbf16, #tpu.memory_space<vmem>>, vector<1x128x256xbf16>
    %428 = vector.shape_cast %427 : vector<1x128x256xbf16> to vector<128x256xbf16>
    %cst_257 = arith.constant dense<0.000000e+00> : vector<4x256xf32>
    %429 = tpu.matmul %426, %428, %cst_257 {dimension_numbers = #tpu.dot_dimension_numbers<[1], [0], [0], [1], [0, 0, 1, 1], [], []>} : vector<4x128xbf16>, vector<128x256xbf16>, vector<4x256xf32> -> vector<4x256xf32>
    %430 = arith.addf %424, %429 : vector<4x256xf32>
    %c192 = arith.constant 192 : index
    %c0_258 = arith.constant 0 : index
    %431 = vector.load %arg13[%c192, %c0_258] : memref<448x256xf32, #tpu.memory_space<vmem>>, vector<256x256xf32>
    %cst_259 = arith.constant dense<0.000000e+00> : vector<256xf32>
    %432 = vector.multi_reduction <add>, %430, %cst_259 [0] : vector<4x256xf32> to vector<256xf32>
    %433 = vector.shape_cast %432 : vector<256xf32> to vector<1x256xf32>
    %cst_260 = arith.constant dense<0.000000e+00> : vector<1x256xf32>
    %434 = tpu.matmul %433, %431, %cst_260 {dimension_numbers = #tpu.dot_dimension_numbers<[1], [0], [0], [1], [0, 0, 1, 1], [], []>} : vector<1x256xf32>, vector<256x256xf32>, vector<1x256xf32> -> vector<1x256xf32>
    %435 = arith.mulf %430, %430 : vector<4x256xf32>
    %cst_261 = arith.constant dense<0.000000e+00> : vector<256xf32>
    %436 = vector.multi_reduction <add>, %435, %cst_261 [0] : vector<4x256xf32> to vector<256xf32>
    %437 = vector.shape_cast %436 : vector<256xf32> to vector<1x256xf32>
    %cst_262 = arith.constant dense<0.000000e+00> : vector<1x256xf32>
    %438 = tpu.matmul %437, %431, %cst_262 {dimension_numbers = #tpu.dot_dimension_numbers<[1], [0], [0], [1], [0, 0, 1, 1], [], []>} : vector<1x256xf32>, vector<256x256xf32>, vector<1x256xf32> -> vector<1x256xf32>
    %cst_263 = arith.constant 1.250000e-01 : f32
    %439 = vector.broadcast %cst_263 : f32 to vector<1x256xf32>
    %440 = arith.mulf %434, %439 : vector<1x256xf32>
    %cst_264 = arith.constant 1.250000e-01 : f32
    %441 = vector.broadcast %cst_264 : f32 to vector<1x256xf32>
    %442 = arith.mulf %438, %441 : vector<1x256xf32>
    %443 = arith.mulf %440, %440 : vector<1x256xf32>
    %444 = arith.subf %442, %443 : vector<1x256xf32>
    %cst_265 = arith.constant 0.000000e+00 : f32
    %445 = vector.broadcast %cst_265 : f32 to vector<1x256xf32>
    %446 = arith.maximumf %444, %445 : vector<1x256xf32>
    %447 = vector.broadcast %440 : vector<1x256xf32> to vector<4x256xf32>
    %448 = arith.subf %430, %447 : vector<4x256xf32>
    %cst_266 = arith.constant 9.99999974E-6 : f32
    %449 = vector.broadcast %cst_266 : f32 to vector<1x256xf32>
    %450 = arith.addf %446, %449 : vector<1x256xf32>
    %451 = math.rsqrt %450 : vector<1x256xf32>
    %452 = vector.broadcast %451 : vector<1x256xf32> to vector<4x256xf32>
    %453 = arith.mulf %448, %452 : vector<4x256xf32>
    %454 = math.tanh %453 : vector<4x256xf32>
    %455 = vector.extract_strided_slice %454 {offsets = [0, 0], sizes = [1, 256], strides = [1, 1]} : vector<4x256xf32> to vector<1x256xf32>
    %456 = vector.extract_strided_slice %454 {offsets = [1, 0], sizes = [1, 256], strides = [1, 1]} : vector<4x256xf32> to vector<1x256xf32>
    %457 = vector.extract_strided_slice %454 {offsets = [2, 0], sizes = [1, 256], strides = [1, 1]} : vector<4x256xf32> to vector<1x256xf32>
    %458 = vector.extract_strided_slice %454 {offsets = [3, 0], sizes = [1, 256], strides = [1, 1]} : vector<4x256xf32> to vector<1x256xf32>
    %459 = tpu.iota {dimensions = array<i32: 0>} : vector<1x256xi32>
    %c2_i32_267 = arith.constant 2 : i32
    %460 = vector.broadcast %c2_i32_267 : i32 to vector<1x256xi32>
    %461 = arith.muli %460, %459 : vector<1x256xi32>
    %462 = arith.sitofp %461 : vector<1x256xi32> to vector<1x256xf32>
    %cst_268 = arith.constant 1.000000e+00 : f32
    %463 = vector.broadcast %cst_268 : f32 to vector<1x256xf32>
    %464 = arith.addf %462, %463 : vector<1x256xf32>
    %465 = arith.cmpf ogt, %456, %455 : vector<1x256xf32>
    %466 = arith.select %465, %456, %455 : vector<1x256xi1>, vector<1x256xf32>
    %467 = arith.select %465, %464, %462 : vector<1x256xi1>, vector<1x256xf32>
    %cst_269 = arith.constant 2.000000e+00 : f32
    %468 = vector.broadcast %cst_269 : f32 to vector<1x256xf32>
    %469 = arith.addf %462, %468 : vector<1x256xf32>
    %470 = arith.cmpf ogt, %457, %466 : vector<1x256xf32>
    %471 = arith.select %470, %457, %466 : vector<1x256xi1>, vector<1x256xf32>
    %472 = arith.select %470, %469, %467 : vector<1x256xi1>, vector<1x256xf32>
    %cst_270 = arith.constant 3.000000e+00 : f32
    %473 = vector.broadcast %cst_270 : f32 to vector<1x256xf32>
    %474 = arith.addf %462, %473 : vector<1x256xf32>
    %475 = arith.cmpf ogt, %458, %471 : vector<1x256xf32>
    %476 = arith.select %475, %458, %471 : vector<1x256xi1>, vector<1x256xf32>
    %477 = arith.select %475, %474, %472 : vector<1x256xi1>, vector<1x256xf32>
    %478 = tpu.iota {dimensions = array<i32: 0>} : vector<4x256xi32>
    %479 = arith.sitofp %478 : vector<4x256xi32> to vector<4x256xf32>
    %480 = vector.broadcast %477 : vector<1x256xf32> to vector<4x256xf32>
    %481 = arith.cmpf oeq, %480, %479 : vector<4x256xf32>
    %482 = vector.shape_cast %476 : vector<1x256xf32> to vector<1x256xf32>
    %483 = vector.broadcast %482 : vector<1x256xf32> to vector<4x256xf32>
    %cst_271 = arith.constant 0.000000e+00 : f32
    %484 = vector.broadcast %cst_271 : f32 to vector<4x256xf32>
    %485 = arith.select %481, %483, %484 : vector<4x256xi1>, vector<4x256xf32>
    %c192_272 = arith.constant 192 : index
    %c0_273 = arith.constant 0 : index
    %486 = vector.load %arg13[%c192_272, %c0_273] : memref<448x256xf32, #tpu.memory_space<vmem>>, vector<256x256xf32>
    %cst_274 = arith.constant dense<0.000000e+00> : vector<256xf32>
    %487 = vector.multi_reduction <add>, %485, %cst_274 [0] : vector<4x256xf32> to vector<256xf32>
    %488 = vector.shape_cast %487 : vector<256xf32> to vector<1x256xf32>
    %cst_275 = arith.constant dense<0.000000e+00> : vector<1x256xf32>
    %489 = tpu.matmul %488, %486, %cst_275 {dimension_numbers = #tpu.dot_dimension_numbers<[1], [0], [0], [1], [0, 0, 1, 1], [], []>} : vector<1x256xf32>, vector<256x256xf32>, vector<1x256xf32> -> vector<1x256xf32>
    %490 = arith.mulf %485, %485 : vector<4x256xf32>
    %cst_276 = arith.constant dense<0.000000e+00> : vector<256xf32>
    %491 = vector.multi_reduction <add>, %490, %cst_276 [0] : vector<4x256xf32> to vector<256xf32>
    %492 = vector.shape_cast %491 : vector<256xf32> to vector<1x256xf32>
    %cst_277 = arith.constant dense<0.000000e+00> : vector<1x256xf32>
    %493 = tpu.matmul %492, %486, %cst_277 {dimension_numbers = #tpu.dot_dimension_numbers<[1], [0], [0], [1], [0, 0, 1, 1], [], []>} : vector<1x256xf32>, vector<256x256xf32>, vector<1x256xf32> -> vector<1x256xf32>
    %cst_278 = arith.constant 1.250000e-01 : f32
    %494 = vector.broadcast %cst_278 : f32 to vector<1x256xf32>
    %495 = arith.mulf %489, %494 : vector<1x256xf32>
    %cst_279 = arith.constant 1.250000e-01 : f32
    %496 = vector.broadcast %cst_279 : f32 to vector<1x256xf32>
    %497 = arith.mulf %493, %496 : vector<1x256xf32>
    %498 = arith.mulf %495, %495 : vector<1x256xf32>
    %499 = arith.subf %497, %498 : vector<1x256xf32>
    %cst_280 = arith.constant 0.000000e+00 : f32
    %500 = vector.broadcast %cst_280 : f32 to vector<1x256xf32>
    %501 = arith.maximumf %499, %500 : vector<1x256xf32>
    %502 = vector.broadcast %495 : vector<1x256xf32> to vector<4x256xf32>
    %503 = arith.subf %485, %502 : vector<4x256xf32>
    %cst_281 = arith.constant 9.99999974E-6 : f32
    %504 = vector.broadcast %cst_281 : f32 to vector<1x256xf32>
    %505 = arith.addf %501, %504 : vector<1x256xf32>
    %506 = math.rsqrt %505 : vector<1x256xf32>
    %507 = vector.broadcast %506 : vector<1x256xf32> to vector<4x256xf32>
    %508 = arith.mulf %503, %507 : vector<4x256xf32>
    %509 = math.tanh %508 : vector<4x256xf32>
    %cst_282 = arith.constant 0.000000e+00 : f32
    %510 = vector.broadcast %cst_282 : f32 to vector<3x256xf32>
    %c0_283 = arith.constant 0 : index
    %c0_284 = arith.constant 0 : index
    %511 = vector.load %arg16[%c0_283, %c0_284] : memref<32x256xf32, #tpu.memory_space<vmem>>, vector<3x256xf32>
    tpu.vector_store %arg16[%c0_283, %c0_284], %510 {strides = array<i32>} : memref<32x256xf32, #tpu.memory_space<vmem>>, vector<3x256xf32>,
    %c7_285 = arith.constant 7 : index
    %c0_286 = arith.constant 0 : index
    %512 = vector.load %arg16[%c7_285, %c0_286] : memref<32x256xf32, #tpu.memory_space<vmem>>, vector<3x256xf32>
    tpu.vector_store %arg16[%c7_285, %c0_286], %510 {strides = array<i32>} : memref<32x256xf32, #tpu.memory_space<vmem>>, vector<3x256xf32>,
    %c3_287 = arith.constant 3 : index
    %c0_288 = arith.constant 0 : index
    %513 = vector.load %arg16[%c3_287, %c0_288] : memref<32x256xf32, #tpu.memory_space<vmem>>, vector<4x256xf32>
    tpu.vector_store %arg16[%c3_287, %c0_288], %509 {strides = array<i32>} : memref<32x256xf32, #tpu.memory_space<vmem>>, vector<4x256xf32>,
    %c0_289 = arith.constant 0 : index
    %c0_290 = arith.constant 0 : index
    %514 = vector.load %arg16[%c0_289, %c0_290] : memref<32x256xf32, #tpu.memory_space<vmem>>, vector<10x256xf32>
    %cst_291 = arith.constant 0.000000e+00 : f32
    %515 = vector.broadcast %cst_291 : f32 to vector<5x128xf32>
    %516 = vector.extract_strided_slice %514 {offsets = [0, 0], sizes = [5, 256], strides = [1, 1]} : vector<10x256xf32> to vector<5x256xf32>
    %517 = arith.truncf %516 : vector<5x256xf32> to vector<5x256xbf16>
    %c0_292 = arith.constant 0 : index
    %c0_293 = arith.constant 0 : index
    %c0_294 = arith.constant 0 : index
    %518 = vector.load %arg10[%c0_292, %c0_293, %c0_294] : memref<6x256x128xbf16, #tpu.memory_space<vmem>>, vector<1x256x128xbf16>
    %519 = vector.shape_cast %518 : vector<1x256x128xbf16> to vector<256x128xbf16>
    %cst_295 = arith.constant dense<0.000000e+00> : vector<5x128xf32>
    %520 = tpu.matmul %517, %519, %cst_295 {dimension_numbers = #tpu.dot_dimension_numbers<[1], [0], [0], [1], [0, 0, 1, 1], [], []>} : vector<5x256xbf16>, vector<256x128xbf16>, vector<5x128xf32> -> vector<5x128xf32>
    %521 = arith.addf %515, %520 : vector<5x128xf32>
    %522 = vector.extract_strided_slice %514 {offsets = [1, 0], sizes = [5, 256], strides = [1, 1]} : vector<10x256xf32> to vector<5x256xf32>
    %523 = arith.truncf %522 : vector<5x256xf32> to vector<5x256xbf16>
    %c1_296 = arith.constant 1 : index
    %c0_297 = arith.constant 0 : index
    %c0_298 = arith.constant 0 : index
    %524 = vector.load %arg10[%c1_296, %c0_297, %c0_298] : memref<6x256x128xbf16, #tpu.memory_space<vmem>>, vector<1x256x128xbf16>
    %525 = vector.shape_cast %524 : vector<1x256x128xbf16> to vector<256x128xbf16>
    %cst_299 = arith.constant dense<0.000000e+00> : vector<5x128xf32>
    %526 = tpu.matmul %523, %525, %cst_299 {dimension_numbers = #tpu.dot_dimension_numbers<[1], [0], [0], [1], [0, 0, 1, 1], [], []>} : vector<5x256xbf16>, vector<256x128xbf16>, vector<5x128xf32> -> vector<5x128xf32>
    %527 = arith.addf %521, %526 : vector<5x128xf32>
    %528 = vector.extract_strided_slice %514 {offsets = [2, 0], sizes = [5, 256], strides = [1, 1]} : vector<10x256xf32> to vector<5x256xf32>
    %529 = arith.truncf %528 : vector<5x256xf32> to vector<5x256xbf16>
    %c2_300 = arith.constant 2 : index
    %c0_301 = arith.constant 0 : index
    %c0_302 = arith.constant 0 : index
    %530 = vector.load %arg10[%c2_300, %c0_301, %c0_302] : memref<6x256x128xbf16, #tpu.memory_space<vmem>>, vector<1x256x128xbf16>
    %531 = vector.shape_cast %530 : vector<1x256x128xbf16> to vector<256x128xbf16>
    %cst_303 = arith.constant dense<0.000000e+00> : vector<5x128xf32>
    %532 = tpu.matmul %529, %531, %cst_303 {dimension_numbers = #tpu.dot_dimension_numbers<[1], [0], [0], [1], [0, 0, 1, 1], [], []>} : vector<5x256xbf16>, vector<256x128xbf16>, vector<5x128xf32> -> vector<5x128xf32>
    %533 = arith.addf %527, %532 : vector<5x128xf32>
    %534 = vector.extract_strided_slice %514 {offsets = [3, 0], sizes = [5, 256], strides = [1, 1]} : vector<10x256xf32> to vector<5x256xf32>
    %535 = arith.truncf %534 : vector<5x256xf32> to vector<5x256xbf16>
    %c3_304 = arith.constant 3 : index
    %c0_305 = arith.constant 0 : index
    %c0_306 = arith.constant 0 : index
    %536 = vector.load %arg10[%c3_304, %c0_305, %c0_306] : memref<6x256x128xbf16, #tpu.memory_space<vmem>>, vector<1x256x128xbf16>
    %537 = vector.shape_cast %536 : vector<1x256x128xbf16> to vector<256x128xbf16>
    %cst_307 = arith.constant dense<0.000000e+00> : vector<5x128xf32>
    %538 = tpu.matmul %535, %537, %cst_307 {dimension_numbers = #tpu.dot_dimension_numbers<[1], [0], [0], [1], [0, 0, 1, 1], [], []>} : vector<5x256xbf16>, vector<256x128xbf16>, vector<5x128xf32> -> vector<5x128xf32>
    %539 = arith.addf %533, %538 : vector<5x128xf32>
    %540 = vector.extract_strided_slice %514 {offsets = [4, 0], sizes = [5, 256], strides = [1, 1]} : vector<10x256xf32> to vector<5x256xf32>
    %541 = arith.truncf %540 : vector<5x256xf32> to vector<5x256xbf16>
    %c4_308 = arith.constant 4 : index
    %c0_309 = arith.constant 0 : index
    %c0_310 = arith.constant 0 : index
    %542 = vector.load %arg10[%c4_308, %c0_309, %c0_310] : memref<6x256x128xbf16, #tpu.memory_space<vmem>>, vector<1x256x128xbf16>
    %543 = vector.shape_cast %542 : vector<1x256x128xbf16> to vector<256x128xbf16>
    %cst_311 = arith.constant dense<0.000000e+00> : vector<5x128xf32>
    %544 = tpu.matmul %541, %543, %cst_311 {dimension_numbers = #tpu.dot_dimension_numbers<[1], [0], [0], [1], [0, 0, 1, 1], [], []>} : vector<5x256xbf16>, vector<256x128xbf16>, vector<5x128xf32> -> vector<5x128xf32>
    %545 = arith.addf %539, %544 : vector<5x128xf32>
    %546 = vector.extract_strided_slice %514 {offsets = [5, 0], sizes = [5, 256], strides = [1, 1]} : vector<10x256xf32> to vector<5x256xf32>
    %547 = arith.truncf %546 : vector<5x256xf32> to vector<5x256xbf16>
    %c5_312 = arith.constant 5 : index
    %c0_313 = arith.constant 0 : index
    %c0_314 = arith.constant 0 : index
    %548 = vector.load %arg10[%c5_312, %c0_313, %c0_314] : memref<6x256x128xbf16, #tpu.memory_space<vmem>>, vector<1x256x128xbf16>
    %549 = vector.shape_cast %548 : vector<1x256x128xbf16> to vector<256x128xbf16>
    %cst_315 = arith.constant dense<0.000000e+00> : vector<5x128xf32>
    %550 = tpu.matmul %547, %549, %cst_315 {dimension_numbers = #tpu.dot_dimension_numbers<[1], [0], [0], [1], [0, 0, 1, 1], [], []>} : vector<5x256xbf16>, vector<256x128xbf16>, vector<5x128xf32> -> vector<5x128xf32>
    %551 = arith.addf %545, %550 : vector<5x128xf32>
    %cst_316 = arith.constant 0.000000e+00 : f32
    %552 = vector.broadcast %cst_316 : f32 to vector<1x128xf32>
    %c0_317 = arith.constant 0 : index
    %c0_318 = arith.constant 0 : index
    %553 = vector.load %arg16[%c0_317, %c0_318] : memref<32x256xf32, #tpu.memory_space<vmem>>, vector<1x128xf32>
    tpu.vector_store %arg16[%c0_317, %c0_318], %552 {strides = array<i32>} : memref<32x256xf32, #tpu.memory_space<vmem>>, vector<1x128xf32>,
    %c6_319 = arith.constant 6 : index
    %c0_320 = arith.constant 0 : index
    %554 = vector.load %arg16[%c6_319, %c0_320] : memref<32x256xf32, #tpu.memory_space<vmem>>, vector<1x128xf32>
    tpu.vector_store %arg16[%c6_319, %c0_320], %552 {strides = array<i32>} : memref<32x256xf32, #tpu.memory_space<vmem>>, vector<1x128xf32>,
    %c1_321 = arith.constant 1 : index
    %c0_322 = arith.constant 0 : index
    %555 = vector.load %arg16[%c1_321, %c0_322] : memref<32x256xf32, #tpu.memory_space<vmem>>, vector<5x128xf32>
    tpu.vector_store %arg16[%c1_321, %c0_322], %551 {strides = array<i32>} : memref<32x256xf32, #tpu.memory_space<vmem>>, vector<5x128xf32>,
    %c0_323 = arith.constant 0 : index
    %c0_324 = arith.constant 0 : index
    %556 = vector.load %arg16[%c0_323, %c0_324] : memref<32x256xf32, #tpu.memory_space<vmem>>, vector<7x128xf32>
    %cst_325 = arith.constant 0.000000e+00 : f32
    %557 = vector.broadcast %cst_325 : f32 to vector<5x128xf32>
    %558 = vector.extract_strided_slice %556 {offsets = [0, 0], sizes = [5, 128], strides = [1, 1]} : vector<7x128xf32> to vector<5x128xf32>
    %559 = arith.truncf %558 : vector<5x128xf32> to vector<5x128xbf16>
    %c0_326 = arith.constant 0 : index
    %c0_327 = arith.constant 0 : index
    %c0_328 = arith.constant 0 : index
    %560 = vector.load %arg7[%c0_326, %c0_327, %c0_328] : memref<3x128x128xbf16, #tpu.memory_space<vmem>>, vector<1x128x128xbf16>
    %561 = vector.shape_cast %560 : vector<1x128x128xbf16> to vector<128x128xbf16>
    %cst_329 = arith.constant dense<0.000000e+00> : vector<5x128xf32>
    %562 = tpu.matmul %559, %561, %cst_329 {dimension_numbers = #tpu.dot_dimension_numbers<[1], [0], [0], [1], [0, 0, 1, 1], [], []>} : vector<5x128xbf16>, vector<128x128xbf16>, vector<5x128xf32> -> vector<5x128xf32>
    %563 = arith.addf %557, %562 : vector<5x128xf32>
    %564 = vector.extract_strided_slice %556 {offsets = [1, 0], sizes = [5, 128], strides = [1, 1]} : vector<7x128xf32> to vector<5x128xf32>
    %565 = arith.truncf %564 : vector<5x128xf32> to vector<5x128xbf16>
    %c1_330 = arith.constant 1 : index
    %c0_331 = arith.constant 0 : index
    %c0_332 = arith.constant 0 : index
    %566 = vector.load %arg7[%c1_330, %c0_331, %c0_332] : memref<3x128x128xbf16, #tpu.memory_space<vmem>>, vector<1x128x128xbf16>
    %567 = vector.shape_cast %566 : vector<1x128x128xbf16> to vector<128x128xbf16>
    %cst_333 = arith.constant dense<0.000000e+00> : vector<5x128xf32>
    %568 = tpu.matmul %565, %567, %cst_333 {dimension_numbers = #tpu.dot_dimension_numbers<[1], [0], [0], [1], [0, 0, 1, 1], [], []>} : vector<5x128xbf16>, vector<128x128xbf16>, vector<5x128xf32> -> vector<5x128xf32>
    %569 = arith.addf %563, %568 : vector<5x128xf32>
    %570 = vector.extract_strided_slice %556 {offsets = [2, 0], sizes = [5, 128], strides = [1, 1]} : vector<7x128xf32> to vector<5x128xf32>
    %571 = arith.truncf %570 : vector<5x128xf32> to vector<5x128xbf16>
    %c2_334 = arith.constant 2 : index
    %c0_335 = arith.constant 0 : index
    %c0_336 = arith.constant 0 : index
    %572 = vector.load %arg7[%c2_334, %c0_335, %c0_336] : memref<3x128x128xbf16, #tpu.memory_space<vmem>>, vector<1x128x128xbf16>
    %573 = vector.shape_cast %572 : vector<1x128x128xbf16> to vector<128x128xbf16>
    %cst_337 = arith.constant dense<0.000000e+00> : vector<5x128xf32>
    %574 = tpu.matmul %571, %573, %cst_337 {dimension_numbers = #tpu.dot_dimension_numbers<[1], [0], [0], [1], [0, 0, 1, 1], [], []>} : vector<5x128xbf16>, vector<128x128xbf16>, vector<5x128xf32> -> vector<5x128xf32>
    %575 = arith.addf %569, %574 : vector<5x128xf32>
    %c64_338 = arith.constant 64 : index
    %c0_339 = arith.constant 0 : index
    %576 = vector.load %arg13[%c64_338, %c0_339] : memref<448x256xf32, #tpu.memory_space<vmem>>, vector<128x128xf32>
    %cst_340 = arith.constant dense<0.000000e+00> : vector<128xf32>
    %577 = vector.multi_reduction <add>, %575, %cst_340 [0] : vector<5x128xf32> to vector<128xf32>
    %578 = vector.shape_cast %577 : vector<128xf32> to vector<1x128xf32>
    %cst_341 = arith.constant dense<0.000000e+00> : vector<1x128xf32>
    %579 = tpu.matmul %578, %576, %cst_341 {dimension_numbers = #tpu.dot_dimension_numbers<[1], [0], [0], [1], [0, 0, 1, 1], [], []>} : vector<1x128xf32>, vector<128x128xf32>, vector<1x128xf32> -> vector<1x128xf32>
    %580 = arith.mulf %575, %575 : vector<5x128xf32>
    %cst_342 = arith.constant dense<0.000000e+00> : vector<128xf32>
    %581 = vector.multi_reduction <add>, %580, %cst_342 [0] : vector<5x128xf32> to vector<128xf32>
    %582 = vector.shape_cast %581 : vector<128xf32> to vector<1x128xf32>
    %cst_343 = arith.constant dense<0.000000e+00> : vector<1x128xf32>
    %583 = tpu.matmul %582, %576, %cst_343 {dimension_numbers = #tpu.dot_dimension_numbers<[1], [0], [0], [1], [0, 0, 1, 1], [], []>} : vector<1x128xf32>, vector<128x128xf32>, vector<1x128xf32> -> vector<1x128xf32>
    %cst_344 = arith.constant 1.000000e-01 : f32
    %584 = vector.broadcast %cst_344 : f32 to vector<1x128xf32>
    %585 = arith.mulf %579, %584 : vector<1x128xf32>
    %cst_345 = arith.constant 1.000000e-01 : f32
    %586 = vector.broadcast %cst_345 : f32 to vector<1x128xf32>
    %587 = arith.mulf %583, %586 : vector<1x128xf32>
    %588 = arith.mulf %585, %585 : vector<1x128xf32>
    %589 = arith.subf %587, %588 : vector<1x128xf32>
    %cst_346 = arith.constant 0.000000e+00 : f32
    %590 = vector.broadcast %cst_346 : f32 to vector<1x128xf32>
    %591 = arith.maximumf %589, %590 : vector<1x128xf32>
    %592 = vector.broadcast %585 : vector<1x128xf32> to vector<5x128xf32>
    %593 = arith.subf %575, %592 : vector<5x128xf32>
    %cst_347 = arith.constant 9.99999974E-6 : f32
    %594 = vector.broadcast %cst_347 : f32 to vector<1x128xf32>
    %595 = arith.addf %591, %594 : vector<1x128xf32>
    %596 = math.rsqrt %595 : vector<1x128xf32>
    %597 = vector.broadcast %596 : vector<1x128xf32> to vector<5x128xf32>
    %598 = arith.mulf %593, %597 : vector<5x128xf32>
    %cst_348 = arith.constant 0.000000e+00 : f32
    %599 = vector.broadcast %cst_348 : f32 to vector<5x128xf32>
    %600 = arith.maximumf %598, %599 : vector<5x128xf32>
    %cst_349 = arith.constant 0.000000e+00 : f32
    %601 = vector.broadcast %cst_349 : f32 to vector<1x128xf32>
    %c0_350 = arith.constant 0 : index
    %c0_351 = arith.constant 0 : index
    %602 = vector.load %arg16[%c0_350, %c0_351] : memref<32x256xf32, #tpu.memory_space<vmem>>, vector<1x128xf32>
    tpu.vector_store %arg16[%c0_350, %c0_351], %601 {strides = array<i32>} : memref<32x256xf32, #tpu.memory_space<vmem>>, vector<1x128xf32>,
    %c6_352 = arith.constant 6 : index
    %c0_353 = arith.constant 0 : index
    %603 = vector.load %arg16[%c6_352, %c0_353] : memref<32x256xf32, #tpu.memory_space<vmem>>, vector<1x128xf32>
    tpu.vector_store %arg16[%c6_352, %c0_353], %601 {strides = array<i32>} : memref<32x256xf32, #tpu.memory_space<vmem>>, vector<1x128xf32>,
    %c1_354 = arith.constant 1 : index
    %c0_355 = arith.constant 0 : index
    %604 = vector.load %arg16[%c1_354, %c0_355] : memref<32x256xf32, #tpu.memory_space<vmem>>, vector<5x128xf32>
    tpu.vector_store %arg16[%c1_354, %c0_355], %600 {strides = array<i32>} : memref<32x256xf32, #tpu.memory_space<vmem>>, vector<5x128xf32>,
    %c0_356 = arith.constant 0 : index
    %c0_357 = arith.constant 0 : index
    %605 = vector.load %arg16[%c0_356, %c0_357] : memref<32x256xf32, #tpu.memory_space<vmem>>, vector<7x128xf32>
    %cst_358 = arith.constant 0.000000e+00 : f32
    %606 = vector.broadcast %cst_358 : f32 to vector<5x128xf32>
    %607 = vector.extract_strided_slice %605 {offsets = [0, 0], sizes = [5, 128], strides = [1, 1]} : vector<7x128xf32> to vector<5x128xf32>
    %608 = arith.truncf %607 : vector<5x128xf32> to vector<5x128xbf16>
    %c0_359 = arith.constant 0 : index
    %c0_360 = arith.constant 0 : index
    %c0_361 = arith.constant 0 : index
    %609 = vector.load %arg8[%c0_359, %c0_360, %c0_361] : memref<3x128x128xbf16, #tpu.memory_space<vmem>>, vector<1x128x128xbf16>
    %610 = vector.shape_cast %609 : vector<1x128x128xbf16> to vector<128x128xbf16>
    %cst_362 = arith.constant dense<0.000000e+00> : vector<5x128xf32>
    %611 = tpu.matmul %608, %610, %cst_362 {dimension_numbers = #tpu.dot_dimension_numbers<[1], [0], [0], [1], [0, 0, 1, 1], [], []>} : vector<5x128xbf16>, vector<128x128xbf16>, vector<5x128xf32> -> vector<5x128xf32>
    %612 = arith.addf %606, %611 : vector<5x128xf32>
    %613 = vector.extract_strided_slice %605 {offsets = [1, 0], sizes = [5, 128], strides = [1, 1]} : vector<7x128xf32> to vector<5x128xf32>
    %614 = arith.truncf %613 : vector<5x128xf32> to vector<5x128xbf16>
    %c1_363 = arith.constant 1 : index
    %c0_364 = arith.constant 0 : index
    %c0_365 = arith.constant 0 : index
    %615 = vector.load %arg8[%c1_363, %c0_364, %c0_365] : memref<3x128x128xbf16, #tpu.memory_space<vmem>>, vector<1x128x128xbf16>
    %616 = vector.shape_cast %615 : vector<1x128x128xbf16> to vector<128x128xbf16>
    %cst_366 = arith.constant dense<0.000000e+00> : vector<5x128xf32>
    %617 = tpu.matmul %614, %616, %cst_366 {dimension_numbers = #tpu.dot_dimension_numbers<[1], [0], [0], [1], [0, 0, 1, 1], [], []>} : vector<5x128xbf16>, vector<128x128xbf16>, vector<5x128xf32> -> vector<5x128xf32>
    %618 = arith.addf %612, %617 : vector<5x128xf32>
    %619 = vector.extract_strided_slice %605 {offsets = [2, 0], sizes = [5, 128], strides = [1, 1]} : vector<7x128xf32> to vector<5x128xf32>
    %620 = arith.truncf %619 : vector<5x128xf32> to vector<5x128xbf16>
    %c2_367 = arith.constant 2 : index
    %c0_368 = arith.constant 0 : index
    %c0_369 = arith.constant 0 : index
    %621 = vector.load %arg8[%c2_367, %c0_368, %c0_369] : memref<3x128x128xbf16, #tpu.memory_space<vmem>>, vector<1x128x128xbf16>
    %622 = vector.shape_cast %621 : vector<1x128x128xbf16> to vector<128x128xbf16>
    %cst_370 = arith.constant dense<0.000000e+00> : vector<5x128xf32>
    %623 = tpu.matmul %620, %622, %cst_370 {dimension_numbers = #tpu.dot_dimension_numbers<[1], [0], [0], [1], [0, 0, 1, 1], [], []>} : vector<5x128xbf16>, vector<128x128xbf16>, vector<5x128xf32> -> vector<5x128xf32>
    %624 = arith.addf %618, %623 : vector<5x128xf32>
    %c64_371 = arith.constant 64 : index
    %c0_372 = arith.constant 0 : index
    %625 = vector.load %arg13[%c64_371, %c0_372] : memref<448x256xf32, #tpu.memory_space<vmem>>, vector<128x128xf32>
    %cst_373 = arith.constant dense<0.000000e+00> : vector<128xf32>
    %626 = vector.multi_reduction <add>, %624, %cst_373 [0] : vector<5x128xf32> to vector<128xf32>
    %627 = vector.shape_cast %626 : vector<128xf32> to vector<1x128xf32>
    %cst_374 = arith.constant dense<0.000000e+00> : vector<1x128xf32>
    %628 = tpu.matmul %627, %625, %cst_374 {dimension_numbers = #tpu.dot_dimension_numbers<[1], [0], [0], [1], [0, 0, 1, 1], [], []>} : vector<1x128xf32>, vector<128x128xf32>, vector<1x128xf32> -> vector<1x128xf32>
    %629 = arith.mulf %624, %624 : vector<5x128xf32>
    %cst_375 = arith.constant dense<0.000000e+00> : vector<128xf32>
    %630 = vector.multi_reduction <add>, %629, %cst_375 [0] : vector<5x128xf32> to vector<128xf32>
    %631 = vector.shape_cast %630 : vector<128xf32> to vector<1x128xf32>
    %cst_376 = arith.constant dense<0.000000e+00> : vector<1x128xf32>
    %632 = tpu.matmul %631, %625, %cst_376 {dimension_numbers = #tpu.dot_dimension_numbers<[1], [0], [0], [1], [0, 0, 1, 1], [], []>} : vector<1x128xf32>, vector<128x128xf32>, vector<1x128xf32> -> vector<1x128xf32>
    %cst_377 = arith.constant 1.000000e-01 : f32
    %633 = vector.broadcast %cst_377 : f32 to vector<1x128xf32>
    %634 = arith.mulf %628, %633 : vector<1x128xf32>
    %cst_378 = arith.constant 1.000000e-01 : f32
    %635 = vector.broadcast %cst_378 : f32 to vector<1x128xf32>
    %636 = arith.mulf %632, %635 : vector<1x128xf32>
    %637 = arith.mulf %634, %634 : vector<1x128xf32>
    %638 = arith.subf %636, %637 : vector<1x128xf32>
    %cst_379 = arith.constant 0.000000e+00 : f32
    %639 = vector.broadcast %cst_379 : f32 to vector<1x128xf32>
    %640 = arith.maximumf %638, %639 : vector<1x128xf32>
    %641 = vector.broadcast %634 : vector<1x128xf32> to vector<5x128xf32>
    %642 = arith.subf %624, %641 : vector<5x128xf32>
    %cst_380 = arith.constant 9.99999974E-6 : f32
    %643 = vector.broadcast %cst_380 : f32 to vector<1x128xf32>
    %644 = arith.addf %640, %643 : vector<1x128xf32>
    %645 = math.rsqrt %644 : vector<1x128xf32>
    %646 = vector.broadcast %645 : vector<1x128xf32> to vector<5x128xf32>
    %647 = arith.mulf %642, %646 : vector<5x128xf32>
    %648 = arith.addf %647, %551 : vector<5x128xf32>
    %cst_381 = arith.constant 0.000000e+00 : f32
    %649 = vector.broadcast %cst_381 : f32 to vector<5x128xf32>
    %650 = arith.maximumf %648, %649 : vector<5x128xf32>
    %651 = tpu.iota {dimensions = array<i32: 0>} : vector<12x128xi32>
    %652 = arith.sitofp %651 : vector<12x128xi32> to vector<12x128xf32>
    %c100 = arith.constant 100 : index
    %c0_382 = arith.constant 0 : index
    %653 = vector.load %arg14[%c100, %c0_382] : memref<132x28xf32, #tpu.memory_space<vmem>>, vector<12x5xf32>
    %c112 = arith.constant 112 : index
    %c0_383 = arith.constant 0 : index
    %654 = vector.load %arg14[%c112, %c0_383] : memref<132x28xf32, #tpu.memory_space<vmem>>, vector<12x5xf32>
    %cst_384 = arith.constant dense<0.000000e+00> : vector<12x128xf32>
    %655 = tpu.matmul %653, %650, %cst_384 {dimension_numbers = #tpu.dot_dimension_numbers<[1], [0], [0], [1], [0, 0, 1, 1], [], []>} : vector<12x5xf32>, vector<5x128xf32>, vector<12x128xf32> -> vector<12x128xf32>
    %cst_385 = arith.constant dense<0.000000e+00> : vector<12x128xf32>
    %656 = tpu.matmul %653, %289, %cst_385 {dimension_numbers = #tpu.dot_dimension_numbers<[1], [0], [0], [1], [0, 0, 1, 1], [], []>} : vector<12x5xf32>, vector<5x128xf32>, vector<12x128xf32> -> vector<12x128xf32>
    %cst_386 = arith.constant dense<0.000000e+00> : vector<12x128xf32>
    %657 = tpu.matmul %654, %650, %cst_386 {dimension_numbers = #tpu.dot_dimension_numbers<[1], [0], [0], [1], [0, 0, 1, 1], [], []>} : vector<12x5xf32>, vector<5x128xf32>, vector<12x128xf32> -> vector<12x128xf32>
    %cst_387 = arith.constant dense<0.000000e+00> : vector<12x128xf32>
    %658 = tpu.matmul %654, %289, %cst_387 {dimension_numbers = #tpu.dot_dimension_numbers<[1], [0], [0], [1], [0, 0, 1, 1], [], []>} : vector<12x5xf32>, vector<5x128xf32>, vector<12x128xf32> -> vector<12x128xf32>
    %cst_388 = arith.constant 9.000000e+00 : f32
    %659 = vector.broadcast %cst_388 : f32 to vector<12x128xf32>
    %660 = arith.cmpf ole, %652, %659 : vector<12x128xf32>
    %661 = arith.cmpf oeq, %656, %652 : vector<12x128xf32>
    %662 = arith.andi %660, %661 : vector<12x128xi1>
    %cst_389 = arith.constant 2.000000e+00 : f32
    %663 = vector.broadcast %cst_389 : f32 to vector<12x128xf32>
    %664 = arith.cmpf oge, %652, %663 : vector<12x128xf32>
    %665 = arith.cmpf oeq, %658, %652 : vector<12x128xf32>
    %666 = arith.andi %664, %665 : vector<12x128xi1>
    %cst_390 = arith.constant 0.000000e+00 : f32
    %667 = vector.broadcast %cst_390 : f32 to vector<12x128xf32>
    %668 = arith.select %666, %657, %667 : vector<12x128xi1>, vector<12x128xf32>
    %669 = arith.select %662, %655, %668 : vector<12x128xi1>, vector<12x128xf32>
    %c64_391 = arith.constant 64 : index
    %c0_392 = arith.constant 0 : index
    %670 = vector.load %arg13[%c64_391, %c0_392] : memref<448x256xf32, #tpu.memory_space<vmem>>, vector<128x128xf32>
    %cst_393 = arith.constant dense<0.000000e+00> : vector<128xf32>
    %671 = vector.multi_reduction <add>, %669, %cst_393 [0] : vector<12x128xf32> to vector<128xf32>
    %672 = vector.shape_cast %671 : vector<128xf32> to vector<1x128xf32>
    %cst_394 = arith.constant dense<0.000000e+00> : vector<1x128xf32>
    %673 = tpu.matmul %672, %670, %cst_394 {dimension_numbers = #tpu.dot_dimension_numbers<[1], [0], [0], [1], [0, 0, 1, 1], [], []>} : vector<1x128xf32>, vector<128x128xf32>, vector<1x128xf32> -> vector<1x128xf32>
    %674 = arith.mulf %669, %669 : vector<12x128xf32>
    %cst_395 = arith.constant dense<0.000000e+00> : vector<128xf32>
    %675 = vector.multi_reduction <add>, %674, %cst_395 [0] : vector<12x128xf32> to vector<128xf32>
    %676 = vector.shape_cast %675 : vector<128xf32> to vector<1x128xf32>
    %cst_396 = arith.constant dense<0.000000e+00> : vector<1x128xf32>
    %677 = tpu.matmul %676, %670, %cst_396 {dimension_numbers = #tpu.dot_dimension_numbers<[1], [0], [0], [1], [0, 0, 1, 1], [], []>} : vector<1x128xf32>, vector<128x128xf32>, vector<1x128xf32> -> vector<1x128xf32>
    %cst_397 = arith.constant 0.0416666679 : f32
    %678 = vector.broadcast %cst_397 : f32 to vector<1x128xf32>
    %679 = arith.mulf %673, %678 : vector<1x128xf32>
    %cst_398 = arith.constant 0.0416666679 : f32
    %680 = vector.broadcast %cst_398 : f32 to vector<1x128xf32>
    %681 = arith.mulf %677, %680 : vector<1x128xf32>
    %682 = arith.mulf %679, %679 : vector<1x128xf32>
    %683 = arith.subf %681, %682 : vector<1x128xf32>
    %cst_399 = arith.constant 0.000000e+00 : f32
    %684 = vector.broadcast %cst_399 : f32 to vector<1x128xf32>
    %685 = arith.maximumf %683, %684 : vector<1x128xf32>
    %686 = vector.broadcast %679 : vector<1x128xf32> to vector<12x128xf32>
    %687 = arith.subf %669, %686 : vector<12x128xf32>
    %cst_400 = arith.constant 9.99999974E-6 : f32
    %688 = vector.broadcast %cst_400 : f32 to vector<1x128xf32>
    %689 = arith.addf %685, %688 : vector<1x128xf32>
    %690 = math.rsqrt %689 : vector<1x128xf32>
    %691 = vector.broadcast %690 : vector<1x128xf32> to vector<12x128xf32>
    %692 = arith.mulf %687, %691 : vector<12x128xf32>
    %693 = math.tanh %692 : vector<12x128xf32>
    %cst_401 = arith.constant 0.000000e+00 : f32
    %694 = vector.broadcast %cst_401 : f32 to vector<3x128xf32>
    %c0_402 = arith.constant 0 : index
    %c0_403 = arith.constant 0 : index
    %695 = vector.load %arg16[%c0_402, %c0_403] : memref<32x256xf32, #tpu.memory_space<vmem>>, vector<3x128xf32>
    tpu.vector_store %arg16[%c0_402, %c0_403], %694 {strides = array<i32>} : memref<32x256xf32, #tpu.memory_space<vmem>>, vector<3x128xf32>,
    %c15_404 = arith.constant 15 : index
    %c0_405 = arith.constant 0 : index
    %696 = vector.load %arg16[%c15_404, %c0_405] : memref<32x256xf32, #tpu.memory_space<vmem>>, vector<3x128xf32>
    tpu.vector_store %arg16[%c15_404, %c0_405], %694 {strides = array<i32>} : memref<32x256xf32, #tpu.memory_space<vmem>>, vector<3x128xf32>,
    %c3_406 = arith.constant 3 : index
    %c0_407 = arith.constant 0 : index
    %697 = vector.load %arg16[%c3_406, %c0_407] : memref<32x256xf32, #tpu.memory_space<vmem>>, vector<12x128xf32>
    tpu.vector_store %arg16[%c3_406, %c0_407], %693 {strides = array<i32>} : memref<32x256xf32, #tpu.memory_space<vmem>>, vector<12x128xf32>,
    %c0_408 = arith.constant 0 : index
    %c0_409 = arith.constant 0 : index
    %698 = vector.load %arg16[%c0_408, %c0_409] : memref<32x256xf32, #tpu.memory_space<vmem>>, vector<18x128xf32>
    %cst_410 = arith.constant 0.000000e+00 : f32
    %699 = vector.broadcast %cst_410 : f32 to vector<13x64xf32>
    %700 = vector.extract_strided_slice %698 {offsets = [0, 0], sizes = [13, 128], strides = [1, 1]} : vector<18x128xf32> to vector<13x128xf32>
    %701 = arith.truncf %700 : vector<13x128xf32> to vector<13x128xbf16>
    %c0_411 = arith.constant 0 : index
    %c0_412 = arith.constant 0 : index
    %c0_413 = arith.constant 0 : index
    %702 = vector.load %arg11[%c0_411, %c0_412, %c0_413] : memref<6x128x64xbf16, #tpu.memory_space<vmem>>, vector<1x128x64xbf16>
    %703 = vector.shape_cast %702 : vector<1x128x64xbf16> to vector<128x64xbf16>
    %cst_414 = arith.constant dense<0.000000e+00> : vector<13x64xf32>
    %704 = tpu.matmul %701, %703, %cst_414 {dimension_numbers = #tpu.dot_dimension_numbers<[1], [0], [0], [1], [0, 0, 1, 1], [], []>} : vector<13x128xbf16>, vector<128x64xbf16>, vector<13x64xf32> -> vector<13x64xf32>
    %705 = arith.addf %699, %704 : vector<13x64xf32>
    %706 = vector.extract_strided_slice %698 {offsets = [1, 0], sizes = [13, 128], strides = [1, 1]} : vector<18x128xf32> to vector<13x128xf32>
    %707 = arith.truncf %706 : vector<13x128xf32> to vector<13x128xbf16>
    %c1_415 = arith.constant 1 : index
    %c0_416 = arith.constant 0 : index
    %c0_417 = arith.constant 0 : index
    %708 = vector.load %arg11[%c1_415, %c0_416, %c0_417] : memref<6x128x64xbf16, #tpu.memory_space<vmem>>, vector<1x128x64xbf16>
    %709 = vector.shape_cast %708 : vector<1x128x64xbf16> to vector<128x64xbf16>
    %cst_418 = arith.constant dense<0.000000e+00> : vector<13x64xf32>
    %710 = tpu.matmul %707, %709, %cst_418 {dimension_numbers = #tpu.dot_dimension_numbers<[1], [0], [0], [1], [0, 0, 1, 1], [], []>} : vector<13x128xbf16>, vector<128x64xbf16>, vector<13x64xf32> -> vector<13x64xf32>
    %711 = arith.addf %705, %710 : vector<13x64xf32>
    %712 = vector.extract_strided_slice %698 {offsets = [2, 0], sizes = [13, 128], strides = [1, 1]} : vector<18x128xf32> to vector<13x128xf32>
    %713 = arith.truncf %712 : vector<13x128xf32> to vector<13x128xbf16>
    %c2_419 = arith.constant 2 : index
    %c0_420 = arith.constant 0 : index
    %c0_421 = arith.constant 0 : index
    %714 = vector.load %arg11[%c2_419, %c0_420, %c0_421] : memref<6x128x64xbf16, #tpu.memory_space<vmem>>, vector<1x128x64xbf16>
    %715 = vector.shape_cast %714 : vector<1x128x64xbf16> to vector<128x64xbf16>
    %cst_422 = arith.constant dense<0.000000e+00> : vector<13x64xf32>
    %716 = tpu.matmul %713, %715, %cst_422 {dimension_numbers = #tpu.dot_dimension_numbers<[1], [0], [0], [1], [0, 0, 1, 1], [], []>} : vector<13x128xbf16>, vector<128x64xbf16>, vector<13x64xf32> -> vector<13x64xf32>
    %717 = arith.addf %711, %716 : vector<13x64xf32>
    %718 = vector.extract_strided_slice %698 {offsets = [3, 0], sizes = [13, 128], strides = [1, 1]} : vector<18x128xf32> to vector<13x128xf32>
    %719 = arith.truncf %718 : vector<13x128xf32> to vector<13x128xbf16>
    %c3_423 = arith.constant 3 : index
    %c0_424 = arith.constant 0 : index
    %c0_425 = arith.constant 0 : index
    %720 = vector.load %arg11[%c3_423, %c0_424, %c0_425] : memref<6x128x64xbf16, #tpu.memory_space<vmem>>, vector<1x128x64xbf16>
    %721 = vector.shape_cast %720 : vector<1x128x64xbf16> to vector<128x64xbf16>
    %cst_426 = arith.constant dense<0.000000e+00> : vector<13x64xf32>
    %722 = tpu.matmul %719, %721, %cst_426 {dimension_numbers = #tpu.dot_dimension_numbers<[1], [0], [0], [1], [0, 0, 1, 1], [], []>} : vector<13x128xbf16>, vector<128x64xbf16>, vector<13x64xf32> -> vector<13x64xf32>
    %723 = arith.addf %717, %722 : vector<13x64xf32>
    %724 = vector.extract_strided_slice %698 {offsets = [4, 0], sizes = [13, 128], strides = [1, 1]} : vector<18x128xf32> to vector<13x128xf32>
    %725 = arith.truncf %724 : vector<13x128xf32> to vector<13x128xbf16>
    %c4_427 = arith.constant 4 : index
    %c0_428 = arith.constant 0 : index
    %c0_429 = arith.constant 0 : index
    %726 = vector.load %arg11[%c4_427, %c0_428, %c0_429] : memref<6x128x64xbf16, #tpu.memory_space<vmem>>, vector<1x128x64xbf16>
    %727 = vector.shape_cast %726 : vector<1x128x64xbf16> to vector<128x64xbf16>
    %cst_430 = arith.constant dense<0.000000e+00> : vector<13x64xf32>
    %728 = tpu.matmul %725, %727, %cst_430 {dimension_numbers = #tpu.dot_dimension_numbers<[1], [0], [0], [1], [0, 0, 1, 1], [], []>} : vector<13x128xbf16>, vector<128x64xbf16>, vector<13x64xf32> -> vector<13x64xf32>
    %729 = arith.addf %723, %728 : vector<13x64xf32>
    %730 = vector.extract_strided_slice %698 {offsets = [5, 0], sizes = [13, 128], strides = [1, 1]} : vector<18x128xf32> to vector<13x128xf32>
    %731 = arith.truncf %730 : vector<13x128xf32> to vector<13x128xbf16>
    %c5_431 = arith.constant 5 : index
    %c0_432 = arith.constant 0 : index
    %c0_433 = arith.constant 0 : index
    %732 = vector.load %arg11[%c5_431, %c0_432, %c0_433] : memref<6x128x64xbf16, #tpu.memory_space<vmem>>, vector<1x128x64xbf16>
    %733 = vector.shape_cast %732 : vector<1x128x64xbf16> to vector<128x64xbf16>
    %cst_434 = arith.constant dense<0.000000e+00> : vector<13x64xf32>
    %734 = tpu.matmul %731, %733, %cst_434 {dimension_numbers = #tpu.dot_dimension_numbers<[1], [0], [0], [1], [0, 0, 1, 1], [], []>} : vector<13x128xbf16>, vector<128x64xbf16>, vector<13x64xf32> -> vector<13x64xf32>
    %735 = arith.addf %729, %734 : vector<13x64xf32>
    %cst_435 = arith.constant 0.000000e+00 : f32
    %736 = vector.broadcast %cst_435 : f32 to vector<1x64xf32>
    %c0_436 = arith.constant 0 : index
    %c0_437 = arith.constant 0 : index
    %737 = vector.load %arg16[%c0_436, %c0_437] : memref<32x256xf32, #tpu.memory_space<vmem>>, vector<1x64xf32>
    tpu.vector_store %arg16[%c0_436, %c0_437], %736 {strides = array<i32>} : memref<32x256xf32, #tpu.memory_space<vmem>>, vector<1x64xf32>,
    %c14_438 = arith.constant 14 : index
    %c0_439 = arith.constant 0 : index
    %738 = vector.load %arg16[%c14_438, %c0_439] : memref<32x256xf32, #tpu.memory_space<vmem>>, vector<1x64xf32>
    tpu.vector_store %arg16[%c14_438, %c0_439], %736 {strides = array<i32>} : memref<32x256xf32, #tpu.memory_space<vmem>>, vector<1x64xf32>,
    %c1_440 = arith.constant 1 : index
    %c0_441 = arith.constant 0 : index
    %739 = vector.load %arg16[%c1_440, %c0_441] : memref<32x256xf32, #tpu.memory_space<vmem>>, vector<13x64xf32>
    tpu.vector_store %arg16[%c1_440, %c0_441], %735 {strides = array<i32>} : memref<32x256xf32, #tpu.memory_space<vmem>>, vector<13x64xf32>,
    %c0_442 = arith.constant 0 : index
    %c0_443 = arith.constant 0 : index
    %740 = vector.load %arg16[%c0_442, %c0_443] : memref<32x256xf32, #tpu.memory_space<vmem>>, vector<15x64xf32>
    %cst_444 = arith.constant 0.000000e+00 : f32
    %741 = vector.broadcast %cst_444 : f32 to vector<13x64xf32>
    %742 = vector.extract_strided_slice %740 {offsets = [0, 0], sizes = [13, 64], strides = [1, 1]} : vector<15x64xf32> to vector<13x64xf32>
    %743 = arith.truncf %742 : vector<13x64xf32> to vector<13x64xbf16>
    %c0_445 = arith.constant 0 : index
    %c0_446 = arith.constant 0 : index
    %c0_447 = arith.constant 0 : index
    %744 = vector.load %arg4[%c0_445, %c0_446, %c0_447] : memref<3x64x64xbf16, #tpu.memory_space<vmem>>, vector<1x64x64xbf16>
    %745 = vector.shape_cast %744 : vector<1x64x64xbf16> to vector<64x64xbf16>
    %cst_448 = arith.constant dense<0.000000e+00> : vector<13x64xf32>
    %746 = tpu.matmul %743, %745, %cst_448 {dimension_numbers = #tpu.dot_dimension_numbers<[1], [0], [0], [1], [0, 0, 1, 1], [], []>} : vector<13x64xbf16>, vector<64x64xbf16>, vector<13x64xf32> -> vector<13x64xf32>
    %747 = arith.addf %741, %746 : vector<13x64xf32>
    %748 = vector.extract_strided_slice %740 {offsets = [1, 0], sizes = [13, 64], strides = [1, 1]} : vector<15x64xf32> to vector<13x64xf32>
    %749 = arith.truncf %748 : vector<13x64xf32> to vector<13x64xbf16>
    %c1_449 = arith.constant 1 : index
    %c0_450 = arith.constant 0 : index
    %c0_451 = arith.constant 0 : index
    %750 = vector.load %arg4[%c1_449, %c0_450, %c0_451] : memref<3x64x64xbf16, #tpu.memory_space<vmem>>, vector<1x64x64xbf16>
    %751 = vector.shape_cast %750 : vector<1x64x64xbf16> to vector<64x64xbf16>
    %cst_452 = arith.constant dense<0.000000e+00> : vector<13x64xf32>
    %752 = tpu.matmul %749, %751, %cst_452 {dimension_numbers = #tpu.dot_dimension_numbers<[1], [0], [0], [1], [0, 0, 1, 1], [], []>} : vector<13x64xbf16>, vector<64x64xbf16>, vector<13x64xf32> -> vector<13x64xf32>
    %753 = arith.addf %747, %752 : vector<13x64xf32>
    %754 = vector.extract_strided_slice %740 {offsets = [2, 0], sizes = [13, 64], strides = [1, 1]} : vector<15x64xf32> to vector<13x64xf32>
    %755 = arith.truncf %754 : vector<13x64xf32> to vector<13x64xbf16>
    %c2_453 = arith.constant 2 : index
    %c0_454 = arith.constant 0 : index
    %c0_455 = arith.constant 0 : index
    %756 = vector.load %arg4[%c2_453, %c0_454, %c0_455] : memref<3x64x64xbf16, #tpu.memory_space<vmem>>, vector<1x64x64xbf16>
    %757 = vector.shape_cast %756 : vector<1x64x64xbf16> to vector<64x64xbf16>
    %cst_456 = arith.constant dense<0.000000e+00> : vector<13x64xf32>
    %758 = tpu.matmul %755, %757, %cst_456 {dimension_numbers = #tpu.dot_dimension_numbers<[1], [0], [0], [1], [0, 0, 1, 1], [], []>} : vector<13x64xbf16>, vector<64x64xbf16>, vector<13x64xf32> -> vector<13x64xf32>
    %759 = arith.addf %753, %758 : vector<13x64xf32>
    %c0_457 = arith.constant 0 : index
    %c0_458 = arith.constant 0 : index
    %760 = vector.load %arg13[%c0_457, %c0_458] : memref<448x256xf32, #tpu.memory_space<vmem>>, vector<64x64xf32>
    %cst_459 = arith.constant dense<0.000000e+00> : vector<64xf32>
    %761 = vector.multi_reduction <add>, %759, %cst_459 [0] : vector<13x64xf32> to vector<64xf32>
    %762 = vector.shape_cast %761 : vector<64xf32> to vector<1x64xf32>
    %cst_460 = arith.constant dense<0.000000e+00> : vector<1x64xf32>
    %763 = tpu.matmul %762, %760, %cst_460 {dimension_numbers = #tpu.dot_dimension_numbers<[1], [0], [0], [1], [0, 0, 1, 1], [], []>} : vector<1x64xf32>, vector<64x64xf32>, vector<1x64xf32> -> vector<1x64xf32>
    %764 = arith.mulf %759, %759 : vector<13x64xf32>
    %cst_461 = arith.constant dense<0.000000e+00> : vector<64xf32>
    %765 = vector.multi_reduction <add>, %764, %cst_461 [0] : vector<13x64xf32> to vector<64xf32>
    %766 = vector.shape_cast %765 : vector<64xf32> to vector<1x64xf32>
    %cst_462 = arith.constant dense<0.000000e+00> : vector<1x64xf32>
    %767 = tpu.matmul %766, %760, %cst_462 {dimension_numbers = #tpu.dot_dimension_numbers<[1], [0], [0], [1], [0, 0, 1, 1], [], []>} : vector<1x64xf32>, vector<64x64xf32>, vector<1x64xf32> -> vector<1x64xf32>
    %cst_463 = arith.constant 0.0384615399 : f32
    %768 = vector.broadcast %cst_463 : f32 to vector<1x64xf32>
    %769 = arith.mulf %763, %768 : vector<1x64xf32>
    %cst_464 = arith.constant 0.0384615399 : f32
    %770 = vector.broadcast %cst_464 : f32 to vector<1x64xf32>
    %771 = arith.mulf %767, %770 : vector<1x64xf32>
    %772 = arith.mulf %769, %769 : vector<1x64xf32>
    %773 = arith.subf %771, %772 : vector<1x64xf32>
    %cst_465 = arith.constant 0.000000e+00 : f32
    %774 = vector.broadcast %cst_465 : f32 to vector<1x64xf32>
    %775 = arith.maximumf %773, %774 : vector<1x64xf32>
    %776 = vector.broadcast %769 : vector<1x64xf32> to vector<13x64xf32>
    %777 = arith.subf %759, %776 : vector<13x64xf32>
    %cst_466 = arith.constant 9.99999974E-6 : f32
    %778 = vector.broadcast %cst_466 : f32 to vector<1x64xf32>
    %779 = arith.addf %775, %778 : vector<1x64xf32>
    %780 = math.rsqrt %779 : vector<1x64xf32>
    %781 = vector.broadcast %780 : vector<1x64xf32> to vector<13x64xf32>
    %782 = arith.mulf %777, %781 : vector<13x64xf32>
    %cst_467 = arith.constant 0.000000e+00 : f32
    %783 = vector.broadcast %cst_467 : f32 to vector<13x64xf32>
    %784 = arith.maximumf %782, %783 : vector<13x64xf32>
    %cst_468 = arith.constant 0.000000e+00 : f32
    %785 = vector.broadcast %cst_468 : f32 to vector<1x64xf32>
    %c0_469 = arith.constant 0 : index
    %c0_470 = arith.constant 0 : index
    %786 = vector.load %arg16[%c0_469, %c0_470] : memref<32x256xf32, #tpu.memory_space<vmem>>, vector<1x64xf32>
    tpu.vector_store %arg16[%c0_469, %c0_470], %785 {strides = array<i32>} : memref<32x256xf32, #tpu.memory_space<vmem>>, vector<1x64xf32>,
    %c14_471 = arith.constant 14 : index
    %c0_472 = arith.constant 0 : index
    %787 = vector.load %arg16[%c14_471, %c0_472] : memref<32x256xf32, #tpu.memory_space<vmem>>, vector<1x64xf32>
    tpu.vector_store %arg16[%c14_471, %c0_472], %785 {strides = array<i32>} : memref<32x256xf32, #tpu.memory_space<vmem>>, vector<1x64xf32>,
    %c1_473 = arith.constant 1 : index
    %c0_474 = arith.constant 0 : index
    %788 = vector.load %arg16[%c1_473, %c0_474] : memref<32x256xf32, #tpu.memory_space<vmem>>, vector<13x64xf32>
    tpu.vector_store %arg16[%c1_473, %c0_474], %784 {strides = array<i32>} : memref<32x256xf32, #tpu.memory_space<vmem>>, vector<13x64xf32>,
    %c0_475 = arith.constant 0 : index
    %c0_476 = arith.constant 0 : index
    %789 = vector.load %arg16[%c0_475, %c0_476] : memref<32x256xf32, #tpu.memory_space<vmem>>, vector<15x64xf32>
    %cst_477 = arith.constant 0.000000e+00 : f32
    %790 = vector.broadcast %cst_477 : f32 to vector<13x64xf32>
    %791 = vector.extract_strided_slice %789 {offsets = [0, 0], sizes = [13, 64], strides = [1, 1]} : vector<15x64xf32> to vector<13x64xf32>
    %792 = arith.truncf %791 : vector<13x64xf32> to vector<13x64xbf16>
    %c0_478 = arith.constant 0 : index
    %c0_479 = arith.constant 0 : index
    %c0_480 = arith.constant 0 : index
    %793 = vector.load %arg5[%c0_478, %c0_479, %c0_480] : memref<3x64x64xbf16, #tpu.memory_space<vmem>>, vector<1x64x64xbf16>
    %794 = vector.shape_cast %793 : vector<1x64x64xbf16> to vector<64x64xbf16>
    %cst_481 = arith.constant dense<0.000000e+00> : vector<13x64xf32>
    %795 = tpu.matmul %792, %794, %cst_481 {dimension_numbers = #tpu.dot_dimension_numbers<[1], [0], [0], [1], [0, 0, 1, 1], [], []>} : vector<13x64xbf16>, vector<64x64xbf16>, vector<13x64xf32> -> vector<13x64xf32>
    %796 = arith.addf %790, %795 : vector<13x64xf32>
    %797 = vector.extract_strided_slice %789 {offsets = [1, 0], sizes = [13, 64], strides = [1, 1]} : vector<15x64xf32> to vector<13x64xf32>
    %798 = arith.truncf %797 : vector<13x64xf32> to vector<13x64xbf16>
    %c1_482 = arith.constant 1 : index
    %c0_483 = arith.constant 0 : index
    %c0_484 = arith.constant 0 : index
    %799 = vector.load %arg5[%c1_482, %c0_483, %c0_484] : memref<3x64x64xbf16, #tpu.memory_space<vmem>>, vector<1x64x64xbf16>
    %800 = vector.shape_cast %799 : vector<1x64x64xbf16> to vector<64x64xbf16>
    %cst_485 = arith.constant dense<0.000000e+00> : vector<13x64xf32>
    %801 = tpu.matmul %798, %800, %cst_485 {dimension_numbers = #tpu.dot_dimension_numbers<[1], [0], [0], [1], [0, 0, 1, 1], [], []>} : vector<13x64xbf16>, vector<64x64xbf16>, vector<13x64xf32> -> vector<13x64xf32>
    %802 = arith.addf %796, %801 : vector<13x64xf32>
    %803 = vector.extract_strided_slice %789 {offsets = [2, 0], sizes = [13, 64], strides = [1, 1]} : vector<15x64xf32> to vector<13x64xf32>
    %804 = arith.truncf %803 : vector<13x64xf32> to vector<13x64xbf16>
    %c2_486 = arith.constant 2 : index
    %c0_487 = arith.constant 0 : index
    %c0_488 = arith.constant 0 : index
    %805 = vector.load %arg5[%c2_486, %c0_487, %c0_488] : memref<3x64x64xbf16, #tpu.memory_space<vmem>>, vector<1x64x64xbf16>
    %806 = vector.shape_cast %805 : vector<1x64x64xbf16> to vector<64x64xbf16>
    %cst_489 = arith.constant dense<0.000000e+00> : vector<13x64xf32>
    %807 = tpu.matmul %804, %806, %cst_489 {dimension_numbers = #tpu.dot_dimension_numbers<[1], [0], [0], [1], [0, 0, 1, 1], [], []>} : vector<13x64xbf16>, vector<64x64xbf16>, vector<13x64xf32> -> vector<13x64xf32>
    %808 = arith.addf %802, %807 : vector<13x64xf32>
    %c0_490 = arith.constant 0 : index
    %c0_491 = arith.constant 0 : index
    %809 = vector.load %arg13[%c0_490, %c0_491] : memref<448x256xf32, #tpu.memory_space<vmem>>, vector<64x64xf32>
    %cst_492 = arith.constant dense<0.000000e+00> : vector<64xf32>
    %810 = vector.multi_reduction <add>, %808, %cst_492 [0] : vector<13x64xf32> to vector<64xf32>
    %811 = vector.shape_cast %810 : vector<64xf32> to vector<1x64xf32>
    %cst_493 = arith.constant dense<0.000000e+00> : vector<1x64xf32>
    %812 = tpu.matmul %811, %809, %cst_493 {dimension_numbers = #tpu.dot_dimension_numbers<[1], [0], [0], [1], [0, 0, 1, 1], [], []>} : vector<1x64xf32>, vector<64x64xf32>, vector<1x64xf32> -> vector<1x64xf32>
    %813 = arith.mulf %808, %808 : vector<13x64xf32>
    %cst_494 = arith.constant dense<0.000000e+00> : vector<64xf32>
    %814 = vector.multi_reduction <add>, %813, %cst_494 [0] : vector<13x64xf32> to vector<64xf32>
    %815 = vector.shape_cast %814 : vector<64xf32> to vector<1x64xf32>
    %cst_495 = arith.constant dense<0.000000e+00> : vector<1x64xf32>
    %816 = tpu.matmul %815, %809, %cst_495 {dimension_numbers = #tpu.dot_dimension_numbers<[1], [0], [0], [1], [0, 0, 1, 1], [], []>} : vector<1x64xf32>, vector<64x64xf32>, vector<1x64xf32> -> vector<1x64xf32>
    %cst_496 = arith.constant 0.0384615399 : f32
    %817 = vector.broadcast %cst_496 : f32 to vector<1x64xf32>
    %818 = arith.mulf %812, %817 : vector<1x64xf32>
    %cst_497 = arith.constant 0.0384615399 : f32
    %819 = vector.broadcast %cst_497 : f32 to vector<1x64xf32>
    %820 = arith.mulf %816, %819 : vector<1x64xf32>
    %821 = arith.mulf %818, %818 : vector<1x64xf32>
    %822 = arith.subf %820, %821 : vector<1x64xf32>
    %cst_498 = arith.constant 0.000000e+00 : f32
    %823 = vector.broadcast %cst_498 : f32 to vector<1x64xf32>
    %824 = arith.maximumf %822, %823 : vector<1x64xf32>
    %825 = vector.broadcast %818 : vector<1x64xf32> to vector<13x64xf32>
    %826 = arith.subf %808, %825 : vector<13x64xf32>
    %cst_499 = arith.constant 9.99999974E-6 : f32
    %827 = vector.broadcast %cst_499 : f32 to vector<1x64xf32>
    %828 = arith.addf %824, %827 : vector<1x64xf32>
    %829 = math.rsqrt %828 : vector<1x64xf32>
    %830 = vector.broadcast %829 : vector<1x64xf32> to vector<13x64xf32>
    %831 = arith.mulf %826, %830 : vector<13x64xf32>
    %832 = arith.addf %831, %735 : vector<13x64xf32>
    %cst_500 = arith.constant 0.000000e+00 : f32
    %833 = vector.broadcast %cst_500 : f32 to vector<13x64xf32>
    %834 = arith.maximumf %832, %833 : vector<13x64xf32>
    %835 = tpu.iota {dimensions = array<i32: 0>} : vector<28x64xi32>
    %836 = arith.sitofp %835 : vector<28x64xi32> to vector<28x64xf32>
    %c44 = arith.constant 44 : index
    %c0_501 = arith.constant 0 : index
    %837 = vector.load %arg14[%c44, %c0_501] : memref<132x28xf32, #tpu.memory_space<vmem>>, vector<28x13xf32>
    %c72 = arith.constant 72 : index
    %c0_502 = arith.constant 0 : index
    %838 = vector.load %arg14[%c72, %c0_502] : memref<132x28xf32, #tpu.memory_space<vmem>>, vector<28x13xf32>
    %cst_503 = arith.constant dense<0.000000e+00> : vector<28x64xf32>
    %839 = tpu.matmul %837, %834, %cst_503 {dimension_numbers = #tpu.dot_dimension_numbers<[1], [0], [0], [1], [0, 0, 1, 1], [], []>} : vector<28x13xf32>, vector<13x64xf32>, vector<28x64xf32> -> vector<28x64xf32>
    %cst_504 = arith.constant dense<0.000000e+00> : vector<28x64xf32>
    %840 = tpu.matmul %837, %97, %cst_504 {dimension_numbers = #tpu.dot_dimension_numbers<[1], [0], [0], [1], [0, 0, 1, 1], [], []>} : vector<28x13xf32>, vector<13x64xf32>, vector<28x64xf32> -> vector<28x64xf32>
    %cst_505 = arith.constant dense<0.000000e+00> : vector<28x64xf32>
    %841 = tpu.matmul %838, %834, %cst_505 {dimension_numbers = #tpu.dot_dimension_numbers<[1], [0], [0], [1], [0, 0, 1, 1], [], []>} : vector<28x13xf32>, vector<13x64xf32>, vector<28x64xf32> -> vector<28x64xf32>
    %cst_506 = arith.constant dense<0.000000e+00> : vector<28x64xf32>
    %842 = tpu.matmul %838, %97, %cst_506 {dimension_numbers = #tpu.dot_dimension_numbers<[1], [0], [0], [1], [0, 0, 1, 1], [], []>} : vector<28x13xf32>, vector<13x64xf32>, vector<28x64xf32> -> vector<28x64xf32>
    %cst_507 = arith.constant 2.500000e+01 : f32
    %843 = vector.broadcast %cst_507 : f32 to vector<28x64xf32>
    %844 = arith.cmpf ole, %836, %843 : vector<28x64xf32>
    %845 = arith.cmpf oeq, %840, %836 : vector<28x64xf32>
    %846 = arith.andi %844, %845 : vector<28x64xi1>
    %cst_508 = arith.constant 2.000000e+00 : f32
    %847 = vector.broadcast %cst_508 : f32 to vector<28x64xf32>
    %848 = arith.cmpf oge, %836, %847 : vector<28x64xf32>
    %849 = arith.cmpf oeq, %842, %836 : vector<28x64xf32>
    %850 = arith.andi %848, %849 : vector<28x64xi1>
    %cst_509 = arith.constant 0.000000e+00 : f32
    %851 = vector.broadcast %cst_509 : f32 to vector<28x64xf32>
    %852 = arith.select %850, %841, %851 : vector<28x64xi1>, vector<28x64xf32>
    %853 = arith.select %846, %839, %852 : vector<28x64xi1>, vector<28x64xf32>
    %c0_510 = arith.constant 0 : index
    %c0_511 = arith.constant 0 : index
    %854 = vector.load %arg13[%c0_510, %c0_511] : memref<448x256xf32, #tpu.memory_space<vmem>>, vector<64x64xf32>
    %cst_512 = arith.constant dense<0.000000e+00> : vector<64xf32>
    %855 = vector.multi_reduction <add>, %853, %cst_512 [0] : vector<28x64xf32> to vector<64xf32>
    %856 = vector.shape_cast %855 : vector<64xf32> to vector<1x64xf32>
    %cst_513 = arith.constant dense<0.000000e+00> : vector<1x64xf32>
    %857 = tpu.matmul %856, %854, %cst_513 {dimension_numbers = #tpu.dot_dimension_numbers<[1], [0], [0], [1], [0, 0, 1, 1], [], []>} : vector<1x64xf32>, vector<64x64xf32>, vector<1x64xf32> -> vector<1x64xf32>
    %858 = arith.mulf %853, %853 : vector<28x64xf32>
    %cst_514 = arith.constant dense<0.000000e+00> : vector<64xf32>
    %859 = vector.multi_reduction <add>, %858, %cst_514 [0] : vector<28x64xf32> to vector<64xf32>
    %860 = vector.shape_cast %859 : vector<64xf32> to vector<1x64xf32>
    %cst_515 = arith.constant dense<0.000000e+00> : vector<1x64xf32>
    %861 = tpu.matmul %860, %854, %cst_515 {dimension_numbers = #tpu.dot_dimension_numbers<[1], [0], [0], [1], [0, 0, 1, 1], [], []>} : vector<1x64xf32>, vector<64x64xf32>, vector<1x64xf32> -> vector<1x64xf32>
    %cst_516 = arith.constant 0.0178571437 : f32
    %862 = vector.broadcast %cst_516 : f32 to vector<1x64xf32>
    %863 = arith.mulf %857, %862 : vector<1x64xf32>
    %cst_517 = arith.constant 0.0178571437 : f32
    %864 = vector.broadcast %cst_517 : f32 to vector<1x64xf32>
    %865 = arith.mulf %861, %864 : vector<1x64xf32>
    %866 = arith.mulf %863, %863 : vector<1x64xf32>
    %867 = arith.subf %865, %866 : vector<1x64xf32>
    %cst_518 = arith.constant 0.000000e+00 : f32
    %868 = vector.broadcast %cst_518 : f32 to vector<1x64xf32>
    %869 = arith.maximumf %867, %868 : vector<1x64xf32>
    %870 = vector.broadcast %863 : vector<1x64xf32> to vector<28x64xf32>
    %871 = arith.subf %853, %870 : vector<28x64xf32>
    %cst_519 = arith.constant 9.99999974E-6 : f32
    %872 = vector.broadcast %cst_519 : f32 to vector<1x64xf32>
    %873 = arith.addf %869, %872 : vector<1x64xf32>
    %874 = math.rsqrt %873 : vector<1x64xf32>
    %875 = vector.broadcast %874 : vector<1x64xf32> to vector<28x64xf32>
    %876 = arith.mulf %871, %875 : vector<28x64xf32>
    %877 = math.tanh %876 : vector<28x64xf32>
    %cst_520 = arith.constant 0.000000e+00 : f32
    %878 = vector.broadcast %cst_520 : f32 to vector<2x64xf32>
    %c0_521 = arith.constant 0 : index
    %c0_522 = arith.constant 0 : index
    %879 = vector.load %arg16[%c0_521, %c0_522] : memref<32x256xf32, #tpu.memory_space<vmem>>, vector<2x64xf32>
    tpu.vector_store %arg16[%c0_521, %c0_522], %878 {strides = array<i32>} : memref<32x256xf32, #tpu.memory_space<vmem>>, vector<2x64xf32>,
    %c30_523 = arith.constant 30 : index
    %c0_524 = arith.constant 0 : index
    %880 = vector.load %arg16[%c30_523, %c0_524] : memref<32x256xf32, #tpu.memory_space<vmem>>, vector<2x64xf32>
    tpu.vector_store %arg16[%c30_523, %c0_524], %878 {strides = array<i32>} : memref<32x256xf32, #tpu.memory_space<vmem>>, vector<2x64xf32>,
    %c2_525 = arith.constant 2 : index
    %c0_526 = arith.constant 0 : index
    %881 = vector.load %arg16[%c2_525, %c0_526] : memref<32x256xf32, #tpu.memory_space<vmem>>, vector<28x64xf32>
    tpu.vector_store %arg16[%c2_525, %c0_526], %877 {strides = array<i32>} : memref<32x256xf32, #tpu.memory_space<vmem>>, vector<28x64xf32>,
    %c0_527 = arith.constant 0 : index
    %c0_528 = arith.constant 0 : index
    %882 = vector.load %arg16[%c0_527, %c0_528] : memref<32x256xf32, #tpu.memory_space<vmem>>, vector<32x64xf32>
    %cst_529 = arith.constant 0.000000e+00 : f32
    %883 = vector.broadcast %cst_529 : f32 to vector<28x2xf32>
    %884 = vector.extract_strided_slice %882 {offsets = [0, 0], sizes = [28, 64], strides = [1, 1]} : vector<32x64xf32> to vector<28x64xf32>
    %885 = arith.truncf %884 : vector<28x64xf32> to vector<28x64xbf16>
    %c0_530 = arith.constant 0 : index
    %c0_531 = arith.constant 0 : index
    %c0_532 = arith.constant 0 : index
    %886 = vector.load %arg12[%c0_530, %c0_531, %c0_532] : memref<5x64x2xbf16, #tpu.memory_space<vmem>>, vector<1x64x2xbf16>
    %887 = vector.shape_cast %886 : vector<1x64x2xbf16> to vector<64x2xbf16>
    %cst_533 = arith.constant dense<0.000000e+00> : vector<28x2xf32>
    %888 = tpu.matmul %885, %887, %cst_533 {dimension_numbers = #tpu.dot_dimension_numbers<[1], [0], [0], [1], [0, 0, 1, 1], [], []>} : vector<28x64xbf16>, vector<64x2xbf16>, vector<28x2xf32> -> vector<28x2xf32>
    %889 = arith.addf %883, %888 : vector<28x2xf32>
    %890 = vector.extract_strided_slice %882 {offsets = [1, 0], sizes = [28, 64], strides = [1, 1]} : vector<32x64xf32> to vector<28x64xf32>
    %891 = arith.truncf %890 : vector<28x64xf32> to vector<28x64xbf16>
    %c1_534 = arith.constant 1 : index
    %c0_535 = arith.constant 0 : index
    %c0_536 = arith.constant 0 : index
    %892 = vector.load %arg12[%c1_534, %c0_535, %c0_536] : memref<5x64x2xbf16, #tpu.memory_space<vmem>>, vector<1x64x2xbf16>
    %893 = vector.shape_cast %892 : vector<1x64x2xbf16> to vector<64x2xbf16>
    %cst_537 = arith.constant dense<0.000000e+00> : vector<28x2xf32>
    %894 = tpu.matmul %891, %893, %cst_537 {dimension_numbers = #tpu.dot_dimension_numbers<[1], [0], [0], [1], [0, 0, 1, 1], [], []>} : vector<28x64xbf16>, vector<64x2xbf16>, vector<28x2xf32> -> vector<28x2xf32>
    %895 = arith.addf %889, %894 : vector<28x2xf32>
    %896 = vector.extract_strided_slice %882 {offsets = [2, 0], sizes = [28, 64], strides = [1, 1]} : vector<32x64xf32> to vector<28x64xf32>
    %897 = arith.truncf %896 : vector<28x64xf32> to vector<28x64xbf16>
    %c2_538 = arith.constant 2 : index
    %c0_539 = arith.constant 0 : index
    %c0_540 = arith.constant 0 : index
    %898 = vector.load %arg12[%c2_538, %c0_539, %c0_540] : memref<5x64x2xbf16, #tpu.memory_space<vmem>>, vector<1x64x2xbf16>
    %899 = vector.shape_cast %898 : vector<1x64x2xbf16> to vector<64x2xbf16>
    %cst_541 = arith.constant dense<0.000000e+00> : vector<28x2xf32>
    %900 = tpu.matmul %897, %899, %cst_541 {dimension_numbers = #tpu.dot_dimension_numbers<[1], [0], [0], [1], [0, 0, 1, 1], [], []>} : vector<28x64xbf16>, vector<64x2xbf16>, vector<28x2xf32> -> vector<28x2xf32>
    %901 = arith.addf %895, %900 : vector<28x2xf32>
    %902 = vector.extract_strided_slice %882 {offsets = [3, 0], sizes = [28, 64], strides = [1, 1]} : vector<32x64xf32> to vector<28x64xf32>
    %903 = arith.truncf %902 : vector<28x64xf32> to vector<28x64xbf16>
    %c3_542 = arith.constant 3 : index
    %c0_543 = arith.constant 0 : index
    %c0_544 = arith.constant 0 : index
    %904 = vector.load %arg12[%c3_542, %c0_543, %c0_544] : memref<5x64x2xbf16, #tpu.memory_space<vmem>>, vector<1x64x2xbf16>
    %905 = vector.shape_cast %904 : vector<1x64x2xbf16> to vector<64x2xbf16>
    %cst_545 = arith.constant dense<0.000000e+00> : vector<28x2xf32>
    %906 = tpu.matmul %903, %905, %cst_545 {dimension_numbers = #tpu.dot_dimension_numbers<[1], [0], [0], [1], [0, 0, 1, 1], [], []>} : vector<28x64xbf16>, vector<64x2xbf16>, vector<28x2xf32> -> vector<28x2xf32>
    %907 = arith.addf %901, %906 : vector<28x2xf32>
    %908 = vector.extract_strided_slice %882 {offsets = [4, 0], sizes = [28, 64], strides = [1, 1]} : vector<32x64xf32> to vector<28x64xf32>
    %909 = arith.truncf %908 : vector<28x64xf32> to vector<28x64xbf16>
    %c4_546 = arith.constant 4 : index
    %c0_547 = arith.constant 0 : index
    %c0_548 = arith.constant 0 : index
    %910 = vector.load %arg12[%c4_546, %c0_547, %c0_548] : memref<5x64x2xbf16, #tpu.memory_space<vmem>>, vector<1x64x2xbf16>
    %911 = vector.shape_cast %910 : vector<1x64x2xbf16> to vector<64x2xbf16>
    %cst_549 = arith.constant dense<0.000000e+00> : vector<28x2xf32>
    %912 = tpu.matmul %909, %911, %cst_549 {dimension_numbers = #tpu.dot_dimension_numbers<[1], [0], [0], [1], [0, 0, 1, 1], [], []>} : vector<28x64xbf16>, vector<64x2xbf16>, vector<28x2xf32> -> vector<28x2xf32>
    %913 = arith.addf %907, %912 : vector<28x2xf32>
    %c0_550 = arith.constant 0 : index
    %c0_551 = arith.constant 0 : index
    %914 = vector.load %arg15[%c0_550, %c0_551] : memref<28x2xf32, #tpu.memory_space<vmem>>, vector<28x2xf32>
    tpu.vector_store %arg15[%c0_550, %c0_551], %913 {strides = array<i32>} : memref<28x2xf32, #tpu.memory_space<vmem>>, vector<28x2xf32>,
    return
  }
}

</mosaic_0001>

<bundles_post_ra>
// kernel: squeeze.1
= control target key start
LH: loop header
LB: loop body
LE: loop exit
PB: predicated region body
PF: predicated region fallthrough
CT: control target
= control target key end

     0   :  { %s310_s8 = smov 126   ;;  %s311_s9 = smov 118   ;;  %vm7_vm0 = vcmask 15360   ;;  %s573_s0 = inlined_call_operand.vmem [shape: f32[2,56], index: 0, kind: input, shape index: {}]   ;;  %s574_s1 = inlined_call_operand.vmem [shape: f32[2,28,2], index: 1, kind: output, shape index: {}]  }
   0x1   :  { %v4_v0 = vld [vmem:[%s573_s0] sm:$0x3]  ;;  %s309_s0 = smov 122   ;;  %s312_s10 = smov 120  }
   0x2   :  { %5 = vst [vmem:[#allocation0] sm:$0x3] %v4_v0  ;;  %s313_s11 = smov 124   ;;  %s314_s12 = smov 116  }
   0x3   :  { %s315_s13 = smov 112   ;;  %s316_s14 = smov 114  }
   0x4   :  { %s317_s15 = smov 110   ;;  %s318_s16 = smov 106  }
   0x5   :  { %s319_s17 = smov 108   ;;  %s320_s18 = smov 104  }
   0x6   :  { %s321_s19 = smov 100   ;;  %s322_s20 = smov 102  }
   0x7   :  { %s323_s21 = smov 98   ;;  %s324_s22 = smov 94  }
   0x8   :  { %s325_s23 = smov 96   ;;  %s326_s24 = smov 92  }
   0x9   :  { %v27_v1 = vld [vmem:[#allocation0] sm:$0x3]   ;;  %s327_s25 = smov 88   ;;  %s328_s26 = smov 90  }
   0xa   :  { %v11_v2 = vld [vmem:[#allocation0] sm:$0x3]   ;;  %28 = vrot.lane.b32.xlu1 %v27_v1, %s309_s0  ;;  %s329_s27 = smov 86   ;;  %s330_s28 = smov 82  }
   0xb   :  { %12 = vrot.lane.b32.xlu0 %v11_v2, %s310_s8  ;;  %v43_v3 = vld [vmem:[#allocation0] sm:$0x3]   ;;  %s331_s29 = smov 84   ;;  %s332_s30 = smov 80  }
   0xc   :  { %44 = vrot.lane.b32.xlu2 %v43_v3, %s311_s9  ;;  %v35_v4 = vld [vmem:[#allocation0] sm:$0x3]   ;;  %s333_s2 = smov 76   ;;  %s334_s3 = smov 78  }
   0xd   :  { %v19_v5 = vld [vmem:[#allocation0] sm:$0x3]   ;;  %s335_s4 = smov 74  }
   0xe   :  { %v51_v6 = vld [vmem:[#allocation0] sm:$0x3]  }
   0xf   :  { %v67_v7 = vld [vmem:[#allocation0] sm:$0x3]  }
  0x10   :  { %v59_v8 = vld [vmem:[#allocation0] sm:$0x3]  }
  0x11   :  { %v75_v9 = vld [vmem:[#allocation0] sm:$0x3]  }
  0x12   :  { %36 = vrot.lane.b32.xlu1 %v35_v4, %s312_s10  ;;  %v91_v10 = vld [vmem:[#allocation0] sm:$0x3]  }
  0x13   :  { %20 = vrot.lane.b32.xlu0 %v19_v5, %s313_s11  ;;  %v83_v11 = vld [vmem:[#allocation0] sm:$0x3]  }
  0x14   :  { %52 = vrot.lane.b32.xlu2 %v51_v6, %s314_s12  ;;  %v99_v12 = vld [vmem:[#allocation0] sm:$0x3]  }
  0x15   :  { %v115_v13 = vld [vmem:[#allocation0] sm:$0x3]  }
  0x16   :  { %v107_v14 = vld [vmem:[#allocation0] sm:$0x3]  }
  0x17   :  { %v123_v15 = vld [vmem:[#allocation0] sm:$0x3]  }
  0x18   :  { %v139_v16 = vld [vmem:[#allocation0] sm:$0x3]  }
  0x19   :  { %v131_v17 = vld [vmem:[#allocation0] sm:$0x3]  }
  0x1a   :  { %68 = vrot.lane.b32.xlu1 %v67_v7, %s315_s13  ;;  %v147_v18 = vld [vmem:[#allocation0] sm:$0x3]  }
  0x1b   :  { %60 = vrot.lane.b32.xlu0 %v59_v8, %s316_s14  ;;  %v163_v19 = vld [vmem:[#allocation0] sm:$0x3]  }
  0x1c   :  { %76 = vrot.lane.b32.xlu2 %v75_v9, %s317_s15  ;;  %v155_v20 = vld [vmem:[#allocation0] sm:$0x3]  }
  0x1d   :  { %v171_v21 = vld [vmem:[#allocation0] sm:$0x3]  }
  0x1e   :  { %v187_v22 = vld [vmem:[#allocation0] sm:$0x3]  }
  0x1f   :  { %v179_v23 = vld [vmem:[#allocation0] sm:$0x3]  }
  0x20   :  { %v195_v24 = vld [vmem:[#allocation0] sm:$0x3]  }
  0x21   :  { %v211_v25 = vld [vmem:[#allocation0] sm:$0x3]  }
  0x22   :  { %92 = vrot.lane.b32.xlu1 %v91_v10, %s318_s16  ;;  %v203_v26 = vld [vmem:[#allocation0] sm:$0x3]  }
  0x23   :  { %84 = vrot.lane.b32.xlu0 %v83_v11, %s319_s17  ;;  %v219_v27 = vld [vmem:[#allocation0] sm:$0x3]  }
  0x24   :  { %100 = vrot.lane.b32.xlu2 %v99_v12, %s320_s18  ;;  %v6_v46 = vld [vmem:[#allocation0] sm:$0x3]  }
  0x25   :  { %8 = vst.msk [vmem:[%s574_s1] sm:$0x1] %vm7_vm0, %v6_v46  }
  0x26   :  { %227 = vst.msk [vmem:[%s574_s1 + $0x1f] sm:$0x2] %vm7_vm0, %v6_v46  }
  0x2a   :  { %116 = vrot.lane.b32.xlu1 %v115_v13, %s321_s19 }
  0x2b   :  { %108 = vrot.lane.b32.xlu0 %v107_v14, %s322_s20 }
  0x2c   :  { %124 = vrot.lane.b32.xlu2 %v123_v15, %s323_s21 }
  0x32   :  { %140 = vrot.lane.b32.xlu1 %v139_v16, %s324_s22 }
  0x33   :  { %132 = vrot.lane.b32.xlu0 %v131_v17, %s325_s23 }
  0x34   :  { %148 = vrot.lane.b32.xlu2 %v147_v18, %s326_s24 }
  0x3a   :  { %164 = vrot.lane.b32.xlu1 %v163_v19, %s327_s25 }
  0x3b   :  { %156 = vrot.lane.b32.xlu0 %v155_v20, %s328_s26 }
  0x3c   :  { %172 = vrot.lane.b32.xlu2 %v171_v21, %s329_s27 }
  0x42   :  { %188 = vrot.lane.b32.xlu1 %v187_v22, %s330_s28 }
  0x43   :  { %180 = vrot.lane.b32.xlu0 %v179_v23, %s331_s29 }
  0x44   :  { %196 = vrot.lane.b32.xlu2 %v195_v24, %s332_s30 }
  0x4a   :  { %212 = vrot.lane.b32.xlu1 %v211_v25, %s333_s2 }
  0x4b   :  { %204 = vrot.lane.b32.xlu0 %v203_v26, %s334_s3 }
  0x4c   :  { %220 = vrot.lane.b32.xlu2 %v219_v27, %s335_s4 }
  0x66   :  { %v45_v28 = vpop.permute.xlu2 %44  }
  0x67   :  { %236 = vst.msk [vmem:[%s574_s1 + $0x5] sm:$0x1] %vm7_vm0, %v45_v28  }
  0x68   :  { %237 = vst.msk [vmem:[%s574_s1 + $0x24] sm:$0x2] %vm7_vm0, %v45_v28  }
  0x6e   :  { %v53_v29 = vpop.permute.xlu2 %52  }
  0x6f   :  { %238 = vst.msk [vmem:[%s574_s1 + $0x6] sm:$0x1] %vm7_vm0, %v53_v29  }
  0x70   :  { %239 = vst.msk [vmem:[%s574_s1 + $0x25] sm:$0x2] %vm7_vm0, %v53_v29  }
  0x76   :  { %v77_v30 = vpop.permute.xlu2 %76  }
  0x77   :  { %244 = vst.msk [vmem:[%s574_s1 + $0x9] sm:$0x1] %vm7_vm0, %v77_v30  }
  0x78   :  { %245 = vst.msk [vmem:[%s574_s1 + $0x28] sm:$0x2] %vm7_vm0, %v77_v30  }
  0x7c   :  { %v29_v31 = vpop.permute.xlu1 %28  }
  0x7d   :  { %v13_v32 = vpop.permute.xlu0 %12   ;;  %232 = vst.msk [vmem:[%s574_s1 + $0x3] sm:$0x1] %vm7_vm0, %v29_v31  }
  0x7e   :  { %233 = vst.msk [vmem:[%s574_s1 + $0x22] sm:$0x2] %vm7_vm0, %v29_v31   ;;  %v101_v33 = vpop.permute.xlu2 %100  }
  0x7f   :  { %228 = vst.msk [vmem:[%s574_s1 + $0x1] sm:$0x1] %vm7_vm0, %v13_v32  }
  0x80   :  { %229 = vst.msk [vmem:[%s574_s1 + $0x20] sm:$0x2] %vm7_vm0, %v13_v32  }
  0x81   :  { %250 = vst.msk [vmem:[%s574_s1 + $0xc] sm:$0x1] %vm7_vm0, %v101_v33  }
  0x82   :  { %251 = vst.msk [vmem:[%s574_s1 + $0x2b] sm:$0x2] %vm7_vm0, %v101_v33  }
  0x84   :  { %v37_v34 = vpop.permute.xlu1 %36  }
  0x85   :  { %v21_v35 = vpop.permute.xlu0 %20   ;;  %234 = vst.msk [vmem:[%s574_s1 + $0x4] sm:$0x1] %vm7_vm0, %v37_v34  }
  0x86   :  { %235 = vst.msk [vmem:[%s574_s1 + $0x23] sm:$0x2] %vm7_vm0, %v37_v34   ;;  %v125_v36 = vpop.permute.xlu2 %124  }
  0x87   :  { %230 = vst.msk [vmem:[%s574_s1 + $0x2] sm:$0x1] %vm7_vm0, %v21_v35  }
  0x88   :  { %231 = vst.msk [vmem:[%s574_s1 + $0x21] sm:$0x2] %vm7_vm0, %v21_v35  }
  0x89   :  { %256 = vst.msk [vmem:[%s574_s1 + $0xf] sm:$0x1] %vm7_vm0, %v125_v36  }
  0x8a   :  { %257 = vst.msk [vmem:[%s574_s1 + $0x2e] sm:$0x2] %vm7_vm0, %v125_v36  }
  0x8c   :  { %v69_v37 = vpop.permute.xlu1 %68  }
  0x8d   :  { %v61_v38 = vpop.permute.xlu0 %60   ;;  %242 = vst.msk [vmem:[%s574_s1 + $0x8] sm:$0x1] %vm7_vm0, %v69_v37  }
  0x8e   :  { %243 = vst.msk [vmem:[%s574_s1 + $0x27] sm:$0x2] %vm7_vm0, %v69_v37   ;;  %v149_v39 = vpop.permute.xlu2 %148  }
  0x8f   :  { %240 = vst.msk [vmem:[%s574_s1 + $0x7] sm:$0x1] %vm7_vm0, %v61_v38  }
  0x90   :  { %241 = vst.msk [vmem:[%s574_s1 + $0x26] sm:$0x2] %vm7_vm0, %v61_v38  }
  0x91   :  { %262 = vst.msk [vmem:[%s574_s1 + $0x12] sm:$0x1] %vm7_vm0, %v149_v39  }
  0x92   :  { %263 = vst.msk [vmem:[%s574_s1 + $0x31] sm:$0x2] %vm7_vm0, %v149_v39  }
  0x94   :  { %v93_v40 = vpop.permute.xlu1 %92  }
  0x95   :  { %v85_v41 = vpop.permute.xlu0 %84   ;;  %248 = vst.msk [vmem:[%s574_s1 + $0xb] sm:$0x1] %vm7_vm0, %v93_v40  }
  0x96   :  { %249 = vst.msk [vmem:[%s574_s1 + $0x2a] sm:$0x2] %vm7_vm0, %v93_v40   ;;  %v173_v42 = vpop.permute.xlu2 %172  }
  0x97   :  { %246 = vst.msk [vmem:[%s574_s1 + $0xa] sm:$0x1] %vm7_vm0, %v85_v41  }
  0x98   :  { %247 = vst.msk [vmem:[%s574_s1 + $0x29] sm:$0x2] %vm7_vm0, %v85_v41  }
  0x99   :  { %268 = vst.msk [vmem:[%s574_s1 + $0x15] sm:$0x1] %vm7_vm0, %v173_v42  }
  0x9a   :  { %269 = vst.msk [vmem:[%s574_s1 + $0x34] sm:$0x2] %vm7_vm0, %v173_v42  }
  0x9c   :  { %v117_v43 = vpop.permute.xlu1 %116  }
  0x9d   :  { %v109_v44 = vpop.permute.xlu0 %108   ;;  %254 = vst.msk [vmem:[%s574_s1 + $0xe] sm:$0x1] %vm7_vm0, %v117_v43  }
  0x9e   :  { %255 = vst.msk [vmem:[%s574_s1 + $0x2d] sm:$0x2] %vm7_vm0, %v117_v43   ;;  %v197_v45 = vpop.permute.xlu2 %196  }
  0x9f   :  { %252 = vst.msk [vmem:[%s574_s1 + $0xd] sm:$0x1] %vm7_vm0, %v109_v44  }
  0xa0   :  { %253 = vst.msk [vmem:[%s574_s1 + $0x2c] sm:$0x2] %vm7_vm0, %v109_v44  }
  0xa1   :  { %274 = vst.msk [vmem:[%s574_s1 + $0x18] sm:$0x1] %vm7_vm0, %v197_v45  }
  0xa2   :  { %275 = vst.msk [vmem:[%s574_s1 + $0x37] sm:$0x2] %vm7_vm0, %v197_v45  }
  0xa4   :  { %v141_v47 = vpop.permute.xlu1 %140  }
  0xa5   :  { %v133_v48 = vpop.permute.xlu0 %132   ;;  %260 = vst.msk [vmem:[%s574_s1 + $0x11] sm:$0x1] %vm7_vm0, %v141_v47  }
  0xa6   :  { %261 = vst.msk [vmem:[%s574_s1 + $0x30] sm:$0x2] %vm7_vm0, %v141_v47   ;;  %v221_v49 = vpop.permute.xlu2 %220  }
  0xa7   :  { %258 = vst.msk [vmem:[%s574_s1 + $0x10] sm:$0x1] %vm7_vm0, %v133_v48  }
  0xa8   :  { %259 = vst.msk [vmem:[%s574_s1 + $0x2f] sm:$0x2] %vm7_vm0, %v133_v48  }
  0xa9   :  { %280 = vst.msk [vmem:[%s574_s1 + $0x1b] sm:$0x1] %vm7_vm0, %v221_v49  }
  0xaa   :  { %281 = vst.msk [vmem:[%s574_s1 + $0x3a] sm:$0x2] %vm7_vm0, %v221_v49  }
  0xac   :  { %v165_v50 = vpop.permute.xlu1 %164  }
  0xad   :  { %v157_v51 = vpop.permute.xlu0 %156   ;;  %266 = vst.msk [vmem:[%s574_s1 + $0x14] sm:$0x1] %vm7_vm0, %v165_v50  }
  0xae   :  { %267 = vst.msk [vmem:[%s574_s1 + $0x33] sm:$0x2] %vm7_vm0, %v165_v50  }
  0xaf   :  { %264 = vst.msk [vmem:[%s574_s1 + $0x13] sm:$0x1] %vm7_vm0, %v157_v51  }
  0xb0   :  { %265 = vst.msk [vmem:[%s574_s1 + $0x32] sm:$0x2] %vm7_vm0, %v157_v51  }
  0xb4   :  { %v189_v52 = vpop.permute.xlu1 %188  }
  0xb5   :  { %v181_v53 = vpop.permute.xlu0 %180   ;;  %272 = vst.msk [vmem:[%s574_s1 + $0x17] sm:$0x1] %vm7_vm0, %v189_v52  }
  0xb6   :  { %273 = vst.msk [vmem:[%s574_s1 + $0x36] sm:$0x2] %vm7_vm0, %v189_v52  }
  0xb7   :  { %270 = vst.msk [vmem:[%s574_s1 + $0x16] sm:$0x1] %vm7_vm0, %v181_v53  }
  0xb8   :  { %271 = vst.msk [vmem:[%s574_s1 + $0x35] sm:$0x2] %vm7_vm0, %v181_v53  }
  0xbc   :  { %v213_v54 = vpop.permute.xlu1 %212  }
  0xbd   :  { %v205_v55 = vpop.permute.xlu0 %204   ;;  %278 = vst.msk [vmem:[%s574_s1 + $0x1a] sm:$0x1] %vm7_vm0, %v213_v54  }
  0xbe   :  { %279 = vst.msk [vmem:[%s574_s1 + $0x39] sm:$0x2] %vm7_vm0, %v213_v54  }
  0xbf   :  { %276 = vst.msk [vmem:[%s574_s1 + $0x19] sm:$0x1] %vm7_vm0, %v205_v55  }
  0xc0   :  { %277 = vst.msk [vmem:[%s574_s1 + $0x38] sm:$0x2] %vm7_vm0, %v205_v55  }

// kernel: forward.1
= control target key start
LH: loop header
LB: loop body
LE: loop exit
PB: predicated region body
PF: predicated region fallthrough
CT: control target
= control target key end

     0   :  { %20 = vsyncpa [#allocation4], 0  ;;  %s12377_s0 = inlined_call_operand.vmem [shape: f32[28,4], index: 0, kind: input, shape index: {}]   ;;  %s12378_s1 = inlined_call_operand.vmem [shape: bf16[1,4,2], index: 1, kind: input, shape index: {}]   ;;  %s12379_s2 = inlined_call_operand.vmem [shape: f32[1,2], index: 2, kind: input, shape index: {}]   ;;  %s12380_s3 = inlined_call_operand.vmem [shape: bf16[5,2,64], index: 3, kind: input, shape index: {}]   ;;  %s12381_s4 = inlined_call_operand.hbm [shape: bf16[3,64,64], index: 4, kind: input, shape index: {}]   ;;  %s12382_s5 = inlined_call_operand.hbm [shape: bf16[3,64,64], index: 5, kind: input, shape index: {}]   ;;  %s12383_s6 = inlined_call_operand.vmem [shape: bf16[6,64,128], index: 6, kind: input, shape index: {}]   ;;  %s12384_s7 = inlined_call_operand.vmem [shape: bf16[3,128,128], index: 7, kind: input, shape index: {}]   ;;  %s12385_s8 = inlined_call_operand.vmem [shape: bf16[3,128,128], index: 8, kind: input, shape index: {}]   ;;  %s12386_s9 = inlined_call_operand.hbm [shape: bf16[6,128,256], index: 9, kind: input, shape index: {}]   ;;  %s12387_s10 = inlined_call_operand.hbm [shape: bf16[6,256,128], index: 10, kind: input, shape index: {}]   ;;  %s12388_s11 = inlined_call_operand.vmem [shape: bf16[6,128,64], index: 11, kind: input, shape index: {}]   ;;  %s12389_s12 = inlined_call_operand.vmem [shape: bf16[5,64,2], index: 12, kind: input, shape index: {}]   ;;  %s12390_s13 = inlined_call_operand.hbm [shape: f32[448,256], index: 13, kind: input, shape index: {}]   ;;  %s12391_s14 = inlined_call_operand.vmem [shape: f32[132,28], index: 14, kind: input, shape index: {}]   ;;  %s12392_s15 = inlined_call_operand.vmem [shape: f32[28,2], index: 15, kind: output, shape index: {}]  }
   0x1   :  { %21 = vsyncpa [#allocation6], 0 }
   0x2   :  { %22 = vsyncpa [#allocation9], 0  ;;  %s48_s20 = sshll.u32 %s12382_s5, 4  ;;  %s10204_s21 = smov [#allocation5]   ;;  %s49_s20 = int_to_ptr.hbm [resolvable:$true] %s48_s20 }
   0x3   :  { %s50_s22 = sshll.u32 %s10204_s21, 4  ;;  %s80_s25 = sshll.u32 %s12387_s10, 4  ;;  %s51_s22 = int_to_ptr.vmem [resolvable:$true] %s50_s22  ;;  %s81_s25 = int_to_ptr.hbm [resolvable:$true] %s80_s25 }
   0x4   :  { %s10205_s26 = smov 64   ;;  %s10206_s27 = smov 4  }
   0x5   :  { %56 = dma.hbm_to_vmem [thread:$0]  %s49_s20, 1536, %s51_s22, [#allocation6], %s10205_s26, %s10205_s26, %s10206_s27  }
   0x6   :  { %s10207_s28 = smov [#allocation8]   ;;  %s35_s17 = sshll.u32 %s12381_s4, 4  ;;  %s36_s17 = int_to_ptr.hbm [resolvable:$true] %s35_s17 }
   0x7   :  { %s82_s29 = sshll.u32 %s10207_s28, 4  ;;  %s67_s19 = sshll.u32 %s12386_s9, 4  ;;  %s83_s29 = int_to_ptr.vmem [resolvable:$true] %s82_s29  ;;  %s68_s19 = int_to_ptr.hbm [resolvable:$true] %s67_s19 }
   0x8   :  { %88 = dma.hbm_to_vmem [thread:$0]  %s81_s25, 12288, %s83_s29, [#allocation9], %s10205_s26, %s10205_s26, %s10206_s27  }
   0x9   :  { %s10208_s21 = smov [#allocation3]   ;;  %s10209_s10 = smov [#allocation7]  }
   0xa   :  { %s37_s23 = sshll.u32 %s10208_s21, 4  ;;  %s69_s20 = sshll.u32 %s10209_s10, 4  ;;  %s38_s23 = int_to_ptr.vmem [resolvable:$true] %s37_s23  ;;  %s70_s20 = int_to_ptr.vmem [resolvable:$true] %s69_s20 }
   0xb   :  { %43 = dma.hbm_to_vmem [thread:$0]  %s36_s17, 1536, %s38_s23, [#allocation4], %s10205_s26, %s10205_s26, %s10206_s27  }
   0xc   :  { %s10210_s22 = smov 128   ;;  %s10211_s24 = smov 8  }
   0xd   :  { %75 = dma.hbm_to_vmem [thread:$0]  %s68_s19, 12288, %s70_s20, [#allocation6], %s10210_s22, %s10210_s22, %s10211_s24  }
   0xe   :  { %s97_s30 = sshll.u32 %s12390_s13, 4  ;;  %s10212_s25 = smov [#allocation10]   ;;  %s98_s30 = int_to_ptr.hbm [resolvable:$true] %s97_s30 }
   0xf   :  { %s99_s29 = sshll.u32 %s10212_s25, 4  ;;  %s10213_s9 = smov 256   ;;  %s100_s29 = int_to_ptr.vmem [resolvable:$true] %s99_s29 }
  0x10   :  { %s10214_s16 = smov 16  }
  0x11   :  { %105 = dma.hbm_to_vmem [thread:$0]  %s98_s30, 14336, %s100_s29, [#allocation9], %s10213_s9, %s10213_s9, %s10214_s16  }
  0x12   :  { %10198 = dma.done.wait [#allocation4], 1536  }
  0x13   :  { %10199 = vsyncadd [#allocation4], 4294965760 }
  0x14   :  { %10200 = dma.done.wait [#allocation6], 13824  }
  0x15   :  { %10201 = vsyncadd [#allocation6], 4294953472 }
  0x16   :  { %10202 = dma.done.wait [#allocation9], 26624  }
  0x17   :  { %10203 = vsyncadd [#allocation9], 4294940672  ;;  %vm12459_vm0 = vcmask 1041408   ;;  %v135_v0 = vld [vmem:[%s12378_s1] sm:$0x3]  ;;  %v130_v2 = vld [vmem:[%s12377_s0 + $0x8] sm:$0xff] }
  0x18   :  { %v129_v1 = vld [vmem:[%s12377_s0] sm:$0xff]  ;;  %v149_v3 = vsel %vm12459_vm0, %v135_v0, 0  ;;  %v131_v5 = vld [vmem:[%s12377_s0 + $0x10] sm:$0xff]  ;;  %v132_v6 = vld [vmem:[%s12377_s0 + $0x18] sm:$0xf]  ;;  %vm140_vm1 = vcmask 31744  }
  0x19   :  { %v133_v4 = vpack.c.bf16 %v130_v2, %v129_v1  ;;  %158 = vmatpush.bf16.msra.mxu0 %v149_v3  ;;  %10000 = vmatpush.bf16.msra.mxu1 %v149_v3  ;;  %v134_v7 = vpack.c.bf16 %v132_v6, %v131_v5  ;;  %vm170_vm2 = vcmask 9216   ;;  %v12399_v8 = vmov 0.0   ;;  %v202_v9 = vld [vmem:[%s12380_s3] sm:$0x1]  ;;  %v7491_v11 = vld [vmem:[%s12380_s3 + $0x2] sm:$0x1] }
  0x1a   :  { %171 = vst.msk [vmem:[#allocation2] sm:$0x3] %vm170_vm2, %v12399_v8  ;;  %vm172_vm3 = vcmask 15366   ;;  %vm12465_vm4 = vcmask 1040384   ;;  %v7486_v13 = vld [vmem:[%s12380_s3 + $0x1] sm:$0x1] }
  0x1b   :  { %3828 = vst [vmem:[#allocation2 + $0x8] sm:$0x7] %v12399_v8  ;;  %v255_v10 = vsel %vm12465_vm4, %v202_v9, 0  ;;  %v291_v12 = vsel %vm12465_vm4, %v7491_v11, 0  ;;  %v7494_v14 = vld [vmem:[%s12380_s3 + $0x3] sm:$0x1] }
  0x1c   :  { %7484 = vmatmul.msk.bf16.vlgmr.msra.gmra.mxu0 %vm140_vm1, %v133_v4  ;;  %7485 = vmatmul.msk.bf16.vlgmr.msra.gmra.mxu1 %vm140_vm1, %v134_v7  ;;  %3830 = vst [vmem:[#allocation2 + $0x8] sm:$0x80] %v12399_v8  ;;  %v10013_v15 = vld [vmem:[%s12379_s2] ss:$0 sm:$0xff]  ;;  %v229_v16 = vsel %vm12465_vm4, %v7486_v13, 0  ;;  %v333_v17 = vsel %vm12465_vm4, %v7494_v14, 0 }
  0x1d   :  { %3832 = vst [vmem:[#allocation2 + $0x18] sm:$0x3] %v12399_v8  ;;  %264 = vmatpush.bf16.msra.mxu2 %v255_v10  ;;  %300 = vmatpush.bf16.msra.mxu3 %v291_v12  ;;  %vm189_vm5 = vcmask 15362   ;;  %vm677_vm6 = vcmask 516096   ;;  %vm12393_vm7 = vcmask 15360   ;;  %vm194_vm8 = vcmask 13312  }
  0x1e   :  { %173 = vst.msk [vmem:[#allocation2 + $0x30] sm:$0xc0] %vm172_vm3, %v12399_v8  ;;  %238 = vmatpush.bf16.msrb.mxu1 %v229_v16  ;;  %342 = vmatpush.bf16.msrb.mxu0 %v333_v17  ;;  %v7497_v34 = vld [vmem:[%s12380_s3 + $0x4] sm:$0x1]  ;;  %vm1237_vm9 = vcmask 523271   ;;  %vm7116_vm10 = vcmask 523270  }
  0x1f   :  { %v371_v35 = vsel %vm12465_vm4, %v7497_v34, 0  ;;  %vm12396_vm11 = vcmask 1046528   ;;  %vm12395_vm12 = vsmask.f32 7424  ;;  %vm12394_vm13 = vsmask.f32 6400 }
  0x20   :  { %vm12467_vm14 = vcmask 1045504   ;;  %v10382_v9 = vld [vmem:[#allocation10 + $0x70] sm:$0xff]  ;;  %v10386_v10 = vld [vmem:[#allocation10 + $0x60] sm:$0xff]  ;;  %vm12463_vm15 = vcmask 523264   ;;  %vm12398_vm1 = vcmask 519168  }
  0x21   :  { %430 = vmatpush.msrb.mxu2 %v10382_v9  ;;  %470 = vmatpush.msrb.mxu3 %v10382_v9  ;;  %v10390_v12 = vld [vmem:[#allocation10 + $0x50] sm:$0xff] }
  0x22   :  { %380 = vmatpush.bf16.msra.mxu1 %v371_v35  ;;  %v10396_v16 = vld [vmem:[#allocation10 + $0x30] sm:$0xff] }
  0x23   :  { %431 = vmatpush.msrb.mxu2 %v10386_v10  ;;  %471 = vmatpush.msrb.mxu3 %v10386_v10 }
  0x25   :  { %432 = vmatpush.msrb.mxu2 %v10390_v12  ;;  %472 = vmatpush.msrb.mxu3 %v10390_v12 }
  0x99   :  { %v160_v18 = vpop.f32.mrf.mxu0  ;;  %v165_v19 = vpop.f32.mrf.mxu1 }
  0x9a   :  { %v161_v20 = vadd.f32 %v10013_v15, %v160_v18  ;;  %v166_v22 = vadd.f32 %v10013_v15, %v165_v19  ;;  %v10400_v18 = vld [vmem:[#allocation10 + $0x20] sm:$0xff] }
  0x9c   :  { %v178_v21 = vrot.slane %v161_v20, 6  ;;  %v181_v27 = vrot.slane %v166_v22, 6  ;;  %v10404_v22 = vld [vmem:[#allocation10 + $0x10] sm:$0xff] }
  0x9e   :  { %190 = vst.msk [vmem:[#allocation2] sm:$0xfc] %vm189_vm5, %v178_v21 }
  0xa1   :  { %v162_v23 = vpop.f32.mrf.mxu0  ;;  %v167_v24 = vpop.f32.mrf.mxu1 }
  0xa2   :  { %v163_v25 = vadd.f32 %v10013_v15, %v162_v23  ;;  %v168_v26 = vadd.f32 %v10013_v15, %v167_v24  ;;  %v10393_v15 = vld [vmem:[#allocation10 + $0x40] sm:$0xff] }
  0xa3   :  { %433 = vmatpush.msrb.mxu2 %v10393_v15  ;;  %473 = vmatpush.msrb.mxu3 %v10393_v15 }
  0xa4   :  { %v179_v28 = vrot.slane %v163_v25, 6  ;;  %v183_v29 = vrot.slane %v168_v26, 6  ;;  %v10408_v25 = vld [vmem:[#allocation10] sm:$0xff] }
  0xa5   :  { %v196_v30 = vld [vmem:[#allocation2] sm:$0xff]  ;;  %434 = vmatpush.msrb.mxu2 %v10396_v16  ;;  %474 = vmatpush.msrb.mxu3 %v10396_v16 }
  0xa6   :  { %v180_v31 = vsel %vm12459_vm0, %v178_v21, %v179_v28  ;;  %v182_v32 = vsel %vm12459_vm0, %v179_v28, %v181_v27  ;;  %678 = vst.msk [vmem:[#allocation2] sm:$0x1] %vm677_vm6, %v12399_v8  ;;  %v184_v33 = vsel %vm12459_vm0, %v181_v27, %v183_v29 }
  0xa7   :  { %192 = vst.msk [vmem:[#allocation2 + $0x10] sm:$0xff] %vm12393_vm7, %v180_v31  ;;  %435 = vmatpush.msrb.mxu2 %v10400_v18  ;;  %475 = vmatpush.msrb.mxu3 %v10400_v18 }
  0xa8   :  { %193 = vst.msk [vmem:[#allocation2 + $0x20] sm:$0xff] %vm12393_vm7, %v182_v32 }
  0xa9   :  { %195 = vst.msk [vmem:[#allocation2 + $0x30] sm:$0x3f] %vm194_vm8, %v184_v33  ;;  %436 = vmatpush.msrb.mxu2 %v10404_v22  ;;  %476 = vmatpush.msrb.mxu3 %v10404_v22  ;;  %vm529_vm8 = vcmask 1043456  }
  0xab   :  { %437 = vmatpush.msrb.mxu2 %v10408_v25  ;;  %477 = vmatpush.msrb.mxu3 %v10408_v25 }
  0xae   :  { %v197_v36 = vld [vmem:[#allocation2 + $0x10] sm:$0xff] }
  0xaf   :  { %v198_v37 = vld [vmem:[#allocation2 + $0x20] sm:$0xff]  ;;  %679 = vst.msk [vmem:[#allocation2 + $0x16] sm:$0x1] %vm677_vm6, %v12399_v8  ;;  %v200_v38 = vpack.c.bf16 %v197_v36, %v196_v30 }
  0xb0   :  { %1238 = vst.msk [vmem:[#allocation2 + $0x10] sm:$0x80] %vm1237_vm9, %v12399_v8  ;;  %v199_v39 = vld [vmem:[#allocation2 + $0x30] sm:$0xff]  ;;  %vm516_vm9 = vcmask 228352  }
  0xb1   :  { %1239 = vst.msk [vmem:[#allocation2 + $0x20] sm:$0x1] %vm677_vm6, %v12399_v8  ;;  %7489 = vmatmul.msk.bf16.vlgmr.msra.gmra.mxu2 %vm12393_vm7, %v200_v38  ;;  %v201_v40 = vpack.c.bf16 %v199_v39, %v198_v37  ;;  %v281_v41 = vrot.slane %v200_v38, 1  ;;  %v207_v42 = vshrl.u32 %v200_v38, 16  ;;  %v209_v43 = vshll.u32 %v200_v38, 16 }
  0xb2   :  { %7117 = vst.msk [vmem:[#allocation2 + $0x30] sm:$0xc0] %vm7116_vm10, %v12399_v8  ;;  %v361_v60 = vrot.slane %v200_v38, 2 }
  0xb3   :  { %v282_v44 = vrot.slane %v201_v40, 1  ;;  %v211_v45 = vrot.slane %v209_v43, 1  ;;  %v214_v46 = vshll.u32 %v201_v40, 16  ;;  %v218_v47 = vshrl.u32 %v201_v40, 16 }
  0xb4   :  { %v319_v48 = vrot.slane %v207_v42, 1  ;;  %v320_v49 = vrot.slane %v209_v43, 2  ;;  %v362_v61 = vrot.slane %v201_v40, 2 }
  0xb5   :  { %v283_v50 = vsel %vm12396_vm11, %v281_v41, %v282_v44  ;;  %v212_v51 = vor.u32 %v211_v45, %v207_v42  ;;  %v216_v52 = vrot.slane %v214_v46, 1  ;;  %v322_v53 = vrot.slane %v218_v47, 1 }
  0xb6   :  { %7492 = vmatmul.msk.bf16.vlgmr.msra.gmra.mxu3 %vm12393_vm7, %v283_v50  ;;  %v321_v54 = vor.u32 %v320_v49, %v319_v48  ;;  %v323_v55 = vrot.slane %v214_v46, 2  ;;  %v363_v62 = vsel %vm12467_vm14, %v361_v60, %v362_v61 }
  0xb7   :  { %v217_v56 = vsel %vm12395_vm12, %v212_v51, %v216_v52  ;;  %v220_v59 = vor.u32 %v218_v47, %v216_v52 }
  0xb8   :  { %7487 = vmatmul.msk.bf16.vlgmr.msrb.gmra.mxu1 %vm12393_vm7, %v217_v56  ;;  %v324_v57 = vor.u32 %v323_v55, %v322_v53 }
  0xba   :  { %v325_v58 = vsel %vm12394_vm13, %v321_v54, %v324_v57 }
  0xbb   :  { %7495 = vmatmul.msk.bf16.vlgmr.msrb.gmra.mxu0 %vm12393_vm7, %v325_v58 }
  0xc1   :  { %7490 = vmatmul.msk.bf16.gmra.mxu2 %vm12393_vm7, %v201_v40 }
  0xc6   :  { %7493 = vmatmul.msk.bf16.gmra.mxu3 %vm12393_vm7, %v282_v44 }
  0xc8   :  { %7488 = vmatmul.msk.bf16.gmra.mxu1 %vm12393_vm7, %v220_v59 }
  0xcb   :  { %7496 = vmatmul.msk.bf16.gmra.mxu0 %vm12393_vm7, %v324_v57 }
  0xd8   :  { %7498 = vmatmul.msk.bf16.vlgmr.msra.gmra.mxu1 %vm12393_vm7, %v363_v62 }
  0xe8   :  { %7499 = vmatmul.msk.bf16.gmra.mxu1 %vm12393_vm7, %v362_v61 }
 0x134   :  { %v266_v1 = vpop.f32.mrf.mxu2 }
 0x135   :  { %v240_v63 = vpop.f32.mrf.mxu1 }
 0x136   :  { %v267_v20 = vadd.f32 %v266_v1, %v240_v63 }
 0x138   :  { %v344_v4 = vpop.f32.mrf.mxu0 }
 0x139   :  { %v302_v3 = vpop.f32.mrf.mxu3 }
 0x13a   :  { %v312_v26 = vadd.f32 %v302_v3, %v267_v20 }
 0x13c   :  { %v268_v5 = vpop.f32.mrf.mxu2  ;;  %v354_v32 = vadd.f32 %v344_v4, %v312_v26 }
 0x13d   :  { %v242_v0 = vpop.f32.mrf.mxu1 }
 0x13e   :  { %v269_v17 = vadd.f32 %v268_v5, %v242_v0 }
 0x140   :  { %v346_v13 = vpop.f32.mrf.mxu0 }
 0x141   :  { %v304_v7 = vpop.f32.mrf.mxu3 }
 0x142   :  { %v313_v24 = vadd.f32 %v304_v7, %v269_v17 }
 0x144   :  { %v271_v14 = vpop.f32.mrf.mxu2  ;;  %v355_v30 = vadd.f32 %v346_v13, %v313_v24 }
 0x145   :  { %v245_v2 = vpop.f32.mrf.mxu1 }
 0x146   :  { %v272_v21 = vadd.f32 %v271_v14, %v245_v2 }
 0x148   :  { %v349_v28 = vpop.f32.mrf.mxu0 }
 0x149   :  { %v307_v19 = vpop.f32.mrf.mxu3 }
 0x14a   :  { %v314_v27 = vadd.f32 %v307_v19, %v272_v21 }
 0x14c   :  { %v273_v29 = vpop.f32.mrf.mxu2  ;;  %v356_v34 = vadd.f32 %v349_v28, %v314_v27 }
 0x14d   :  { %v247_v6 = vpop.f32.mrf.mxu1 }
 0x14e   :  { %v274_v31 = vadd.f32 %v273_v29, %v247_v6 }
 0x150   :  { %v351_v44 = vpop.f32.mrf.mxu0 }
 0x151   :  { %v309_v35 = vpop.f32.mrf.mxu3 }
 0x152   :  { %v315_v39 = vadd.f32 %v309_v35, %v274_v31 }
 0x154   :  { %v357_v48 = vadd.f32 %v351_v44, %v315_v39 }
 0x155   :  { %v382_v11 = vpop.f32.mrf.mxu1 }
 0x156   :  { %v10416_v37 = vadd.f32 %v382_v11, %v354_v32 }
 0x158   :  { %v442_v41 = vmul.f32 %v10416_v37, %v10416_v37  ;;  %v405_v45 = vsel %vm12463_vm15, %v10416_v37, 0.0 }
 0x15a   :  { %v446_v51 = vsel %vm12463_vm15, %v442_v41, 0.0 }
 0x15d   :  { %v384_v23 = vpop.f32.mrf.mxu1 }
 0x15e   :  { %v10414_v33 = vadd.f32 %v384_v23, %v355_v30 }
 0x160   :  { %v443_v40 = vmul.f32 %v10414_v33, %v10414_v33  ;;  %v406_v42 = vsel %vm12463_vm15, %v10414_v33, 0.0 }
 0x161   :  { %v407_v49 = vadd.f32 %v406_v42, %v405_v45 }
 0x162   :  { %v447_v46 = vsel %vm12463_vm15, %v443_v40, 0.0 }
 0x163   :  { %v448_v54 = vadd.f32 %v447_v46, %v446_v51  ;;  %v515_v51 = vld [vmem:[%s12391_s14 + $0x18] sm:$0xf] }
 0x165   :  { %v387_v36 = vpop.f32.mrf.mxu1 }
 0x166   :  { %v10418_v38 = vadd.f32 %v387_v36, %v356_v34 }
 0x168   :  { %v444_v43 = vmul.f32 %v10418_v38, %v10418_v38  ;;  %v408_v47 = vsel %vm12463_vm15, %v10418_v38, 0.0 }
 0x169   :  { %v409_v55 = vadd.f32 %v408_v47, %v407_v49  ;;  %v513_v49 = vld [vmem:[%s12391_s14 + $0x8] sm:$0xff] }
 0x16a   :  { %v449_v52 = vsel %vm12463_vm15, %v444_v43, 0.0 }
 0x16b   :  { %v450_v58 = vadd.f32 %v449_v52, %v448_v54  ;;  %v562_v52 = vlaneseq }
 0x16d   :  { %v389_v50 = vpop.f32.mrf.mxu1 }
 0x16e   :  { %v395_v53 = vadd.f32 %v389_v50, %v357_v48  ;;  %v514_v50 = vld [vmem:[%s12391_s14 + $0x10] sm:$0xff] }
 0x170   :  { %v411_v56 = vsel %vm12398_vm1, %v395_v53, 0.0  ;;  %v445_v57 = vmul.f32 %v395_v53, %v395_v53 }
 0x171   :  { %v412_v59 = vadd.f32 %v411_v56, %v409_v55 }
 0x172   :  { %v451_v60 = vsel %vm12398_vm1, %v445_v57, 0.0  ;;  %vm1684_vm1 = vcmask 97280  }
 0x173   :  { %v413_v61 = vrot.slane %v412_v59, 4  ;;  %v452_v62 = vadd.f32 %v451_v60, %v450_v58  ;;  %v9575_v60 = vld [vmem:[#allocation3 + $0x18] sm:$0xff] }
 0x174   :  { %792 = vmatpush.bf16.msra.mxu0 %v9575_v60 }
 0x175   :  { %v414_v63 = vadd.f32 %v413_v61, %v412_v59  ;;  %v453_v0 = vrot.slane %v452_v62, 4  ;;  %v9583_v61 = vld [vmem:[#allocation3 + $0x58] sm:$0xff] }
 0x176   :  { %844 = vmatpush.bf16.msrb.mxu1 %v9583_v61 }
 0x177   :  { %v415_v1 = vrot.slane %v414_v63, 2  ;;  %v454_v2 = vadd.f32 %v453_v0, %v452_v62 }
 0x179   :  { %v416_v3 = vadd.f32 %v415_v1, %v414_v63  ;;  %v455_v4 = vrot.slane %v454_v2, 2  ;;  %v9574_v1 = vld [vmem:[#allocation3 + $0x10] sm:$0xff] }
 0x17a   :  { %793 = vmatpush.bf16.msra.mxu0 %v9574_v1 }
 0x17b   :  { %v417_v5 = vrot.slane %v416_v3, 1  ;;  %v456_v6 = vadd.f32 %v455_v4, %v454_v2  ;;  %v9579_v2 = vld [vmem:[#allocation3 + $0x38] sm:$0xff] }
 0x17c   :  { %752 = vmatpush.bf16.msra.mxu3 %v9579_v2 }
 0x17d   :  { %v418_v7 = vadd.f32 %v417_v5, %v416_v3  ;;  %v457_v11 = vrot.slane %v456_v6, 1  ;;  %v9582_v3 = vld [vmem:[#allocation3 + $0x50] sm:$0xff] }
 0x17e   :  { %845 = vmatpush.bf16.msrb.mxu1 %v9582_v3 }
 0x17f   :  { %7500 = vmatmul.msk.f32.vlgmr.msrb.gmra.mxu2 %vm12463_vm15, %v418_v7  ;;  %v458_v13 = vadd.f32 %v457_v11, %v456_v6 }
 0x181   :  { %7501 = vmatmul.msk.f32.vlgmr.msrb.gmra.mxu3 %vm12463_vm15, %v458_v13 }
 0x202   :  { %v439_v14 = vpop.f32.mrf.mxu2 }
 0x203   :  { %v482_v17 = vmul.f32 0.017857144, %v439_v14  ;;  %v9573_v14 = vld [vmem:[#allocation3 + $0x8] sm:$0xff] }
 0x204   :  { %v479_v19 = vpop.f32.mrf.mxu3  ;;  %794 = vmatpush.bf16.msra.mxu0 %v9573_v14 }
 0x205   :  { %v484_v20 = vmul.f32 %v482_v17, %v482_v17  ;;  %v483_v21 = vmul.f32 0.017857144, %v479_v19  ;;  %v487_v32 = vperm.slane %v482_v17, 0  ;;  %v9578_v19 = vld [vmem:[#allocation3 + $0x30] sm:$0xff] }
 0x206   :  { %753 = vmatpush.bf16.msra.mxu3 %v9578_v19 }
 0x207   :  { %v485_v23 = vsub.f32 %v483_v21, %v484_v20  ;;  %v490_v36 = vsub.f32 %v10418_v38, %v487_v32  ;;  %v491_v39 = vsub.f32 %v395_v53, %v487_v32  ;;  %v489_v41 = vsub.f32 %v10414_v33, %v487_v32  ;;  %v512_v33 = vld [vmem:[%s12391_s14] sm:$0xff]  ;;  %v9581_v20 = vld [vmem:[#allocation3 + $0x48] sm:$0xff] }
 0x208   :  { %v488_v44 = vsub.f32 %v10416_v37, %v487_v32  ;;  %v10475_v53 = vshrl.u32 %v562_v52, 7  ;;  %846 = vmatpush.bf16.msrb.mxu1 %v9581_v20 }
 0x209   :  { %v486_v24 = vmax.f32 %v485_v23, 0.0 }
 0x20a   :  { %12468 = vst [vmem:[#allocation14_spill] sm:$0xff] %v10475_v53  ;;  %v10478_v54 = vadd.s32 8, %v10475_v53  ;;  %v565_v56 = vmul.u32 2, %v10475_v53  ;;  %v11248_v53 = vld [vmem:[#allocation10 + $0x1a0] sm:$0xff] }
 0x20b   :  { %v492_v26 = vadd.f32 1e-05, %v486_v24  ;;  %12494 = vst [vmem:[#allocation40_spill] sm:$0xff] %v11248_v53 }
 0x20c   :  { %12469 = vst [vmem:[#allocation15_spill] sm:$0xff] %v10478_v54  ;;  %v566_v55 = vmul.u32 2, %v10478_v54  ;;  %v10484_v59 = vcvt.s32.f32 %v565_v56  ;;  %v11242_v54 = vld [vmem:[#allocation10 + $0x1b8] sm:$0xff] }
 0x20d   :  { %10014 = vrsqrt.f32 %v492_v26  ;;  %vm499_vm3 = vweird.f32 %v492_v26  ;;  %12492 = vst [vmem:[#allocation38_spill] sm:$0xff] %v11242_v54 }
 0x20e   :  { %v10482_v58 = vcvt.s32.f32 %v566_v55  ;;  %12470 = vst [vmem:[#allocation16_spill] sm:$0xff] %v10484_v59  ;;  %v10492_v0 = vadd.f32 1.0, %v10484_v59  ;;  %v10500_v11 = vrot.slane %v10484_v59, 2  ;;  %v10505_v17 = vadd.f32 2.0, %v10484_v59 }
 0x20f   :  { %v10518_v32 = vadd.f32 3.0, %v10484_v59  ;;  %v11260_v59 = vld [vmem:[#allocation10 + $0x198] sm:$0xff] }
 0x210   :  { %v10487_v62 = vadd.f32 1.0, %v10482_v58  ;;  %12471 = vst [vmem:[#allocation17_spill] sm:$0xff] %v10492_v0  ;;  %v597_v6 = vrot.slane %v10482_v58, 2  ;;  %v10497_v7 = vrot.slane %v10492_v0, 2 }
 0x211   :  { %12472 = vst [vmem:[#allocation18_spill] sm:$0xff] %v10505_v17 }
 0x212   :  { %v589_v5 = vrot.slane %v10487_v62, 2  ;;  %v598_v23 = vsel %vm12467_vm14, %v10500_v11, %v597_v6  ;;  %12473 = vst [vmem:[#allocation19_spill] sm:$0xff] %v10518_v32 }
 0x213   :  { %v10015_v27 = vpop.eup %10014  ;;  %12497 = vst [vmem:[#allocation43_spill] sm:$0xff] %v11260_v59 }
 0x214   :  { %v494_v28 = vmul.f32 %v10015_v27, %v492_v26  ;;  %vm500_vm2 = vweird.f32 %v10015_v27  ;;  %v590_v21 = vsel %vm12467_vm14, %v10497_v7, %v589_v5 }
 0x215   :  { %vm501_vm5 = vmor %vm499_vm3, %vm500_vm2  ;;  %vm610_vm3 = vcmask 1042432  }
 0x216   :  { %v495_v29 = vmul.f32 %v10015_v27, %v494_v28 }
 0x218   :  { %v496_v30 = vmul.f32 0.5, %v495_v29  ;;  %v9572_v29 = vld [vmem:[#allocation3] sm:$0xff] }
 0x219   :  { %795 = vmatpush.bf16.msra.mxu0 %v9572_v29 }
 0x21a   :  { %v497_v31 = vsub.f32 1.5, %v496_v30  ;;  %v9577_v30 = vld [vmem:[#allocation3 + $0x28] sm:$0xff] }
 0x21b   :  { %754 = vmatpush.bf16.msra.mxu3 %v9577_v30 }
 0x21c   :  { %v498_v34 = vmul.f32 %v10015_v27, %v497_v31  ;;  %v9580_v31 = vld [vmem:[#allocation3 + $0x40] sm:$0xff] }
 0x21d   :  { %847 = vmatpush.bf16.msrb.mxu1 %v9580_v31 }
 0x21e   :  { %v502_v35 = vsel %vm501_vm5, %v10015_v27, %v498_v34 }
 0x21f   :  { %v503_v40 = vperm.slane %v502_v35, 0 }
 0x221   :  { %v507_v42 = vmul.f32 %v503_v40, %v491_v39  ;;  %v506_v43 = vmul.f32 %v503_v40, %v490_v36  ;;  %v505_v45 = vmul.f32 %v503_v40, %v489_v41  ;;  %v504_v46 = vmul.f32 %v503_v40, %v488_v44 }
 0x222   :  { %v10523_v36 = vrot.slane %v10505_v17, 7  ;;  %v11258_v17 = vld [vmem:[#allocation10 + $0x190] sm:$0xff] }
 0x223   :  { %10016 = vtanh.f32 %v507_v42  ;;  %12496 = vst [vmem:[#allocation42_spill] sm:$0xff] %v11258_v17 }
 0x224   :  { %10018 = vtanh.f32 %v506_v43  ;;  %v606_v43 = vadd.f32 2.0, %v10482_v58 }
 0x225   :  { %10020 = vtanh.f32 %v505_v45 }
 0x226   :  { %10022 = vtanh.f32 %v504_v46  ;;  %v9576_v46 = vld [vmem:[#allocation3 + $0x20] sm:$0xff] }
 0x227   :  { %755 = vmatpush.bf16.msra.mxu3 %v9576_v46 }
 0x229   :  { %v10017_v47 = vpop.eup %10016 }
 0x22a   :  { %7502 = vmatpush.msk.msra.mxu2 %vm529_vm8, %v10017_v47  ;;  %v10019_v48 = vpop.eup %10018  ;;  %v10529_v47 = vrot.slane %v10518_v32, 1  ;;  %v11250_v32 = vld [vmem:[#allocation10 + $0x1a8] sm:$0xff] }
 0x22b   :  { %v10021_v38 = vpop.eup %10020  ;;  %885 = vmatpush.msrb.mxu3 %v10382_v9  ;;  %12495 = vst [vmem:[#allocation41_spill] sm:$0xff] %v11250_v32 }
 0x22c   :  { %546 = vmatpush.msra.mxu2 %v10019_v48  ;;  %v10023_v37 = vpop.eup %10022 }
 0x22d   :  { %886 = vmatpush.msrb.mxu3 %v10386_v10 }
 0x22e   :  { %547 = vmatpush.msra.mxu2 %v10021_v38 }
 0x22f   :  { %887 = vmatpush.msrb.mxu3 %v10390_v12 }
 0x230   :  { %548 = vmatpush.msra.mxu2 %v10023_v37 }
 0x231   :  { %7503 = vmatmul.msk.f32.vlgmr.msra.gmra.mxu2 %vm516_vm9, %v512_v33  ;;  %888 = vmatpush.msrb.mxu3 %v10393_v15 }
 0x232   :  { %919 = vmatpush.msrb.mxu2 %v10382_v9 }
 0x233   :  { %889 = vmatpush.msrb.mxu3 %v10396_v16 }
 0x234   :  { %920 = vmatpush.msrb.mxu2 %v10386_v10 }
 0x235   :  { %890 = vmatpush.msrb.mxu3 %v10400_v18 }
 0x236   :  { %921 = vmatpush.msrb.mxu2 %v10390_v12 }
 0x237   :  { %891 = vmatpush.msrb.mxu3 %v10404_v22 }
 0x238   :  { %922 = vmatpush.msrb.mxu2 %v10393_v15 }
 0x239   :  { %7504 = vmatmul.msk.f32.gmra.mxu2 %vm516_vm9, %v513_v49  ;;  %892 = vmatpush.msrb.mxu3 %v10408_v25 }
 0x23a   :  { %923 = vmatpush.msrb.mxu2 %v10396_v16 }
 0x23c   :  { %924 = vmatpush.msrb.mxu2 %v10400_v18 }
 0x23e   :  { %925 = vmatpush.msrb.mxu2 %v10404_v22 }
 0x240   :  { %926 = vmatpush.msrb.mxu2 %v10408_v25 }
 0x241   :  { %7505 = vmatmul.msk.f32.gmra.mxu2 %vm516_vm9, %v514_v50  ;;  %v625_v50 = vrot.slane %v606_v43, 7 }
 0x242   :  { %1156 = vmatpush.msra.mxu2 %v10382_v9 }
 0x243   :  { %v626_v61 = vsel %vm12465_vm4, %v10523_v36, %v625_v50 }
 0x244   :  { %1157 = vmatpush.msra.mxu2 %v10386_v10 }
 0x246   :  { %1158 = vmatpush.msra.mxu2 %v10390_v12 }
 0x248   :  { %1159 = vmatpush.msra.mxu2 %v10393_v15 }
 0x249   :  { %7506 = vmatmul.msk.f32.gmra.mxu2 %vm516_vm9, %v515_v51  ;;  %v642_v51 = vadd.f32 3.0, %v10482_v58 }
 0x24a   :  { %1160 = vmatpush.msra.mxu2 %v10396_v16 }
 0x24b   :  { %v661_v62 = vrot.slane %v642_v51, 1 }
 0x24c   :  { %1161 = vmatpush.msra.mxu2 %v10400_v18 }
 0x24e   :  { %1162 = vmatpush.msra.mxu2 %v10404_v22 }
 0x250   :  { %1163 = vmatpush.msra.mxu2 %v10408_v25 }
 0x2b4   :  { %v550_v57 = vpop.f32.mrf.mxu2 }
 0x2b5   :  { %v574_v4 = vrot.slane %v550_v57, 2 }
 0x2bc   :  { %v10489_v63 = vpop.f32.mrf.mxu2 }
 0x2bd   :  { %v575_v13 = vrot.slane %v10489_v63, 2  ;;  %vm580_vm10 = vcmp.gt.f32.partialorder %v10489_v63, %v574_v4 }
 0x2be   :  { %v583_v24 = vsel %vm580_vm10, %v10489_v63, %v574_v4  ;;  %v602_v26 = vsel %vm580_vm10, %v10497_v7, %v10500_v11 }
 0x2bf   :  { %v576_v28 = vsel %vm12467_vm14, %v574_v4, %v575_v13  ;;  %v611_v39 = vrot.slane %v583_v24, 5  ;;  %v632_v40 = vrot.slane %v602_v26, 5 }
 0x2c4   :  { %v10514_v27 = vpop.f32.mrf.mxu2 }
 0x2c5   :  { %vm581_vm2 = vcmp.gt.f32.partialorder %v10514_v27, %v576_v28 }
 0x2c6   :  { %v584_v34 = vsel %vm581_vm2, %v10514_v27, %v576_v28  ;;  %v603_v35 = vsel %vm581_vm2, %v590_v21, %v598_v23 }
 0x2c7   :  { %v612_v41 = vrot.slane %v584_v34, 5  ;;  %v633_v42 = vrot.slane %v603_v35, 5 }
 0x2c9   :  { %v613_v44 = vsel %vm610_vm3, %v611_v39, %v612_v41  ;;  %v634_v45 = vsel %vm610_vm3, %v632_v40, %v633_v42 }
 0x2ca   :  { %vm618_vm5 = vcmp.gt.f32.partialorder %v550_v57, %v613_v44 }
 0x2cb   :  { %v620_v48 = vsel %vm618_vm5, %v550_v57, %v613_v44  ;;  %v639_v38 = vsel %vm618_vm5, %v10523_v36, %v634_v45 }
 0x2cc   :  { %v645_v33 = vrot.slane %v620_v48, 2  ;;  %v668_v37 = vrot.slane %v639_v38, 2  ;;  %v559_v49 = vpop.f32.mrf.mxu2 }
 0x2cd   :  { %vm582_vm9 = vcmp.gt.f32.partialorder %v559_v49, %v575_v13 }
 0x2ce   :  { %vm651_vm10 = vcmp.gt.f32.partialorder %v10489_v63, %v645_v33  ;;  %v585_v52 = vsel %vm582_vm9, %v559_v49, %v575_v13  ;;  %v604_v55 = vsel %vm582_vm9, %v589_v5, %v597_v6  ;;  %v662_v13 = vsel %vm12396_vm11, %v10529_v47, %v661_v62 }
 0x2cf   :  { %v614_v56 = vrot.slane %v585_v52, 5  ;;  %v635_v60 = vrot.slane %v604_v55, 5  ;;  %v674_v57 = vsel %vm651_vm10, %v10529_v47, %v668_v37  ;;  %v654_v4 = vsel %vm651_vm10, %v10489_v63, %v645_v33 }
 0x2d0   :  { %vm12466_vm9 = vcmask 523265   ;;  %v683_v20 = vrot.slane %v654_v4, 6  ;;  %v1224_v30 = vrot.slane %v654_v4, 7  ;;  %vm12464_vm10 = vcmask 521216  }
 0x2d1   :  { %v615_v58 = vsel %vm610_vm3, %v612_v41, %v614_v56  ;;  %v636_v1 = vsel %vm610_vm3, %v633_v42, %v635_v60  ;;  %v6872_v39 = vrot.slane %v674_v57, 7 }
 0x2d2   :  { %vm619_vm2 = vcmp.gt.f32.partialorder %v10489_v63, %v615_v58 }
 0x2d3   :  { %v621_v2 = vsel %vm619_vm2, %v10489_v63, %v615_v58  ;;  %v640_v3 = vsel %vm619_vm2, %v626_v61, %v636_v1 }
 0x2d4   :  { %v646_v5 = vrot.slane %v621_v2, 2  ;;  %v669_v6 = vrot.slane %v640_v3, 2 }
 0x2d6   :  { %v647_v14 = vsel %vm12467_vm14, %v645_v33, %v646_v5  ;;  %vm653_vm5 = vcmp.gt.f32.partialorder %v559_v49, %v646_v5  ;;  %v670_v19 = vsel %vm12467_vm14, %v668_v37, %v669_v6 }
 0x2d7   :  { %vm652_vm2 = vcmp.gt.f32.partialorder %v10514_v27, %v647_v14  ;;  %v656_v21 = vsel %vm653_vm5, %v559_v49, %v646_v5  ;;  %v676_v23 = vsel %vm653_vm5, %v661_v62, %v669_v6  ;;  %vm12461_vm5 = vcmask 520192  }
 0x2d8   :  { %v655_v63 = vsel %vm652_vm2, %v10514_v27, %v647_v14  ;;  %v686_v24 = vrot.slane %v656_v21, 6  ;;  %v1227_v26 = vrot.slane %v656_v21, 7  ;;  %v6875_v28 = vrot.slane %v676_v23, 7 }
 0x2d9   :  { %v684_v29 = vrot.slane %v655_v63, 6  ;;  %v1225_v31 = vrot.slane %v655_v63, 7  ;;  %v675_v34 = vsel %vm652_vm2, %v662_v13, %v670_v19 }
 0x2da   :  { %v6873_v35 = vrot.slane %v675_v34, 7 }
 0x2db   :  { %v685_v40 = vsel %vm12459_vm0, %v683_v20, %v684_v29  ;;  %v687_v41 = vsel %vm12459_vm0, %v684_v29, %v686_v24  ;;  %v10563_v27 = vsel %vm12465_vm4, %v1224_v30, %v1225_v31  ;;  %v10566_v42 = vsel %vm12465_vm4, %v1225_v31, %v1227_v26 }
 0x2dc   :  { %691 = vst.msk [vmem:[#allocation2] sm:$0xfe] %vm12466_vm9, %v685_v40  ;;  %v10570_v43 = vsel %vm12465_vm4, %v6873_v35, %v6875_v28  ;;  %v10573_v44 = vsel %vm12465_vm4, %v6872_v39, %v6873_v35 }
 0x2dd   :  { %12474 = vst [vmem:[#allocation20_spill] sm:$0xff] %v10570_v43  ;;  %v11240_v43 = vld [vmem:[#allocation10 + $0x280] sm:$0xff] }
 0x2de   :  { %12475 = vst [vmem:[#allocation21_spill] sm:$0xff] %v10573_v44  ;;  %v11238_v44 = vld [vmem:[#allocation10 + $0x1b0] sm:$0xff] }
 0x2df   :  { %693 = vst.msk [vmem:[#allocation2 + $0x10] sm:$0x3f] %vm12464_vm10, %v687_v41  ;;  %v9587_v41 = vld [vmem:[#allocation5 + $0x18] sm:$0xff] }
 0x2e0   :  { %1064 = vmatpush.bf16.msra.mxu1 %v9587_v41  ;;  %12491 = vst [vmem:[#allocation37_spill] sm:$0xff] %v11240_v43 }
 0x2e3   :  { %v694_v45 = vld [vmem:[#allocation2] sm:$0xff] }
 0x2e4   :  { %955 = vst.msk [vmem:[#allocation2] sm:$0x1] %vm677_vm6, %v12399_v8 }
 0x2e6   :  { %v695_v46 = vld [vmem:[#allocation2 + $0x10] sm:$0x7f] }
 0x2e7   :  { %v696_v48 = vpack.c.bf16 %v695_v46, %v694_v45  ;;  %956 = vst.msk [vmem:[#allocation2 + $0x16] sm:$0x1] %vm677_vm6, %v12399_v8 }
 0x2e9   :  { %7540 = vmatmul.msk.bf16.vlgmr.msra.gmra.mxu0 %vm12463_vm15, %v696_v48  ;;  %v812_v38 = vrot.slane %v696_v48, 1  ;;  %v717_v33 = vshll.u32 %v696_v48, 16  ;;  %v715_v37 = vshrl.u32 %v696_v48, 16 }
 0x2eb   :  { %7557 = vmatmul.msk.bf16.vlgmr.msrb.gmra.mxu1 %vm12463_vm15, %v812_v38  ;;  %v719_v49 = vrot.slane %v717_v33, 1  ;;  %v9595_v38 = vld [vmem:[#allocation5 + $0x58] sm:$0xff] }
 0x2ed   :  { %v720_v50 = vor.u32 %v719_v49, %v715_v37  ;;  %v9586_v37 = vld [vmem:[#allocation5 + $0x10] sm:$0xff] }
 0x2ee   :  { %1065 = vmatpush.bf16.msra.mxu1 %v9586_v37 }
 0x2ef   :  { %7523 = vmatmul.msk.bf16.vlgmr.msra.gmra.mxu3 %vm12463_vm15, %v720_v50  ;;  %v9591_v50 = vld [vmem:[#allocation5 + $0x38] sm:$0xff] }
 0x2f0   :  { %1116 = vmatpush.bf16.msra.mxu3 %v9595_v38  ;;  %1024 = vmatpush.bf16.msrb.mxu0 %v9591_v50 }
 0x366   :  { %v797_v51 = vpop.f32.mrf.mxu0 }
 0x368   :  { %v849_v52 = vpop.f32.mrf.mxu1 }
 0x36e   :  { %v799_v57 = vpop.f32.mrf.mxu0 }
 0x370   :  { %v851_v58 = vpop.f32.mrf.mxu1 }
 0x372   :  { %v757_v55 = vpop.f32.mrf.mxu3 }
 0x373   :  { %v798_v56 = vadd.f32 %v797_v51, %v757_v55  ;;  %v9594_v51 = vld [vmem:[#allocation5 + $0x50] sm:$0xff]  ;;  %v9585_v55 = vld [vmem:[#allocation5 + $0x8] sm:$0xff] }
 0x374   :  { %1117 = vmatpush.bf16.msra.mxu3 %v9594_v51  ;;  %1066 = vmatpush.bf16.msra.mxu1 %v9585_v55 }
 0x375   :  { %v10583_v60 = vadd.f32 %v849_v52, %v798_v56  ;;  %v9590_v56 = vld [vmem:[#allocation5 + $0x30] sm:$0xff] }
 0x376   :  { %1025 = vmatpush.bf16.msrb.mxu0 %v9590_v56 }
 0x377   :  { %v897_v1 = vmul.f32 %v10583_v60, %v10583_v60  ;;  %v864_v3 = vsel %vm12463_vm15, %v10583_v60, 0.0 }
 0x379   :  { %v899_v13 = vsel %vm12463_vm15, %v897_v1, 0.0 }
 0x37a   :  { %v759_v61 = vpop.f32.mrf.mxu3 }
 0x37b   :  { %v800_v62 = vadd.f32 %v799_v57, %v759_v61  ;;  %v9593_v57 = vld [vmem:[#allocation5 + $0x48] sm:$0xff]  ;;  %v9584_v61 = vld [vmem:[#allocation5] sm:$0xff] }
 0x37c   :  { %1118 = vmatpush.bf16.msra.mxu3 %v9593_v57  ;;  %1067 = vmatpush.bf16.msra.mxu1 %v9584_v61 }
 0x37d   :  { %v10587_v2 = vadd.f32 %v851_v58, %v800_v62  ;;  %v9589_v62 = vld [vmem:[#allocation5 + $0x28] sm:$0xff]  ;;  %v9592_v58 = vld [vmem:[#allocation5 + $0x40] sm:$0xff] }
 0x37e   :  { %1026 = vmatpush.bf16.msrb.mxu0 %v9589_v62 }
 0x37f   :  { %v866_v4 = vsel %vm12461_vm5, %v10587_v2, 0.0  ;;  %v898_v5 = vmul.f32 %v10587_v2, %v10587_v2 }
 0x380   :  { %v867_v6 = vadd.f32 %v866_v4, %v864_v3  ;;  %1119 = vmatpush.bf16.msra.mxu3 %v9592_v58  ;;  %v9588_v4 = vld [vmem:[#allocation5 + $0x20] sm:$0xff] }
 0x381   :  { %v900_v14 = vsel %vm12461_vm5, %v898_v5, 0.0 }
 0x382   :  { %v868_v19 = vrot.slane %v867_v6, 4  ;;  %v901_v20 = vadd.f32 %v900_v14, %v899_v13  ;;  %1027 = vmatpush.bf16.msrb.mxu0 %v9588_v4 }
 0x384   :  { %v869_v21 = vadd.f32 %v868_v19, %v867_v6  ;;  %v902_v23 = vrot.slane %v901_v20, 4 }
 0x386   :  { %v870_v63 = vrot.slane %v869_v21, 2  ;;  %v903_v24 = vadd.f32 %v902_v23, %v901_v20  ;;  %1190 = vmatpush.msra.mxu0 %v10382_v9 }
 0x388   :  { %v871_v26 = vadd.f32 %v870_v63, %v869_v21  ;;  %v904_v28 = vrot.slane %v903_v24, 2  ;;  %1191 = vmatpush.msra.mxu0 %v10386_v10 }
 0x38a   :  { %v872_v29 = vrot.slane %v871_v26, 1  ;;  %v905_v30 = vadd.f32 %v904_v28, %v903_v24  ;;  %1192 = vmatpush.msra.mxu0 %v10390_v12 }
 0x38c   :  { %v873_v31 = vadd.f32 %v872_v29, %v871_v26  ;;  %v906_v34 = vrot.slane %v905_v30, 1  ;;  %1193 = vmatpush.msra.mxu0 %v10393_v15 }
 0x38e   :  { %7558 = vmatmul.msk.f32.vlgmr.msrb.gmra.mxu3 %vm12463_vm15, %v873_v31  ;;  %v907_v35 = vadd.f32 %v906_v34, %v905_v30  ;;  %1194 = vmatpush.msra.mxu0 %v10396_v16 }
 0x390   :  { %7559 = vmatmul.msk.f32.vlgmr.msrb.gmra.mxu2 %vm12463_vm15, %v907_v35  ;;  %1195 = vmatpush.msra.mxu0 %v10400_v18 }
 0x392   :  { %1196 = vmatpush.msra.mxu0 %v10404_v22 }
 0x394   :  { %1197 = vmatpush.msra.mxu0 %v10408_v25 }
 0x411   :  { %v894_v39 = vpop.f32.mrf.mxu3 }
 0x412   :  { %v931_v40 = vmul.f32 0.03846154, %v894_v39 }
 0x413   :  { %v928_v45 = vpop.f32.mrf.mxu2 }
 0x414   :  { %v933_v46 = vmul.f32 %v931_v40, %v931_v40  ;;  %v932_v48 = vmul.f32 0.03846154, %v928_v45  ;;  %v936_v14 = vperm.slane %v931_v40, 0 }
 0x416   :  { %v934_v33 = vsub.f32 %v932_v48, %v933_v46  ;;  %v937_v21 = vsub.f32 %v10583_v60, %v936_v14  ;;  %v938_v23 = vsub.f32 %v10587_v2, %v936_v14 }
 0x418   :  { %v935_v49 = vmax.f32 %v934_v33, 0.0 }
 0x41a   :  { %v939_v52 = vadd.f32 1e-05, %v935_v49 }
 0x41c   :  { %10024 = vrsqrt.f32 %v939_v52  ;;  %vm946_vm7 = vweird.f32 %v939_v52 }
 0x422   :  { %v10025_v1 = vpop.eup %10024 }
 0x423   :  { %v941_v3 = vmul.f32 %v10025_v1, %v939_v52  ;;  %vm947_vm2 = vweird.f32 %v10025_v1 }
 0x424   :  { %vm948_vm13 = vmor %vm946_vm7, %vm947_vm2  ;;  %vm12460_vm7 = vcmask 517120  }
 0x425   :  { %v942_v5 = vmul.f32 %v10025_v1, %v941_v3 }
 0x427   :  { %v943_v6 = vmul.f32 0.5, %v942_v5 }
 0x429   :  { %v944_v13 = vsub.f32 1.5, %v943_v6 }
 0x42b   :  { %v945_v19 = vmul.f32 %v10025_v1, %v944_v13 }
 0x42d   :  { %v949_v20 = vsel %vm948_vm13, %v10025_v1, %v945_v19 }
 0x42e   :  { %v950_v63 = vperm.slane %v949_v20, 0 }
 0x430   :  { %v951_v9 = vmul.f32 %v950_v63, %v937_v21  ;;  %v952_v24 = vmul.f32 %v950_v63, %v938_v23 }
 0x432   :  { %v953_v10 = vmax.f32 %v951_v9, 0.0  ;;  %v954_v26 = vmax.f32 %v952_v24, 0.0  ;;  %v9599_v24 = vld [vmem:[%s12383_s6 + $0x18] sm:$0xff] }
 0x433   :  { %1350 = vmatpush.bf16.msrb.mxu3 %v9599_v24 }
 0x434   :  { %v959_v12 = vrot.slane %v953_v10, 7  ;;  %v960_v28 = vrot.slane %v954_v26, 7  ;;  %v9607_v26 = vld [vmem:[%s12383_s6 + $0x58] sm:$0xff] }
 0x435   :  { %1402 = vmatpush.bf16.msrb.mxu2 %v9607_v26 }
 0x436   :  { %v961_v15 = vsel %vm12465_vm4, %v959_v12, %v960_v28  ;;  %964 = vst.msk [vmem:[#allocation2] sm:$0xfe] %vm12466_vm9, %v959_v12  ;;  %v9598_v28 = vld [vmem:[%s12383_s6 + $0x10] sm:$0xff] }
 0x437   :  { %965 = vst.msk [vmem:[#allocation2 + $0x10] sm:$0x3f] %vm12464_vm10, %v961_v15  ;;  %1351 = vmatpush.bf16.msrb.mxu3 %v9598_v28 }
 0x43d   :  { %v966_v16 = vld [vmem:[#allocation2] sm:$0xff] }
 0x43e   :  { %1236 = vst.msk [vmem:[#allocation2] sm:$0x3] %vm12460_vm7, %v12399_v8  ;;  %v967_v18 = vld [vmem:[#allocation2 + $0x10] sm:$0x7f] }
 0x43f   :  { %v968_v60 = vpack.c.bf16 %v967_v18, %v966_v16  ;;  %v9603_v16 = vld [vmem:[%s12383_s6 + $0x38] sm:$0xff]  ;;  %v9606_v18 = vld [vmem:[%s12383_s6 + $0x50] sm:$0xff] }
 0x440   :  { %1310 = vmatpush.bf16.msrb.mxu1 %v9603_v16  ;;  %1403 = vmatpush.bf16.msrb.mxu2 %v9606_v18 }
 0x441   :  { %7593 = vmatmul.msk.bf16.vlgmr.msra.gmra.mxu1 %vm12463_vm15, %v968_v60  ;;  %v1084_v22 = vrot.slane %v968_v60, 1  ;;  %v989_v2 = vshll.u32 %v968_v60, 16  ;;  %v987_v25 = vshrl.u32 %v968_v60, 16  ;;  %v9611_v60 = vld [vmem:[%s12383_s6 + $0x78] sm:$0xff] }
 0x443   :  { %7610 = vmatmul.msk.bf16.vlgmr.msra.gmra.mxu3 %vm12463_vm15, %v1084_v22  ;;  %v991_v29 = vrot.slane %v989_v2, 1  ;;  %v9597_v22 = vld [vmem:[%s12383_s6 + $0x8] sm:$0xff]  ;;  %v9602_v2 = vld [vmem:[%s12383_s6 + $0x30] sm:$0xff] }
 0x444   :  { %1352 = vmatpush.bf16.msrb.mxu3 %v9597_v22  ;;  %1311 = vmatpush.bf16.msrb.mxu1 %v9602_v2 }
 0x445   :  { %v992_v30 = vor.u32 %v991_v29, %v987_v25  ;;  %v9605_v25 = vld [vmem:[%s12383_s6 + $0x48] sm:$0xff]  ;;  %v9610_v29 = vld [vmem:[%s12383_s6 + $0x70] sm:$0xff] }
 0x446   :  { %1404 = vmatpush.bf16.msrb.mxu2 %v9605_v25 }
 0x447   :  { %7576 = vmatmul.msk.bf16.vlgmr.msrb.gmra.mxu0 %vm12463_vm15, %v992_v30  ;;  %v9596_v30 = vld [vmem:[%s12383_s6] sm:$0xff] }
 0x448   :  { %1457 = vmatpush.bf16.msrb.mxu0 %v9611_v60  ;;  %1353 = vmatpush.bf16.msrb.mxu3 %v9596_v30 }
 0x44c   :  { %1458 = vmatpush.bf16.msrb.mxu0 %v9610_v29 }
 0x4be   :  { %v1069_v31 = vpop.f32.mrf.mxu1 }
 0x4c4   :  { %v1029_v34 = vpop.f32.mrf.mxu0 }
 0x4c5   :  { %v1070_v39 = vadd.f32 %v1069_v31, %v1029_v34  ;;  %v9601_v34 = vld [vmem:[%s12383_s6 + $0x28] sm:$0xff] }
 0x4c6   :  { %v1121_v35 = vpop.f32.mrf.mxu3  ;;  %v1071_v41 = vpop.f32.mrf.mxu1  ;;  %1312 = vmatpush.bf16.msrb.mxu1 %v9601_v34 }
 0x4c7   :  { %v10617_v40 = vadd.f32 %v1121_v35, %v1070_v39  ;;  %v9604_v35 = vld [vmem:[%s12383_s6 + $0x40] sm:$0xff]  ;;  %v9609_v39 = vld [vmem:[%s12383_s6 + $0x68] sm:$0xff] }
 0x4c8   :  { %1405 = vmatpush.bf16.msrb.mxu2 %v9604_v35  ;;  %1459 = vmatpush.bf16.msrb.mxu0 %v9609_v39  ;;  %v10728_v35 = vld [vmem:[#allocation10 + $0x170] sm:$0xff]  ;;  %v10730_v39 = vld [vmem:[#allocation10 + $0x160] sm:$0xff] }
 0x4c9   :  { %v1168_v38 = vmul.f32 %v10617_v40, %v10617_v40  ;;  %v1136_v37 = vsel %vm12463_vm15, %v10617_v40, 0.0 }
 0x4cb   :  { %v1170_v52 = vsel %vm12463_vm15, %v1168_v38, 0.0  ;;  %v9600_v38 = vld [vmem:[%s12383_s6 + $0x20] sm:$0xff] }
 0x4cc   :  { %v1031_v45 = vpop.f32.mrf.mxu0  ;;  %1313 = vmatpush.bf16.msrb.mxu1 %v9600_v38  ;;  %v10752_v38 = vld [vmem:[#allocation10 + $0x110] sm:$0xff] }
 0x4cd   :  { %v1072_v46 = vadd.f32 %v1071_v41, %v1031_v45  ;;  %v9619_v45 = vld [vmem:[%s12383_s6 + $0xb8] sm:$0xff] }
 0x4ce   :  { %v1123_v48 = vpop.f32.mrf.mxu3  ;;  %1572 = vmatpush.bf16.msra.mxu3 %v9619_v45  ;;  %v10740_v45 = vld [vmem:[#allocation10 + $0x140] sm:$0xff] }
 0x4cf   :  { %v10621_v33 = vadd.f32 %v1123_v48, %v1072_v46  ;;  %v10678_v46 = vld [vmem:[#allocation2 + $0x20] sm:$0x1] }
 0x4d0   :  { %5743 = vst [vmem:[#allocation2 + $0x20] sm:$0x3] %v12399_v8  ;;  %v1522_v16 = vpack.c.bf16 %v10678_v46, %v10678_v46  ;;  %v10743_v46 = vld [vmem:[#allocation10 + $0x130] sm:$0xff] }
 0x4d1   :  { %v1137_v49 = vsel %vm12461_vm5, %v10621_v33, 0.0  ;;  %v1169_v50 = vmul.f32 %v10621_v33, %v10621_v33 }
 0x4d2   :  { %v1138_v51 = vadd.f32 %v1137_v49, %v1136_v37  ;;  %v9608_v37 = vld [vmem:[%s12383_s6 + $0x60] sm:$0xff]  ;;  %v9618_v49 = vld [vmem:[%s12383_s6 + $0xb0] sm:$0xff]  ;;  %v1537_v25 = vshll.u32 %v1522_v16, 16 }
 0x4d3   :  { %v1171_v55 = vsel %vm12461_vm5, %v1169_v50, 0.0  ;;  %1460 = vmatpush.bf16.msrb.mxu0 %v9608_v37  ;;  %1573 = vmatpush.bf16.msra.mxu3 %v9618_v49  ;;  %v10756_v37 = vld [vmem:[#allocation10 + $0x100] sm:$0xff]  ;;  %v10760_v49 = vld [vmem:[#allocation10 + $0xf0] sm:$0xff] }
 0x4d4   :  { %v1139_v56 = vrot.slane %v1138_v51, 4  ;;  %v1172_v57 = vadd.f32 %v1171_v55, %v1170_v52  ;;  %v9615_v52 = vld [vmem:[%s12383_s6 + $0x98] sm:$0xff]  ;;  %v1539_v30 = vrot.slane %v1537_v25, 3 }
 0x4d5   :  { %1510 = vmatpush.bf16.msra.mxu1 %v9615_v52  ;;  %v10764_v52 = vld [vmem:[#allocation10 + $0xe0] sm:$0xff] }
 0x4d6   :  { %v1140_v61 = vadd.f32 %v1139_v56, %v1138_v51  ;;  %v1173_v62 = vrot.slane %v1172_v57, 4  ;;  %v9617_v56 = vld [vmem:[%s12383_s6 + $0xa8] sm:$0xff] }
 0x4d7   :  { %1574 = vmatpush.bf16.msra.mxu3 %v9617_v56  ;;  %v10772_v56 = vld [vmem:[#allocation10 + $0xc0] sm:$0xff] }
 0x4d8   :  { %v1141_v58 = vrot.slane %v1140_v61, 2  ;;  %v1174_v1 = vadd.f32 %v1173_v62, %v1172_v57 }
 0x4da   :  { %v1142_v3 = vadd.f32 %v1141_v58, %v1140_v61  ;;  %v1175_v4 = vrot.slane %v1174_v1, 2  ;;  %v9614_v61 = vld [vmem:[%s12383_s6 + $0x90] sm:$0xff] }
 0x4db   :  { %1511 = vmatpush.bf16.msra.mxu1 %v9614_v61 }
 0x4dc   :  { %v1143_v5 = vrot.slane %v1142_v3, 1  ;;  %v1176_v6 = vadd.f32 %v1175_v4, %v1174_v1  ;;  %v9616_v4 = vld [vmem:[%s12383_s6 + $0xa0] sm:$0xff] }
 0x4dd   :  { %1575 = vmatpush.bf16.msra.mxu3 %v9616_v4  ;;  %v10786_v4 = vld [vmem:[#allocation10 + $0x80] sm:$0xff] }
 0x4de   :  { %v1144_v13 = vadd.f32 %v1143_v5, %v1142_v3  ;;  %v1177_v14 = vrot.slane %v1176_v6, 1  ;;  %v9613_v5 = vld [vmem:[%s12383_s6 + $0x88] sm:$0xff] }
 0x4df   :  { %1512 = vmatpush.bf16.msra.mxu1 %v9613_v5 }
 0x4e0   :  { %7611 = vmatmul.msk.f32.vlgmr.msra.gmra.mxu2 %vm12463_vm15, %v1144_v13  ;;  %v1178_v19 = vadd.f32 %v1177_v14, %v1176_v6 }
 0x4e1   :  { %1608 = vmatpush.msra.mxu2 %v10728_v35 }
 0x4e2   :  { %7612 = vmatmul.msk.f32.vlgmr.msra.gmra.mxu0 %vm12463_vm15, %v1178_v19 }
 0x4e3   :  { %1638 = vmatpush.msra.mxu0 %v10728_v35  ;;  %1609 = vmatpush.msra.mxu2 %v10730_v39 }
 0x4e5   :  { %1639 = vmatpush.msra.mxu0 %v10730_v39 }
 0x55f   :  { %v1199_v20 = vpop.f32.mrf.mxu0 }
 0x560   :  { %v1203_v63 = vmul.f32 0.03846154, %v1199_v20 }
 0x563   :  { %v1165_v21 = vpop.f32.mrf.mxu2 }
 0x564   :  { %v1202_v23 = vmul.f32 0.03846154, %v1165_v21 }
 0x566   :  { %v1204_v9 = vmul.f32 %v1202_v23, %v1202_v23  ;;  %v1207_v55 = vperm.slane %v1202_v23, 0 }
 0x568   :  { %v1205_v10 = vsub.f32 %v1203_v63, %v1204_v9  ;;  %v1208_v58 = vsub.f32 %v10617_v40, %v1207_v55  ;;  %v1209_v1 = vsub.f32 %v10621_v33, %v1207_v55  ;;  %v9612_v40 = vld [vmem:[%s12383_s6 + $0x80] sm:$0xff]  ;;  %v10768_v55 = vld [vmem:[#allocation10 + $0xd0] sm:$0xff] }
 0x569   :  { %1513 = vmatpush.bf16.msra.mxu1 %v9612_v40 }
 0x56a   :  { %v1206_v12 = vmax.f32 %v1205_v10, 0.0 }
 0x56c   :  { %v1210_v15 = vadd.f32 1e-05, %v1206_v12 }
 0x56e   :  { %10026 = vrsqrt.f32 %v1210_v15  ;;  %vm1217_vm2 = vweird.f32 %v1210_v15 }
 0x574   :  { %v10027_v31 = vpop.eup %10026 }
 0x575   :  { %v1212_v41 = vmul.f32 %v10027_v31, %v1210_v15  ;;  %vm1218_vm13 = vweird.f32 %v10027_v31 }
 0x576   :  { %vm1219_vm12 = vmor %vm1217_vm2, %vm1218_vm13  ;;  %vm1249_vm13 = vcmask 522240   ;;  %vm1532_vm2 = vsmask.f32 5376 }
 0x577   :  { %v1213_v48 = vmul.f32 %v10027_v31, %v1212_v41  ;;  %v10736_v41 = vld [vmem:[#allocation10 + $0x150] sm:$0xff] }
 0x578   :  { %1610 = vmatpush.msra.mxu2 %v10736_v41  ;;  %1640 = vmatpush.msra.mxu0 %v10736_v41 }
 0x579   :  { %v1214_v50 = vmul.f32 0.5, %v1213_v48  ;;  %v10746_v48 = vld [vmem:[#allocation10 + $0x120] sm:$0xff] }
 0x57a   :  { %1611 = vmatpush.msra.mxu2 %v10740_v45  ;;  %1641 = vmatpush.msra.mxu0 %v10740_v45 }
 0x57b   :  { %v1215_v51 = vsub.f32 1.5, %v1214_v50 }
 0x57c   :  { %1612 = vmatpush.msra.mxu2 %v10743_v46  ;;  %1642 = vmatpush.msra.mxu0 %v10743_v46 }
 0x57d   :  { %v1216_v57 = vmul.f32 %v10027_v31, %v1215_v51 }
 0x57e   :  { %1613 = vmatpush.msra.mxu2 %v10746_v48  ;;  %1643 = vmatpush.msra.mxu0 %v10746_v48 }
 0x57f   :  { %v1220_v62 = vsel %vm1219_vm12, %v10027_v31, %v1216_v57  ;;  %vm12397_vm12 = vcmask 523266   ;;  %v10774_v57 = vld [vmem:[#allocation10 + $0xb0] sm:$0xff] }
 0x580   :  { %v1221_v3 = vperm.slane %v1220_v62, 0  ;;  %1614 = vmatpush.msra.mxu2 %v10752_v38  ;;  %1644 = vmatpush.msra.mxu0 %v10752_v38  ;;  %v10778_v62 = vld [vmem:[#allocation10 + $0xa0] sm:$0xff] }
 0x582   :  { %v1222_v6 = vmul.f32 %v1221_v3, %v1208_v58  ;;  %v1223_v13 = vmul.f32 %v1221_v3, %v1209_v1  ;;  %1615 = vmatpush.msra.mxu2 %v10756_v37  ;;  %1645 = vmatpush.msra.mxu0 %v10756_v37  ;;  %v10782_v3 = vld [vmem:[#allocation10 + $0x90] sm:$0xff] }
 0x584   :  { %v1231_v14 = vadd.f32 %v10563_v27, %v1222_v6  ;;  %v1232_v19 = vadd.f32 %v10566_v42, %v1223_v13  ;;  %1616 = vmatpush.msra.mxu2 %v10760_v49  ;;  %1646 = vmatpush.msra.mxu0 %v10760_v49 }
 0x586   :  { %v1233_v33 = vmax.f32 %v1231_v14, 0.0  ;;  %v1234_v20 = vmax.f32 %v1232_v19, 0.0  ;;  %1617 = vmatpush.msra.mxu2 %v10764_v52  ;;  %1647 = vmatpush.msra.mxu0 %v10764_v52 }
 0x588   :  { %v1242_v21 = vrot.slane %v1233_v33, 6  ;;  %v1243_v23 = vrot.slane %v1234_v20, 6  ;;  %1618 = vmatpush.msra.mxu2 %v10768_v55  ;;  %1648 = vmatpush.msra.mxu0 %v10768_v55 }
 0x58a   :  { %v1244_v63 = vsel %vm12459_vm0, %v1242_v21, %v1243_v23  ;;  %1248 = vst.msk [vmem:[#allocation2] sm:$0xfc] %vm12397_vm12, %v1242_v21  ;;  %1619 = vmatpush.msra.mxu2 %v10772_v56  ;;  %1649 = vmatpush.msra.mxu0 %v10772_v56 }
 0x58b   :  { %1250 = vst.msk [vmem:[#allocation2 + $0x10] sm:$0x7f] %vm1249_vm13, %v1244_v63 }
 0x58c   :  { %1620 = vmatpush.msra.mxu2 %v10774_v57  ;;  %1650 = vmatpush.msra.mxu0 %v10774_v57 }
 0x58e   :  { %1621 = vmatpush.msra.mxu2 %v10778_v62  ;;  %1651 = vmatpush.msra.mxu0 %v10778_v62 }
 0x590   :  { %1622 = vmatpush.msra.mxu2 %v10782_v3  ;;  %1652 = vmatpush.msra.mxu0 %v10782_v3 }
 0x591   :  { %v1251_v27 = vld [vmem:[#allocation2] sm:$0xff] }
 0x592   :  { %1754 = vst [vmem:[#allocation2 + $0x6] sm:$0x1] %v12399_v8  ;;  %v1252_v42 = vld [vmem:[#allocation2 + $0x10] sm:$0xff]  ;;  %1623 = vmatpush.msra.mxu2 %v10786_v4  ;;  %1653 = vmatpush.msra.mxu0 %v10786_v4 }
 0x593   :  { %2453 = vst [vmem:[#allocation2] sm:$0x80] %v12399_v8  ;;  %v1254_v9 = vpack.c.bf16 %v1252_v42, %v1251_v27 }
 0x594   :  { %1753 = vst [vmem:[#allocation2] sm:$0x1] %v12399_v8 }
 0x595   :  { %7654 = vmatmul.msk.bf16.vlgmr.msrb.gmra.mxu3 %vm12463_vm15, %v1254_v9  ;;  %2454 = vst [vmem:[#allocation2 + $0x10] sm:$0x1] %v12399_v8  ;;  %v1370_v24 = vrot.slane %v1254_v9, 1  ;;  %v1273_v10 = vshrl.u32 %v1254_v9, 16  ;;  %v1275_v26 = vshll.u32 %v1254_v9, 16  ;;  %v1478_v34 = vrot.slane %v1254_v9, 2 }
 0x596   :  { %5742 = vst [vmem:[#allocation2 + $0x10] sm:$0x80] %v12399_v8 }
 0x597   :  { %7679 = vmatmul.msk.bf16.vlgmr.msrb.gmra.mxu2 %vm12463_vm15, %v1370_v24  ;;  %v1277_v12 = vrot.slane %v1275_v26, 1  ;;  %v1423_v28 = vrot.slane %v1273_v10, 1  ;;  %v1424_v15 = vrot.slane %v1275_v26, 2  ;;  %v1533_v22 = vrot.slane %v1273_v10, 2 }
 0x598   :  { %v1534_v2 = vrot.slane %v1275_v26, 3 }
 0x599   :  { %v1278_v18 = vor.u32 %v1277_v12, %v1273_v10  ;;  %v1425_v60 = vor.u32 %v1424_v15, %v1423_v28 }
 0x59a   :  { %v1535_v29 = vor.u32 %v1534_v2, %v1533_v22 }
 0x59b   :  { %7637 = vmatmul.msk.bf16.vlgmr.msrb.gmra.mxu1 %vm12463_vm15, %v1278_v18  ;;  %7704 = vmatmul.msk.bf16.vlgmr.msrb.gmra.mxu0 %vm12463_vm15, %v1425_v60 }
 0x59c   :  { %v1540_v31 = vsel %vm1532_vm2, %v1535_v29, %v1539_v30  ;;  %2033 = vmatpush.msrb.mxu0 %v10728_v35 }
 0x59e   :  { %2034 = vmatpush.msrb.mxu0 %v10730_v39 }
 0x5a0   :  { %2035 = vmatpush.msrb.mxu0 %v10736_v41 }
 0x5a2   :  { %2036 = vmatpush.msrb.mxu0 %v10740_v45 }
 0x5a4   :  { %2037 = vmatpush.msrb.mxu0 %v10743_v46 }
 0x5a5   :  { %7754 = vmatmul.msk.bf16.vlgmr.msra.gmra.mxu3 %vm12463_vm15, %v1540_v31 }
 0x5a6   :  { %2038 = vmatpush.msrb.mxu0 %v10746_v48 }
 0x5a8   :  { %2039 = vmatpush.msrb.mxu0 %v10752_v38 }
 0x5aa   :  { %2040 = vmatpush.msrb.mxu0 %v10756_v37 }
 0x5ab   :  { %7729 = vmatmul.msk.bf16.vlgmr.msra.gmra.mxu1 %vm12463_vm15, %v1478_v34 }
 0x5ac   :  { %2041 = vmatpush.msrb.mxu0 %v10760_v49 }
 0x5ae   :  { %2042 = vmatpush.msrb.mxu0 %v10764_v52 }
 0x5b0   :  { %2043 = vmatpush.msrb.mxu0 %v10768_v55 }
 0x5b2   :  { %2044 = vmatpush.msrb.mxu0 %v10772_v56 }
 0x5b4   :  { %2045 = vmatpush.msrb.mxu0 %v10774_v57 }
 0x5b6   :  { %2046 = vmatpush.msrb.mxu0 %v10778_v62 }
 0x5b8   :  { %2047 = vmatpush.msrb.mxu0 %v10782_v3 }
 0x5ba   :  { %2048 = vmatpush.msrb.mxu0 %v10786_v4 }
 0x618   :  { %v1315_v50 = vpop.f32.mrf.mxu1  ;;  %v1355_v51 = vpop.f32.mrf.mxu3 }
 0x619   :  { %v1356_v5 = vadd.f32 %v1355_v51, %v1315_v50  ;;  %v1462_v6 = vpop.f32.mrf.mxu0 }
 0x61a   :  { %v1407_v61 = vpop.f32.mrf.mxu2 }
 0x61b   :  { %v1412_v19 = vadd.f32 %v1407_v61, %v1356_v5 }
 0x61d   :  { %v1467_v21 = vadd.f32 %v1462_v6, %v1412_v19 }
 0x620   :  { %v1317_v58 = vpop.f32.mrf.mxu1  ;;  %v1357_v1 = vpop.f32.mrf.mxu3 }
 0x621   :  { %v1358_v13 = vadd.f32 %v1357_v1, %v1317_v58  ;;  %v1464_v23 = vpop.f32.mrf.mxu0 }
 0x622   :  { %v1409_v14 = vpop.f32.mrf.mxu2 }
 0x623   :  { %v1413_v20 = vadd.f32 %v1409_v14, %v1358_v13 }
 0x625   :  { %v1468_v27 = vadd.f32 %v1464_v23, %v1413_v20 }
 0x628   :  { %v1515_v40 = vpop.f32.mrf.mxu1  ;;  %v1577_v33 = vpop.f32.mrf.mxu3 }
 0x629   :  { %v1520_v63 = vadd.f32 %v1515_v40, %v1467_v21 }
 0x62b   :  { %v1582_v24 = vadd.f32 %v1577_v33, %v1520_v63 }
 0x62d   :  { %v1628_v15 = vmul.f32 %v1582_v24, %v1582_v24 }
 0x630   :  { %v1517_v42 = vpop.f32.mrf.mxu1  ;;  %v1579_v10 = vpop.f32.mrf.mxu3 }
 0x631   :  { %v1521_v9 = vadd.f32 %v1517_v42, %v1468_v27 }
 0x633   :  { %v1583_v26 = vadd.f32 %v1579_v10, %v1521_v9 }
 0x635   :  { %v1600_v12 = vsel %vm529_vm8, %v1583_v26, 0.0  ;;  %v1629_v28 = vmul.f32 %v1583_v26, %v1583_v26 }
 0x636   :  { %v1601_v16 = vadd.f32 %v1600_v12, %v1582_v24 }
 0x637   :  { %v1630_v18 = vsel %vm529_vm8, %v1629_v28, 0.0 }
 0x638   :  { %v1602_v60 = vrot.slane %v1601_v16, 4  ;;  %v1631_v22 = vadd.f32 %v1630_v18, %v1628_v15 }
 0x63a   :  { %v1603_v2 = vadd.f32 %v1602_v60, %v1601_v16  ;;  %v1632_v25 = vrot.slane %v1631_v22, 4 }
 0x63c   :  { %v1604_v29 = vrot.slane %v1603_v2, 2  ;;  %v1633_v30 = vadd.f32 %v1632_v25, %v1631_v22 }
 0x63e   :  { %v1605_v31 = vadd.f32 %v1604_v29, %v1603_v2  ;;  %v1634_v34 = vrot.slane %v1633_v30, 2  ;;  %v1682_v2 = vld [vmem:[%s12391_s14 + $0x1c] sm:$0xff] }
 0x63f   :  { %v9643_v29 = vld [vmem:[%s12384_s7 + $0xb8] sm:$0xff] }
 0x640   :  { %v1606_v50 = vrot.slane %v1605_v31, 1  ;;  %v1635_v51 = vadd.f32 %v1634_v34, %v1633_v30  ;;  %1995 = vmatpush.bf16.msrb.mxu2 %v9643_v29  ;;  %v9626_v30 = vld [vmem:[%s12384_s7 + $0x30] sm:$0xff] }
 0x641   :  { %v9642_v34 = vld [vmem:[%s12384_s7 + $0xb0] sm:$0xff] }
 0x642   :  { %v1607_v61 = vadd.f32 %v1606_v50, %v1605_v31  ;;  %v1636_v58 = vrot.slane %v1635_v51, 1  ;;  %v9635_v31 = vld [vmem:[%s12384_s7 + $0x78] sm:$0xff]  ;;  %v9625_v50 = vld [vmem:[%s12384_s7 + $0x28] sm:$0xff] }
 0x643   :  { %1853 = vmatpush.bf16.msrb.mxu3 %v9635_v31 }
 0x644   :  { %1624 = vmatmul.f32.vlgmr.msra.gmra.mxu2 %v1607_v61  ;;  %v1637_v1 = vadd.f32 %v1636_v58, %v1635_v51  ;;  %v9634_v51 = vld [vmem:[%s12384_s7 + $0x70] sm:$0xff]  ;;  %v9641_v61 = vld [vmem:[%s12384_s7 + $0xa8] sm:$0xff]  ;;  %v9624_v58 = vld [vmem:[%s12384_s7 + $0x20] sm:$0xff] }
 0x645   :  { %1996 = vmatpush.bf16.msrb.mxu2 %v9642_v34 }
 0x646   :  { %1654 = vmatmul.f32.vlgmr.msra.gmra.mxu0 %v1637_v1  ;;  %v9633_v1 = vld [vmem:[%s12384_s7 + $0x68] sm:$0xff] }
 0x647   :  { %1854 = vmatpush.bf16.msrb.mxu3 %v9634_v51 }
 0x649   :  { %1997 = vmatpush.bf16.msrb.mxu2 %v9641_v61 }
 0x64b   :  { %1855 = vmatpush.bf16.msrb.mxu3 %v9633_v1 }
 0x6c3   :  { %v1655_v5 = vpop.f32.mrf.mxu0 }
 0x6c4   :  { %v1659_v14 = vmul.f32 0.041666668, %v1655_v5  ;;  %v9640_v5 = vld [vmem:[%s12384_s7 + $0xa0] sm:$0xff] }
 0x6c5   :  { %1998 = vmatpush.bf16.msrb.mxu2 %v9640_v5 }
 0x6c7   :  { %v1625_v6 = vpop.f32.mrf.mxu2 }
 0x6c8   :  { %v1658_v13 = vmul.f32 0.041666668, %v1625_v6  ;;  %v9623_v6 = vld [vmem:[%s12384_s7 + $0x18] sm:$0xff] }
 0x6ca   :  { %v1660_v19 = vmul.f32 %v1658_v13, %v1658_v13  ;;  %v1663_v9 = vperm.slane %v1658_v13, 0  ;;  %v9632_v13 = vld [vmem:[%s12384_s7 + $0x60] sm:$0xff] }
 0x6cb   :  { %1856 = vmatpush.bf16.msrb.mxu3 %v9632_v13 }
 0x6cc   :  { %v1661_v40 = vsub.f32 %v1659_v14, %v1660_v19  ;;  %v1665_v28 = vsub.f32 %v1583_v26, %v1663_v9  ;;  %v1664_v16 = vsub.f32 %v1582_v24, %v1663_v9  ;;  %v1683_v26 = vld [vmem:[%s12391_s14 + $0x24] sm:$0xf]  ;;  %v9627_v24 = vld [vmem:[%s12384_s7 + $0x38] sm:$0xff]  ;;  %v9622_v19 = vld [vmem:[%s12384_s7 + $0x10] sm:$0xff] }
 0x6cd   :  { %v9639_v14 = vld [vmem:[%s12384_s7 + $0x98] sm:$0xff] }
 0x6ce   :  { %v1662_v33 = vmax.f32 %v1661_v40, 0.0  ;;  %1999 = vmatpush.bf16.msrb.mxu2 %v9639_v14  ;;  %v9631_v40 = vld [vmem:[%s12384_s7 + $0x58] sm:$0xff] }
 0x6cf   :  { %1857 = vmatpush.bf16.msrb.mxu3 %v9631_v40 }
 0x6d0   :  { %v1666_v20 = vadd.f32 1e-05, %v1662_v33  ;;  %v9638_v33 = vld [vmem:[%s12384_s7 + $0x90] sm:$0xff] }
 0x6d2   :  { %10028 = vrsqrt.f32 %v1666_v20  ;;  %vm1673_vm11 = vweird.f32 %v1666_v20  ;;  %2000 = vmatpush.bf16.msrb.mxu2 %v9638_v33 }
 0x6d8   :  { %v10029_v21 = vpop.eup %10028 }
 0x6d9   :  { %v1668_v23 = vmul.f32 %v10029_v21, %v1666_v20  ;;  %vm1674_vm13 = vweird.f32 %v10029_v21  ;;  %v9621_v20 = vld [vmem:[%s12384_s7 + $0x8] sm:$0xff] }
 0x6da   :  { %vm1675_vm12 = vmor %vm1673_vm11, %vm1674_vm13 }
 0x6db   :  { %v1669_v63 = vmul.f32 %v10029_v21, %v1668_v23  ;;  %v9637_v23 = vld [vmem:[%s12384_s7 + $0x88] sm:$0xff] }
 0x6dc   :  { %2001 = vmatpush.bf16.msrb.mxu2 %v9637_v23 }
 0x6dd   :  { %v1670_v27 = vmul.f32 0.5, %v1669_v63  ;;  %v9620_v63 = vld [vmem:[%s12384_s7] sm:$0xff] }
 0x6df   :  { %v1671_v42 = vsub.f32 1.5, %v1670_v27  ;;  %v9629_v27 = vld [vmem:[%s12384_s7 + $0x48] sm:$0xff] }
 0x6e1   :  { %v1672_v10 = vmul.f32 %v10029_v21, %v1671_v42  ;;  %v9636_v42 = vld [vmem:[%s12384_s7 + $0x80] sm:$0xff] }
 0x6e2   :  { %2002 = vmatpush.bf16.msrb.mxu2 %v9636_v42 }
 0x6e3   :  { %v1676_v12 = vsel %vm1675_vm12, %v10029_v21, %v1672_v10  ;;  %v9630_v21 = vld [vmem:[%s12384_s7 + $0x50] sm:$0xff] }
 0x6e4   :  { %v1677_v15 = vperm.slane %v1676_v12, 0  ;;  %1858 = vmatpush.bf16.msrb.mxu3 %v9630_v21  ;;  %v9628_v12 = vld [vmem:[%s12384_s7 + $0x40] sm:$0xff] }
 0x6e6   :  { %v1679_v18 = vmul.f32 %v1677_v15, %v1665_v28  ;;  %v1678_v60 = vmul.f32 %v1677_v15, %v1664_v16 }
 0x6e8   :  { %10030 = vtanh.f32 %v1679_v18  ;;  %1859 = vmatpush.bf16.msrb.mxu3 %v9629_v27 }
 0x6e9   :  { %10032 = vtanh.f32 %v1678_v60 }
 0x6ec   :  { %1860 = vmatpush.bf16.msrb.mxu3 %v9628_v12 }
 0x6ee   :  { %v10031_v22 = vpop.eup %10030 }
 0x6ef   :  { %7755 = vmatpush.msk.msrb.mxu1 %vm529_vm8, %v10031_v22  ;;  %v10033_v25 = vpop.eup %10032 }
 0x6f0   :  { %2061 = vmatpush.msra.mxu3 %v10728_v35 }
 0x6f1   :  { %1709 = vmatpush.msrb.mxu1 %v10033_v25 }
 0x6f2   :  { %7756 = vmatmul.msk.f32.vlgmr.msrb.gmra.mxu1 %vm1684_vm1, %v1682_v2  ;;  %2062 = vmatpush.msra.mxu3 %v10730_v39 }
 0x6f3   :  { %1914 = vmatpush.bf16.msra.mxu1 %v9627_v24 }
 0x6f4   :  { %2063 = vmatpush.msra.mxu3 %v10736_v41 }
 0x6f6   :  { %2064 = vmatpush.msra.mxu3 %v10740_v45 }
 0x6f7   :  { %1915 = vmatpush.bf16.msra.mxu1 %v9626_v30 }
 0x6f8   :  { %2065 = vmatpush.msra.mxu3 %v10743_v46 }
 0x6fa   :  { %7757 = vmatmul.msk.f32.gmra.mxu1 %vm1684_vm1, %v1683_v26  ;;  %2066 = vmatpush.msra.mxu3 %v10746_v48 }
 0x6fb   :  { %1916 = vmatpush.bf16.msra.mxu1 %v9625_v50 }
 0x6fc   :  { %2067 = vmatpush.msra.mxu3 %v10752_v38 }
 0x6fe   :  { %2068 = vmatpush.msra.mxu3 %v10756_v37 }
 0x6ff   :  { %1917 = vmatpush.bf16.msra.mxu1 %v9624_v58 }
 0x700   :  { %2069 = vmatpush.msra.mxu3 %v10760_v49 }
 0x702   :  { %2070 = vmatpush.msra.mxu3 %v10764_v52 }
 0x703   :  { %1918 = vmatpush.bf16.msra.mxu1 %v9623_v6 }
 0x704   :  { %2071 = vmatpush.msra.mxu3 %v10768_v55 }
 0x706   :  { %2072 = vmatpush.msra.mxu3 %v10772_v56 }
 0x707   :  { %1919 = vmatpush.bf16.msra.mxu1 %v9622_v19 }
 0x708   :  { %2073 = vmatpush.msra.mxu3 %v10774_v57 }
 0x70a   :  { %2074 = vmatpush.msra.mxu3 %v10778_v62 }
 0x70b   :  { %1920 = vmatpush.bf16.msra.mxu1 %v9621_v20 }
 0x70c   :  { %2075 = vmatpush.msra.mxu3 %v10782_v3 }
 0x70e   :  { %2076 = vmatpush.msra.mxu3 %v10786_v4 }
 0x70f   :  { %1921 = vmatpush.bf16.msra.mxu1 %v9620_v63 }
 0x76f   :  { %v1711_v9 = vpop.f32.mrf.mxu1 }
 0x770   :  { %v1718_v10 = vrot.slane %v1711_v9, 2 }
 0x772   :  { %vm1720_vm11 = vcmp.gt.f32.partialorder %v1711_v9, %v1718_v10 }
 0x773   :  { %v1722_v28 = vsel %vm1720_vm11, %v1711_v9, %v1718_v10  ;;  %v1724_v15 = vsel %vm1720_vm11, %v10497_v7, %v10500_v11 }
 0x774   :  { %v1728_v22 = vrot.slane %v1722_v28, 5  ;;  %v1736_v2 = vrot.slane %v1724_v15, 5 }
 0x777   :  { %v1714_v16 = vpop.f32.mrf.mxu1 }
 0x778   :  { %vm1721_vm1 = vcmp.gt.f32.partialorder %v1714_v16, %v1718_v10 }
 0x779   :  { %v1723_v18 = vsel %vm1721_vm1, %v1714_v16, %v1718_v10  ;;  %v1725_v60 = vsel %vm1721_vm1, %v10497_v7, %v10500_v11  ;;  %vm12462_vm1 = vcmask 1044480  }
 0x77a   :  { %v1729_v25 = vrot.slane %v1723_v18, 5  ;;  %v1737_v26 = vrot.slane %v1725_v60, 5 }
 0x77c   :  { %v1730_v24 = vsel %vm610_vm3, %v1728_v22, %v1729_v25  ;;  %v1738_v29 = vsel %vm610_vm3, %v1736_v2, %v1737_v26 }
 0x77d   :  { %vm1732_vm12 = vcmp.gt.f32.partialorder %v1711_v9, %v1730_v24 }
 0x77e   :  { %v1733_v30 = vsel %vm1732_vm12, %v1711_v9, %v1730_v24  ;;  %v1740_v31 = vsel %vm1732_vm12, %v10523_v36, %v1738_v29 }
 0x77f   :  { %v1742_v34 = vrot.slane %v1733_v30, 2  ;;  %v1749_v7 = vrot.slane %v1740_v31, 2 }
 0x781   :  { %vm1744_vm13 = vcmp.gt.f32.partialorder %v1711_v9, %v1742_v34  ;;  %vm1745_vm11 = vcmp.gt.f32.partialorder %v1714_v16, %v1742_v34 }
 0x782   :  { %v1746_v11 = vsel %vm1744_vm13, %v1711_v9, %v1742_v34  ;;  %v1747_v50 = vsel %vm1745_vm11, %v1714_v16, %v1742_v34  ;;  %v1751_v51 = vsel %vm1744_vm13, %v10529_v47, %v1749_v7  ;;  %v1752_v61 = vsel %vm1745_vm11, %v10529_v47, %v1749_v7 }
 0x783   :  { %v1757_v58 = vrot.slane %v1746_v11, 6  ;;  %v1758_v1 = vrot.slane %v1747_v50, 6  ;;  %v2447_v5 = vrot.slane %v1747_v50, 7  ;;  %v2446_v36 = vrot.slane %v1746_v11, 7 }
 0x784   :  { %v5563_v6 = vrot.slane %v1751_v51, 7  ;;  %v5564_v13 = vrot.slane %v1752_v61, 7 }
 0x785   :  { %v1759_v14 = vsel %vm12459_vm0, %v1757_v58, %v1758_v1  ;;  %v10909_v19 = vsel %vm12465_vm4, %v2446_v36, %v2447_v5  ;;  %v9651_v58 = vld [vmem:[%s12385_s8 + $0x38] sm:$0xff]  ;;  %v9650_v5 = vld [vmem:[%s12385_s8 + $0x30] sm:$0xff] }
 0x786   :  { %1761 = vst [vmem:[#allocation2] sm:$0x3e] %v1759_v14  ;;  %v10912_v40 = vsel %vm12465_vm4, %v5563_v6, %v5564_v13  ;;  %2260 = vmatpush.bf16.msra.mxu2 %v9651_v58  ;;  %v9667_v1 = vld [vmem:[%s12385_s8 + $0xb8] sm:$0xff]  ;;  %v9666_v6 = vld [vmem:[%s12385_s8 + $0xb0] sm:$0xff]  ;;  %v9649_v13 = vld [vmem:[%s12385_s8 + $0x28] sm:$0xff] }
 0x787   :  { %12476 = vst [vmem:[#allocation22_spill] sm:$0xff] %v10912_v40  ;;  %2341 = vmatpush.bf16.msra.mxu0 %v9667_v1  ;;  %v9659_v36 = vld [vmem:[%s12385_s8 + $0x78] sm:$0xff]  ;;  %v9658_v14 = vld [vmem:[%s12385_s8 + $0x70] sm:$0xff]  ;;  %v11246_v40 = vld [vmem:[#allocation10 + $0x288] sm:$0xff] }
 0x788   :  { %2199 = vmatpush.bf16.msrb.mxu1 %v9659_v36  ;;  %12493 = vst [vmem:[#allocation39_spill] sm:$0xff] %v11246_v40 }
 0x78a   :  { %2261 = vmatpush.bf16.msra.mxu2 %v9650_v5 }
 0x78b   :  { %2342 = vmatpush.bf16.msra.mxu0 %v9666_v6 }
 0x78c   :  { %2200 = vmatpush.bf16.msrb.mxu1 %v9658_v14  ;;  %v8138_v14 = vld [vmem:[#allocation7 + $0x78] sm:$0xf0] }
 0x78d   :  { %v1762_v47 = vld [vmem:[#allocation2] sm:$0x7f] }
 0x78e   :  { %2102 = vst [vmem:[#allocation2] sm:$0x1] %v12399_v8  ;;  %v1763_v33 = vpack.c.bf16 %v1762_v47, %v1762_v47  ;;  %2262 = vmatpush.bf16.msra.mxu2 %v9649_v13  ;;  %v9665_v47 = vld [vmem:[%s12385_s8 + $0xa8] sm:$0xff] }
 0x78f   :  { %2103 = vst [vmem:[#allocation2 + $0x6] sm:$0x1] %v12399_v8  ;;  %2343 = vmatpush.bf16.msra.mxu0 %v9665_v47 }
 0x790   :  { %1922 = vmatmul.bf16.vlgmr.msra.gmra.mxu1 %v1763_v33  ;;  %v1945_v20 = vrot.slane %v1763_v33, 1  ;;  %v1800_v21 = vshll.u32 %v1763_v33, 16  ;;  %v1798_v23 = vshrl.u32 %v1763_v33, 16  ;;  %v9648_v33 = vld [vmem:[%s12385_s8 + $0x20] sm:$0xff] }
 0x792   :  { %2003 = vmatmul.bf16.vlgmr.msrb.gmra.mxu2 %v1945_v20  ;;  %v1802_v63 = vrot.slane %v1800_v21, 1  ;;  %v9657_v21 = vld [vmem:[%s12385_s8 + $0x68] sm:$0xff] }
 0x793   :  { %2263 = vmatpush.bf16.msra.mxu2 %v9648_v33  ;;  %2201 = vmatpush.bf16.msrb.mxu1 %v9657_v21 }
 0x794   :  { %v1803_v27 = vor.u32 %v1802_v63, %v1798_v23  ;;  %v9664_v23 = vld [vmem:[%s12385_s8 + $0xa0] sm:$0xff] }
 0x795   :  { %2344 = vmatpush.bf16.msra.mxu0 %v9664_v23 }
 0x796   :  { %1861 = vmatmul.bf16.vlgmr.msrb.gmra.mxu3 %v1803_v27  ;;  %v9647_v27 = vld [vmem:[%s12385_s8 + $0x18] sm:$0xff] }
 0x797   :  { %2378 = vmatpush.msrb.mxu3 %v10728_v35  ;;  %2264 = vmatpush.bf16.msra.mxu2 %v9647_v27 }
 0x799   :  { %2379 = vmatpush.msrb.mxu3 %v10730_v39 }
 0x79b   :  { %2380 = vmatpush.msrb.mxu3 %v10736_v41 }
 0x79d   :  { %2381 = vmatpush.msrb.mxu3 %v10740_v45 }
 0x79f   :  { %2382 = vmatpush.msrb.mxu3 %v10743_v46 }
 0x7a1   :  { %2383 = vmatpush.msrb.mxu3 %v10746_v48 }
 0x7a3   :  { %2384 = vmatpush.msrb.mxu3 %v10752_v38 }
 0x7a5   :  { %2385 = vmatpush.msrb.mxu3 %v10756_v37 }
 0x7a7   :  { %2386 = vmatpush.msrb.mxu3 %v10760_v49 }
 0x7a9   :  { %2387 = vmatpush.msrb.mxu3 %v10764_v52 }
 0x7ab   :  { %2388 = vmatpush.msrb.mxu3 %v10768_v55 }
 0x7ad   :  { %2389 = vmatpush.msrb.mxu3 %v10772_v56 }
 0x7af   :  { %2390 = vmatpush.msrb.mxu3 %v10774_v57 }
 0x7b1   :  { %2391 = vmatpush.msrb.mxu3 %v10778_v62 }
 0x7b3   :  { %2392 = vmatpush.msrb.mxu3 %v10782_v3 }
 0x7b5   :  { %2393 = vmatpush.msrb.mxu3 %v10786_v4 }
 0x80d   :  { %v1923_v42 = vpop.f32.mrf.mxu1 }
 0x815   :  { %v1925_v9 = vpop.f32.mrf.mxu1  ;;  %v2004_v10 = vpop.f32.mrf.mxu2 }
 0x816   :  { %v9663_v9 = vld [vmem:[%s12385_s8 + $0x98] sm:$0xff] }
 0x817   :  { %2345 = vmatpush.bf16.msra.mxu0 %v9663_v9 }
 0x819   :  { %v1862_v12 = vpop.f32.mrf.mxu3 }
 0x81a   :  { %v1924_v28 = vadd.f32 %v1923_v42, %v1862_v12  ;;  %v9656_v42 = vld [vmem:[%s12385_s8 + $0x60] sm:$0xff] }
 0x81b   :  { %2202 = vmatpush.bf16.msrb.mxu1 %v9656_v42 }
 0x81c   :  { %v10939_v15 = vadd.f32 %v2004_v10, %v1924_v28 }
 0x81d   :  { %v2006_v16 = vpop.f32.mrf.mxu2 }
 0x81e   :  { %v2026_v18 = vsel %vm12462_vm1, %v10939_v15, 0.0  ;;  %v2053_v60 = vmul.f32 %v10939_v15, %v10939_v15  ;;  %v9646_v16 = vld [vmem:[%s12385_s8 + $0x10] sm:$0xff] }
 0x81f   :  { %v2027_v22 = vrot.slane %v2026_v18, 4  ;;  %2265 = vmatpush.bf16.msra.mxu2 %v9646_v16 }
 0x820   :  { %v2054_v2 = vsel %vm12462_vm1, %v2053_v60, 0.0  ;;  %v9655_v60 = vld [vmem:[%s12385_s8 + $0x58] sm:$0xff] }
 0x821   :  { %v2028_v25 = vadd.f32 %v2027_v22, %v2026_v18  ;;  %v2055_v26 = vrot.slane %v2054_v2, 4  ;;  %v1864_v24 = vpop.f32.mrf.mxu3  ;;  %v9662_v22 = vld [vmem:[%s12385_s8 + $0x90] sm:$0xff]  ;;  %2203 = vmatpush.bf16.msrb.mxu1 %v9655_v60 }
 0x822   :  { %2346 = vmatpush.bf16.msra.mxu0 %v9662_v22  ;;  %v9654_v24 = vld [vmem:[%s12385_s8 + $0x50] sm:$0xff] }
 0x823   :  { %v2029_v29 = vrot.slane %v2028_v25, 2  ;;  %v2056_v30 = vadd.f32 %v2055_v26, %v2054_v2 }
 0x825   :  { %v2030_v31 = vadd.f32 %v2029_v29, %v2028_v25  ;;  %v2057_v34 = vrot.slane %v2056_v30, 2  ;;  %v9645_v25 = vld [vmem:[%s12385_s8 + $0x8] sm:$0xff]  ;;  %2204 = vmatpush.bf16.msrb.mxu1 %v9654_v24 }
 0x826   :  { %2266 = vmatpush.bf16.msra.mxu2 %v9645_v25  ;;  %v9661_v29 = vld [vmem:[%s12385_s8 + $0x88] sm:$0xff] }
 0x827   :  { %v2031_v7 = vrot.slane %v2030_v31, 1  ;;  %v2058_v11 = vadd.f32 %v2057_v34, %v2056_v30  ;;  %2347 = vmatpush.bf16.msra.mxu0 %v9661_v29  ;;  %v9644_v30 = vld [vmem:[%s12385_s8] sm:$0xff] }
 0x828   :  { %v9660_v34 = vld [vmem:[%s12385_s8 + $0x80] sm:$0xff] }
 0x829   :  { %v2032_v50 = vadd.f32 %v2031_v7, %v2030_v31  ;;  %v2059_v51 = vrot.slane %v2058_v11, 1  ;;  %v9653_v31 = vld [vmem:[%s12385_s8 + $0x48] sm:$0xff] }
 0x82a   :  { %2267 = vmatpush.bf16.msra.mxu2 %v9644_v30  ;;  %2205 = vmatpush.bf16.msrb.mxu1 %v9653_v31  ;;  %v8128_v30 = vld [vmem:[#allocation7 + $0x60] sm:$0xf]  ;;  %v9681_v31 = vld [vmem:[#allocation7 + $0x64] sm:$0xf0] }
 0x82b   :  { %2049 = vmatmul.f32.vlgmr.msrb.gmra.mxu0 %v2032_v50  ;;  %v2060_v61 = vadd.f32 %v2059_v51, %v2058_v11  ;;  %v9652_v11 = vld [vmem:[%s12385_s8 + $0x40] sm:$0xff] }
 0x82c   :  { %2348 = vmatpush.bf16.msra.mxu0 %v9660_v34  ;;  %v9680_v34 = vld [vmem:[#allocation7 + $0x64] sm:$0xf] }
 0x82d   :  { %2077 = vmatmul.f32.vlgmr.msra.gmra.mxu3 %v2060_v61 }
 0x82e   :  { %2206 = vmatpush.bf16.msrb.mxu1 %v9652_v11  ;;  %v8130_v11 = vld [vmem:[#allocation7 + $0x68] sm:$0xf0] }
 0x832   :  { %2406 = vmatpush.msra.mxu1 %v10728_v35 }
 0x834   :  { %2407 = vmatpush.msra.mxu1 %v10730_v39 }
 0x836   :  { %2408 = vmatpush.msra.mxu1 %v10736_v41 }
 0x838   :  { %2409 = vmatpush.msra.mxu1 %v10740_v45 }
 0x83a   :  { %2410 = vmatpush.msra.mxu1 %v10743_v46 }
 0x83c   :  { %2411 = vmatpush.msra.mxu1 %v10746_v48 }
 0x83e   :  { %2412 = vmatpush.msra.mxu1 %v10752_v38 }
 0x840   :  { %2413 = vmatpush.msra.mxu1 %v10756_v37 }
 0x842   :  { %2414 = vmatpush.msra.mxu1 %v10760_v49 }
 0x844   :  { %2415 = vmatpush.msra.mxu1 %v10764_v52 }
 0x846   :  { %2416 = vmatpush.msra.mxu1 %v10768_v55  ;;  %v8136_v55 = vld [vmem:[#allocation7 + $0x70] sm:$0xf] }
 0x848   :  { %2417 = vmatpush.msra.mxu1 %v10772_v56  ;;  %v9683_v56 = vld [vmem:[#allocation7 + $0x74] sm:$0xf0] }
 0x84a   :  { %2418 = vmatpush.msra.mxu1 %v10774_v57  ;;  %v9682_v57 = vld [vmem:[#allocation7 + $0x74] sm:$0xf] }
 0x84b   :  { %v8141_v47 = vor.u32 %v9682_v57, %v8138_v14  ;;  %v9676_v57 = vld [vmem:[#allocation7 + $0x44] sm:$0xf]  ;;  %v8114_v14 = vld [vmem:[#allocation7 + $0x48] sm:$0xf0] }
 0x84c   :  { %2419 = vmatpush.msra.mxu1 %v10778_v62 }
 0x84e   :  { %2420 = vmatpush.msra.mxu1 %v10782_v3 }
 0x850   :  { %2421 = vmatpush.msra.mxu1 %v10786_v4 }
 0x8a8   :  { %v2050_v20 = vpop.f32.mrf.mxu0 }
 0x8a9   :  { %v2081_v63 = vmul.f32 0.1, %v2050_v20 }
 0x8ab   :  { %v2083_v12 = vmul.f32 %v2081_v63, %v2081_v63  ;;  %v2086_v1 = vperm.slane %v2081_v63, 0 }
 0x8ad   :  { %v2087_v6 = vsub.f32 %v10939_v15, %v2086_v1  ;;  %v8137_v15 = vor.u32 %v9683_v56, %v8136_v55  ;;  %v8112_v55 = vld [vmem:[#allocation7 + $0x40] sm:$0xf]  ;;  %v9677_v56 = vld [vmem:[#allocation7 + $0x44] sm:$0xf0] }
 0x8af   :  { %2689 = vmatpush.bf16.msra.mxu3 %v8137_v15  ;;  %v8113_v15 = vor.u32 %v9677_v56, %v8112_v55  ;;  %v8082_v55 = vld [vmem:[#allocation7 + $0x8] sm:$0xf0]  ;;  %v8264_v56 = vld [vmem:[#allocation7 + $0x1f0] sm:$0xf] }
 0x8b0   :  { %v2078_v10 = vpop.f32.mrf.mxu3 }
 0x8b1   :  { %v2082_v28 = vmul.f32 0.1, %v2078_v10 }
 0x8b3   :  { %v2084_v18 = vsub.f32 %v2082_v28, %v2083_v12 }
 0x8b5   :  { %v2085_v2 = vmax.f32 %v2084_v18, 0.0 }
 0x8b7   :  { %v2088_v26 = vadd.f32 1e-05, %v2085_v2 }
 0x8b9   :  { %10034 = vrsqrt.f32 %v2088_v26  ;;  %vm2095_vm13 = vweird.f32 %v2088_v26 }
 0x8bf   :  { %v10035_v7 = vpop.eup %10034 }
 0x8c0   :  { %v2090_v50 = vmul.f32 %v10035_v7, %v2088_v26  ;;  %vm2096_vm12 = vweird.f32 %v10035_v7 }
 0x8c1   :  { %vm2097_vm11 = vmor %vm2095_vm13, %vm2096_vm12 }
 0x8c2   :  { %v2091_v51 = vmul.f32 %v10035_v7, %v2090_v50  ;;  %v8133_v50 = vor.u32 %v9680_v34, %v8130_v11  ;;  %v8040_v34 = vld [vmem:[#allocation7 + $0xb0] sm:$0xf]  ;;  %v9690_v11 = vld [vmem:[#allocation7 + $0xb4] sm:$0xf] }
 0x8c4   :  { %v2092_v61 = vmul.f32 0.5, %v2091_v51  ;;  %v8072_v51 = vld [vmem:[#allocation7 + $0xf0] sm:$0xf] }
 0x8c6   :  { %v2093_v58 = vsub.f32 1.5, %v2092_v61  ;;  %v9699_v61 = vld [vmem:[#allocation7 + $0xf4] sm:$0xf0] }
 0x8c7   :  { %v8073_v1 = vor.u32 %v9699_v61, %v8072_v51  ;;  %v8042_v51 = vld [vmem:[#allocation7 + $0xb8] sm:$0xf0] }
 0x8c8   :  { %v2094_v5 = vmul.f32 %v10035_v7, %v2093_v58  ;;  %v9698_v58 = vld [vmem:[#allocation7 + $0xf4] sm:$0xf]  ;;  %v8045_v61 = vor.u32 %v9690_v11, %v8042_v51  ;;  %v8248_v11 = vld [vmem:[#allocation7 + $0x1d0] sm:$0xf] }
 0x8c9   :  { %2583 = vmatpush.bf16.msrb.mxu2 %v8073_v1  ;;  %v9671_v1 = vld [vmem:[#allocation7 + $0x14] sm:$0xf0]  ;;  %v9726_v51 = vld [vmem:[#allocation7 + $0x1d4] sm:$0xf] }
 0x8ca   :  { %v2098_v36 = vsel %vm2097_vm11, %v10035_v7, %v2094_v5  ;;  %v8129_v7 = vor.u32 %v9681_v31, %v8128_v30  ;;  %v8074_v5 = vld [vmem:[#allocation7 + $0xf8] sm:$0xf0]  ;;  %v8098_v30 = vld [vmem:[#allocation7 + $0x28] sm:$0xf0] }
 0x8cb   :  { %v2099_v13 = vperm.slane %v2098_v36, 0  ;;  %v8077_v36 = vor.u32 %v9698_v58, %v8074_v5  ;;  %v8088_v58 = vld [vmem:[#allocation7 + $0x10] sm:$0xf]  ;;  %v9670_v5 = vld [vmem:[#allocation7 + $0x14] sm:$0xf] }
 0x8cc   :  { %2690 = vmatpush.bf16.msra.mxu3 %v8129_v7  ;;  %v9691_v7 = vld [vmem:[#allocation7 + $0xb4] sm:$0xf0] }
 0x8cd   :  { %v2100_v35 = vmul.f32 %v2099_v13, %v2087_v6  ;;  %v8120_v6 = vld [vmem:[#allocation7 + $0x50] sm:$0xf]  ;;  %v9679_v13 = vld [vmem:[#allocation7 + $0x54] sm:$0xf0]  ;;  %2596 = vmatpush.bf16.msrb.mxu0 %v8077_v36  ;;  %v8089_v36 = vor.u32 %v9671_v1, %v8088_v58  ;;  %v8250_v58 = vld [vmem:[#allocation7 + $0x1d8] sm:$0xf0] }
 0x8ce   :  { %v8253_v1 = vor.u32 %v9726_v51, %v8250_v58  ;;  %v8170_v51 = vld [vmem:[#allocation7 + $0x138] sm:$0xf0]  ;;  %v8216_v58 = vld [vmem:[#allocation7 + $0x190] sm:$0xf] }
 0x8cf   :  { %v2101_v39 = vmax.f32 %v2100_v35, 0.0  ;;  %v9678_v35 = vld [vmem:[#allocation7 + $0x54] sm:$0xf] }
 0x8d1   :  { %v2105_v41 = vrot.slane %v2101_v39, 7  ;;  %v8121_v39 = vor.u32 %v9679_v13, %v8120_v6  ;;  %v8090_v6 = vld [vmem:[#allocation7 + $0x18] sm:$0xf0] }
 0x8d2   :  { %v8093_v13 = vor.u32 %v9670_v5, %v8090_v6  ;;  %v8192_v5 = vld [vmem:[#allocation7 + $0x160] sm:$0xf] }
 0x8d3   :  { %2107 = vst [vmem:[#allocation2] sm:$0x3e] %v2105_v41  ;;  %v8122_v41 = vld [vmem:[#allocation7 + $0x58] sm:$0xf0]  ;;  %2691 = vmatpush.bf16.msra.mxu3 %v8121_v39  ;;  %v9689_v39 = vld [vmem:[#allocation7 + $0xa4] sm:$0xf0] }
 0x8d7   :  { %2692 = vmatpush.bf16.msra.mxu3 %v8113_v15 }
 0x8da   :  { %v2108_v45 = vld [vmem:[#allocation2] sm:$0x7f] }
 0x8db   :  { %2452 = vst [vmem:[#allocation2] sm:$0x3] %v12399_v8  ;;  %v2109_v46 = vpack.c.bf16 %v2108_v45, %v2108_v45  ;;  %v8125_v45 = vor.u32 %v9678_v35, %v8122_v41  ;;  %v8032_v35 = vld [vmem:[#allocation7 + $0xa0] sm:$0xf]  ;;  %v9688_v41 = vld [vmem:[#allocation7 + $0xa4] sm:$0xf] }
 0x8dd   :  { %2268 = vmatmul.bf16.vlgmr.msra.gmra.mxu2 %v2109_v46  ;;  %v2291_v48 = vrot.slane %v2109_v46, 1  ;;  %v2146_v38 = vshll.u32 %v2109_v46, 16  ;;  %v2144_v37 = vshrl.u32 %v2109_v46, 16  ;;  %v8064_v46 = vld [vmem:[#allocation7 + $0xe0] sm:$0xf] }
 0x8df   :  { %2349 = vmatmul.bf16.vlgmr.msra.gmra.mxu0 %v2291_v48  ;;  %v2148_v49 = vrot.slane %v2146_v38, 1  ;;  %v9697_v48 = vld [vmem:[#allocation7 + $0xe4] sm:$0xf0]  ;;  %v9696_v38 = vld [vmem:[#allocation7 + $0xe4] sm:$0xf] }
 0x8e1   :  { %v2149_v52 = vor.u32 %v2148_v49, %v2144_v37  ;;  %v8065_v37 = vor.u32 %v9697_v48, %v8064_v46  ;;  %v8066_v49 = vld [vmem:[#allocation7 + $0xe8] sm:$0xf0] }
 0x8e2   :  { %v8034_v46 = vld [vmem:[#allocation7 + $0xa8] sm:$0xf0] }
 0x8e3   :  { %2207 = vmatmul.bf16.vlgmr.msrb.gmra.mxu1 %v2149_v52  ;;  %v8069_v52 = vor.u32 %v9696_v38, %v8066_v49  ;;  %2584 = vmatpush.bf16.msrb.mxu2 %v8065_v37  ;;  %v8037_v48 = vor.u32 %v9688_v41, %v8034_v46  ;;  %v8080_v38 = vld [vmem:[#allocation7] sm:$0xf]  ;;  %v9669_v37 = vld [vmem:[#allocation7 + $0x4] sm:$0xf0]  ;;  %v9668_v49 = vld [vmem:[#allocation7 + $0x4] sm:$0xf] }
 0x8e4   :  { %2702 = vmatpush.bf16.msrb.mxu1 %v8141_v47  ;;  %v8117_v47 = vor.u32 %v9676_v57, %v8114_v14  ;;  %v9731_v57 = vld [vmem:[#allocation7 + $0x1f4] sm:$0xf0]  ;;  %v8085_v15 = vor.u32 %v9668_v49, %v8082_v55  ;;  %v8240_v41 = vld [vmem:[#allocation7 + $0x1c0] sm:$0xf]  ;;  %v9724_v46 = vld [vmem:[#allocation7 + $0x1c4] sm:$0xf] }
 0x8e5   :  { %2597 = vmatpush.bf16.msrb.mxu0 %v8069_v52  ;;  %v8081_v52 = vor.u32 %v9669_v37, %v8080_v38  ;;  %v8265_v14 = vor.u32 %v9731_v57, %v8264_v56  ;;  %v8242_v49 = vld [vmem:[#allocation7 + $0x1c8] sm:$0xf0]  ;;  %v8184_v56 = vld [vmem:[#allocation7 + $0x150] sm:$0xf]  ;;  %v9711_v57 = vld [vmem:[#allocation7 + $0x154] sm:$0xf0] }
 0x8e6   :  { %v8245_v55 = vor.u32 %v9724_v46, %v8242_v49  ;;  %v8162_v46 = vld [vmem:[#allocation7 + $0x128] sm:$0xf0]  ;;  %v9716_v49 = vld [vmem:[#allocation7 + $0x184] sm:$0xf] }
 0x8e8   :  { %2703 = vmatpush.bf16.msrb.mxu1 %v8133_v50  ;;  %v8041_v50 = vor.u32 %v9691_v7, %v8040_v34 }
 0x8ec   :  { %2704 = vmatpush.bf16.msrb.mxu1 %v8125_v45  ;;  %v8033_v45 = vor.u32 %v9689_v39, %v8032_v35  ;;  %v8194_v35 = vld [vmem:[#allocation7 + $0x168] sm:$0xf0] }
 0x8f0   :  { %2705 = vmatpush.bf16.msrb.mxu1 %v8117_v47  ;;  %v9730_v47 = vld [vmem:[#allocation7 + $0x1f4] sm:$0xf] }
 0x95c   :  { %v2350_v62 = vpop.f32.mrf.mxu0 }
 0x960   :  { %v2208_v33 = vpop.f32.mrf.mxu1  ;;  %v2269_v20 = vpop.f32.mrf.mxu2 }
 0x961   :  { %v2270_v21 = vadd.f32 %v2269_v20, %v2208_v33  ;;  %v9695_v33 = vld [vmem:[#allocation7 + $0xd4] sm:$0xf0]  ;;  %v9694_v20 = vld [vmem:[#allocation7 + $0xd4] sm:$0xf] }
 0x963   :  { %v11036_v3 = vadd.f32 %v2350_v62, %v2270_v21  ;;  %v8056_v62 = vld [vmem:[#allocation7 + $0xd0] sm:$0xf] }
 0x964   :  { %v2352_v23 = vpop.f32.mrf.mxu0  ;;  %v8057_v21 = vor.u32 %v9695_v33, %v8056_v62  ;;  %v8266_v62 = vld [vmem:[#allocation7 + $0x1f8] sm:$0xf0]  ;;  %v8024_v33 = vld [vmem:[#allocation7 + $0x90] sm:$0xf] }
 0x965   :  { %v2371_v4 = vsel %vm12462_vm1, %v11036_v3, 0.0  ;;  %v2398_v63 = vmul.f32 %v11036_v3, %v11036_v3  ;;  %v8058_v23 = vld [vmem:[#allocation7 + $0xd8] sm:$0xf0] }
 0x966   :  { %v2372_v27 = vrot.slane %v2371_v4, 4  ;;  %2585 = vmatpush.bf16.msrb.mxu2 %v8057_v21  ;;  %v9687_v21 = vld [vmem:[#allocation7 + $0x94] sm:$0xf0] }
 0x967   :  { %v2399_v42 = vsel %vm12462_vm1, %v2398_v63, 0.0  ;;  %v8104_v63 = vld [vmem:[#allocation7 + $0x30] sm:$0xf] }
 0x968   :  { %v2373_v9 = vadd.f32 %v2372_v27, %v2371_v4  ;;  %v2400_v10 = vrot.slane %v2399_v42, 4  ;;  %v2210_v12 = vpop.f32.mrf.mxu1  ;;  %v2271_v28 = vpop.f32.mrf.mxu2  ;;  %v8061_v4 = vor.u32 %v9694_v20, %v8058_v23  ;;  %v9675_v27 = vld [vmem:[#allocation7 + $0x34] sm:$0xf0]  ;;  %v8269_v20 = vor.u32 %v9730_v47, %v8266_v62  ;;  %v9686_v23 = vld [vmem:[#allocation7 + $0x94] sm:$0xf] }
 0x969   :  { %v8048_v28 = vld [vmem:[#allocation7 + $0xc0] sm:$0xf]  ;;  %v8186_v47 = vld [vmem:[#allocation7 + $0x158] sm:$0xf0] }
 0x96a   :  { %v2374_v16 = vrot.slane %v2373_v9, 2  ;;  %v2401_v18 = vadd.f32 %v2400_v10, %v2399_v42  ;;  %v9674_v42 = vld [vmem:[#allocation7 + $0x34] sm:$0xf]  ;;  %v8106_v10 = vld [vmem:[#allocation7 + $0x38] sm:$0xf0]  ;;  %2598 = vmatpush.bf16.msrb.mxu0 %v8061_v4 }
 0x96b   :  { %v8109_v12 = vor.u32 %v9674_v42, %v8106_v10  ;;  %v8026_v4 = vld [vmem:[#allocation7 + $0x98] sm:$0xf0]  ;;  %v8256_v42 = vld [vmem:[#allocation7 + $0x1e0] sm:$0xf]  ;;  %v9728_v10 = vld [vmem:[#allocation7 + $0x1e4] sm:$0xf] }
 0x96c   :  { %v2402_v60 = vrot.slane %v2401_v18, 2  ;;  %v2375_v22 = vadd.f32 %v2374_v16, %v2373_v9  ;;  %v8105_v9 = vor.u32 %v9675_v27, %v8104_v63  ;;  %v9693_v16 = vld [vmem:[#allocation7 + $0xc4] sm:$0xf0]  ;;  %v8025_v63 = vor.u32 %v9687_v21, %v8024_v33  ;;  %v8232_v21 = vld [vmem:[#allocation7 + $0x1b0] sm:$0xf] }
 0x96d   :  { %2706 = vmatpush.bf16.msrb.mxu1 %v8109_v12  ;;  %v8029_v27 = vor.u32 %v9686_v23, %v8026_v4  ;;  %v9723_v23 = vld [vmem:[#allocation7 + $0x1b4] sm:$0xf0] }
 0x96e   :  { %v2403_v2 = vadd.f32 %v2402_v60, %v2401_v18  ;;  %v2376_v25 = vrot.slane %v2375_v22, 1  ;;  %v9692_v18 = vld [vmem:[#allocation7 + $0xc4] sm:$0xf]  ;;  %2693 = vmatpush.bf16.msra.mxu3 %v8105_v9  ;;  %v8049_v60 = vor.u32 %v9693_v16, %v8048_v28  ;;  %v9729_v9 = vld [vmem:[#allocation7 + $0x1e4] sm:$0xf0]  ;;  %v8233_v4 = vor.u32 %v9723_v23, %v8232_v21 }
 0x96f   :  { %v8257_v12 = vor.u32 %v9729_v9, %v8256_v42  ;;  %v8258_v28 = vld [vmem:[#allocation7 + $0x1e8] sm:$0xf0]  ;;  %v8016_v16 = vld [vmem:[#allocation7 + $0x80] sm:$0xf] }
 0x970   :  { %v2377_v26 = vadd.f32 %v2376_v25, %v2375_v22  ;;  %v2404_v24 = vrot.slane %v2403_v2, 1  ;;  %v8050_v22 = vld [vmem:[#allocation7 + $0xc8] sm:$0xf0]  ;;  %v8096_v25 = vld [vmem:[#allocation7 + $0x20] sm:$0xf]  ;;  %2586 = vmatpush.bf16.msrb.mxu2 %v8049_v60  ;;  %v8261_v60 = vor.u32 %v9728_v10, %v8258_v28 }
 0x971   :  { %v8176_v10 = vld [vmem:[#allocation7 + $0x140] sm:$0xf]  ;;  %v9708_v28 = vld [vmem:[#allocation7 + $0x144] sm:$0xf] }
 0x972   :  { %2394 = vmatmul.f32.vlgmr.msrb.gmra.mxu3 %v2377_v26  ;;  %v2405_v29 = vadd.f32 %v2404_v24, %v2403_v2  ;;  %v8053_v2 = vor.u32 %v9692_v18, %v8050_v22  ;;  %v9673_v26 = vld [vmem:[#allocation7 + $0x24] sm:$0xf0]  ;;  %v9672_v24 = vld [vmem:[#allocation7 + $0x24] sm:$0xf] }
 0x973   :  { %v8101_v31 = vor.u32 %v9672_v24, %v8098_v30  ;;  %v9685_v18 = vld [vmem:[#allocation7 + $0x84] sm:$0xf0]  ;;  %v9714_v30 = vld [vmem:[#allocation7 + $0x174] sm:$0xf] }
 0x974   :  { %2422 = vmatmul.f32.vlgmr.msra.gmra.mxu1 %v2405_v29  ;;  %v8097_v29 = vor.u32 %v9673_v26, %v8096_v25  ;;  %2599 = vmatpush.bf16.msrb.mxu0 %v8053_v2  ;;  %v8017_v22 = vor.u32 %v9685_v18, %v8016_v16  ;;  %v9684_v2 = vld [vmem:[#allocation7 + $0x84] sm:$0xf]  ;;  %v8018_v25 = vld [vmem:[#allocation7 + $0x88] sm:$0xf0]  ;;  %v8200_v26 = vld [vmem:[#allocation7 + $0x170] sm:$0xf] }
 0x975   :  { %2707 = vmatpush.bf16.msrb.mxu1 %v8101_v31  ;;  %2587 = vmatpush.bf16.msrb.mxu2 %v8041_v50  ;;  %v8021_v24 = vor.u32 %v9684_v2, %v8018_v25  ;;  %v8202_v31 = vld [vmem:[#allocation7 + $0x178] sm:$0xf0]  ;;  %v9727_v50 = vld [vmem:[#allocation7 + $0x1d4] sm:$0xf0]  ;;  %v8178_v18 = vld [vmem:[#allocation7 + $0x148] sm:$0xf0] }
 0x976   :  { %2694 = vmatpush.bf16.msra.mxu3 %v8097_v29  ;;  %v9715_v29 = vld [vmem:[#allocation7 + $0x174] sm:$0xf0]  ;;  %v8205_v7 = vor.u32 %v9714_v30, %v8202_v31  ;;  %v8224_v2 = vld [vmem:[#allocation7 + $0x1a0] sm:$0xf]  ;;  %v9721_v25 = vld [vmem:[#allocation7 + $0x1a4] sm:$0xf0] }
 0x977   :  { %v8201_v34 = vor.u32 %v9715_v29, %v8200_v26  ;;  %v8225_v26 = vor.u32 %v9721_v25, %v8224_v2  ;;  %v8226_v29 = vld [vmem:[#allocation7 + $0x1a8] sm:$0xf0] }
 0x978   :  { %2600 = vmatpush.bf16.msrb.mxu0 %v8045_v61  ;;  %v8249_v61 = vor.u32 %v9727_v50, %v8248_v11  ;;  %v9706_v50 = vld [vmem:[#allocation7 + $0x134] sm:$0xf] }
 0x979   :  { %2708 = vmatpush.bf16.msrb.mxu1 %v8093_v13  ;;  %2588 = vmatpush.bf16.msrb.mxu2 %v8033_v45  ;;  %v9712_v13 = vld [vmem:[#allocation7 + $0x164] sm:$0xf]  ;;  %v9725_v45 = vld [vmem:[#allocation7 + $0x1c4] sm:$0xf0] }
 0x97a   :  { %2695 = vmatpush.bf16.msra.mxu3 %v8089_v36  ;;  %v9713_v36 = vld [vmem:[#allocation7 + $0x164] sm:$0xf0]  ;;  %v8197_v39 = vor.u32 %v9712_v13, %v8194_v35  ;;  %v8241_v37 = vor.u32 %v9725_v45, %v8240_v41  ;;  %v8160_v35 = vld [vmem:[#allocation7 + $0x120] sm:$0xf]  ;;  %v9704_v41 = vld [vmem:[#allocation7 + $0x124] sm:$0xf] }
 0x97b   :  { %v8193_v6 = vor.u32 %v9713_v36, %v8192_v5  ;;  %v9718_v5 = vld [vmem:[#allocation7 + $0x194] sm:$0xf] }
 0x97c   :  { %2601 = vmatpush.bf16.msrb.mxu0 %v8037_v48 }
 0x97d   :  { %2709 = vmatpush.bf16.msrb.mxu1 %v8085_v15  ;;  %2589 = vmatpush.bf16.msrb.mxu2 %v8025_v63  ;;  %v8185_v15 = vor.u32 %v9711_v57, %v8184_v56  ;;  %v9722_v63 = vld [vmem:[#allocation7 + $0x1b4] sm:$0xf]  ;;  %v8210_v56 = vld [vmem:[#allocation7 + $0x188] sm:$0xf0] }
 0x97e   :  { %2696 = vmatpush.bf16.msra.mxu3 %v8081_v52 }
 0x980   :  { %2602 = vmatpush.bf16.msrb.mxu0 %v8029_v27  ;;  %v8234_v27 = vld [vmem:[#allocation7 + $0x1b8] sm:$0xf0] }
 0x981   :  { %2957 = vmatpush.bf16.msra.mxu1 %v8269_v20  ;;  %2590 = vmatpush.bf16.msrb.mxu2 %v8017_v22  ;;  %v8237_v9 = vor.u32 %v9722_v63, %v8234_v27  ;;  %v8181_v22 = vor.u32 %v9708_v28, %v8178_v18  ;;  %v8144_v63 = vld [vmem:[#allocation7 + $0x100] sm:$0xf]  ;;  %v9701_v27 = vld [vmem:[#allocation7 + $0x104] sm:$0xf0]  ;;  %v11051_v18 = vld [vmem:[#allocation2 + $0x10] sm:$0x1] }
 0x982   :  { %2944 = vmatpush.bf16.msrb.mxu3 %v8265_v14  ;;  %v9710_v14 = vld [vmem:[#allocation7 + $0x154] sm:$0xf]  ;;  %3831 = vst [vmem:[#allocation2 + $0x10] sm:$0x3] %v12399_v8 }
 0x983   :  { %v8189_v20 = vor.u32 %v9710_v14, %v8186_v47  ;;  %v8152_v14 = vld [vmem:[#allocation7 + $0x110] sm:$0xf] }
 0x984   :  { %2603 = vmatpush.bf16.msrb.mxu0 %v8021_v24  ;;  %v9720_v24 = vld [vmem:[#allocation7 + $0x1a4] sm:$0xf] }
 0x985   :  { %2958 = vmatpush.bf16.msra.mxu1 %v8261_v60  ;;  %2815 = vmatpush.bf16.msra.mxu2 %v8201_v34  ;;  %v8229_v31 = vor.u32 %v9720_v24, %v8226_v29  ;;  %v8168_v34 = vld [vmem:[#allocation7 + $0x130] sm:$0xf] }
 0x986   :  { %2945 = vmatpush.bf16.msrb.mxu3 %v8257_v12  ;;  %v9709_v12 = vld [vmem:[#allocation7 + $0x144] sm:$0xf0] }
 0x987   :  { %v8177_v16 = vor.u32 %v9709_v12, %v8176_v10  ;;  %v8145_v10 = vor.u32 %v9701_v27, %v8144_v63  ;;  %v8146_v12 = vld [vmem:[#allocation7 + $0x108] sm:$0xf0]  ;;  %v9756_v63 = vld [vmem:[#allocation7 + $0x2c4] sm:$0xf] }
 0x988   :  { %2828 = vmatpush.bf16.msra.mxu0 %v8205_v7  ;;  %v9707_v7 = vld [vmem:[#allocation7 + $0x134] sm:$0xf0]  ;;  %v8370_v27 = vld [vmem:[#allocation7 + $0x2c8] sm:$0xf0] }
 0x989   :  { %2959 = vmatpush.bf16.msra.mxu1 %v8253_v1  ;;  %2816 = vmatpush.bf16.msra.mxu2 %v8193_v6  ;;  %v8169_v11 = vor.u32 %v9707_v7, %v8168_v34  ;;  %v9719_v1 = vld [vmem:[#allocation7 + $0x194] sm:$0xf0]  ;;  %v8218_v6 = vld [vmem:[#allocation7 + $0x198] sm:$0xf0]  ;;  %v8392_v7 = vld [vmem:[#allocation7 + $0x2f0] sm:$0xf] }
 0x98a   :  { %2946 = vmatpush.bf16.msrb.mxu3 %v8249_v61  ;;  %v8173_v61 = vor.u32 %v9706_v50, %v8170_v51  ;;  %v8217_v36 = vor.u32 %v9719_v1, %v8216_v58  ;;  %v8221_v13 = vor.u32 %v9718_v5, %v8218_v6  ;;  %v8394_v50 = vld [vmem:[#allocation7 + $0x2f8] sm:$0xf0]  ;;  %v9761_v1 = vld [vmem:[#allocation7 + $0x2e4] sm:$0xf0]  ;;  %v8386_v5 = vld [vmem:[#allocation7 + $0x2e8] sm:$0xf0] }
 0x98b   :  { %v9747_v6 = vld [vmem:[#allocation7 + $0x274] sm:$0xf0] }
 0x98c   :  { %2829 = vmatpush.bf16.msra.mxu0 %v8197_v39  ;;  %v9705_v39 = vld [vmem:[#allocation7 + $0x124] sm:$0xf0] }
 0x98d   :  { %2960 = vmatpush.bf16.msra.mxu1 %v8245_v55  ;;  %2817 = vmatpush.bf16.msra.mxu2 %v8185_v15  ;;  %v8161_v45 = vor.u32 %v9705_v39, %v8160_v35  ;;  %v8213_v15 = vor.u32 %v9716_v49, %v8210_v56  ;;  %v9746_v35 = vld [vmem:[#allocation7 + $0x274] sm:$0xf]  ;;  %v8330_v39 = vld [vmem:[#allocation7 + $0x278] sm:$0xf0] }
 0x98e   :  { %2947 = vmatpush.bf16.msrb.mxu3 %v8241_v37  ;;  %v9717_v37 = vld [vmem:[#allocation7 + $0x184] sm:$0xf0]  ;;  %v9758_v49 = vld [vmem:[#allocation7 + $0x2d4] sm:$0xf] }
 0x990   :  { %2830 = vmatpush.bf16.msra.mxu0 %v8189_v20  ;;  %v8154_v20 = vld [vmem:[#allocation7 + $0x118] sm:$0xf0] }
 0x991   :  { %2961 = vmatpush.bf16.msra.mxu1 %v8237_v9  ;;  %2818 = vmatpush.bf16.msra.mxu2 %v8177_v16 }
 0x992   :  { %2948 = vmatpush.bf16.msrb.mxu3 %v8233_v4 }
 0x994   :  { %2831 = vmatpush.bf16.msra.mxu0 %v8181_v22 }
 0x995   :  { %2962 = vmatpush.bf16.msra.mxu1 %v8229_v31  ;;  %2819 = vmatpush.bf16.msra.mxu2 %v8169_v11  ;;  %v9762_v11 = vld [vmem:[#allocation7 + $0x2f4] sm:$0xf] }
 0x996   :  { %2949 = vmatpush.bf16.msrb.mxu3 %v8225_v26  ;;  %v8397_v58 = vor.u32 %v9762_v11, %v8394_v50  ;;  %v9741_v11 = vld [vmem:[#allocation7 + $0x244] sm:$0xf0]  ;;  %v9740_v50 = vld [vmem:[#allocation7 + $0x244] sm:$0xf] }
 0x998   :  { %2832 = vmatpush.bf16.msra.mxu0 %v8173_v61 }
 0x999   :  { %2963 = vmatpush.bf16.msra.mxu1 %v8221_v13  ;;  %2820 = vmatpush.bf16.msra.mxu2 %v8161_v45 }
 0x99a   :  { %2950 = vmatpush.bf16.msrb.mxu3 %v8217_v36  ;;  %v8328_v36 = vld [vmem:[#allocation7 + $0x270] sm:$0xf] }
 0x99b   :  { %v8329_v56 = vor.u32 %v9747_v6, %v8328_v36  ;;  %v9752_v36 = vld [vmem:[#allocation7 + $0x2a4] sm:$0xf]  ;;  %v8354_v6 = vld [vmem:[#allocation7 + $0x2a8] sm:$0xf0] }
 0x99d   :  { %2964 = vmatpush.bf16.msra.mxu1 %v8213_v15  ;;  %v8320_v15 = vld [vmem:[#allocation7 + $0x260] sm:$0xf] }
 0x9f1   :  { %v2423_v48 = vpop.f32.mrf.mxu1 }
 0x9f2   :  { %v2427_v62 = vmul.f32 0.1, %v2423_v48  ;;  %v8165_v48 = vor.u32 %v9704_v41, %v8162_v46  ;;  %v8376_v46 = vld [vmem:[#allocation7 + $0x2d0] sm:$0xf] }
 0x9f4   :  { %2833 = vmatpush.bf16.msra.mxu0 %v8165_v48  ;;  %v9759_v48 = vld [vmem:[#allocation7 + $0x2d4] sm:$0xf0] }
 0x9f5   :  { %v2395_v38 = vpop.f32.mrf.mxu3 }
 0x9f6   :  { %v11043_v52 = vmul.f32 0.1, %v2395_v38  ;;  %v8208_v38 = vld [vmem:[#allocation7 + $0x180] sm:$0xf] }
 0x9f7   :  { %v8209_v55 = vor.u32 %v9717_v37, %v8208_v38 }
 0x9f8   :  { %v2428_v33 = vmul.f32 %v11043_v52, %v11043_v52 }
 0x9f9   :  { %2951 = vmatpush.bf16.msrb.mxu3 %v8209_v55  ;;  %v8378_v55 = vld [vmem:[#allocation7 + $0x2d8] sm:$0xf0] }
 0x9fa   :  { %v2429_v42 = vsub.f32 %v2427_v62, %v2428_v33  ;;  %v9703_v62 = vld [vmem:[#allocation7 + $0x114] sm:$0xf0]  ;;  %v9702_v33 = vld [vmem:[#allocation7 + $0x114] sm:$0xf] }
 0x9fb   :  { %v8153_v21 = vor.u32 %v9703_v62, %v8152_v14  ;;  %v8157_v23 = vor.u32 %v9702_v33, %v8154_v20  ;;  %v9744_v62 = vld [vmem:[#allocation7 + $0x264] sm:$0xf]  ;;  %v8322_v33 = vld [vmem:[#allocation7 + $0x268] sm:$0xf0]  ;;  %v8377_v20 = vor.u32 %v9759_v48, %v8376_v46  ;;  %v8298_v46 = vld [vmem:[#allocation7 + $0x238] sm:$0xf0] }
 0x9fc   :  { %v2430_v60 = vmax.f32 %v2429_v42, 0.0  ;;  %v9700_v42 = vld [vmem:[#allocation7 + $0x104] sm:$0xf] }
 0x9fd   :  { %2821 = vmatpush.bf16.msra.mxu2 %v8153_v21  ;;  %2834 = vmatpush.bf16.msra.mxu0 %v8157_v23  ;;  %v8149_v28 = vor.u32 %v9700_v42, %v8146_v12  ;;  %v8381_v21 = vor.u32 %v9758_v49, %v8378_v55  ;;  %v8368_v23 = vld [vmem:[#allocation7 + $0x2c0] sm:$0xf]  ;;  %v9743_v12 = vld [vmem:[#allocation7 + $0x254] sm:$0xf0]  ;;  %v9750_v55 = vld [vmem:[#allocation7 + $0x294] sm:$0xf] }
 0x9fe   :  { %v11047_v30 = vadd.f32 1e-05, %v2430_v60  ;;  %v2431_v60 = vperm.slane %v11043_v52, 0  ;;  %v9763_v52 = vld [vmem:[#allocation7 + $0x2f4] sm:$0xf0] }
 0x9ff   :  { %v8393_v61 = vor.u32 %v9763_v52, %v8392_v7  ;;  %v8304_v52 = vld [vmem:[#allocation7 + $0x240] sm:$0xf]  ;;  %v9751_v49 = vld [vmem:[#allocation7 + $0x294] sm:$0xf0] }
 0xa00   :  { %10036 = vrsqrt.f32 %v11047_v30  ;;  %vm2440_vm13 = vweird.f32 %v11047_v30  ;;  %v2432_v25 = vsub.f32 %v11036_v3, %v2431_v60 }
 0xa01   :  { %2822 = vmatpush.bf16.msra.mxu2 %v8145_v10  ;;  %2835 = vmatpush.bf16.msra.mxu0 %v8149_v28  ;;  %v8312_v10 = vld [vmem:[#allocation7 + $0x250] sm:$0xf]  ;;  %v9742_v28 = vld [vmem:[#allocation7 + $0x254] sm:$0xf] }
 0xa06   :  { %v10037_v57 = vpop.eup %10036 }
 0xa07   :  { %v2435_v47 = vmul.f32 %v10037_v57, %v11047_v30  ;;  %vm2441_vm12 = vweird.f32 %v10037_v57  ;;  %v8384_v30 = vld [vmem:[#allocation7 + $0x2e0] sm:$0xf] }
 0xa08   :  { %vm2442_vm11 = vmor %vm2440_vm13, %vm2441_vm12  ;;  %v8385_v41 = vor.u32 %v9761_v1, %v8384_v30  ;;  %v8352_v1 = vld [vmem:[#allocation7 + $0x2a0] sm:$0xf] }
 0xa09   :  { %v2436_v4 = vmul.f32 %v10037_v57, %v2435_v47  ;;  %v9745_v47 = vld [vmem:[#allocation7 + $0x264] sm:$0xf0] }
 0xa0a   :  { %v8321_v42 = vor.u32 %v9745_v47, %v8320_v15  ;;  %v8288_v47 = vld [vmem:[#allocation7 + $0x220] sm:$0xf] }
 0xa0b   :  { %v2437_v9 = vmul.f32 0.5, %v2436_v4  ;;  %v9757_v4 = vld [vmem:[#allocation7 + $0x2c4] sm:$0xf0] }
 0xa0c   :  { %v8369_v60 = vor.u32 %v9757_v4, %v8368_v23 }
 0xa0d   :  { %v2438_v16 = vsub.f32 1.5, %v2437_v9  ;;  %v8325_v9 = vor.u32 %v9744_v62, %v8322_v33  ;;  %v9737_v62 = vld [vmem:[#allocation7 + $0x224] sm:$0xf0] }
 0xa0f   :  { %v2439_v22 = vmul.f32 %v10037_v57, %v2438_v16  ;;  %v8314_v16 = vld [vmem:[#allocation7 + $0x258] sm:$0xf0] }
 0xa10   :  { %v8317_v7 = vor.u32 %v9742_v28, %v8314_v16  ;;  %v8280_v28 = vld [vmem:[#allocation7 + $0x210] sm:$0xf]  ;;  %v9735_v16 = vld [vmem:[#allocation7 + $0x214] sm:$0xf0] }
 0xa11   :  { %v2443_v2 = vsel %vm2442_vm11, %v10037_v57, %v2439_v22  ;;  %v8333_v57 = vor.u32 %v9746_v35, %v8330_v39  ;;  %v8373_v22 = vor.u32 %v9756_v63, %v8370_v27  ;;  %v8296_v39 = vld [vmem:[#allocation7 + $0x230] sm:$0xf]  ;;  %v8336_v63 = vld [vmem:[#allocation7 + $0x280] sm:$0xf]  ;;  %v9749_v27 = vld [vmem:[#allocation7 + $0x284] sm:$0xf0] }
 0xa12   :  { %v2444_v26 = vperm.slane %v2443_v2, 0  ;;  %v8360_v2 = vld [vmem:[#allocation7 + $0x2b0] sm:$0xf] }
 0xa14   :  { %v2445_v24 = vmul.f32 %v2444_v26, %v2432_v25  ;;  %v9755_v25 = vld [vmem:[#allocation7 + $0x2b4] sm:$0xf0] }
 0xa16   :  { %v2450_v29 = vadd.f32 %v10909_v19, %v2445_v24  ;;  %v9760_v19 = vld [vmem:[#allocation7 + $0x2e4] sm:$0xf] }
 0xa17   :  { %v8389_v45 = vor.u32 %v9760_v19, %v8386_v5  ;;  %v9753_v5 = vld [vmem:[#allocation7 + $0x2a4] sm:$0xf0] }
 0xa18   :  { %v2451_v31 = vmax.f32 %v2450_v29, 0.0  ;;  %v9754_v29 = vld [vmem:[#allocation7 + $0x2b4] sm:$0xf]  ;;  %v8353_v48 = vor.u32 %v9753_v5, %v8352_v1  ;;  %v11078_v5 = vld [vmem:[#allocation10 + $0x360] sm:$0xff] }
 0xa19   :  { %v11074_v1 = vld [vmem:[#allocation10 + $0x370] sm:$0xff] }
 0xa1a   :  { %v2456_v34 = vrot.slane %v2451_v31, 6  ;;  %v8362_v31 = vld [vmem:[#allocation7 + $0x2b8] sm:$0xf0]  ;;  %12477 = vst [vmem:[#allocation23_spill] sm:$0xff] %v11074_v1 }
 0xa1b   :  { %v8365_v30 = vor.u32 %v9754_v29, %v8362_v31  ;;  %v8281_v29 = vor.u32 %v9735_v16, %v8280_v28  ;;  %v11180_v28 = vld [vmem:[#allocation10 + $0x208] sm:$0xff]  ;;  %v11184_v16 = vld [vmem:[#allocation10 + $0x2d8] sm:$0xff] }
 0xa1c   :  { %2458 = vst [vmem:[#allocation2] sm:$0x7c] %v2456_v34  ;;  %v8313_v34 = vor.u32 %v9743_v12, %v8312_v10  ;;  %v8289_v10 = vor.u32 %v9737_v62, %v8288_v47  ;;  %v11136_v47 = vld [vmem:[#allocation10 + $0x318] sm:$0xff]  ;;  %v11140_v62 = vld [vmem:[#allocation10 + $0x230] sm:$0xff] }
 0xa1d   :  { %12482 = vst [vmem:[#allocation28_spill] sm:$0xff] %v11136_v47 }
 0xa1e   :  { %12484 = vst [vmem:[#allocation30_spill] sm:$0xff] %v11184_v16 }
 0xa23   :  { %v11058_v51 = vld [vmem:[#allocation2] sm:$0xff] }
 0xa24   :  { %3827 = vst [vmem:[#allocation2] sm:$0x7] %v12399_v8  ;;  %v11063_v3 = vpack.c.bf16 %v11058_v51, %v11058_v51 }
 0xa25   :  { %3829 = vst [vmem:[#allocation2] sm:$0x80] %v12399_v8 }
 0xa26   :  { %2697 = vmatmul.bf16.vlgmr.msra.gmra.mxu3 %v11063_v3  ;;  %2710 = vmatmul.bf16.vlgmr.msrb.gmra.mxu1 %v11063_v3  ;;  %v2498_v13 = vshll.u32 %v11063_v3, 16  ;;  %v2496_v38 = vshrl.u32 %v11063_v3, 16  ;;  %v2733_v33 = vrot.slane %v11063_v3, 1 }
 0xa27   :  { %3206 = vmatpush.bf16.msra.mxu3 %v8393_v61  ;;  %3219 = vmatpush.bf16.msrb.mxu1 %v8397_v58  ;;  %v8306_v61 = vld [vmem:[#allocation7 + $0x248] sm:$0xf0]  ;;  %v8361_v58 = vor.u32 %v9755_v25, %v8360_v2  ;;  %v8337_v2 = vor.u32 %v9749_v27, %v8336_v63  ;;  %v11158_v27 = vld [vmem:[#allocation10 + $0x2f8] sm:$0xff] }
 0xa28   :  { %v2500_v37 = vrot.slane %v2498_v13, 1  ;;  %v2860_v26 = vrot.slane %v2496_v38, 1  ;;  %v2861_v24 = vrot.slane %v2498_v13, 2  ;;  %v8305_v13 = vor.u32 %v9741_v11, %v8304_v52  ;;  %v9732_v52 = vld [vmem:[#allocation7 + $0x204] sm:$0xf]  ;;  %v11156_v63 = vld [vmem:[#allocation10 + $0x228] sm:$0xff] }
 0xa29   :  { %v8309_v35 = vor.u32 %v9740_v50, %v8306_v61  ;;  %v8274_v11 = vld [vmem:[#allocation7 + $0x208] sm:$0xf0] }
 0xa2a   :  { %v2501_v14 = vor.u32 %v2500_v37, %v2496_v38  ;;  %v2862_v19 = vor.u32 %v2861_v24, %v2860_v26  ;;  %v8357_v38 = vor.u32 %v9752_v36, %v8354_v6  ;;  %v8344_v37 = vld [vmem:[#allocation7 + $0x290] sm:$0xf]  ;;  %v11082_v36 = vld [vmem:[#allocation10 + $0x368] sm:$0xff] }
 0xa2b   :  { %3207 = vmatpush.bf16.msra.mxu3 %v8385_v41  ;;  %3220 = vmatpush.bf16.msrb.mxu1 %v8389_v45  ;;  %v9739_v41 = vld [vmem:[#allocation7 + $0x234] sm:$0xf0]  ;;  %v9738_v45 = vld [vmem:[#allocation7 + $0x234] sm:$0xf]  ;;  %v8345_v23 = vor.u32 %v9751_v49, %v8344_v37  ;;  %v11118_v49 = vld [vmem:[#allocation10 + $0x320] sm:$0xff] }
 0xa2c   :  { %2591 = vmatmul.bf16.vlgmr.msrb.gmra.mxu2 %v2501_v14  ;;  %2604 = vmatmul.bf16.vlgmr.msrb.gmra.mxu0 %v2501_v14  ;;  %v8297_v15 = vor.u32 %v9739_v41, %v8296_v39  ;;  %v8301_v14 = vor.u32 %v9738_v45, %v8298_v46  ;;  %v11086_v6 = vld [vmem:[#allocation10 + $0x350] sm:$0xff]  ;;  %v11096_v39 = vld [vmem:[#allocation10 + $0x278] sm:$0xff]  ;;  %v11100_v41 = vld [vmem:[#allocation10 + $0x348] sm:$0xff] }
 0xa2d   :  { %3071 = vmatpush.bf16.msrb.mxu2 %v8329_v56  ;;  %3084 = vmatpush.bf16.msrb.mxu0 %v8333_v57  ;;  %v8346_v56 = vld [vmem:[#allocation7 + $0x298] sm:$0xf0]  ;;  %v3099_v57 = vpack.c.bf16 %v11051_v18, %v11058_v51  ;;  %v8338_v18 = vld [vmem:[#allocation7 + $0x288] sm:$0xf0]  ;;  %12479 = vst [vmem:[#allocation25_spill] sm:$0xff] %v11086_v6  ;;  %v11102_v45 = vld [vmem:[#allocation10 + $0x260] sm:$0xff] }
 0xa2e   :  { %v8349_v4 = vor.u32 %v9750_v55, %v8346_v56  ;;  %v11104_v46 = vld [vmem:[#allocation10 + $0x330] sm:$0xff]  ;;  %v11120_v55 = vld [vmem:[#allocation10 + $0x258] sm:$0xff]  ;;  %v11124_v56 = vld [vmem:[#allocation10 + $0x328] sm:$0xff] }
 0xa2f   :  { %3208 = vmatpush.bf16.msra.mxu3 %v8377_v20  ;;  %3221 = vmatpush.bf16.msrb.mxu1 %v8381_v21  ;;  %v9736_v20 = vld [vmem:[#allocation7 + $0x224] sm:$0xf]  ;;  %v8290_v21 = vld [vmem:[#allocation7 + $0x228] sm:$0xf0]  ;;  %v3118_v51 = vshrl.u32 %v3099_v57, 16  ;;  %12481 = vst [vmem:[#allocation27_spill] sm:$0xff] %v11104_v46 }
 0xa30   :  { %v8293_v12 = vor.u32 %v9736_v20, %v8290_v21  ;;  %v11116_v37 = vld [vmem:[#allocation10 + $0x250] sm:$0xff]  ;;  %v11144_v20 = vld [vmem:[#allocation10 + $0x238] sm:$0xff]  ;;  %v11148_v21 = vld [vmem:[#allocation10 + $0x308] sm:$0xff] }
 0xa31   :  { %3072 = vmatpush.bf16.msrb.mxu2 %v8321_v42  ;;  %3085 = vmatpush.bf16.msrb.mxu0 %v8325_v9  ;;  %v9748_v42 = vld [vmem:[#allocation7 + $0x284] sm:$0xf]  ;;  %v3121_v9 = vshll.u32 %v3099_v57, 16  ;;  %v3120_v26 = vrot.slane %v3118_v51, 2  ;;  %v11168_v51 = vld [vmem:[#allocation10 + $0x218] sm:$0xff] }
 0xa32   :  { %v8341_v25 = vor.u32 %v9748_v42, %v8338_v18  ;;  %v11128_v57 = vld [vmem:[#allocation10 + $0x240] sm:$0xff]  ;;  %v11164_v42 = vld [vmem:[#allocation10 + $0x210] sm:$0xff] }
 0xa33   :  { %3209 = vmatpush.bf16.msra.mxu3 %v8369_v60  ;;  %3222 = vmatpush.bf16.msrb.mxu1 %v8373_v22  ;;  %v9734_v60 = vld [vmem:[#allocation7 + $0x214] sm:$0xf]  ;;  %v8282_v22 = vld [vmem:[#allocation7 + $0x218] sm:$0xf0]  ;;  %v3123_v24 = vrot.slane %v3121_v9, 3  ;;  %v11166_v18 = vld [vmem:[#allocation10 + $0x2e0] sm:$0xff] }
 0xa34   :  { %v8285_v31 = vor.u32 %v9734_v60, %v8282_v22  ;;  %v11172_v9 = vld [vmem:[#allocation10 + $0x2e8] sm:$0xff]  ;;  %v11188_v60 = vld [vmem:[#allocation10 + $0x1f0] sm:$0xff]  ;;  %v11190_v22 = vld [vmem:[#allocation10 + $0x2c0] sm:$0xff] }
 0xa35   :  { %3073 = vmatpush.bf16.msrb.mxu2 %v8313_v34  ;;  %3086 = vmatpush.bf16.msrb.mxu0 %v8317_v7  ;;  %v8272_v34 = vld [vmem:[#allocation7 + $0x200] sm:$0xf]  ;;  %v9733_v7 = vld [vmem:[#allocation7 + $0x204] sm:$0xf0]  ;;  %v3124_v50 = vor.u32 %v3123_v24, %v3120_v26  ;;  %v11200_v24 = vld [vmem:[#allocation10 + $0x2b0] sm:$0xff] }
 0xa36   :  { %2952 = vmatmul.bf16.vlgmr.msrb.gmra.mxu3 %v2862_v19  ;;  %2965 = vmatmul.bf16.vlgmr.msra.gmra.mxu1 %v2862_v19  ;;  %v8273_v61 = vor.u32 %v9733_v7, %v8272_v34  ;;  %v11076_v19 = vld [vmem:[#allocation10 + $0x378] sm:$0xff]  ;;  %v11198_v26 = vld [vmem:[#allocation10 + $0x1e0] sm:$0xff]  ;;  %12486 = vst [vmem:[#allocation32_spill] sm:$0xff] %v11200_v24  ;;  %v11212_v34 = vld [vmem:[#allocation10 + $0x1d0] sm:$0xff] }
 0xa37   :  { %3210 = vmatpush.bf16.msra.mxu3 %v8361_v58  ;;  %3223 = vmatpush.bf16.msrb.mxu1 %v8365_v30  ;;  %v8277_v58 = vor.u32 %v9732_v52, %v8274_v11  ;;  %v2989_v30 = vrot.slane %v11063_v3, 2  ;;  %12478 = vst [vmem:[#allocation24_spill] sm:$0xff] %v11076_v19  ;;  %v11088_v3 = vld [vmem:[#allocation10 + $0x358] sm:$0xff]  ;;  %v11214_v7 = vld [vmem:[#allocation10 + $0x2a0] sm:$0xff]  ;;  %v11220_v11 = vld [vmem:[#allocation10 + $0x2a8] sm:$0xff] }
 0xa38   :  { %v11216_v52 = vld [vmem:[#allocation10 + $0x1d8] sm:$0xff]  ;;  %12488 = vst [vmem:[#allocation34_spill] sm:$0xff] %v11220_v11 }
 0xa39   :  { %3074 = vmatpush.bf16.msrb.mxu2 %v8305_v13  ;;  %3087 = vmatpush.bf16.msrb.mxu0 %v8309_v35  ;;  %v11092_v13 = vld [vmem:[#allocation10 + $0x270] sm:$0xff]  ;;  %v11094_v35 = vld [vmem:[#allocation10 + $0x340] sm:$0xff] }
 0xa3a   :  { %12480 = vst [vmem:[#allocation26_spill] sm:$0xff] %v11094_v35 }
 0xa3b   :  { %3211 = vmatpush.bf16.msra.mxu3 %v8353_v48  ;;  %3224 = vmatpush.bf16.msrb.mxu1 %v8357_v38  ;;  %v11108_v48 = vld [vmem:[#allocation10 + $0x268] sm:$0xff]  ;;  %v11110_v38 = vld [vmem:[#allocation10 + $0x338] sm:$0xff] }
 0xa3c   :  { %2823 = vmatmul.bf16.vlgmr.msra.gmra.mxu2 %v2733_v33  ;;  %2836 = vmatmul.bf16.vlgmr.msra.gmra.mxu0 %v2733_v33  ;;  %v11142_v33 = vld [vmem:[#allocation10 + $0x300] sm:$0xff] }
 0xa3d   :  { %3075 = vmatpush.bf16.msrb.mxu2 %v8297_v15  ;;  %3088 = vmatpush.bf16.msrb.mxu0 %v8301_v14  ;;  %v11130_v15 = vld [vmem:[#allocation10 + $0x310] sm:$0xff]  ;;  %v11132_v14 = vld [vmem:[#allocation10 + $0x248] sm:$0xff] }
 0xa3f   :  { %3212 = vmatpush.bf16.msra.mxu3 %v8345_v23  ;;  %3225 = vmatpush.bf16.msrb.mxu1 %v8349_v4  ;;  %v11150_v23 = vld [vmem:[#allocation10 + $0x220] sm:$0xff]  ;;  %v11152_v4 = vld [vmem:[#allocation10 + $0x2f0] sm:$0xff] }
 0xa40   :  { %12483 = vst [vmem:[#allocation29_spill] sm:$0xff] %v11152_v4 }
 0xa41   :  { %3076 = vmatpush.bf16.msrb.mxu2 %v8289_v10  ;;  %3089 = vmatpush.bf16.msrb.mxu0 %v8293_v12  ;;  %v11176_v10 = vld [vmem:[#allocation10 + $0x200] sm:$0xff]  ;;  %v11178_v12 = vld [vmem:[#allocation10 + $0x2d0] sm:$0xff] }
 0xa43   :  { %3213 = vmatpush.bf16.msra.mxu3 %v8337_v2  ;;  %3226 = vmatpush.bf16.msrb.mxu1 %v8341_v25  ;;  %v11192_v2 = vld [vmem:[#allocation10 + $0x1f8] sm:$0xff]  ;;  %v11196_v25 = vld [vmem:[#allocation10 + $0x2c8] sm:$0xff] }
 0xa44   :  { %12485 = vst [vmem:[#allocation31_spill] sm:$0xff] %v11196_v25 }
 0xa45   :  { %3077 = vmatpush.bf16.msrb.mxu2 %v8281_v29  ;;  %3090 = vmatpush.bf16.msrb.mxu0 %v8285_v31  ;;  %v11204_v29 = vld [vmem:[#allocation10 + $0x1e8] sm:$0xff]  ;;  %v11206_v31 = vld [vmem:[#allocation10 + $0x2b8] sm:$0xff] }
 0xa46   :  { %3214 = vmatmul.bf16.vlgmr.msra.gmra.mxu3 %v3124_v50  ;;  %3227 = vmatmul.bf16.vlgmr.msrb.gmra.mxu1 %v3124_v50  ;;  %12487 = vst [vmem:[#allocation33_spill] sm:$0xff] %v11206_v31  ;;  %v11224_v50 = vld [vmem:[#allocation10 + $0x1c0] sm:$0xff] }
 0xa47   :  { %3372 = vmatpush.msra.mxu1 %v11076_v19  ;;  %3352 = vmatpush.msrb.mxu3 %v11096_v39 }
 0xa49   :  { %3078 = vmatpush.bf16.msrb.mxu2 %v8273_v61  ;;  %3091 = vmatpush.bf16.msrb.mxu0 %v8277_v58  ;;  %v11226_v61 = vld [vmem:[#allocation10 + $0x290] sm:$0xff]  ;;  %v11228_v58 = vld [vmem:[#allocation10 + $0x1c8] sm:$0xff] }
 0xa4a   :  { %3373 = vmatpush.msra.mxu1 %v11082_v36  ;;  %3353 = vmatpush.msrb.mxu3 %v11108_v48  ;;  %12489 = vst [vmem:[#allocation35_spill] sm:$0xff] %v11226_v61 }
 0xa4c   :  { %3079 = vmatmul.bf16.vlgmr.msrb.gmra.mxu2 %v2989_v30  ;;  %3092 = vmatmul.bf16.vlgmr.msrb.gmra.mxu0 %v2989_v30  ;;  %v11232_v30 = vld [vmem:[#allocation10 + $0x298] sm:$0xff] }
 0xa4d   :  { %3332 = vmatpush.msra.mxu0 %v11074_v1  ;;  %3374 = vmatpush.msra.mxu1 %v11088_v3  ;;  %12490 = vst [vmem:[#allocation36_spill] sm:$0xff] %v11232_v30 }
 0xa4e   :  { %3312 = vmatpush.msra.mxu2 %v11092_v13  ;;  %3354 = vmatpush.msrb.mxu3 %v11120_v55 }
 0xa4f   :  { %3333 = vmatpush.msra.mxu0 %v11078_v5  ;;  %3375 = vmatpush.msra.mxu1 %v11100_v41 }
 0xa50   :  { %3313 = vmatpush.msra.mxu2 %v11102_v45  ;;  %3355 = vmatpush.msrb.mxu3 %v11132_v14 }
 0xa51   :  { %3334 = vmatpush.msra.mxu0 %v11086_v6  ;;  %3376 = vmatpush.msra.mxu1 %v11110_v38 }
 0xa52   :  { %3314 = vmatpush.msra.mxu2 %v11116_v37  ;;  %3356 = vmatpush.msrb.mxu3 %v11144_v20 }
 0xa53   :  { %3335 = vmatpush.msra.mxu0 %v11094_v35  ;;  %3377 = vmatpush.msra.mxu1 %v11124_v56 }
 0xa54   :  { %3315 = vmatpush.msra.mxu2 %v11128_v57  ;;  %3357 = vmatpush.msrb.mxu3 %v11156_v63 }
 0xa55   :  { %3336 = vmatpush.msra.mxu0 %v11104_v46  ;;  %3378 = vmatpush.msra.mxu1 %v11136_v47 }
 0xa56   :  { %3316 = vmatpush.msra.mxu2 %v11140_v62  ;;  %3358 = vmatpush.msrb.mxu3 %v11168_v51 }
 0xa57   :  { %3337 = vmatpush.msra.mxu0 %v11118_v49  ;;  %3379 = vmatpush.msra.mxu1 %v11148_v21 }
 0xa58   :  { %3317 = vmatpush.msra.mxu2 %v11150_v23  ;;  %3359 = vmatpush.msrb.mxu3 %v11180_v28 }
 0xa59   :  { %3338 = vmatpush.msra.mxu0 %v11130_v15  ;;  %3380 = vmatpush.msra.mxu1 %v11158_v27 }
 0xa5a   :  { %3318 = vmatpush.msra.mxu2 %v11164_v42  ;;  %3360 = vmatpush.msrb.mxu3 %v11192_v2 }
 0xa5b   :  { %3339 = vmatpush.msra.mxu0 %v11142_v33  ;;  %3381 = vmatpush.msra.mxu1 %v11172_v9 }
 0xa5c   :  { %3319 = vmatpush.msra.mxu2 %v11176_v10  ;;  %3361 = vmatpush.msrb.mxu3 %v11204_v29 }
 0xa5d   :  { %3340 = vmatpush.msra.mxu0 %v11152_v4  ;;  %3382 = vmatpush.msra.mxu1 %v11184_v16 }
 0xa5e   :  { %3320 = vmatpush.msra.mxu2 %v11188_v60  ;;  %3362 = vmatpush.msrb.mxu3 %v11216_v52 }
 0xa5f   :  { %3341 = vmatpush.msra.mxu0 %v11166_v18  ;;  %3383 = vmatpush.msra.mxu1 %v11196_v25 }
 0xa60   :  { %3321 = vmatpush.msra.mxu2 %v11198_v26  ;;  %3363 = vmatpush.msrb.mxu3 %v11228_v58 }
 0xa61   :  { %3342 = vmatpush.msra.mxu0 %v11178_v12  ;;  %3384 = vmatpush.msra.mxu1 %v11206_v31 }
 0xa62   :  { %3322 = vmatpush.msra.mxu2 %v11212_v34  ;;  %3364 = vmatpush.msrb.mxu3 %v11242_v54 }
 0xa63   :  { %3343 = vmatpush.msra.mxu0 %v11190_v22  ;;  %3385 = vmatpush.msra.mxu1 %v11220_v11 }
 0xa64   :  { %3323 = vmatpush.msra.mxu2 %v11224_v50  ;;  %3365 = vmatpush.msrb.mxu3 %v11250_v32 }
 0xa65   :  { %3344 = vmatpush.msra.mxu0 %v11200_v24  ;;  %3386 = vmatpush.msra.mxu1 %v11232_v30 }
 0xa66   :  { %3324 = vmatpush.msra.mxu2 %v11238_v44  ;;  %3366 = vmatpush.msrb.mxu3 %v11260_v59 }
 0xa67   :  { %3345 = vmatpush.msra.mxu0 %v11214_v7  ;;  %3387 = vmatpush.msra.mxu1 %v11246_v40 }
 0xa68   :  { %3325 = vmatpush.msra.mxu2 %v11248_v53 }
 0xa69   :  { %3346 = vmatpush.msra.mxu0 %v11226_v61  ;;  %3468 = vmatpush.msrb.mxu1 %v11076_v19  ;;  %v11270_v19 = vld [vmem:[#allocation10 + $0x180] sm:$0xff] }
 0xa6a   :  { %3326 = vmatpush.msra.mxu2 %v11258_v17  ;;  %12498 = vst [vmem:[#allocation44_spill] sm:$0xff] %v11270_v19 }
 0xa6b   :  { %3347 = vmatpush.msra.mxu0 %v11240_v43  ;;  %3469 = vmatpush.msrb.mxu1 %v11082_v36 }
 0xa6c   :  { %3327 = vmatpush.msra.mxu2 %v11270_v19 }
 0xa6d   :  { %3428 = vmatpush.msrb.mxu0 %v11074_v1  ;;  %v11272_v1 = vld [vmem:[#allocation10 + $0x188] sm:$0xff]  ;;  %3470 = vmatpush.msrb.mxu1 %v11088_v3 }
 0xa6e   :  { %12499 = vst [vmem:[#allocation45_spill] sm:$0xff] %v11272_v1  ;;  %3367 = vmatpush.msrb.mxu3 %v11272_v1  ;;  %3408 = vmatpush.msrb.mxu2 %v11092_v13 }
 0xa6f   :  { %3429 = vmatpush.msrb.mxu0 %v11078_v5  ;;  %3471 = vmatpush.msrb.mxu1 %v11100_v41 }
 0xa70   :  { %3448 = vmatpush.msra.mxu3 %v11096_v39  ;;  %3409 = vmatpush.msrb.mxu2 %v11102_v45 }
 0xa71   :  { %3430 = vmatpush.msrb.mxu0 %v11086_v6  ;;  %3472 = vmatpush.msrb.mxu1 %v11110_v38 }
 0xa72   :  { %3449 = vmatpush.msra.mxu3 %v11108_v48  ;;  %3410 = vmatpush.msrb.mxu2 %v11116_v37 }
 0xa73   :  { %3431 = vmatpush.msrb.mxu0 %v11094_v35  ;;  %3473 = vmatpush.msrb.mxu1 %v11124_v56 }
 0xa74   :  { %3450 = vmatpush.msra.mxu3 %v11120_v55  ;;  %3411 = vmatpush.msrb.mxu2 %v11128_v57 }
 0xa75   :  { %3432 = vmatpush.msrb.mxu0 %v11104_v46  ;;  %3474 = vmatpush.msrb.mxu1 %v11136_v47 }
 0xa76   :  { %3451 = vmatpush.msra.mxu3 %v11132_v14  ;;  %3412 = vmatpush.msrb.mxu2 %v11140_v62 }
 0xa77   :  { %3433 = vmatpush.msrb.mxu0 %v11118_v49  ;;  %3475 = vmatpush.msrb.mxu1 %v11148_v21 }
 0xa78   :  { %3452 = vmatpush.msra.mxu3 %v11144_v20  ;;  %3413 = vmatpush.msrb.mxu2 %v11150_v23 }
 0xa79   :  { %3434 = vmatpush.msrb.mxu0 %v11130_v15  ;;  %3476 = vmatpush.msrb.mxu1 %v11158_v27 }
 0xa7a   :  { %3453 = vmatpush.msra.mxu3 %v11156_v63  ;;  %3414 = vmatpush.msrb.mxu2 %v11164_v42 }
 0xa7b   :  { %3435 = vmatpush.msrb.mxu0 %v11142_v33  ;;  %3477 = vmatpush.msrb.mxu1 %v11172_v9 }
 0xa7c   :  { %3454 = vmatpush.msra.mxu3 %v11168_v51  ;;  %3415 = vmatpush.msrb.mxu2 %v11176_v10 }
 0xa7d   :  { %3436 = vmatpush.msrb.mxu0 %v11152_v4  ;;  %3478 = vmatpush.msrb.mxu1 %v11184_v16 }
 0xa7e   :  { %3455 = vmatpush.msra.mxu3 %v11180_v28  ;;  %3416 = vmatpush.msrb.mxu2 %v11188_v60 }
 0xa7f   :  { %3437 = vmatpush.msrb.mxu0 %v11166_v18  ;;  %3479 = vmatpush.msrb.mxu1 %v11196_v25 }
 0xa80   :  { %3456 = vmatpush.msra.mxu3 %v11192_v2  ;;  %3417 = vmatpush.msrb.mxu2 %v11198_v26 }
 0xa81   :  { %3438 = vmatpush.msrb.mxu0 %v11178_v12  ;;  %3480 = vmatpush.msrb.mxu1 %v11206_v31 }
 0xa82   :  { %3457 = vmatpush.msra.mxu3 %v11204_v29  ;;  %3418 = vmatpush.msrb.mxu2 %v11212_v34 }
 0xa83   :  { %3439 = vmatpush.msrb.mxu0 %v11190_v22  ;;  %3481 = vmatpush.msrb.mxu1 %v11220_v11 }
 0xa84   :  { %3458 = vmatpush.msra.mxu3 %v11216_v52  ;;  %3419 = vmatpush.msrb.mxu2 %v11224_v50 }
 0xa85   :  { %3440 = vmatpush.msrb.mxu0 %v11200_v24  ;;  %3482 = vmatpush.msrb.mxu1 %v11232_v30 }
 0xa86   :  { %3459 = vmatpush.msra.mxu3 %v11228_v58  ;;  %3420 = vmatpush.msrb.mxu2 %v11238_v44 }
 0xa87   :  { %3441 = vmatpush.msrb.mxu0 %v11214_v7  ;;  %3483 = vmatpush.msrb.mxu1 %v11246_v40 }
 0xa88   :  { %3421 = vmatpush.msrb.mxu2 %v11248_v53  ;;  %v12504_v53 = vld [vmem:[#allocation23_spill] sm:$0xff] }
 0xa89   :  { %3442 = vmatpush.msrb.mxu0 %v11226_v61 }
 0xa8a   :  { %3422 = vmatpush.msrb.mxu2 %v11258_v17 }
 0xa8b   :  { %3443 = vmatpush.msrb.mxu0 %v11240_v43 }
 0xa8c   :  { %3423 = vmatpush.msrb.mxu2 %v11270_v19 }
 0xaa3   :  { %v11234_v8 = vpop.f32.mrf.mxu1 }
 0xaa9   :  { %v11264_v0 = vpop.f32.mrf.mxu0  ;;  %v11266_v54 = vpop.f32.mrf.mxu3 }
 0xaaa   :  { %v2712_v25 = vadd.f32 %v11234_v8, %v11264_v0  ;;  %v12501_v0 = vld [vmem:[#allocation41_spill] sm:$0xff] }
 0xaab   :  { %v2713_v32 = vpop.f32.mrf.mxu1 }
 0xaaf   :  { %v11284_v6 = vpop.f32.mrf.mxu2 }
 0xab1   :  { %v2607_v32 = vpop.f32.mrf.mxu0  ;;  %v2700_v35 = vpop.f32.mrf.mxu3 }
 0xab3   :  { %v2966_v46 = vpop.f32.mrf.mxu1 }
 0xab7   :  { %v2594_v35 = vpop.f32.mrf.mxu2 }
 0xab9   :  { %v2837_v32 = vpop.f32.mrf.mxu0  ;;  %v2953_v47 = vpop.f32.mrf.mxu3 }
 0xaba   :  { %v2842_v31 = vadd.f32 %v2837_v32, %v2712_v25 }
 0xabb   :  { %v2968_v4 = vpop.f32.mrf.mxu1 }
 0xabc   :  { %v2971_v61 = vadd.f32 %v2966_v46, %v2842_v31 }
 0xabf   :  { %v2824_v35 = vpop.f32.mrf.mxu2 }
 0xac1   :  { %v2839_v4 = vpop.f32.mrf.mxu0  ;;  %v2955_v16 = vpop.f32.mrf.mxu3 }
 0xac2   :  { %v12500_v16 = vld [vmem:[#allocation38_spill] sm:$0xff]  ;;  %v2699_v4 = vadd.f32 %v11266_v54, %v11284_v6 }
 0xac3   :  { %v3228_v24 = vpop.f32.mrf.mxu1  ;;  %3460 = vmatpush.msra.mxu3 %v12500_v16 }
 0xac4   :  { %v2841_v43 = vadd.f32 %v2824_v35, %v2699_v4 }
 0xac5   :  { %3461 = vmatpush.msra.mxu3 %v12501_v0 }
 0xac6   :  { %v2970_v6 = vadd.f32 %v2953_v47, %v2841_v43 }
 0xac7   :  { %v2826_v8 = vpop.f32.mrf.mxu2  ;;  %3462 = vmatpush.msra.mxu3 %v11260_v59 }
 0xac9   :  { %v3093_v25 = vpop.f32.mrf.mxu0  ;;  %v3215_v32 = vpop.f32.mrf.mxu3  ;;  %3463 = vmatpush.msra.mxu3 %v11272_v1 }
 0xaca   :  { %v3098_v30 = vadd.f32 %v3093_v25, %v2971_v61 }
 0xacb   :  { %v3230_v40 = vpop.f32.mrf.mxu1 }
 0xacc   :  { %v11342_v8 = vadd.f32 %v3228_v24, %v3098_v30 }
 0xace   :  { %12502 = vst [vmem:[#allocation38_spill] sm:$0xff] %v11342_v8  ;;  %v3305_v0 = vsel %vm529_vm8, %v11342_v8, 0.0  ;;  %v3393_v54 = vmul.f32 %v11342_v8, %v11342_v8 }
 0xacf   :  { %v3306_v46 = vrot.slane %v3305_v0, 4  ;;  %v3080_v31 = vpop.f32.mrf.mxu2 }
 0xad0   :  { %v3401_v59 = vsel %vm529_vm8, %v3393_v54, 0.0  ;;  %v3097_v35 = vadd.f32 %v3080_v31, %v2970_v6 }
 0xad1   :  { %v3307_v61 = vadd.f32 %v3306_v46, %v3305_v0  ;;  %v3402_v4 = vrot.slane %v3401_v59, 4  ;;  %v3095_v25 = vpop.f32.mrf.mxu0  ;;  %v3217_v40 = vpop.f32.mrf.mxu3 }
 0xad2   :  { %v11349_v19 = vadd.f32 %v3215_v32, %v3097_v35 }
 0xad3   :  { %v3308_v24 = vrot.slane %v3307_v61, 2  ;;  %v3403_v30 = vadd.f32 %v3402_v4, %v3401_v59 }
 0xad4   :  { %12503 = vst [vmem:[#allocation46_spill] sm:$0xff] %v11349_v19  ;;  %v3298_v1 = vsel %vm529_vm8, %v11349_v19, 0.0  ;;  %v3392_v8 = vmul.f32 %v11349_v19, %v11349_v19  ;;  %v12505_v19 = vld [vmem:[#allocation24_spill] sm:$0xff] }
 0xad5   :  { %v3404_v43 = vrot.slane %v3403_v30, 2  ;;  %v3299_v47 = vrot.slane %v3298_v1, 4  ;;  %v3309_v17 = vadd.f32 %v3308_v24, %v3307_v61  ;;  %v12506_v24 = vld [vmem:[#allocation25_spill] sm:$0xff] }
 0xad6   :  { %v3394_v54 = vsel %vm529_vm8, %v3392_v8, 0.0 }
 0xad7   :  { %v3300_v6 = vadd.f32 %v3299_v47, %v3298_v1  ;;  %v3395_v0 = vrot.slane %v3394_v54, 4  ;;  %v3082_v46 = vpop.f32.mrf.mxu2  ;;  %v3310_v31 = vrot.slane %v3309_v17, 1  ;;  %v3405_v25 = vadd.f32 %v3404_v43, %v3403_v30  ;;  %v12507_v43 = vld [vmem:[#allocation26_spill] sm:$0xff]  ;;  %v12508_v47 = vld [vmem:[#allocation27_spill] sm:$0xff] }
 0xad8   :  { %v12512_v46 = vld [vmem:[#allocation31_spill] sm:$0xff] }
 0xad9   :  { %v3301_v32 = vrot.slane %v3300_v6, 2  ;;  %v3396_v35 = vadd.f32 %v3395_v0, %v3394_v54  ;;  %v3311_v40 = vadd.f32 %v3310_v31, %v3309_v17  ;;  %v3406_v61 = vrot.slane %v3405_v25, 1  ;;  %v12509_v54 = vld [vmem:[#allocation28_spill] sm:$0xff]  ;;  %v12511_v0 = vld [vmem:[#allocation30_spill] sm:$0xff] }
 0xada   :  { %v12513_v31 = vld [vmem:[#allocation32_spill] sm:$0xff] }
 0xadb   :  { %v3302_v59 = vadd.f32 %v3301_v32, %v3300_v6  ;;  %v3397_v4 = vrot.slane %v3396_v35, 2  ;;  %3348 = vmatmul.f32.vlgmr.msra.gmra.mxu0 %v3311_v40  ;;  %3388 = vmatmul.f32.vlgmr.msra.gmra.mxu1 %v3311_v40  ;;  %v3407_v17 = vadd.f32 %v3406_v61, %v3405_v25  ;;  %v12510_v6 = vld [vmem:[#allocation29_spill] sm:$0xff]  ;;  %v12515_v32 = vld [vmem:[#allocation34_spill] sm:$0xff] }
 0xadc   :  { %3629 = vmatpush.msra.mxu0 %v12504_v53  ;;  %3669 = vmatpush.msra.mxu1 %v12505_v19  ;;  %v12514_v25 = vld [vmem:[#allocation33_spill] sm:$0xff]  ;;  %v12520_v61 = vld [vmem:[#allocation42_spill] sm:$0xff] }
 0xadd   :  { %v3303_v11 = vrot.slane %v3302_v59, 1  ;;  %v3398_v1 = vadd.f32 %v3397_v4, %v3396_v35  ;;  %v12516_v35 = vld [vmem:[#allocation40_spill] sm:$0xff]  ;;  %v12517_v40 = vld [vmem:[#allocation41_spill] sm:$0xff] }
 0xade   :  { %3630 = vmatpush.msra.mxu0 %v11078_v5  ;;  %3670 = vmatpush.msra.mxu1 %v11082_v36  ;;  %v12519_v4 = vld [vmem:[#allocation36_spill] sm:$0xff] }
 0xadf   :  { %v3304_v8 = vadd.f32 %v3303_v11, %v3302_v59  ;;  %v3399_v30 = vrot.slane %v3398_v1, 1  ;;  %v12518_v59 = vld [vmem:[#allocation35_spill] sm:$0xff] }
 0xae0   :  { %3631 = vmatpush.msra.mxu0 %v12506_v24  ;;  %3671 = vmatpush.msra.mxu1 %v11088_v3 }
 0xae1   :  { %3328 = vmatmul.f32.vlgmr.msra.gmra.mxu2 %v3304_v8  ;;  %3368 = vmatmul.f32.vlgmr.msrb.gmra.mxu3 %v3304_v8  ;;  %v3400_v11 = vadd.f32 %v3399_v30, %v3398_v1  ;;  %v12521_v1 = vld [vmem:[#allocation43_spill] sm:$0xff]  ;;  %v12522_v8 = vld [vmem:[#allocation37_spill] sm:$0xff]  ;;  %v12524_v30 = vld [vmem:[#allocation44_spill] sm:$0xff] }
 0xae2   :  { %3609 = vmatpush.msra.mxu2 %v11092_v13  ;;  %3649 = vmatpush.msrb.mxu3 %v11096_v39 }
 0xae3   :  { %3444 = vmatmul.f32.vlgmr.msrb.gmra.mxu0 %v3407_v17  ;;  %3484 = vmatmul.f32.vlgmr.msrb.gmra.mxu1 %v3407_v17  ;;  %v12523_v17 = vld [vmem:[#allocation39_spill] sm:$0xff] }
 0xae4   :  { %3610 = vmatpush.msra.mxu2 %v11102_v45  ;;  %3650 = vmatpush.msrb.mxu3 %v11108_v48 }
 0xae5   :  { %3632 = vmatpush.msra.mxu0 %v12507_v43  ;;  %3672 = vmatpush.msra.mxu1 %v11100_v41 }
 0xae6   :  { %3611 = vmatpush.msra.mxu2 %v11116_v37  ;;  %3651 = vmatpush.msrb.mxu3 %v11120_v55 }
 0xae7   :  { %3633 = vmatpush.msra.mxu0 %v12508_v47  ;;  %3673 = vmatpush.msra.mxu1 %v11110_v38 }
 0xae8   :  { %3612 = vmatpush.msra.mxu2 %v11128_v57  ;;  %3652 = vmatpush.msrb.mxu3 %v11132_v14 }
 0xae9   :  { %3424 = vmatmul.f32.vlgmr.msrb.gmra.mxu2 %v3400_v11  ;;  %3464 = vmatmul.f32.vlgmr.msra.gmra.mxu3 %v3400_v11  ;;  %v12525_v11 = vld [vmem:[#allocation45_spill] sm:$0xff] }
 0xaea   :  { %3613 = vmatpush.msra.mxu2 %v11140_v62  ;;  %3653 = vmatpush.msrb.mxu3 %v11144_v20 }
 0xaeb   :  { %3634 = vmatpush.msra.mxu0 %v11118_v49  ;;  %3674 = vmatpush.msra.mxu1 %v11124_v56 }
 0xaec   :  { %3614 = vmatpush.msra.mxu2 %v11150_v23  ;;  %3654 = vmatpush.msrb.mxu3 %v11156_v63 }
 0xaed   :  { %3635 = vmatpush.msra.mxu0 %v11130_v15  ;;  %3675 = vmatpush.msra.mxu1 %v12509_v54 }
 0xaee   :  { %3615 = vmatpush.msra.mxu2 %v11164_v42  ;;  %3655 = vmatpush.msrb.mxu3 %v11168_v51 }
 0xaef   :  { %3636 = vmatpush.msra.mxu0 %v11142_v33  ;;  %3676 = vmatpush.msra.mxu1 %v11148_v21 }
 0xaf0   :  { %3616 = vmatpush.msra.mxu2 %v11176_v10  ;;  %3656 = vmatpush.msrb.mxu3 %v11180_v28 }
 0xaf1   :  { %3637 = vmatpush.msra.mxu0 %v12510_v6  ;;  %3677 = vmatpush.msra.mxu1 %v11158_v27 }
 0xaf2   :  { %3617 = vmatpush.msra.mxu2 %v11188_v60  ;;  %3657 = vmatpush.msrb.mxu3 %v11192_v2 }
 0xaf3   :  { %3638 = vmatpush.msra.mxu0 %v11166_v18  ;;  %3678 = vmatpush.msra.mxu1 %v11172_v9 }
 0xaf4   :  { %3618 = vmatpush.msra.mxu2 %v11198_v26  ;;  %3658 = vmatpush.msrb.mxu3 %v11204_v29 }
 0xaf5   :  { %3639 = vmatpush.msra.mxu0 %v11178_v12  ;;  %3679 = vmatpush.msra.mxu1 %v12511_v0 }
 0xaf6   :  { %3619 = vmatpush.msra.mxu2 %v11212_v34  ;;  %3659 = vmatpush.msrb.mxu3 %v11216_v52 }
 0xaf7   :  { %3640 = vmatpush.msra.mxu0 %v11190_v22  ;;  %3680 = vmatpush.msra.mxu1 %v12512_v46 }
 0xaf8   :  { %3620 = vmatpush.msra.mxu2 %v11224_v50  ;;  %3660 = vmatpush.msrb.mxu3 %v11228_v58 }
 0xaf9   :  { %3641 = vmatpush.msra.mxu0 %v12513_v31  ;;  %3681 = vmatpush.msra.mxu1 %v12514_v25 }
 0xafa   :  { %3621 = vmatpush.msra.mxu2 %v11238_v44  ;;  %3661 = vmatpush.msrb.mxu3 %v12500_v16 }
 0xafb   :  { %3642 = vmatpush.msra.mxu0 %v11214_v7  ;;  %3682 = vmatpush.msra.mxu1 %v12515_v32 }
 0xafc   :  { %3622 = vmatpush.msra.mxu2 %v12516_v35  ;;  %3662 = vmatpush.msrb.mxu3 %v12517_v40 }
 0xafd   :  { %3643 = vmatpush.msra.mxu0 %v12518_v59  ;;  %3683 = vmatpush.msra.mxu1 %v12519_v4 }
 0xafe   :  { %3623 = vmatpush.msra.mxu2 %v12520_v61  ;;  %3663 = vmatpush.msrb.mxu3 %v12521_v1 }
 0xaff   :  { %3644 = vmatpush.msra.mxu0 %v12522_v8  ;;  %3684 = vmatpush.msra.mxu1 %v12523_v17 }
 0xb00   :  { %3624 = vmatpush.msra.mxu2 %v12524_v30  ;;  %3664 = vmatpush.msrb.mxu3 %v12525_v11 }
 0xb01   :  { %3725 = vmatpush.msrb.mxu0 %v12504_v53  ;;  %3765 = vmatpush.msrb.mxu1 %v12505_v19 }
 0xb02   :  { %3705 = vmatpush.msrb.mxu2 %v11092_v13  ;;  %3745 = vmatpush.msra.mxu3 %v11096_v39 }
 0xb03   :  { %3726 = vmatpush.msrb.mxu0 %v11078_v5  ;;  %3766 = vmatpush.msrb.mxu1 %v11082_v36 }
 0xb04   :  { %3706 = vmatpush.msrb.mxu2 %v11102_v45  ;;  %3746 = vmatpush.msra.mxu3 %v11108_v48 }
 0xb05   :  { %3727 = vmatpush.msrb.mxu0 %v12506_v24  ;;  %3767 = vmatpush.msrb.mxu1 %v11088_v3 }
 0xb06   :  { %3707 = vmatpush.msrb.mxu2 %v11116_v37  ;;  %3747 = vmatpush.msra.mxu3 %v11120_v55 }
 0xb07   :  { %3728 = vmatpush.msrb.mxu0 %v12507_v43  ;;  %3768 = vmatpush.msrb.mxu1 %v11100_v41 }
 0xb08   :  { %3708 = vmatpush.msrb.mxu2 %v11128_v57  ;;  %3748 = vmatpush.msra.mxu3 %v11132_v14 }
 0xb09   :  { %3729 = vmatpush.msrb.mxu0 %v12508_v47  ;;  %3769 = vmatpush.msrb.mxu1 %v11110_v38 }
 0xb0a   :  { %3709 = vmatpush.msrb.mxu2 %v11140_v62  ;;  %3749 = vmatpush.msra.mxu3 %v11144_v20 }
 0xb0b   :  { %3730 = vmatpush.msrb.mxu0 %v11118_v49  ;;  %3770 = vmatpush.msrb.mxu1 %v11124_v56 }
 0xb0c   :  { %3710 = vmatpush.msrb.mxu2 %v11150_v23  ;;  %3750 = vmatpush.msra.mxu3 %v11156_v63 }
 0xb0d   :  { %3731 = vmatpush.msrb.mxu0 %v11130_v15  ;;  %3771 = vmatpush.msrb.mxu1 %v12509_v54 }
 0xb0e   :  { %3711 = vmatpush.msrb.mxu2 %v11164_v42  ;;  %3751 = vmatpush.msra.mxu3 %v11168_v51 }
 0xb0f   :  { %3732 = vmatpush.msrb.mxu0 %v11142_v33  ;;  %3772 = vmatpush.msrb.mxu1 %v11148_v21 }
 0xb10   :  { %3712 = vmatpush.msrb.mxu2 %v11176_v10  ;;  %3752 = vmatpush.msra.mxu3 %v11180_v28 }
 0xb11   :  { %3733 = vmatpush.msrb.mxu0 %v12510_v6  ;;  %3773 = vmatpush.msrb.mxu1 %v11158_v27 }
 0xb12   :  { %3713 = vmatpush.msrb.mxu2 %v11188_v60  ;;  %3753 = vmatpush.msra.mxu3 %v11192_v2 }
 0xb13   :  { %3734 = vmatpush.msrb.mxu0 %v11166_v18  ;;  %3774 = vmatpush.msrb.mxu1 %v11172_v9 }
 0xb14   :  { %3714 = vmatpush.msrb.mxu2 %v11198_v26  ;;  %3754 = vmatpush.msra.mxu3 %v11204_v29 }
 0xb15   :  { %3735 = vmatpush.msrb.mxu0 %v11178_v12  ;;  %3775 = vmatpush.msrb.mxu1 %v12511_v0  ;;  %v12528_v0 = vld [vmem:[#allocation17_spill] sm:$0xff] }
 0xb16   :  { %3715 = vmatpush.msrb.mxu2 %v11212_v34  ;;  %3755 = vmatpush.msra.mxu3 %v11216_v52 }
 0xb17   :  { %3736 = vmatpush.msrb.mxu0 %v11190_v22  ;;  %3776 = vmatpush.msrb.mxu1 %v12512_v46  ;;  %v3540_v46 = vrot.slane %v12528_v0, 7 }
 0xb18   :  { %3716 = vmatpush.msrb.mxu2 %v11224_v50  ;;  %3756 = vmatpush.msra.mxu3 %v11228_v58 }
 0xb19   :  { %3737 = vmatpush.msrb.mxu0 %v12513_v31  ;;  %3777 = vmatpush.msrb.mxu1 %v12514_v25  ;;  %v12529_v31 = vld [vmem:[#allocation16_spill] sm:$0xff] }
 0xb1a   :  { %3717 = vmatpush.msrb.mxu2 %v11238_v44  ;;  %3757 = vmatpush.msra.mxu3 %v12500_v16  ;;  %v12527_v16 = vld [vmem:[#allocation38_spill] sm:$0xff]  ;;  %v3542_v25 = vrot.slane %v12529_v31, 7 }
 0xb1b   :  { %3738 = vmatpush.msrb.mxu0 %v11214_v7  ;;  %3778 = vmatpush.msrb.mxu1 %v12515_v32  ;;  %v12526_v7 = vld [vmem:[#allocation46_spill] sm:$0xff] }
 0xb1c   :  { %3718 = vmatpush.msrb.mxu2 %v12516_v35  ;;  %3758 = vmatpush.msra.mxu3 %v12517_v40 }
 0xb1d   :  { %3739 = vmatpush.msrb.mxu0 %v12518_v59  ;;  %3779 = vmatpush.msrb.mxu1 %v12519_v4  ;;  %v12530_v59 = vld [vmem:[#allocation18_spill] sm:$0xff] }
 0xb1e   :  { %3719 = vmatpush.msrb.mxu2 %v12520_v61  ;;  %3759 = vmatpush.msra.mxu3 %v12521_v1  ;;  %v3556_v4 = vrot.slane %v12530_v59, 6  ;;  %v9770_v59 = vld [vmem:[#allocation8 + $0x30] sm:$0xff] }
 0xb1f   :  { %3740 = vmatpush.msrb.mxu0 %v12522_v8  ;;  %3780 = vmatpush.msrb.mxu1 %v12523_v17 }
 0xb20   :  { %3720 = vmatpush.msrb.mxu2 %v12524_v30  ;;  %3760 = vmatpush.msra.mxu3 %v12525_v11 }
 0xb58   :  { %v3349_v53 = vpop.f32.mrf.mxu0  ;;  %v3389_v44 = vpop.f32.mrf.mxu1 }
 0xb60   :  { %v3445_v13 = vpop.f32.mrf.mxu0  ;;  %v3485_v39 = vpop.f32.mrf.mxu1 }
 0xb64   :  { %v3329_v19 = vpop.f32.mrf.mxu2  ;;  %v3369_v5 = vpop.f32.mrf.mxu3 }
 0xb65   :  { %v3350_v36 = vadd.f32 %v3349_v53, %v3329_v19  ;;  %v3390_v3 = vadd.f32 %v3389_v44, %v3369_v5  ;;  %v12531_v19 = vld [vmem:[#allocation19_spill] sm:$0xff] }
 0xb66   :  { %v3576_v5 = vrot.slane %v12531_v19, 5  ;;  %v9785_v19 = vld [vmem:[#allocation8 + $0xa8] sm:$0xff] }
 0xb67   :  { %v3488_v41 = vmul.f32 0.125, %v3350_v36  ;;  %v3489_v45 = vmul.f32 0.125, %v3390_v3 }
 0xb69   :  { %v3492_v55 = vmul.f32 %v3488_v41, %v3488_v41  ;;  %v3493_v56 = vmul.f32 %v3489_v45, %v3489_v45  ;;  %v3498_v60 = vperm.slane %v3488_v41, 0  ;;  %v3499_v2 = vperm.slane %v3489_v45, 0 }
 0xb6b   :  { %v3500_v52 = vsub.f32 %v12526_v7, %v3498_v60  ;;  %v3501_v24 = vsub.f32 %v12527_v16, %v3499_v2 }
 0xb6c   :  { %v3425_v48 = vpop.f32.mrf.mxu2  ;;  %v3465_v38 = vpop.f32.mrf.mxu3 }
 0xb6d   :  { %v3446_v37 = vadd.f32 %v3445_v13, %v3425_v48  ;;  %v3486_v49 = vadd.f32 %v3485_v39, %v3465_v38 }
 0xb6f   :  { %v3490_v57 = vmul.f32 0.125, %v3446_v37  ;;  %v3491_v15 = vmul.f32 0.125, %v3486_v49  ;;  %v12532_v37 = vld [vmem:[#allocation14_spill] sm:$0xff] }
 0xb70   :  { %v11491_v49 = vcvt.s32.f32 %v12532_v37 }
 0xb71   :  { %v3494_v14 = vsub.f32 %v3490_v57, %v3492_v55  ;;  %v3495_v62 = vsub.f32 %v3491_v15, %v3493_v56 }
 0xb73   :  { %v3496_v33 = vmax.f32 %v3494_v14, 0.0  ;;  %v3497_v20 = vmax.f32 %v3495_v62, 0.0 }
 0xb75   :  { %v3502_v21 = vadd.f32 1e-05, %v3496_v33  ;;  %v3503_v23 = vadd.f32 1e-05, %v3497_v20 }
 0xb77   :  { %10038 = vrsqrt.f32 %v3502_v21  ;;  %vm3510_vm11 = vweird.f32 %v3502_v21  ;;  %vm3520_vm7 = vweird.f32 %v3503_v23 }
 0xb78   :  { %10040 = vrsqrt.f32 %v3503_v23 }
 0xb7d   :  { %v10039_v63 = vpop.eup %10038 }
 0xb7e   :  { %v10041_v27 = vpop.eup %10040  ;;  %v3505_v42 = vmul.f32 %v10039_v63, %v3502_v21  ;;  %vm3511_vm12 = vweird.f32 %v10039_v63 }
 0xb7f   :  { %v3515_v18 = vmul.f32 %v10041_v27, %v3503_v23  ;;  %vm3521_vm13 = vweird.f32 %v10041_v27  ;;  %vm3512_vm0 = vmor %vm3510_vm11, %vm3511_vm12 }
 0xb80   :  { %v3506_v51 = vmul.f32 %v10039_v63, %v3505_v42  ;;  %vm3522_vm5 = vmor %vm3520_vm7, %vm3521_vm13 }
 0xb81   :  { %v3516_v9 = vmul.f32 %v10041_v27, %v3515_v18 }
 0xb82   :  { %v3507_v10 = vmul.f32 0.5, %v3506_v51 }
 0xb83   :  { %v3517_v12 = vmul.f32 0.5, %v3516_v9 }
 0xb84   :  { %v3508_v28 = vsub.f32 1.5, %v3507_v10 }
 0xb85   :  { %v3518_v22 = vsub.f32 1.5, %v3517_v12 }
 0xb86   :  { %v3509_v26 = vmul.f32 %v10039_v63, %v3508_v28 }
 0xb87   :  { %v3519_v29 = vmul.f32 %v10041_v27, %v3518_v22 }
 0xb88   :  { %v3513_v34 = vsel %vm3512_vm0, %v10039_v63, %v3509_v26 }
 0xb89   :  { %v3524_v50 = vperm.slane %v3513_v34, 0  ;;  %v3523_v58 = vsel %vm3522_vm5, %v10041_v27, %v3519_v29 }
 0xb8a   :  { %v3525_v43 = vperm.slane %v3523_v58, 0 }
 0xb8b   :  { %v3526_v47 = vmul.f32 %v3524_v50, %v3500_v52 }
 0xb8c   :  { %v3527_v54 = vmul.f32 %v3525_v43, %v3501_v24 }
 0xb8d   :  { %10042 = vtanh.f32 %v3526_v47 }
 0xb8e   :  { %10044 = vtanh.f32 %v3527_v54 }
 0xb93   :  { %v10043_v6 = vpop.eup %10042 }
 0xb94   :  { %v10045_v32 = vpop.eup %10044  ;;  %v3532_v35 = vrot.slane %v10043_v6, 7 }
 0xb95   :  { %v3533_v40 = vrot.slane %v10045_v32, 7 }
 0xb96   :  { %vm3536_vm0 = vcmp.gt.f32.partialorder %v10043_v6, %v3532_v35 }
 0xb97   :  { %v3538_v61 = vsel %vm3536_vm0, %v10043_v6, %v3532_v35  ;;  %v3544_v1 = vsel %vm3536_vm0, %v3540_v46, %v3542_v25  ;;  %vm3537_vm5 = vcmp.gt.f32.partialorder %v10045_v32, %v3533_v40  ;;  %v9771_v35 = vld [vmem:[#allocation8 + $0x38] sm:$0xff] }
 0xb98   :  { %v3548_v8 = vrot.slane %v3538_v61, 7  ;;  %v3560_v17 = vrot.slane %v3544_v1, 7  ;;  %v3539_v30 = vsel %vm3537_vm5, %v10045_v32, %v3533_v40  ;;  %v3545_v11 = vsel %vm3537_vm5, %v3540_v46, %v3542_v25  ;;  %v9779_v40 = vld [vmem:[#allocation8 + $0x78] sm:$0xff] }
 0xb99   :  { %v3549_v53 = vrot.slane %v3539_v30, 7  ;;  %v3561_v44 = vrot.slane %v3545_v11, 7  ;;  %v9787_v61 = vld [vmem:[#allocation8 + $0xb8] sm:$0xff]  ;;  %v9786_v30 = vld [vmem:[#allocation8 + $0xb0] sm:$0xff] }
 0xb9a   :  { %vm3552_vm7 = vcmp.gt.f32.partialorder %v10043_v6, %v3548_v8  ;;  %v9795_v1 = vld [vmem:[#allocation8 + $0xf8] sm:$0xff]  ;;  %v9794_v11 = vld [vmem:[#allocation8 + $0xf0] sm:$0xff] }
 0xb9b   :  { %v3554_v36 = vsel %vm3552_vm7, %v10043_v6, %v3548_v8  ;;  %v3564_v3 = vsel %vm3552_vm7, %v3556_v4, %v3560_v17  ;;  %vm3553_vm12 = vcmp.gt.f32.partialorder %v10045_v32, %v3549_v53  ;;  %v9769_v8 = vld [vmem:[#allocation8 + $0x28] sm:$0xff] }
 0xb9c   :  { %v3568_v13 = vrot.slane %v3554_v36, 7  ;;  %v3580_v39 = vrot.slane %v3564_v3, 7  ;;  %v3555_v41 = vsel %vm3553_vm12, %v10045_v32, %v3549_v53  ;;  %v3565_v45 = vsel %vm3553_vm12, %v3556_v4, %v3561_v44  ;;  %v9778_v4 = vld [vmem:[#allocation8 + $0x70] sm:$0xff]  ;;  %v9777_v17 = vld [vmem:[#allocation8 + $0x68] sm:$0xff]  ;;  %v9768_v53 = vld [vmem:[#allocation8 + $0x20] sm:$0xff] }
 0xb9d   :  { %v3569_v48 = vrot.slane %v3555_v41, 7  ;;  %v3581_v38 = vrot.slane %v3565_v45, 7  ;;  %v9776_v44 = vld [vmem:[#allocation8 + $0x60] sm:$0xff]  ;;  %v9767_v36 = vld [vmem:[#allocation8 + $0x18] sm:$0xff]  ;;  %v9766_v41 = vld [vmem:[#allocation8 + $0x10] sm:$0xff] }
 0xb9e   :  { %vm3572_vm13 = vcmp.gt.f32.partialorder %v10043_v6, %v3568_v13  ;;  %v9775_v3 = vld [vmem:[#allocation8 + $0x58] sm:$0xff]  ;;  %v9774_v45 = vld [vmem:[#allocation8 + $0x50] sm:$0xff] }
 0xb9f   :  { %v3574_v55 = vsel %vm3572_vm13, %v10043_v6, %v3568_v13  ;;  %v3584_v56 = vsel %vm3572_vm13, %v3576_v5, %v3580_v39  ;;  %vm3573_vm11 = vcmp.gt.f32.partialorder %v10045_v32, %v3569_v48  ;;  %v9784_v13 = vld [vmem:[#allocation8 + $0xa0] sm:$0xff] }
 0xba0   :  { %v3587_v57 = vperm.slane %v3584_v56, 3  ;;  %v3591_v15 = vperm.slane %v3574_v55, 3  ;;  %v3575_v14 = vsel %vm3573_vm11, %v10045_v32, %v3569_v48  ;;  %v3585_v62 = vsel %vm3573_vm11, %v3576_v5, %v3581_v38  ;;  %v9793_v5 = vld [vmem:[#allocation8 + $0xe8] sm:$0xff]  ;;  %v9792_v39 = vld [vmem:[#allocation8 + $0xe0] sm:$0xff]  ;;  %v9783_v48 = vld [vmem:[#allocation8 + $0x98] sm:$0xff] }
 0xba1   :  { %v3588_v33 = vperm.slane %v3585_v62, 3  ;;  %v3592_v20 = vperm.slane %v3575_v14, 3  ;;  %v9791_v38 = vld [vmem:[#allocation8 + $0xd8] sm:$0xff]  ;;  %v9765_v55 = vld [vmem:[#allocation8 + $0x8] sm:$0xff] }
 0xba2   :  { %vm3589_vm0 = vcmp.eq.f32.partialorder %v3587_v57, %v11491_v49  ;;  %v9773_v56 = vld [vmem:[#allocation8 + $0x48] sm:$0xff]  ;;  %v9782_v57 = vld [vmem:[#allocation8 + $0x90] sm:$0xff] }
 0xba3   :  { %v11494_v21 = vsel %vm3589_vm0, %v3591_v15, 0.0  ;;  %vm3590_vm5 = vcmp.eq.f32.partialorder %v3588_v33, %v11491_v49  ;;  %v9790_v15 = vld [vmem:[#allocation8 + $0xd0] sm:$0xff]  ;;  %v9764_v33 = vld [vmem:[#allocation8] sm:$0xff] }
 0xba4   :  { %v3595_v23 = vsel %vm529_vm8, %v11494_v21, 0.0  ;;  %v11499_v63 = vsel %vm3590_vm5, %v3592_v20, 0.0  ;;  %v3689_v27 = vmul.f32 %v11494_v21, %v11494_v21  ;;  %v9772_v20 = vld [vmem:[#allocation8 + $0x40] sm:$0xff] }
 0xba5   :  { %v3596_v42 = vrot.slane %v3595_v23, 4  ;;  %v3602_v18 = vsel %vm529_vm8, %v11499_v63, 0.0  ;;  %v3690_v51 = vmul.f32 %v11499_v63, %v11499_v63 }
 0xba6   :  { %v3603_v9 = vrot.slane %v3602_v18, 4  ;;  %v3691_v10 = vsel %vm529_vm8, %v3689_v27, 0.0  ;;  %v9827_v27 = vld [vmem:[#allocation8 + $0x1f8] sm:$0xff] }
 0xba7   :  { %v3597_v12 = vadd.f32 %v3596_v42, %v3595_v23  ;;  %v3692_v28 = vrot.slane %v3691_v10, 4  ;;  %v3698_v60 = vsel %vm529_vm8, %v3690_v51, 0.0  ;;  %v9819_v23 = vld [vmem:[#allocation8 + $0x1b8] sm:$0xff]  ;;  %v9781_v51 = vld [vmem:[#allocation8 + $0x88] sm:$0xff] }
 0xba8   :  { %v3604_v22 = vadd.f32 %v3603_v9, %v3602_v18  ;;  %v3699_v2 = vrot.slane %v3698_v60, 4  ;;  %v9789_v9 = vld [vmem:[#allocation8 + $0xc8] sm:$0xff] }
 0xba9   :  { %v3598_v26 = vrot.slane %v3597_v12, 2  ;;  %v3693_v29 = vadd.f32 %v3692_v28, %v3691_v10  ;;  %v9818_v28 = vld [vmem:[#allocation8 + $0x1b0] sm:$0xff] }
 0xbaa   :  { %v3605_v34 = vrot.slane %v3604_v22, 2  ;;  %v3700_v7 = vadd.f32 %v3699_v2, %v3698_v60  ;;  %v9826_v60 = vld [vmem:[#allocation8 + $0x1f0] sm:$0xff]  ;;  %v9788_v2 = vld [vmem:[#allocation8 + $0xc0] sm:$0xff] }
 0xbab   :  { %v3599_v52 = vadd.f32 %v3598_v26, %v3597_v12  ;;  %v3694_v50 = vrot.slane %v3693_v29, 2  ;;  %v9803_v26 = vld [vmem:[#allocation8 + $0x138] sm:$0xff] }
 0xbac   :  { %v3606_v58 = vadd.f32 %v3605_v34, %v3604_v22  ;;  %v3701_v16 = vrot.slane %v3700_v7, 2  ;;  %v9780_v22 = vld [vmem:[#allocation8 + $0x80] sm:$0xff] }
 0xbad   :  { %v3600_v24 = vrot.slane %v3599_v52, 1  ;;  %v3695_v54 = vadd.f32 %v3694_v50, %v3693_v29  ;;  %v9811_v29 = vld [vmem:[#allocation8 + $0x178] sm:$0xff] }
 0xbae   :  { %v3607_v43 = vrot.slane %v3606_v58, 1  ;;  %v3702_v0 = vadd.f32 %v3701_v16, %v3700_v7  ;;  %v9825_v16 = vld [vmem:[#allocation8 + $0x1e8] sm:$0xff] }
 0xbaf   :  { %v3601_v47 = vadd.f32 %v3600_v24, %v3599_v52  ;;  %v3696_v46 = vrot.slane %v3695_v54, 1 }
 0xbb0   :  { %v3608_v6 = vadd.f32 %v3607_v43, %v3606_v58  ;;  %v3703_v31 = vrot.slane %v3702_v0, 1  ;;  %v9817_v58 = vld [vmem:[#allocation8 + $0x1a8] sm:$0xff] }
 0xbb1   :  { %3625 = vmatmul.f32.vlgmr.msra.gmra.mxu2 %v3601_v47  ;;  %3665 = vmatmul.f32.vlgmr.msrb.gmra.mxu3 %v3601_v47  ;;  %v3697_v25 = vadd.f32 %v3696_v46, %v3695_v54 }
 0xbb2   :  { %3645 = vmatmul.f32.vlgmr.msra.gmra.mxu0 %v3608_v6  ;;  %3685 = vmatmul.f32.vlgmr.msra.gmra.mxu1 %v3608_v6  ;;  %v3704_v32 = vadd.f32 %v3703_v31, %v3702_v0  ;;  %v9802_v6 = vld [vmem:[#allocation8 + $0x130] sm:$0xff] }
 0xbb3   :  { %4146 = vmatpush.bf16.msrb.mxu3 %v9771_v35  ;;  %4159 = vmatpush.bf16.msra.mxu1 %v9779_v40  ;;  %v9810_v0 = vld [vmem:[#allocation8 + $0x170] sm:$0xff]  ;;  %v9816_v35 = vld [vmem:[#allocation8 + $0x1a0] sm:$0xff] }
 0xbb4   :  { %4024 = vmatpush.bf16.msra.mxu2 %v9787_v61  ;;  %4037 = vmatpush.bf16.msra.mxu0 %v9795_v1  ;;  %v9824_v40 = vld [vmem:[#allocation8 + $0x1e0] sm:$0xff]  ;;  %v9801_v61 = vld [vmem:[#allocation8 + $0x128] sm:$0xff] }
 0xbb5   :  { %v9809_v1 = vld [vmem:[#allocation8 + $0x168] sm:$0xff] }
 0xbb7   :  { %4147 = vmatpush.bf16.msrb.mxu3 %v9770_v59  ;;  %4160 = vmatpush.bf16.msra.mxu1 %v9778_v4 }
 0xbb8   :  { %4025 = vmatpush.bf16.msra.mxu2 %v9786_v30  ;;  %4038 = vmatpush.bf16.msra.mxu0 %v9794_v11  ;;  %v9815_v30 = vld [vmem:[#allocation8 + $0x198] sm:$0xff] }
 0xbb9   :  { %3721 = vmatmul.f32.vlgmr.msrb.gmra.mxu2 %v3697_v25  ;;  %3761 = vmatmul.f32.vlgmr.msra.gmra.mxu3 %v3697_v25  ;;  %v9823_v11 = vld [vmem:[#allocation8 + $0x1d8] sm:$0xff] }
 0xbba   :  { %3741 = vmatmul.f32.vlgmr.msrb.gmra.mxu0 %v3704_v32  ;;  %3781 = vmatmul.f32.vlgmr.msrb.gmra.mxu1 %v3704_v32 }
 0xbbb   :  { %4148 = vmatpush.bf16.msrb.mxu3 %v9769_v8  ;;  %4161 = vmatpush.bf16.msra.mxu1 %v9777_v17 }
 0xbbc   :  { %4026 = vmatpush.bf16.msra.mxu2 %v9785_v19  ;;  %4039 = vmatpush.bf16.msra.mxu0 %v9793_v5  ;;  %v9800_v19 = vld [vmem:[#allocation8 + $0x120] sm:$0xff] }
 0xbbd   :  { %v9808_v5 = vld [vmem:[#allocation8 + $0x160] sm:$0xff] }
 0xbbf   :  { %4149 = vmatpush.bf16.msrb.mxu3 %v9768_v53  ;;  %4162 = vmatpush.bf16.msra.mxu1 %v9776_v44 }
 0xbc0   :  { %4027 = vmatpush.bf16.msra.mxu2 %v9784_v13  ;;  %4040 = vmatpush.bf16.msra.mxu0 %v9792_v39  ;;  %v9799_v13 = vld [vmem:[#allocation8 + $0x118] sm:$0xff] }
 0xbc1   :  { %v9807_v39 = vld [vmem:[#allocation8 + $0x158] sm:$0xff] }
 0xbc3   :  { %4150 = vmatpush.bf16.msrb.mxu3 %v9767_v36  ;;  %4163 = vmatpush.bf16.msra.mxu1 %v9775_v3  ;;  %v9814_v36 = vld [vmem:[#allocation8 + $0x190] sm:$0xff] }
 0xbc4   :  { %4028 = vmatpush.bf16.msra.mxu2 %v9783_v48  ;;  %4041 = vmatpush.bf16.msra.mxu0 %v9791_v38  ;;  %v9822_v3 = vld [vmem:[#allocation8 + $0x1d0] sm:$0xff] }
 0xbc5   :  { %v9798_v48 = vld [vmem:[#allocation8 + $0x110] sm:$0xff] }
 0xbc6   :  { %v9806_v38 = vld [vmem:[#allocation8 + $0x150] sm:$0xff] }
 0xbc7   :  { %4151 = vmatpush.bf16.msrb.mxu3 %v9766_v41  ;;  %4164 = vmatpush.bf16.msra.mxu1 %v9774_v45  ;;  %v9813_v41 = vld [vmem:[#allocation8 + $0x188] sm:$0xff] }
 0xbc8   :  { %4029 = vmatpush.bf16.msra.mxu2 %v9782_v57  ;;  %4042 = vmatpush.bf16.msra.mxu0 %v9790_v15  ;;  %v9821_v45 = vld [vmem:[#allocation8 + $0x1c8] sm:$0xff] }
 0xbcb   :  { %4152 = vmatpush.bf16.msrb.mxu3 %v9765_v55  ;;  %4165 = vmatpush.bf16.msra.mxu1 %v9773_v56 }
 0xbcc   :  { %4030 = vmatpush.bf16.msra.mxu2 %v9781_v51  ;;  %4043 = vmatpush.bf16.msra.mxu0 %v9789_v9 }
 0xbcf   :  { %4153 = vmatpush.bf16.msrb.mxu3 %v9764_v33  ;;  %4166 = vmatpush.bf16.msra.mxu1 %v9772_v20 }
 0xbd0   :  { %4031 = vmatpush.bf16.msra.mxu2 %v9780_v22  ;;  %4044 = vmatpush.bf16.msra.mxu0 %v9788_v2 }
 0xbd3   :  { %4471 = vmatpush.bf16.msra.mxu3 %v9819_v23  ;;  %4484 = vmatpush.bf16.msrb.mxu1 %v9827_v27  ;;  %v9797_v23 = vld [vmem:[#allocation8 + $0x108] sm:$0xff] }
 0xbd4   :  { %4307 = vmatpush.bf16.msrb.mxu2 %v9803_v26  ;;  %4320 = vmatpush.bf16.msrb.mxu0 %v9811_v29  ;;  %v9805_v27 = vld [vmem:[#allocation8 + $0x148] sm:$0xff] }
 0xbd7   :  { %4472 = vmatpush.bf16.msra.mxu3 %v9818_v28  ;;  %4485 = vmatpush.bf16.msrb.mxu1 %v9826_v60  ;;  %v9804_v28 = vld [vmem:[#allocation8 + $0x140] sm:$0xff] }
 0xbd8   :  { %4308 = vmatpush.bf16.msrb.mxu2 %v9802_v6  ;;  %4321 = vmatpush.bf16.msrb.mxu0 %v9810_v0  ;;  %v9851_v0 = vld [vmem:[#allocation8 + $0x2b8] sm:$0xff] }
 0xbdb   :  { %4473 = vmatpush.bf16.msra.mxu3 %v9817_v58  ;;  %4486 = vmatpush.bf16.msrb.mxu1 %v9825_v16 }
 0xbdc   :  { %4309 = vmatpush.bf16.msrb.mxu2 %v9801_v61  ;;  %4322 = vmatpush.bf16.msrb.mxu0 %v9809_v1 }
 0xbdf   :  { %4474 = vmatpush.bf16.msra.mxu3 %v9816_v35  ;;  %4487 = vmatpush.bf16.msrb.mxu1 %v9824_v40  ;;  %v9850_v35 = vld [vmem:[#allocation8 + $0x2b0] sm:$0xff] }
 0xbe0   :  { %4310 = vmatpush.bf16.msrb.mxu2 %v9800_v19  ;;  %4323 = vmatpush.bf16.msrb.mxu0 %v9808_v5  ;;  %v9857_v19 = vld [vmem:[#allocation8 + $0x2e8] sm:$0xff]  ;;  %v9834_v5 = vld [vmem:[#allocation8 + $0x230] sm:$0xff] }
 0xbe3   :  { %4475 = vmatpush.bf16.msra.mxu3 %v9815_v30  ;;  %4488 = vmatpush.bf16.msrb.mxu1 %v9823_v11  ;;  %v9843_v11 = vld [vmem:[#allocation8 + $0x278] sm:$0xff] }
 0xbe4   :  { %4311 = vmatpush.bf16.msrb.mxu2 %v9799_v13  ;;  %4324 = vmatpush.bf16.msrb.mxu0 %v9807_v39  ;;  %v9856_v13 = vld [vmem:[#allocation8 + $0x2e0] sm:$0xff] }
 0xbe7   :  { %4476 = vmatpush.bf16.msra.mxu3 %v9814_v36  ;;  %4489 = vmatpush.bf16.msrb.mxu1 %v9822_v3  ;;  %v9842_v36 = vld [vmem:[#allocation8 + $0x270] sm:$0xff]  ;;  %v9848_v3 = vld [vmem:[#allocation8 + $0x2a0] sm:$0xff] }
 0xbe8   :  { %4312 = vmatpush.bf16.msrb.mxu2 %v9798_v48  ;;  %4325 = vmatpush.bf16.msrb.mxu0 %v9806_v38 }
 0xbeb   :  { %4477 = vmatpush.bf16.msra.mxu3 %v9813_v41  ;;  %4490 = vmatpush.bf16.msrb.mxu1 %v9821_v45  ;;  %v9833_v45 = vld [vmem:[#allocation8 + $0x228] sm:$0xff] }
 0xbec   :  { %4313 = vmatpush.bf16.msrb.mxu2 %v9797_v23  ;;  %4326 = vmatpush.bf16.msrb.mxu0 %v9805_v27  ;;  %v9840_v23 = vld [vmem:[#allocation8 + $0x260] sm:$0xff]  ;;  %v9846_v27 = vld [vmem:[#allocation8 + $0x290] sm:$0xff] }
 0xbf0   :  { %4327 = vmatpush.bf16.msrb.mxu0 %v9804_v28 }
 0xc2f   :  { %v3646_v14 = vpop.f32.mrf.mxu0  ;;  %v3686_v62 = vpop.f32.mrf.mxu1 }
 0xc34   :  { %v3626_v42 = vpop.f32.mrf.mxu2  ;;  %v3666_v18 = vpop.f32.mrf.mxu3 }
 0xc35   :  { %v3647_v10 = vadd.f32 %v3646_v14, %v3626_v42  ;;  %v3687_v12 = vadd.f32 %v3686_v62, %v3666_v18  ;;  %v9812_v14 = vld [vmem:[#allocation8 + $0x180] sm:$0xff] }
 0xc36   :  { %v9820_v62 = vld [vmem:[#allocation8 + $0x1c0] sm:$0xff]  ;;  %4478 = vmatpush.bf16.msra.mxu3 %v9812_v14 }
 0xc37   :  { %v11509_v34 = vmul.f32 0.125, %v3647_v10  ;;  %v11511_v7 = vmul.f32 0.125, %v3687_v12  ;;  %v3742_v52 = vpop.f32.mrf.mxu0  ;;  %v3782_v50 = vpop.f32.mrf.mxu1  ;;  %4491 = vmatpush.bf16.msrb.mxu1 %v9820_v62  ;;  %v9796_v12 = vld [vmem:[#allocation8 + $0x100] sm:$0xff] }
 0xc38   :  { %4314 = vmatpush.bf16.msrb.mxu2 %v9796_v12  ;;  %v9832_v62 = vld [vmem:[#allocation8 + $0x220] sm:$0xff]  ;;  %v9839_v12 = vld [vmem:[#allocation8 + $0x258] sm:$0xff] }
 0xc39   :  { %v3789_v46 = vmul.f32 %v11509_v34, %v11509_v34  ;;  %v3790_v31 = vmul.f32 %v11511_v7, %v11511_v7  ;;  %v3795_v9 = vperm.slane %v11509_v34, 0  ;;  %v3796_v60 = vperm.slane %v11511_v7, 0 }
 0xc3b   :  { %v3797_v29 = vsub.f32 %v11494_v21, %v3795_v9  ;;  %v3798_v34 = vsub.f32 %v11499_v63, %v3796_v60  ;;  %v9831_v9 = vld [vmem:[#allocation8 + $0x218] sm:$0xff]  ;;  %v9845_v60 = vld [vmem:[#allocation8 + $0x288] sm:$0xff] }
 0xc3c   :  { %v3722_v24 = vpop.f32.mrf.mxu2  ;;  %v3762_v43 = vpop.f32.mrf.mxu3 }
 0xc3d   :  { %v3743_v47 = vadd.f32 %v3742_v52, %v3722_v24  ;;  %v3783_v54 = vadd.f32 %v3782_v50, %v3762_v43 }
 0xc3f   :  { %v3787_v25 = vmul.f32 0.125, %v3743_v47  ;;  %v3788_v32 = vmul.f32 0.125, %v3783_v54 }
 0xc41   :  { %v3791_v59 = vsub.f32 %v3787_v25, %v3789_v46  ;;  %v3792_v4 = vsub.f32 %v3788_v32, %v3790_v31  ;;  %v12533_v46 = vmov 0.0   ;;  %v9859_v31 = vld [vmem:[#allocation8 + $0x2f8] sm:$0xff] }
 0xc43   :  { %v3793_v8 = vmax.f32 %v3791_v59, 0.0  ;;  %v3794_v17 = vmax.f32 %v3792_v4, 0.0  ;;  %v9858_v59 = vld [vmem:[#allocation8 + $0x2f0] sm:$0xff] }
 0xc45   :  { %v3799_v53 = vadd.f32 1e-05, %v3793_v8  ;;  %v3800_v44 = vadd.f32 1e-05, %v3794_v17  ;;  %v9835_v17 = vld [vmem:[#allocation8 + $0x238] sm:$0xff] }
 0xc47   :  { %10046 = vrsqrt.f32 %v3799_v53  ;;  %vm3807_vm13 = vweird.f32 %v3799_v53  ;;  %vm3817_vm0 = vweird.f32 %v3800_v44 }
 0xc48   :  { %10048 = vrsqrt.f32 %v3800_v44 }
 0xc4d   :  { %v10047_v55 = vpop.eup %10046 }
 0xc4e   :  { %v10049_v56 = vpop.eup %10048  ;;  %v3802_v57 = vmul.f32 %v10047_v55, %v3799_v53  ;;  %vm3808_vm7 = vweird.f32 %v10047_v55 }
 0xc4f   :  { %v3812_v15 = vmul.f32 %v10049_v56, %v3800_v44  ;;  %vm3818_vm12 = vweird.f32 %v10049_v56  ;;  %vm3809_vm11 = vmor %vm3807_vm13, %vm3808_vm7  ;;  %v9849_v44 = vld [vmem:[#allocation8 + $0x2a8] sm:$0xff] }
 0xc50   :  { %v3803_v33 = vmul.f32 %v10047_v55, %v3802_v57  ;;  %vm3819_vm5 = vmor %vm3817_vm0, %vm3818_vm12 }
 0xc51   :  { %v3813_v20 = vmul.f32 %v10049_v56, %v3812_v15  ;;  %v9855_v15 = vld [vmem:[#allocation8 + $0x2d8] sm:$0xff] }
 0xc52   :  { %v3804_v42 = vmul.f32 0.5, %v3803_v33  ;;  %v3843_v33 = vld [vmem:[#allocation2 + $0x10] sm:$0x3] }
 0xc53   :  { %v3814_v18 = vmul.f32 0.5, %v3813_v20  ;;  %v3844_v20 = vld [vmem:[#allocation2 + $0x18] sm:$0x3] }
 0xc54   :  { %v3805_v51 = vsub.f32 1.5, %v3804_v42  ;;  %v9854_v42 = vld [vmem:[#allocation8 + $0x2d0] sm:$0xff] }
 0xc55   :  { %v3815_v10 = vsub.f32 1.5, %v3814_v18 }
 0xc56   :  { %v3806_v22 = vmul.f32 %v10047_v55, %v3805_v51 }
 0xc57   :  { %v3816_v2 = vmul.f32 %v10049_v56, %v3815_v10 }
 0xc58   :  { %v3810_v26 = vsel %vm3809_vm11, %v10047_v55, %v3806_v22  ;;  %v9841_v55 = vld [vmem:[#allocation8 + $0x268] sm:$0xff]  ;;  %vm5528_vm11 = vcmask 39936  }
 0xc59   :  { %v3821_v52 = vperm.slane %v3810_v26, 0  ;;  %v3820_v50 = vsel %vm3819_vm5, %v10049_v56, %v3816_v2  ;;  %v9847_v56 = vld [vmem:[#allocation8 + $0x298] sm:$0xff]  ;;  %v9853_v22 = vld [vmem:[#allocation8 + $0x2c8] sm:$0xff] }
 0xc5a   :  { %v3822_v58 = vperm.slane %v3820_v50, 0 }
 0xc5b   :  { %v3823_v16 = vmul.f32 %v3821_v52, %v3797_v29  ;;  %v9830_v29 = vld [vmem:[#allocation8 + $0x210] sm:$0xff] }
 0xc5c   :  { %v3824_v24 = vmul.f32 %v3822_v58, %v3798_v34  ;;  %v9838_v34 = vld [vmem:[#allocation8 + $0x250] sm:$0xff]  ;;  %v9844_v58 = vld [vmem:[#allocation8 + $0x280] sm:$0xff] }
 0xc5d   :  { %10050 = vtanh.f32 %v3823_v16  ;;  %v9852_v16 = vld [vmem:[#allocation8 + $0x2c0] sm:$0xff] }
 0xc5e   :  { %10052 = vtanh.f32 %v3824_v24 }
 0xc63   :  { %v10051_v7 = vpop.eup %10050 }
 0xc64   :  { %v10053_v43 = vpop.eup %10052  ;;  %v3835_v47 = vrot.slane %v10051_v7, 5 }
 0xc65   :  { %v3836_v54 = vrot.slane %v10053_v43, 5  ;;  %v9829_v43 = vld [vmem:[#allocation8 + $0x208] sm:$0xff] }
 0xc66   :  { %3839 = vst [vmem:[#allocation2] sm:$0x78] %v3835_v47 }
 0xc67   :  { %3840 = vst [vmem:[#allocation2 + $0x8] sm:$0x78] %v3836_v54 }
 0xc6d   :  { %v11521_v6 = vld [vmem:[#allocation2] sm:$0xff] }
 0xc6e   :  { %v11525_v21 = vpack.c.bf16 %v11521_v6, %v11521_v6  ;;  %4836 = vst [vmem:[#allocation2] sm:$0x1] %v12533_v46  ;;  %v3842_v63 = vld [vmem:[#allocation2 + $0x8] sm:$0xff]  ;;  %v4498_v18 = vpack.c.bf16 %v3843_v33, %v11521_v6 }
 0xc6f   :  { %4837 = vst [vmem:[#allocation2 + $0x6] sm:$0x1] %v12533_v46  ;;  %v11529_v25 = vpack.c.bf16 %v3842_v63, %v3842_v63  ;;  %v4499_v51 = vpack.c.bf16 %v3844_v20, %v3842_v63  ;;  %v9837_v6 = vld [vmem:[#allocation8 + $0x248] sm:$0xff]  ;;  %v9828_v63 = vld [vmem:[#allocation8 + $0x200] sm:$0xff] }
 0xc70   :  { %4154 = vmatmul.bf16.vlgmr.msrb.gmra.mxu3 %v11525_v21  ;;  %v3915_v32 = vshll.u32 %v11525_v21, 16  ;;  %v3913_v4 = vshrl.u32 %v11525_v21, 16  ;;  %v4207_v10 = vrot.slane %v11525_v21, 1  ;;  %v4696_v2 = vshrl.u32 %v4498_v18, 16  ;;  %v9861_v20 = vld [vmem:[%s12384_s7 + $0x8] sm:$0xff] }
 0xc71   :  { %4167 = vmatmul.bf16.vlgmr.msra.gmra.mxu1 %v11529_v25  ;;  %4809 = vmatpush.bf16.msrb.mxu3 %v9851_v0  ;;  %v3922_v40 = vshll.u32 %v11529_v25, 16  ;;  %v3920_v1 = vshrl.u32 %v11529_v25, 16  ;;  %v4208_v28 = vrot.slane %v11529_v25, 1  ;;  %v4699_v26 = vshll.u32 %v4498_v18, 16 }
 0xc72   :  { %4822 = vmatpush.bf16.msra.mxu1 %v9859_v31  ;;  %v3917_v61 = vrot.slane %v3915_v32, 1  ;;  %v4367_v39 = vrot.slane %v3913_v4, 1  ;;  %v4368_v41 = vrot.slane %v3915_v32, 2  ;;  %v4704_v52 = vshrl.u32 %v4499_v51, 16  ;;  %v9836_v31 = vld [vmem:[#allocation8 + $0x240] sm:$0xff] }
 0xc73   :  { %v3924_v8 = vrot.slane %v3922_v40, 1  ;;  %v4370_v48 = vrot.slane %v3920_v1, 1  ;;  %v4371_v38 = vrot.slane %v3922_v40, 2  ;;  %v4707_v50 = vshll.u32 %v4499_v51, 16  ;;  %v9867_v40 = vld [vmem:[%s12384_s7 + $0x38] sm:$0xff] }
 0xc74   :  { %v3918_v30 = vor.u32 %v3917_v61, %v3913_v4  ;;  %v4369_v57 = vor.u32 %v4368_v41, %v4367_v39  ;;  %v4698_v24 = vrot.slane %v4696_v2, 2  ;;  %v4701_v7 = vrot.slane %v4699_v26, 3  ;;  %v9866_v4 = vld [vmem:[%s12384_s7 + $0x30] sm:$0xff]  ;;  %v9873_v39 = vld [vmem:[%s12384_s7 + $0x68] sm:$0xff]  ;;  %v9880_v41 = vld [vmem:[%s12384_s7 + $0xa0] sm:$0xff] }
 0xc75   :  { %4810 = vmatpush.bf16.msrb.mxu3 %v9850_v35  ;;  %v3925_v53 = vor.u32 %v3924_v8, %v3920_v1  ;;  %v4372_v14 = vor.u32 %v4371_v38, %v4370_v48  ;;  %v4706_v47 = vrot.slane %v4704_v52, 2  ;;  %v4709_v54 = vrot.slane %v4707_v50, 3  ;;  %v9875_v8 = vld [vmem:[%s12384_s7 + $0x78] sm:$0xff]  ;;  %v9872_v38 = vld [vmem:[%s12384_s7 + $0x60] sm:$0xff]  ;;  %v11614_v52 = vld [vmem:[#allocation10 + $0x170] sm:$0xff] }
 0xc76   :  { %4823 = vmatpush.bf16.msra.mxu1 %v9858_v59  ;;  %4032 = vmatmul.bf16.vlgmr.msra.gmra.mxu2 %v3918_v30  ;;  %v4702_v0 = vor.u32 %v4701_v7, %v4698_v24  ;;  %v4535_v25 = vrot.slane %v4498_v18, 2  ;;  %v4536_v32 = vrot.slane %v4499_v51, 2  ;;  %v9883_v59 = vld [vmem:[%s12384_s7 + $0xb8] sm:$0xff]  ;;  %v9860_v51 = vld [vmem:[%s12384_s7] sm:$0xff]  ;;  %v11620_v24 = vld [vmem:[#allocation10 + $0x150] sm:$0xff] }
 0xc77   :  { %4045 = vmatmul.bf16.vlgmr.msra.gmra.mxu0 %v3925_v53  ;;  %4635 = vmatpush.bf16.msra.mxu2 %v9835_v17  ;;  %v4710_v21 = vor.u32 %v4709_v54, %v4706_v47  ;;  %v9882_v17 = vld [vmem:[%s12384_s7 + $0xb0] sm:$0xff]  ;;  %v9863_v48 = vld [vmem:[%s12384_s7 + $0x18] sm:$0xff]  ;;  %v9868_v26 = vld [vmem:[%s12384_s7 + $0x40] sm:$0xff] }
 0xc78   :  { %4648 = vmatpush.bf16.msra.mxu0 %v9843_v11  ;;  %v9865_v11 = vld [vmem:[%s12384_s7 + $0x28] sm:$0xff]  ;;  %v9874_v53 = vld [vmem:[%s12384_s7 + $0x70] sm:$0xff]  ;;  %v11616_v50 = vld [vmem:[#allocation10 + $0x160] sm:$0xff] }
 0xc79   :  { %4811 = vmatpush.bf16.msrb.mxu3 %v9849_v44  ;;  %v9881_v44 = vld [vmem:[%s12384_s7 + $0xa8] sm:$0xff]  ;;  %v11623_v47 = vld [vmem:[#allocation10 + $0x140] sm:$0xff] }
 0xc7a   :  { %4824 = vmatpush.bf16.msra.mxu1 %v9857_v19 }
 0xc7b   :  { %4636 = vmatpush.bf16.msra.mxu2 %v9834_v5 }
 0xc7c   :  { %4649 = vmatpush.bf16.msra.mxu0 %v9842_v36 }
 0xc7d   :  { %4812 = vmatpush.bf16.msrb.mxu3 %v9848_v3  ;;  %v9864_v3 = vld [vmem:[%s12384_s7 + $0x20] sm:$0xff] }
 0xc7e   :  { %4825 = vmatpush.bf16.msra.mxu1 %v9856_v13 }
 0xc7f   :  { %4637 = vmatpush.bf16.msra.mxu2 %v9833_v45 }
 0xc80   :  { %4650 = vmatpush.bf16.msra.mxu0 %v9841_v55  ;;  %4479 = vmatmul.bf16.vlgmr.msra.gmra.mxu3 %v4369_v57  ;;  %v9879_v55 = vld [vmem:[%s12384_s7 + $0x98] sm:$0xff]  ;;  %v9862_v57 = vld [vmem:[%s12384_s7 + $0x10] sm:$0xff] }
 0xc81   :  { %4492 = vmatmul.bf16.vlgmr.msrb.gmra.mxu1 %v4372_v14  ;;  %4813 = vmatpush.bf16.msrb.mxu3 %v9847_v56  ;;  %v9871_v14 = vld [vmem:[%s12384_s7 + $0x58] sm:$0xff] }
 0xc82   :  { %4826 = vmatpush.bf16.msra.mxu1 %v9855_v15 }
 0xc83   :  { %4638 = vmatpush.bf16.msra.mxu2 %v9832_v62  ;;  %v9878_v62 = vld [vmem:[%s12384_s7 + $0x90] sm:$0xff] }
 0xc84   :  { %4651 = vmatpush.bf16.msra.mxu0 %v9840_v23 }
 0xc85   :  { %4814 = vmatpush.bf16.msrb.mxu3 %v9846_v27  ;;  %v9870_v27 = vld [vmem:[%s12384_s7 + $0x50] sm:$0xff] }
 0xc86   :  { %4827 = vmatpush.bf16.msra.mxu1 %v9854_v42  ;;  %4315 = vmatmul.bf16.vlgmr.msrb.gmra.mxu2 %v4207_v10  ;;  %v9877_v42 = vld [vmem:[%s12384_s7 + $0x88] sm:$0xff] }
 0xc87   :  { %4328 = vmatmul.bf16.vlgmr.msrb.gmra.mxu0 %v4208_v28  ;;  %4639 = vmatpush.bf16.msra.mxu2 %v9831_v9  ;;  %v9876_v28 = vld [vmem:[%s12384_s7 + $0x80] sm:$0xff] }
 0xc88   :  { %4652 = vmatpush.bf16.msra.mxu0 %v9839_v12  ;;  %v9869_v12 = vld [vmem:[%s12384_s7 + $0x48] sm:$0xff] }
 0xc89   :  { %4815 = vmatpush.bf16.msrb.mxu3 %v9845_v60 }
 0xc8a   :  { %4828 = vmatpush.bf16.msra.mxu1 %v9853_v22 }
 0xc8b   :  { %4640 = vmatpush.bf16.msra.mxu2 %v9830_v29 }
 0xc8c   :  { %4653 = vmatpush.bf16.msra.mxu0 %v9838_v34 }
 0xc8d   :  { %4816 = vmatpush.bf16.msrb.mxu3 %v9844_v58 }
 0xc8e   :  { %4829 = vmatpush.bf16.msra.mxu1 %v9852_v16 }
 0xc8f   :  { %4641 = vmatpush.bf16.msra.mxu2 %v9829_v43 }
 0xc90   :  { %4654 = vmatpush.bf16.msra.mxu0 %v9837_v6  ;;  %4817 = vmatmul.bf16.vlgmr.msrb.gmra.mxu3 %v4702_v0  ;;  %v11627_v6 = vld [vmem:[#allocation10 + $0x130] sm:$0xff] }
 0xc91   :  { %4830 = vmatmul.bf16.vlgmr.msra.gmra.mxu1 %v4710_v21  ;;  %5073 = vmatpush.bf16.msra.mxu3 %v9883_v59  ;;  %v11635_v59 = vld [vmem:[#allocation10 + $0x110] sm:$0xff] }
 0xc92   :  { %5110 = vmatpush.msrb.mxu1 %v11614_v52 }
 0xc93   :  { %4642 = vmatpush.bf16.msra.mxu2 %v9828_v63 }
 0xc94   :  { %4655 = vmatpush.bf16.msra.mxu0 %v9836_v31  ;;  %5111 = vmatpush.msrb.mxu1 %v11616_v50  ;;  %v11631_v31 = vld [vmem:[#allocation10 + $0x120] sm:$0xff] }
 0xc95   :  { %5074 = vmatpush.bf16.msra.mxu3 %v9882_v17 }
 0xc96   :  { %4643 = vmatmul.bf16.vlgmr.msra.gmra.mxu2 %v4535_v25  ;;  %5112 = vmatpush.msrb.mxu1 %v11620_v24 }
 0xc97   :  { %4656 = vmatmul.bf16.vlgmr.msra.gmra.mxu0 %v4536_v32  ;;  %4932 = vmatpush.bf16.msrb.mxu2 %v9875_v8  ;;  %v11646_v8 = vld [vmem:[#allocation10 + $0xf0] sm:$0xff] }
 0xc98   :  { %4993 = vmatpush.bf16.msrb.mxu0 %v9867_v40  ;;  %5113 = vmatpush.msrb.mxu1 %v11623_v47 }
 0xc99   :  { %5075 = vmatpush.bf16.msra.mxu3 %v9881_v44  ;;  %v11662_v44 = vld [vmem:[#allocation10 + $0xb0] sm:$0xff] }
 0xc9a   :  { %5114 = vmatpush.msrb.mxu1 %v11627_v6 }
 0xc9b   :  { %4933 = vmatpush.bf16.msrb.mxu2 %v9874_v53  ;;  %v11658_v53 = vld [vmem:[#allocation10 + $0xc0] sm:$0xff] }
 0xc9c   :  { %4994 = vmatpush.bf16.msrb.mxu0 %v9866_v4  ;;  %5115 = vmatpush.msrb.mxu1 %v11631_v31 }
 0xc9d   :  { %5076 = vmatpush.bf16.msra.mxu3 %v9880_v41 }
 0xc9e   :  { %5116 = vmatpush.msrb.mxu1 %v11635_v59 }
 0xc9f   :  { %4934 = vmatpush.bf16.msrb.mxu2 %v9873_v39  ;;  %v11672_v39 = vld [vmem:[#allocation10 + $0x90] sm:$0xff] }
 0xca0   :  { %4995 = vmatpush.bf16.msrb.mxu0 %v9865_v11  ;;  %v11654_v11 = vld [vmem:[#allocation10 + $0xd0] sm:$0xff] }
 0xca1   :  { %5077 = vmatpush.bf16.msra.mxu3 %v9879_v55  ;;  %v9907_v55 = vld [vmem:[%s12385_s8 + $0xb8] sm:$0xff] }
 0xca3   :  { %4935 = vmatpush.bf16.msrb.mxu2 %v9872_v38  ;;  %v11680_v38 = vld [vmem:[#allocation10 + $0x80] sm:$0xff] }
 0xca4   :  { %4996 = vmatpush.bf16.msrb.mxu0 %v9864_v3 }
 0xca5   :  { %5078 = vmatpush.bf16.msra.mxu3 %v9878_v62  ;;  %v9902_v62 = vld [vmem:[%s12385_s8 + $0x90] sm:$0xff] }
 0xca7   :  { %4936 = vmatpush.bf16.msrb.mxu2 %v9871_v14  ;;  %v9903_v14 = vld [vmem:[%s12385_s8 + $0x98] sm:$0xff] }
 0xca8   :  { %4997 = vmatpush.bf16.msrb.mxu0 %v9863_v48 }
 0xca9   :  { %5079 = vmatpush.bf16.msra.mxu3 %v9877_v42 }
 0xcab   :  { %4937 = vmatpush.bf16.msrb.mxu2 %v9870_v27 }
 0xcac   :  { %4998 = vmatpush.bf16.msrb.mxu0 %v9862_v57  ;;  %v9905_v57 = vld [vmem:[%s12385_s8 + $0xa8] sm:$0xff] }
 0xcad   :  { %5080 = vmatpush.bf16.msra.mxu3 %v9876_v28 }
 0xcaf   :  { %4938 = vmatpush.bf16.msrb.mxu2 %v9869_v12 }
 0xcb0   :  { %4999 = vmatpush.bf16.msrb.mxu0 %v9861_v20  ;;  %v9900_v20 = vld [vmem:[%s12385_s8 + $0x80] sm:$0xff] }
 0xcb3   :  { %4939 = vmatpush.bf16.msrb.mxu2 %v9868_v26 }
 0xcb4   :  { %5000 = vmatpush.bf16.msrb.mxu0 %v9860_v51 }
 0xcb7   :  { %5138 = vmatpush.msra.mxu2 %v11614_v52 }
 0xcb9   :  { %5139 = vmatpush.msra.mxu2 %v11616_v50 }
 0xcbb   :  { %5140 = vmatpush.msra.mxu2 %v11620_v24 }
 0xcbd   :  { %5141 = vmatpush.msra.mxu2 %v11623_v47 }
 0xcbf   :  { %5142 = vmatpush.msra.mxu2 %v11627_v6 }
 0xcc1   :  { %5143 = vmatpush.msra.mxu2 %v11631_v31 }
 0xcc3   :  { %5144 = vmatpush.msra.mxu2 %v11635_v59 }
 0xcee   :  { %v11540_v35 = vpop.f32.mrf.mxu1 }
 0xcf3   :  { %v4155_v61 = vpop.f32.mrf.mxu3 }
 0xcf4   :  { %v4046_v1 = vpop.f32.mrf.mxu0 }
 0xcf6   :  { %v4170_v30 = vpop.f32.mrf.mxu1 }
 0xcf7   :  { %v11650_v30 = vld [vmem:[#allocation10 + $0xe0] sm:$0xff] }
 0xcf9   :  { %v4033_v19 = vpop.f32.mrf.mxu2 }
 0xcfa   :  { %v4047_v9 = vadd.f32 %v4046_v1, %v4033_v19 }
 0xcfb   :  { %v4157_v5 = vpop.f32.mrf.mxu3 }
 0xcfc   :  { %v4048_v36 = vpop.f32.mrf.mxu0  ;;  %v4156_v22 = vadd.f32 %v4155_v61, %v4047_v9  ;;  %v11641_v61 = vld [vmem:[#allocation10 + $0x100] sm:$0xff] }
 0xcfd   :  { %5117 = vmatpush.msrb.mxu1 %v11641_v61  ;;  %5145 = vmatpush.msra.mxu2 %v11641_v61  ;;  %v11667_v36 = vld [vmem:[#allocation10 + $0xa0] sm:$0xff] }
 0xcfe   :  { %v4493_v13 = vpop.f32.mrf.mxu1  ;;  %v4169_v58 = vadd.f32 %v11540_v35, %v4156_v22 }
 0xcff   :  { %5118 = vmatpush.msrb.mxu1 %v11646_v8  ;;  %5146 = vmatpush.msra.mxu2 %v11646_v8 }
 0xd01   :  { %v4035_v45 = vpop.f32.mrf.mxu2  ;;  %5119 = vmatpush.msrb.mxu1 %v11650_v30  ;;  %5147 = vmatpush.msra.mxu2 %v11650_v30 }
 0xd03   :  { %v4480_v56 = vpop.f32.mrf.mxu3  ;;  %5120 = vmatpush.msrb.mxu1 %v11654_v11  ;;  %5148 = vmatpush.msra.mxu2 %v11654_v11 }
 0xd04   :  { %v4329_v15 = vpop.f32.mrf.mxu0  ;;  %v4494_v54 = vadd.f32 %v4493_v13, %v4480_v56  ;;  %v9906_v56 = vld [vmem:[%s12385_s8 + $0xb0] sm:$0xff] }
 0xd05   :  { %5121 = vmatpush.msrb.mxu1 %v11658_v53  ;;  %5149 = vmatpush.msra.mxu2 %v11658_v53 }
 0xd06   :  { %v4495_v33 = vpop.f32.mrf.mxu1 }
 0xd07   :  { %5122 = vmatpush.msrb.mxu1 %v11662_v44  ;;  %5150 = vmatpush.msra.mxu2 %v11662_v44  ;;  %v9901_v33 = vld [vmem:[%s12385_s8 + $0x88] sm:$0xff] }
 0xd09   :  { %v4316_v23 = vpop.f32.mrf.mxu2  ;;  %5123 = vmatpush.msrb.mxu1 %v11667_v36  ;;  %5151 = vmatpush.msra.mxu2 %v11667_v36 }
 0xd0a   :  { %v4330_v29 = vadd.f32 %v4329_v15, %v4316_v23  ;;  %v9904_v15 = vld [vmem:[%s12385_s8 + $0xa0] sm:$0xff] }
 0xd0b   :  { %v4482_v18 = vpop.f32.mrf.mxu3  ;;  %5124 = vmatpush.msrb.mxu1 %v11672_v39  ;;  %5152 = vmatpush.msra.mxu2 %v11672_v39 }
 0xd0c   :  { %v4331_v10 = vpop.f32.mrf.mxu0  ;;  %v4333_v7 = vadd.f32 %v4330_v29, %v4169_v58 }
 0xd0d   :  { %5125 = vmatpush.msrb.mxu1 %v11680_v38  ;;  %5153 = vmatpush.msra.mxu2 %v11680_v38 }
 0xd0e   :  { %v4831_v60 = vpop.f32.mrf.mxu1  ;;  %v4497_v21 = vadd.f32 %v4494_v54, %v4333_v7 }
 0xd0f   :  { %5416 = vmatpush.bf16.msra.mxu1 %v9907_v55  ;;  %v9887_v55 = vld [vmem:[%s12385_s8 + $0x18] sm:$0xff] }
 0xd11   :  { %v4318_v2 = vpop.f32.mrf.mxu2 }
 0xd13   :  { %v4818_v34 = vpop.f32.mrf.mxu3  ;;  %5417 = vmatpush.bf16.msra.mxu1 %v9906_v56 }
 0xd14   :  { %v4657_v16 = vpop.f32.mrf.mxu0  ;;  %v4832_v32 = vadd.f32 %v4831_v60, %v4818_v34 }
 0xd16   :  { %v4833_v43 = vpop.f32.mrf.mxu1 }
 0xd17   :  { %5418 = vmatpush.bf16.msra.mxu1 %v9905_v57  ;;  %v9896_v57 = vld [vmem:[%s12385_s8 + $0x60] sm:$0xff] }
 0xd19   :  { %v4644_v0 = vpop.f32.mrf.mxu2 }
 0xd1a   :  { %v4658_v63 = vadd.f32 %v4657_v16, %v4644_v0 }
 0xd1b   :  { %v4820_v25 = vpop.f32.mrf.mxu3  ;;  %5419 = vmatpush.bf16.msra.mxu1 %v9904_v15  ;;  %v9886_v15 = vld [vmem:[%s12385_s8 + $0x10] sm:$0xff] }
 0xd1c   :  { %v4661_v35 = vadd.f32 %v4658_v63, %v4497_v21  ;;  %v4659_v40 = vpop.f32.mrf.mxu0  ;;  %v12534_v25 = vld [vmem:[#allocation22_spill] sm:$0xff] }
 0xd1d   :  { %v9899_v40 = vld [vmem:[%s12385_s8 + $0x78] sm:$0xff] }
 0xd1e   :  { %v11639_v4 = vadd.f32 %v4832_v32, %v4661_v35  ;;  %v9891_v32 = vld [vmem:[%s12385_s8 + $0x38] sm:$0xff]  ;;  %v9890_v35 = vld [vmem:[%s12385_s8 + $0x30] sm:$0xff]  ;;  %5275 = vmatpush.bf16.msra.mxu0 %v9899_v40 }
 0xd1f   :  { %5420 = vmatpush.bf16.msra.mxu1 %v9903_v14  ;;  %5336 = vmatpush.bf16.msrb.mxu3 %v9891_v32 }
 0xd20   :  { %v4839_v1 = vrot.slane %v11639_v4, 7 }
 0xd21   :  { %v4646_v17 = vpop.f32.mrf.mxu2 }
 0xd22   :  { %4841 = vst [vmem:[#allocation2] sm:$0x3e] %v4839_v1  ;;  %v9889_v17 = vld [vmem:[%s12385_s8 + $0x28] sm:$0xff] }
 0xd23   :  { %5421 = vmatpush.bf16.msra.mxu1 %v9902_v62  ;;  %5337 = vmatpush.bf16.msrb.mxu3 %v9890_v35  ;;  %v9895_v62 = vld [vmem:[%s12385_s8 + $0x58] sm:$0xff] }
 0xd27   :  { %5422 = vmatpush.bf16.msra.mxu1 %v9901_v33  ;;  %5338 = vmatpush.bf16.msrb.mxu3 %v9889_v17 }
 0xd29   :  { %v4842_v19 = vld [vmem:[#allocation2] sm:$0x7f] }
 0xd2a   :  { %v4843_v5 = vpack.c.bf16 %v4842_v19, %v4842_v19  ;;  %5179 = vst [vmem:[#allocation2] sm:$0x1] %v12533_v46  ;;  %v9898_v19 = vld [vmem:[%s12385_s8 + $0x70] sm:$0xff] }
 0xd2b   :  { %5180 = vst [vmem:[#allocation2 + $0x6] sm:$0x1] %v12533_v46  ;;  %5423 = vmatpush.bf16.msra.mxu1 %v9900_v20  ;;  %5276 = vmatpush.bf16.msra.mxu0 %v9898_v19  ;;  %v9885_v20 = vld [vmem:[%s12385_s8 + $0x8] sm:$0xff] }
 0xd2c   :  { %5001 = vmatmul.bf16.vlgmr.msrb.gmra.mxu0 %v4843_v5  ;;  %v5023_v3 = vrot.slane %v4843_v5, 1  ;;  %v4879_v13 = vshll.u32 %v4843_v5, 16  ;;  %v4877_v41 = vshrl.u32 %v4843_v5, 16 }
 0xd2e   :  { %5081 = vmatmul.bf16.vlgmr.msra.gmra.mxu3 %v5023_v3  ;;  %v4881_v45 = vrot.slane %v4879_v13, 1  ;;  %v9888_v3 = vld [vmem:[%s12385_s8 + $0x20] sm:$0xff] }
 0xd2f   :  { %5339 = vmatpush.bf16.msrb.mxu3 %v9888_v3 }
 0xd30   :  { %v4882_v48 = vor.u32 %v4881_v45, %v4877_v41  ;;  %v9897_v41 = vld [vmem:[%s12385_s8 + $0x68] sm:$0xff] }
 0xd31   :  { %5277 = vmatpush.bf16.msra.mxu0 %v9897_v41 }
 0xd32   :  { %4940 = vmatmul.bf16.vlgmr.msrb.gmra.mxu2 %v4882_v48 }
 0xd33   :  { %5453 = vmatpush.msrb.mxu2 %v11614_v52  ;;  %5340 = vmatpush.bf16.msrb.mxu3 %v9887_v55 }
 0xd35   :  { %5454 = vmatpush.msrb.mxu2 %v11616_v50  ;;  %5278 = vmatpush.bf16.msra.mxu0 %v9896_v57  ;;  %v5524_v57 = vld [vmem:[%s12391_s14 + $0x64] sm:$0xff] }
 0xd37   :  { %5455 = vmatpush.msrb.mxu2 %v11620_v24  ;;  %5341 = vmatpush.bf16.msrb.mxu3 %v9886_v15 }
 0xd39   :  { %5456 = vmatpush.msrb.mxu2 %v11623_v47  ;;  %5279 = vmatpush.bf16.msra.mxu0 %v9895_v62  ;;  %v5525_v62 = vld [vmem:[%s12391_s14 + $0x6c] sm:$0xf] }
 0xd3b   :  { %5457 = vmatpush.msrb.mxu2 %v11627_v6  ;;  %5342 = vmatpush.bf16.msrb.mxu3 %v9885_v20 }
 0xd3d   :  { %5458 = vmatpush.msrb.mxu2 %v11631_v31 }
 0xd3f   :  { %5459 = vmatpush.msrb.mxu2 %v11635_v59 }
 0xd41   :  { %5460 = vmatpush.msrb.mxu2 %v11641_v61 }
 0xd43   :  { %5461 = vmatpush.msrb.mxu2 %v11646_v8 }
 0xd45   :  { %5462 = vmatpush.msrb.mxu2 %v11650_v30 }
 0xd47   :  { %5463 = vmatpush.msrb.mxu2 %v11654_v11 }
 0xd49   :  { %5464 = vmatpush.msrb.mxu2 %v11658_v53 }
 0xd4b   :  { %5465 = vmatpush.msrb.mxu2 %v11662_v44 }
 0xd4d   :  { %5466 = vmatpush.msrb.mxu2 %v11667_v36 }
 0xd4f   :  { %5467 = vmatpush.msrb.mxu2 %v11672_v39 }
 0xd51   :  { %5468 = vmatpush.msrb.mxu2 %v11680_v38 }
 0xda9   :  { %v5002_v23 = vpop.f32.mrf.mxu0 }
 0xdb1   :  { %v5004_v27 = vpop.f32.mrf.mxu0  ;;  %v5082_v42 = vpop.f32.mrf.mxu3 }
 0xdb2   :  { %v9884_v27 = vld [vmem:[%s12385_s8] sm:$0xff] }
 0xdb3   :  { %5343 = vmatpush.bf16.msrb.mxu3 %v9884_v27 }
 0xdb5   :  { %v4941_v18 = vpop.f32.mrf.mxu2 }
 0xdb6   :  { %v5003_v51 = vadd.f32 %v5002_v23, %v4941_v18  ;;  %v9894_v23 = vld [vmem:[%s12385_s8 + $0x50] sm:$0xff] }
 0xdb7   :  { %5280 = vmatpush.bf16.msra.mxu0 %v9894_v23 }
 0xdb8   :  { %v11724_v9 = vadd.f32 %v5082_v42, %v5003_v51  ;;  %v9893_v42 = vld [vmem:[%s12385_s8 + $0x48] sm:$0xff] }
 0xdb9   :  { %v5084_v10 = vpop.f32.mrf.mxu3 }
 0xdba   :  { %v5103_v12 = vsel %vm12462_vm1, %v11724_v9, 0.0  ;;  %v5130_v28 = vmul.f32 %v11724_v9, %v11724_v9 }
 0xdbb   :  { %v5104_v60 = vrot.slane %v5103_v12, 4  ;;  %5281 = vmatpush.bf16.msra.mxu0 %v9893_v42 }
 0xdbc   :  { %v5131_v22 = vsel %vm12462_vm1, %v5130_v28, 0.0 }
 0xdbd   :  { %v5105_v2 = vadd.f32 %v5104_v60, %v5103_v12  ;;  %v5132_v26 = vrot.slane %v5131_v22, 4  ;;  %v4943_v29 = vpop.f32.mrf.mxu2  ;;  %v9892_v12 = vld [vmem:[%s12385_s8 + $0x40] sm:$0xff] }
 0xdbf   :  { %v5106_v34 = vrot.slane %v5105_v2, 2  ;;  %v5133_v58 = vadd.f32 %v5132_v26, %v5131_v22  ;;  %5282 = vmatpush.bf16.msra.mxu0 %v9892_v12 }
 0xdc1   :  { %v5107_v16 = vadd.f32 %v5106_v34, %v5105_v2  ;;  %v5134_v7 = vrot.slane %v5133_v58, 2 }
 0xdc3   :  { %v5108_v43 = vrot.slane %v5107_v16, 1  ;;  %v5135_v54 = vadd.f32 %v5134_v7, %v5133_v58  ;;  %5481 = vmatpush.msrb.mxu0 %v11614_v52 }
 0xdc5   :  { %v5109_v0 = vadd.f32 %v5108_v43, %v5107_v16  ;;  %v5136_v21 = vrot.slane %v5135_v54, 1  ;;  %5482 = vmatpush.msrb.mxu0 %v11616_v50 }
 0xdc7   :  { %5126 = vmatmul.f32.vlgmr.msrb.gmra.mxu1 %v5109_v0  ;;  %v5137_v63 = vadd.f32 %v5136_v21, %v5135_v54  ;;  %5483 = vmatpush.msrb.mxu0 %v11620_v24 }
 0xdc8   :  { %9041 = vmatpush.msk.msrb.mxu1 %vm12462_vm1, %v12534_v25 }
 0xdc9   :  { %5154 = vmatmul.f32.vlgmr.msra.gmra.mxu2 %v5137_v63  ;;  %5484 = vmatpush.msrb.mxu0 %v11623_v47 }
 0xdcb   :  { %5485 = vmatpush.msrb.mxu0 %v11627_v6 }
 0xdcd   :  { %5486 = vmatpush.msrb.mxu0 %v11631_v31 }
 0xdcf   :  { %5487 = vmatpush.msrb.mxu0 %v11635_v59 }
 0xdd1   :  { %5488 = vmatpush.msrb.mxu0 %v11641_v61 }
 0xdd3   :  { %5489 = vmatpush.msrb.mxu0 %v11646_v8 }
 0xdd5   :  { %5490 = vmatpush.msrb.mxu0 %v11650_v30 }
 0xdd7   :  { %5491 = vmatpush.msrb.mxu0 %v11654_v11 }
 0xdd9   :  { %5492 = vmatpush.msrb.mxu0 %v11658_v53 }
 0xddb   :  { %5493 = vmatpush.msrb.mxu0 %v11662_v44 }
 0xddd   :  { %5494 = vmatpush.msrb.mxu0 %v11667_v36 }
 0xddf   :  { %5495 = vmatpush.msrb.mxu0 %v11672_v39 }
 0xde1   :  { %5496 = vmatpush.msrb.mxu0 %v11680_v38 }
 0xe44   :  { %v5127_v1 = vpop.f32.mrf.mxu1 }
 0xe45   :  { %v5158_v5 = vmul.f32 0.1, %v5127_v1 }
 0xe47   :  { %v5160_v45 = vmul.f32 %v5158_v5, %v5158_v5  ;;  %v5163_v22 = vperm.slane %v5158_v5, 0 }
 0xe49   :  { %v5164_v29 = vsub.f32 %v11724_v9, %v5163_v22 }
 0xe4c   :  { %v5155_v13 = vpop.f32.mrf.mxu2 }
 0xe4d   :  { %v5159_v48 = vmul.f32 0.1, %v5155_v13 }
 0xe4f   :  { %v5161_v56 = vsub.f32 %v5159_v48, %v5160_v45 }
 0xe51   :  { %v5162_v14 = vmax.f32 %v5161_v56, 0.0 }
 0xe53   :  { %v5165_v33 = vadd.f32 1e-05, %v5162_v14 }
 0xe55   :  { %10054 = vrsqrt.f32 %v5165_v33  ;;  %vm5172_vm12 = vweird.f32 %v5165_v33 }
 0xe5b   :  { %v10055_v18 = vpop.eup %10054 }
 0xe5c   :  { %v5167_v51 = vmul.f32 %v10055_v18, %v5165_v33  ;;  %vm5173_vm7 = vweird.f32 %v10055_v18 }
 0xe5d   :  { %vm5174_vm13 = vmor %vm5172_vm12, %vm5173_vm7 }
 0xe5e   :  { %v5168_v10 = vmul.f32 %v10055_v18, %v5167_v51 }
 0xe60   :  { %v5169_v28 = vmul.f32 0.5, %v5168_v10 }
 0xe62   :  { %v5170_v60 = vsub.f32 1.5, %v5169_v28 }
 0xe64   :  { %v5171_v2 = vmul.f32 %v10055_v18, %v5170_v60 }
 0xe66   :  { %v5175_v26 = vsel %vm5174_vm13, %v10055_v18, %v5171_v2  ;;  %vm5649_vm13 = vcmp.ge.f32.partialorder %v11491_v49, 2.0 }
 0xe67   :  { %v5176_v34 = vperm.slane %v5175_v26, 0  ;;  %v5526_v26 = vld [vmem:[%s12391_s14 + $0x70] sm:$0xff] }
 0xe69   :  { %v5177_v58 = vmul.f32 %v5176_v34, %v5164_v29 }
 0xe6b   :  { %v5178_v16 = vmax.f32 %v5177_v58, 0.0 }
 0xe6d   :  { %v5182_v7 = vrot.slane %v5178_v16, 7 }
 0xe6f   :  { %5184 = vst [vmem:[#allocation2] sm:$0x3e] %v5182_v7 }
 0xe76   :  { %v5185_v9 = vld [vmem:[#allocation2] sm:$0x7f] }
 0xe77   :  { %v5186_v43 = vpack.c.bf16 %v5185_v9, %v5185_v9  ;;  %5741 = vst [vmem:[#allocation2] sm:$0x7] %v12533_v46  ;;  %v12535_v9 = vld [vmem:[#allocation15_spill] sm:$0xff] }
 0xe79   :  { %5344 = vmatmul.bf16.vlgmr.msrb.gmra.mxu3 %v5186_v43  ;;  %v5366_v54 = vrot.slane %v5186_v43, 1  ;;  %v5222_v0 = vshll.u32 %v5186_v43, 16  ;;  %v5220_v21 = vshrl.u32 %v5186_v43, 16  ;;  %v11859_v43 = vcvt.s32.f32 %v12535_v9  ;;  %v9916_v9 = vld [vmem:[%s12388_s11 + $0x40] sm:$0xff] }
 0xe7b   :  { %5424 = vmatmul.bf16.vlgmr.msra.gmra.mxu1 %v5366_v54  ;;  %v5224_v63 = vrot.slane %v5222_v0, 1  ;;  %vm5650_vm15 = vcmp.ge.f32.partialorder %v11859_v43, 2.0 }
 0xe7c   :  { %5697 = vmatpush.msra.mxu1 %v11614_v52 }
 0xe7d   :  { %v5225_v32 = vor.u32 %v5224_v63, %v5220_v21 }
 0xe7e   :  { %5698 = vmatpush.msra.mxu1 %v11616_v50 }
 0xe7f   :  { %5283 = vmatmul.bf16.vlgmr.msra.gmra.mxu0 %v5225_v32 }
 0xe80   :  { %5699 = vmatpush.msra.mxu1 %v11620_v24  ;;  %5667 = vmatpush.msra.mxu0 %v11614_v52 }
 0xe82   :  { %5700 = vmatpush.msra.mxu1 %v11623_v47  ;;  %5668 = vmatpush.msra.mxu0 %v11616_v50 }
 0xe84   :  { %5701 = vmatpush.msra.mxu1 %v11627_v6  ;;  %5669 = vmatpush.msra.mxu0 %v11620_v24 }
 0xe86   :  { %5702 = vmatpush.msra.mxu1 %v11631_v31  ;;  %5670 = vmatpush.msra.mxu0 %v11623_v47 }
 0xe88   :  { %5703 = vmatpush.msra.mxu1 %v11635_v59  ;;  %5671 = vmatpush.msra.mxu0 %v11627_v6 }
 0xe8a   :  { %5704 = vmatpush.msra.mxu1 %v11641_v61  ;;  %5672 = vmatpush.msra.mxu0 %v11631_v31 }
 0xe8b   :  { %9042 = vmatmul.msk.f32.vlgmr.msrb.gmra.mxu1 %vm5528_vm11, %v5524_v57 }
 0xe8c   :  { %5705 = vmatpush.msra.mxu1 %v11646_v8  ;;  %5673 = vmatpush.msra.mxu0 %v11635_v59 }
 0xe8e   :  { %5706 = vmatpush.msra.mxu1 %v11650_v30  ;;  %5674 = vmatpush.msra.mxu0 %v11641_v61 }
 0xe90   :  { %5707 = vmatpush.msra.mxu1 %v11654_v11  ;;  %5675 = vmatpush.msra.mxu0 %v11646_v8 }
 0xe92   :  { %5708 = vmatpush.msra.mxu1 %v11658_v53  ;;  %5676 = vmatpush.msra.mxu0 %v11650_v30 }
 0xe93   :  { %9043 = vmatmul.msk.f32.gmra.mxu1 %vm5528_vm11, %v5525_v62 }
 0xe94   :  { %5709 = vmatpush.msra.mxu1 %v11662_v44  ;;  %5677 = vmatpush.msra.mxu0 %v11654_v11 }
 0xe96   :  { %5710 = vmatpush.msra.mxu1 %v11667_v36  ;;  %5678 = vmatpush.msra.mxu0 %v11658_v53 }
 0xe98   :  { %5711 = vmatpush.msra.mxu1 %v11672_v39  ;;  %5679 = vmatpush.msra.mxu0 %v11662_v44 }
 0xe9a   :  { %5712 = vmatpush.msra.mxu1 %v11680_v38  ;;  %5680 = vmatpush.msra.mxu0 %v11667_v36 }
 0xe9c   :  { %5681 = vmatpush.msra.mxu0 %v11672_v39 }
 0xe9e   :  { %5682 = vmatpush.msra.mxu0 %v11680_v38 }
 0xef8   :  { %v5425_v52 = vpop.f32.mrf.mxu1 }
 0xefc   :  { %v5284_v50 = vpop.f32.mrf.mxu0  ;;  %v5345_v24 = vpop.f32.mrf.mxu3 }
 0xefd   :  { %v5346_v47 = vadd.f32 %v5345_v24, %v5284_v50 }
 0xeff   :  { %v5429_v6 = vadd.f32 %v5425_v52, %v5346_v47 }
 0xf00   :  { %v5427_v31 = vpop.f32.mrf.mxu1 }
 0xf01   :  { %v5446_v59 = vsel %vm12462_vm1, %v5429_v6, 0.0  ;;  %v5473_v61 = vmul.f32 %v5429_v6, %v5429_v6 }
 0xf02   :  { %v5447_v8 = vrot.slane %v5446_v59, 4 }
 0xf03   :  { %v5474_v30 = vsel %vm12462_vm1, %v5473_v61, 0.0 }
 0xf04   :  { %v5448_v11 = vadd.f32 %v5447_v8, %v5446_v59  ;;  %v5475_v53 = vrot.slane %v5474_v30, 4  ;;  %v5286_v44 = vpop.f32.mrf.mxu0  ;;  %v5347_v36 = vpop.f32.mrf.mxu3 }
 0xf06   :  { %v5449_v35 = vrot.slane %v5448_v11, 2  ;;  %v5476_v39 = vadd.f32 %v5475_v53, %v5474_v30 }
 0xf08   :  { %v5450_v40 = vadd.f32 %v5449_v35, %v5448_v11  ;;  %v5477_v38 = vrot.slane %v5476_v39, 2  ;;  %v5585_v58 = vpop.f32.mrf.mxu1 }
 0xf0a   :  { %v5451_v1 = vrot.slane %v5450_v40, 1  ;;  %v5478_v17 = vadd.f32 %v5477_v38, %v5476_v39 }
 0xf0c   :  { %v5452_v19 = vadd.f32 %v5451_v1, %v5450_v40  ;;  %v5479_v5 = vrot.slane %v5478_v17, 1 }
 0xf0e   :  { %5469 = vmatmul.f32.vlgmr.msrb.gmra.mxu2 %v5452_v19  ;;  %v5480_v3 = vadd.f32 %v5479_v5, %v5478_v17  ;;  %v9915_v17 = vld [vmem:[%s12388_s11 + $0x38] sm:$0xff]  ;;  %v9914_v19 = vld [vmem:[%s12388_s11 + $0x30] sm:$0xff] }
 0xf0f   :  { %v9923_v5 = vld [vmem:[%s12388_s11 + $0x78] sm:$0xff] }
 0xf10   :  { %5497 = vmatmul.f32.vlgmr.msrb.gmra.mxu0 %v5480_v3  ;;  %v9913_v3 = vld [vmem:[%s12388_s11 + $0x28] sm:$0xff] }
 0xf8d   :  { %v5498_v13 = vpop.f32.mrf.mxu0 }
 0xf8e   :  { %v5502_v48 = vmul.f32 0.1, %v5498_v13  ;;  %v9922_v13 = vld [vmem:[%s12388_s11 + $0x70] sm:$0xff] }
 0xf91   :  { %v5470_v41 = vpop.f32.mrf.mxu2 }
 0xf92   :  { %v5501_v45 = vmul.f32 0.1, %v5470_v41  ;;  %v9912_v41 = vld [vmem:[%s12388_s11 + $0x20] sm:$0xff] }
 0xf94   :  { %v5503_v55 = vmul.f32 %v5501_v45, %v5501_v45  ;;  %v5506_v18 = vperm.slane %v5501_v45, 0  ;;  %v9921_v45 = vld [vmem:[%s12388_s11 + $0x68] sm:$0xff] }
 0xf96   :  { %v5504_v56 = vsub.f32 %v5502_v48, %v5503_v55  ;;  %v5507_v12 = vsub.f32 %v5429_v6, %v5506_v18  ;;  %v9931_v48 = vld [vmem:[%s12388_s11 + $0xb8] sm:$0xff]  ;;  %v9929_v18 = vld [vmem:[%s12388_s11 + $0xa8] sm:$0xff] }
 0xf97   :  { %v9911_v55 = vld [vmem:[%s12388_s11 + $0x18] sm:$0xff]  ;;  %5990 = vmatpush.bf16.msrb.mxu0 %v9931_v48 }
 0xf98   :  { %v5505_v15 = vmax.f32 %v5504_v56, 0.0  ;;  %v9920_v56 = vld [vmem:[%s12388_s11 + $0x60] sm:$0xff] }
 0xf9a   :  { %v5508_v14 = vadd.f32 1e-05, %v5505_v15  ;;  %v9930_v15 = vld [vmem:[%s12388_s11 + $0xb0] sm:$0xff] }
 0xf9b   :  { %5991 = vmatpush.bf16.msrb.mxu0 %v9930_v15 }
 0xf9c   :  { %10056 = vrsqrt.f32 %v5508_v14  ;;  %vm5515_vm5 = vweird.f32 %v5508_v14 }
 0xf9f   :  { %5992 = vmatpush.bf16.msrb.mxu0 %v9929_v18 }
 0xfa2   :  { %v10057_v33 = vpop.eup %10056 }
 0xfa3   :  { %v5510_v20 = vmul.f32 %v10057_v33, %v5508_v14  ;;  %vm5516_vm0 = vweird.f32 %v10057_v33  ;;  %v9939_v14 = vld [vmem:[%s12388_s11 + $0xf8] sm:$0xff] }
 0xfa4   :  { %vm5517_vm7 = vmor %vm5515_vm5, %vm5516_vm0  ;;  %vm5643_vm0 = vcmp.le.f32.partialorder %v11491_v49, 9.0  ;;  %vm5645_vm5 = vcmp.eq.f32.partialorder %v5585_v58, %v11491_v49  ;;  %6075 = vmatpush.bf16.msrb.mxu1 %v9939_v14  ;;  %v9927_v58 = vld [vmem:[%s12388_s11 + $0x98] sm:$0xff] }
 0xfa5   :  { %v5511_v23 = vmul.f32 %v10057_v33, %v5510_v20  ;;  %vm5647_vm10 = vmand %vm5643_vm0, %vm5645_vm5  ;;  %vm12544_vm5 = vcmask 520192  }
 0xfa7   :  { %v5512_v27 = vmul.f32 0.5, %v5511_v23 }
 0xfa9   :  { %v5513_v42 = vsub.f32 1.5, %v5512_v27 }
 0xfab   :  { %v5514_v51 = vmul.f32 %v10057_v33, %v5513_v42  ;;  %v9919_v42 = vld [vmem:[%s12388_s11 + $0x58] sm:$0xff] }
 0xfad   :  { %v5518_v10 = vsel %vm5517_vm7, %v10057_v33, %v5514_v51  ;;  %vm5644_vm7 = vcmp.le.f32.partialorder %v11859_v43, 9.0  ;;  %v9910_v33 = vld [vmem:[%s12388_s11 + $0x10] sm:$0xff] }
 0xfae   :  { %v5519_v28 = vperm.slane %v5518_v10, 0  ;;  %v9938_v51 = vld [vmem:[%s12388_s11 + $0xf0] sm:$0xff] }
 0xfaf   :  { %6076 = vmatpush.bf16.msrb.mxu1 %v9938_v51 }
 0xfb0   :  { %v5520_v60 = vmul.f32 %v5519_v28, %v5507_v12  ;;  %v9909_v12 = vld [vmem:[%s12388_s11 + $0x8] sm:$0xff] }
 0xfb2   :  { %v5521_v22 = vadd.f32 %v5520_v60, %v11639_v4  ;;  %v5527_v4 = vld [vmem:[%s12391_s14 + $0x78] sm:$0xf]  ;;  %v9918_v60 = vld [vmem:[%s12388_s11 + $0x50] sm:$0xff] }
 0xfb4   :  { %v5522_v2 = vmax.f32 %v5521_v22, 0.0  ;;  %v9928_v22 = vld [vmem:[%s12388_s11 + $0xa0] sm:$0xff] }
 0xfb5   :  { %5993 = vmatpush.bf16.msrb.mxu0 %v9928_v22 }
 0xfb6   :  { %9038 = vmatpush.msk.msra.mxu3 %vm12462_vm1, %v5522_v2  ;;  %9044 = vmatpush.msk.msra.mxu2 %vm12462_vm1, %v5522_v2  ;;  %v9937_v2 = vld [vmem:[%s12388_s11 + $0xe8] sm:$0xff] }
 0xfb7   :  { %9039 = vmatmul.msk.f32.vlgmr.msra.gmra.mxu3 %vm5528_vm11, %v5524_v57  ;;  %9045 = vmatmul.msk.f32.vlgmr.msra.gmra.mxu2 %vm5528_vm11, %v5526_v26 }
 0xfb8   :  { %9047 = vmatpush.msk.msrb.mxu3 %vm12462_vm1, %v12534_v25  ;;  %v5588_v25 = vpop.f32.mrf.mxu1  ;;  %5846 = vmatpush.bf16.msrb.mxu2 %v9923_v5 }
 0xfb9   :  { %vm5646_vm1 = vcmp.eq.f32.partialorder %v5588_v25, %v11859_v43  ;;  %6077 = vmatpush.bf16.msrb.mxu1 %v9937_v2  ;;  %5994 = vmatpush.bf16.msrb.mxu0 %v9927_v58  ;;  %v9926_v25 = vld [vmem:[%s12388_s11 + $0x90] sm:$0xff] }
 0xfba   :  { %vm5648_vm9 = vmand %vm5644_vm7, %vm5646_vm1  ;;  %5908 = vmatpush.bf16.msra.mxu3 %v9915_v17  ;;  %vm12540_vm1 = vcmask 523264  }
 0xfbb   :  { %vm12542_vm0 = vmmov %vm12540_vm1 }
 0xfbc   :  { %5847 = vmatpush.bf16.msrb.mxu2 %v9922_v13  ;;  %vm12546_vm7 = vmmov %vm12544_vm5 }
 0xfbd   :  { %5995 = vmatpush.bf16.msrb.mxu0 %v9926_v25 }
 0xfbe   :  { %5909 = vmatpush.bf16.msra.mxu3 %v9914_v19 }
 0xfbf   :  { %9040 = vmatmul.msk.f32.gmra.mxu3 %vm5528_vm11, %v5525_v62  ;;  %9046 = vmatmul.msk.f32.gmra.mxu2 %vm5528_vm11, %v5527_v4 }
 0xfc0   :  { %5848 = vmatpush.bf16.msrb.mxu2 %v9921_v45  ;;  %v9949_v45 = vld [vmem:[%s12388_s11 + $0x148] sm:$0xff] }
 0xfc2   :  { %5910 = vmatpush.bf16.msra.mxu3 %v9913_v3 }
 0xfc4   :  { %5849 = vmatpush.bf16.msrb.mxu2 %v9920_v56 }
 0xfc6   :  { %5911 = vmatpush.bf16.msra.mxu3 %v9912_v41  ;;  %v9943_v41 = vld [vmem:[%s12388_s11 + $0x118] sm:$0xff] }
 0xfc7   :  { %9048 = vmatmul.msk.f32.vlgmr.msrb.gmra.mxu3 %vm5528_vm11, %v5526_v26 }
 0xfc8   :  { %5850 = vmatpush.bf16.msrb.mxu2 %v9919_v42 }
 0xfca   :  { %5912 = vmatpush.bf16.msra.mxu3 %v9911_v55  ;;  %v9941_v55 = vld [vmem:[%s12388_s11 + $0x108] sm:$0xff] }
 0xfcc   :  { %5851 = vmatpush.bf16.msrb.mxu2 %v9918_v60 }
 0xfce   :  { %5913 = vmatpush.bf16.msra.mxu3 %v9910_v33 }
 0xfcf   :  { %9049 = vmatmul.msk.f32.gmra.mxu3 %vm5528_vm11, %v5527_v4  ;;  %v9908_v4 = vld [vmem:[%s12388_s11] sm:$0xff] }
 0xfd2   :  { %5914 = vmatpush.bf16.msra.mxu3 %v9909_v12 }
 0xfd6   :  { %5915 = vmatpush.bf16.msra.mxu3 %v9908_v4 }
0x103a   :  { %v5555_v29 = vpop.f32.mrf.mxu3  ;;  %v5614_v16 = vpop.f32.mrf.mxu2 }
0x1042   :  { %v5558_v34 = vpop.f32.mrf.mxu3  ;;  %v5617_v21 = vpop.f32.mrf.mxu2 }
0x104a   :  { %v5637_v7 = vpop.f32.mrf.mxu3 }
0x104b   :  { %vm5651_vm12 = vcmp.eq.f32.partialorder %v5637_v7, %v11491_v49  ;;  %v9954_v7 = vld [vmem:[%s12388_s11 + $0x170] sm:$0xff] }
0x104c   :  { %vm5653_vm11 = vmand %vm5649_vm13, %vm5651_vm12 }
0x104d   :  { %v5655_v54 = vsel %vm5653_vm11, %v5614_v16, 0.0  ;;  %v9936_v16 = vld [vmem:[%s12388_s11 + $0xe0] sm:$0xff]  ;;  %vm12541_vm12 = vmmov %vm12540_vm1 }
0x104e   :  { %v11873_v63 = vsel %vm5647_vm10, %v5555_v29, %v5655_v54  ;;  %v9955_v29 = vld [vmem:[%s12388_s11 + $0x178] sm:$0xff]  ;;  %6078 = vmatpush.bf16.msrb.mxu1 %v9936_v16  ;;  %vm12538_vm10 = vcmask 1040384   ;;  %vm12545_vm11 = vmmov %vm12542_vm0 }
0x104f   :  { %v5687_v47 = vmul.f32 %v11873_v63, %v11873_v63  ;;  %6256 = vmatpush.bf16.msrb.mxu3 %v9955_v29  ;;  %v9935_v54 = vld [vmem:[%s12388_s11 + $0xd8] sm:$0xff] }
0x1052   :  { %v5640_v0 = vpop.f32.mrf.mxu3  ;;  %6079 = vmatpush.bf16.msrb.mxu1 %v9935_v54 }
0x1053   :  { %vm5652_vm4 = vcmp.eq.f32.partialorder %v5640_v0, %v11859_v43  ;;  %v9947_v0 = vld [vmem:[%s12388_s11 + $0x138] sm:$0xff]  ;;  %6257 = vmatpush.bf16.msrb.mxu3 %v9954_v7 }
0x1054   :  { %vm5654_vm14 = vmand %vm5650_vm15, %vm5652_vm4 }
0x1055   :  { %v5656_v32 = vsel %vm5654_vm14, %v5617_v21, 0.0  ;;  %v9953_v21 = vld [vmem:[%s12388_s11 + $0x168] sm:$0xff] }
0x1056   :  { %v11875_v52 = vsel %vm5648_vm9, %v5558_v34, %v5656_v32  ;;  %v9917_v34 = vld [vmem:[%s12388_s11 + $0x48] sm:$0xff]  ;;  %vm12537_vm9 = vcmask 523265  }
0x1057   :  { %v5659_v50 = vsel %vm529_vm8, %v11875_v52, 0.0  ;;  %v5688_v24 = vmul.f32 %v11875_v52, %v11875_v52  ;;  %5852 = vmatpush.bf16.msrb.mxu2 %v9917_v34  ;;  %6258 = vmatpush.bf16.msrb.mxu3 %v9953_v21 }
0x1058   :  { %v5660_v6 = vadd.f32 %v5659_v50, %v11873_v63 }
0x1059   :  { %v5689_v31 = vsel %vm529_vm8, %v5688_v24, 0.0  ;;  %v9925_v24 = vld [vmem:[%s12388_s11 + $0x88] sm:$0xff] }
0x105a   :  { %v5661_v59 = vrot.slane %v5660_v6, 4  ;;  %v5690_v61 = vadd.f32 %v5689_v31, %v5687_v47  ;;  %v9934_v47 = vld [vmem:[%s12388_s11 + $0xd0] sm:$0xff]  ;;  %5996 = vmatpush.bf16.msrb.mxu0 %v9925_v24 }
0x105b   :  { %5853 = vmatpush.bf16.msrb.mxu2 %v9916_v9  ;;  %6080 = vmatpush.bf16.msrb.mxu1 %v9934_v47  ;;  %v9967_v47 = vld [vmem:[#allocation3 + $0x58] sm:$0xff] }
0x105c   :  { %v5662_v8 = vadd.f32 %v5661_v59, %v5660_v6  ;;  %v5691_v30 = vrot.slane %v5690_v61, 4  ;;  %v9946_v6 = vld [vmem:[%s12388_s11 + $0x130] sm:$0xff]  ;;  %v9952_v59 = vld [vmem:[%s12388_s11 + $0x160] sm:$0xff] }
0x105d   :  { %6259 = vmatpush.bf16.msrb.mxu3 %v9952_v59  ;;  %v9966_v59 = vld [vmem:[#allocation3 + $0x50] sm:$0xff] }
0x105e   :  { %v5663_v11 = vrot.slane %v5662_v8, 2  ;;  %v5692_v53 = vadd.f32 %v5691_v30, %v5690_v61  ;;  %v9933_v30 = vld [vmem:[%s12388_s11 + $0xc8] sm:$0xff] }
0x105f   :  { %6162 = vmatpush.bf16.msra.mxu2 %v9947_v0  ;;  %6081 = vmatpush.bf16.msrb.mxu1 %v9933_v30 }
0x1060   :  { %v5664_v44 = vadd.f32 %v5663_v11, %v5662_v8  ;;  %v5693_v36 = vrot.slane %v5692_v53, 2  ;;  %v9924_v8 = vld [vmem:[%s12388_s11 + $0x80] sm:$0xff]  ;;  %v9945_v11 = vld [vmem:[%s12388_s11 + $0x128] sm:$0xff] }
0x1061   :  { %5997 = vmatpush.bf16.msrb.mxu0 %v9924_v8  ;;  %v9957_v8 = vld [vmem:[#allocation3 + $0x8] sm:$0xff] }
0x1062   :  { %v5665_v35 = vrot.slane %v5664_v44, 1  ;;  %v5694_v39 = vadd.f32 %v5693_v36, %v5692_v53 }
0x1063   :  { %6163 = vmatpush.bf16.msra.mxu2 %v9946_v6  ;;  %v9958_v6 = vld [vmem:[#allocation3 + $0x10] sm:$0xff] }
0x1064   :  { %v5666_v40 = vadd.f32 %v5665_v35, %v5664_v44  ;;  %v5695_v38 = vrot.slane %v5694_v39, 1  ;;  %v9951_v44 = vld [vmem:[%s12388_s11 + $0x158] sm:$0xff] }
0x1065   :  { %6260 = vmatpush.bf16.msrb.mxu3 %v9951_v44 }
0x1066   :  { %5683 = vmatmul.f32.vlgmr.msra.gmra.mxu0 %v5666_v40  ;;  %v5696_v1 = vadd.f32 %v5695_v38, %v5694_v39  ;;  %v9932_v39 = vld [vmem:[%s12388_s11 + $0xc0] sm:$0xff] }
0x1067   :  { %6164 = vmatpush.bf16.msra.mxu2 %v9945_v11  ;;  %v9944_v40 = vld [vmem:[%s12388_s11 + $0x120] sm:$0xff]  ;;  %6082 = vmatpush.bf16.msrb.mxu1 %v9932_v39  ;;  %v9965_v11 = vld [vmem:[#allocation3 + $0x48] sm:$0xff] }
0x1068   :  { %5713 = vmatmul.f32.vlgmr.msra.gmra.mxu1 %v5696_v1  ;;  %v9950_v1 = vld [vmem:[%s12388_s11 + $0x150] sm:$0xff]  ;;  %v9956_v39 = vld [vmem:[#allocation3] sm:$0xff] }
0x1069   :  { %6261 = vmatpush.bf16.msrb.mxu3 %v9950_v1 }
0x106b   :  { %6165 = vmatpush.bf16.msra.mxu2 %v9944_v40  ;;  %v9964_v40 = vld [vmem:[#allocation3 + $0x40] sm:$0xff] }
0x106d   :  { %6262 = vmatpush.bf16.msrb.mxu3 %v9949_v45 }
0x106f   :  { %6166 = vmatpush.bf16.msra.mxu2 %v9943_v41 }
0x10e3   :  { %v5684_v57 = vpop.f32.mrf.mxu0 }
0x10e4   :  { %v11921_v62 = vmul.f32 0.041666668, %v5684_v57 }
0x10e5   :  { %v5714_v20 = vpop.f32.mrf.mxu1 }
0x10e6   :  { %v5719_v23 = vmul.f32 %v11921_v62, %v11921_v62  ;;  %v5718_v27 = vmul.f32 0.041666668, %v5714_v20  ;;  %v5722_v36 = vperm.slane %v11921_v62, 0  ;;  %v9940_v62 = vld [vmem:[%s12388_s11 + $0x100] sm:$0xff] }
0x10e7   :  { %v5755_v20 = vld [vmem:[#allocation2 + $0x20] sm:$0x3] }
0x10e8   :  { %v5720_v10 = vsub.f32 %v5718_v27, %v5719_v23  ;;  %v5723_v17 = vsub.f32 %v11873_v63, %v5722_v36  ;;  %v5724_v19 = vsub.f32 %v11875_v52, %v5722_v36  ;;  %v9942_v63 = vld [vmem:[%s12388_s11 + $0x110] sm:$0xff]  ;;  %v9948_v52 = vld [vmem:[%s12388_s11 + $0x140] sm:$0xff]  ;;  %v6091_v42 = vpack.c.bf16 %v5755_v20, %v5755_v20 }
0x10e9   :  { %6167 = vmatpush.bf16.msra.mxu2 %v9942_v63  ;;  %6263 = vmatpush.bf16.msrb.mxu3 %v9948_v52 }
0x10ea   :  { %v5721_v28 = vmax.f32 %v5720_v10, 0.0  ;;  %v6199_v22 = vshrl.u32 %v6091_v42, 16  ;;  %v6202_v2 = vshll.u32 %v6091_v42, 16  ;;  %v6111_v0 = vrot.slane %v6091_v42, 2 }
0x10ec   :  { %v5725_v26 = vadd.f32 1e-05, %v5721_v28  ;;  %v6201_v58 = vrot.slane %v6199_v22, 2  ;;  %v6204_v16 = vrot.slane %v6202_v2, 3  ;;  %v12063_v22 = vld [vmem:[#allocation10 + $0x60] sm:$0xff]  ;;  %v12066_v2 = vld [vmem:[#allocation10 + $0x50] sm:$0xff] }
0x10ed   :  { %6168 = vmatpush.bf16.msra.mxu2 %v9941_v55 }
0x10ee   :  { %10058 = vrsqrt.f32 %v5725_v26  ;;  %vm5732_vm14 = vweird.f32 %v5725_v26  ;;  %v6205_v9 = vor.u32 %v6204_v16, %v6201_v58  ;;  %v12087_v58 = vld [vmem:[#allocation10] sm:$0xff]  ;;  %v9979_v16 = vld [vmem:[#allocation5 + $0x58] sm:$0xff] }
0x10f1   :  { %6169 = vmatpush.bf16.msra.mxu2 %v9940_v62 }
0x10f4   :  { %v10059_v32 = vpop.eup %10058 }
0x10f5   :  { %v5727_v50 = vmul.f32 %v10059_v32, %v5725_v26  ;;  %vm5733_vm4 = vweird.f32 %v10059_v32 }
0x10f6   :  { %vm5734_vm8 = vmor %vm5732_vm14, %vm5733_vm4  ;;  %vm12549_vm14 = vcmask 1044480  }
0x10f7   :  { %v5728_v31 = vmul.f32 %v10059_v32, %v5727_v50  ;;  %v9959_v50 = vld [vmem:[#allocation3 + $0x18] sm:$0xff]  ;;  %vm12547_vm4 = vmmov %vm12542_vm0 }
0x10f8   :  { %6380 = vmatpush.bf16.msra.mxu1 %v9959_v50 }
0x10f9   :  { %v5729_v61 = vmul.f32 0.5, %v5728_v31  ;;  %v9963_v31 = vld [vmem:[#allocation3 + $0x38] sm:$0xff] }
0x10fa   :  { %6340 = vmatpush.bf16.msra.mxu0 %v9963_v31 }
0x10fb   :  { %v5730_v53 = vsub.f32 1.5, %v5729_v61  ;;  %v9962_v61 = vld [vmem:[#allocation3 + $0x30] sm:$0xff] }
0x10fc   :  { %6381 = vmatpush.bf16.msra.mxu1 %v9958_v6 }
0x10fd   :  { %v5731_v35 = vmul.f32 %v10059_v32, %v5730_v53  ;;  %v9961_v53 = vld [vmem:[#allocation3 + $0x28] sm:$0xff] }
0x10fe   :  { %6341 = vmatpush.bf16.msra.mxu0 %v9962_v61 }
0x10ff   :  { %v5735_v38 = vsel %vm5734_vm8, %v10059_v32, %v5731_v35  ;;  %vm12550_vm8 = vmmov %vm12542_vm0 }
0x1100   :  { %v5736_v5 = vperm.slane %v5735_v38, 0  ;;  %6382 = vmatpush.bf16.msra.mxu1 %v9957_v8 }
0x1102   :  { %v5737_v3 = vmul.f32 %v5736_v5, %v5723_v17  ;;  %v5738_v13 = vmul.f32 %v5736_v5, %v5724_v19  ;;  %6342 = vmatpush.bf16.msra.mxu0 %v9961_v53  ;;  %v9960_v17 = vld [vmem:[#allocation3 + $0x20] sm:$0xff] }
0x1104   :  { %10060 = vtanh.f32 %v5737_v3  ;;  %6383 = vmatpush.bf16.msra.mxu1 %v9956_v39 }
0x1105   :  { %10062 = vtanh.f32 %v5738_v13 }
0x1106   :  { %6343 = vmatpush.bf16.msra.mxu0 %v9960_v17 }
0x110a   :  { %v10061_v48 = vpop.eup %10060 }
0x110b   :  { %v10063_v56 = vpop.eup %10062  ;;  %v5746_v57 = vrot.slane %v10061_v48, 5 }
0x110c   :  { %v5747_v15 = vrot.slane %v10063_v56, 5 }
0x110d   :  { %5751 = vst [vmem:[#allocation2] sm:$0xf8] %v5746_v57 }
0x110e   :  { %v5748_v14 = vsel %vm610_vm3, %v5746_v57, %v5747_v15  ;;  %vm12536_vm3 = vcmask 1045504  }
0x110f   :  { %5752 = vst [vmem:[#allocation2 + $0x10] sm:$0x7f] %v5748_v14 }
0x1114   :  { %v5753_v33 = vld [vmem:[#allocation2] sm:$0xff] }
0x1115   :  { %6272 = vst.msk [vmem:[#allocation2] sm:$0x1] %vm677_vm6, %v12533_v46 }
0x1116   :  { %v5754_v23 = vld [vmem:[#allocation2 + $0x10] sm:$0xff] }
0x1117   :  { %v5756_v27 = vpack.c.bf16 %v5754_v23, %v5753_v33  ;;  %6273 = vst.msk [vmem:[#allocation2 + $0x16] sm:$0x1] %vm677_vm6, %v12533_v46 }
0x1119   :  { %5916 = vmatmul.bf16.vlgmr.msra.gmra.mxu3 %v5756_v27  ;;  %v5940_v18 = vrot.slane %v5756_v27, 1  ;;  %v5791_v51 = vshrl.u32 %v5756_v27, 16  ;;  %v5793_v10 = vshll.u32 %v5756_v27, 16  ;;  %v6110_v54 = vrot.slane %v5756_v27, 2 }
0x111b   :  { %5998 = vmatmul.bf16.vlgmr.msrb.gmra.mxu0 %v5940_v18  ;;  %v5795_v12 = vrot.slane %v5793_v10, 1  ;;  %v6023_v28 = vrot.slane %v5791_v51, 1  ;;  %v6024_v60 = vrot.slane %v5793_v10, 2  ;;  %v6195_v29 = vrot.slane %v5791_v51, 2 }
0x111c   :  { %v6196_v34 = vrot.slane %v5793_v10, 3  ;;  %v6112_v21 = vsel %vm12536_vm3, %v6110_v54, %v6111_v0 }
0x111d   :  { %v5796_v26 = vor.u32 %v5795_v12, %v5791_v51  ;;  %v6025_v4 = vor.u32 %v6024_v60, %v6023_v28  ;;  %v12059_v60 = vld [vmem:[#allocation10 + $0x70] sm:$0xff] }
0x111e   :  { %v6197_v7 = vor.u32 %v6196_v34, %v6195_v29  ;;  %6471 = vmatpush.msra.mxu3 %v12059_v60  ;;  %6505 = vmatpush.msrb.mxu0 %v12059_v60  ;;  %v12079_v29 = vld [vmem:[#allocation10 + $0x20] sm:$0xff]  ;;  %v12083_v34 = vld [vmem:[#allocation10 + $0x10] sm:$0xff] }
0x111f   :  { %5854 = vmatmul.bf16.vlgmr.msrb.gmra.mxu2 %v5796_v26  ;;  %6083 = vmatmul.bf16.vlgmr.msrb.gmra.mxu1 %v6025_v4  ;;  %v12069_v26 = vld [vmem:[#allocation10 + $0x40] sm:$0xff]  ;;  %v12073_v4 = vld [vmem:[#allocation10 + $0x30] sm:$0xff] }
0x1120   :  { %v6206_v25 = vsel %vm1532_vm2, %v6197_v7, %v6205_v9  ;;  %6431 = vmatpush.bf16.msrb.mxu2 %v9967_v47  ;;  %vm12539_vm2 = vcmask 521216   ;;  %6472 = vmatpush.msra.mxu3 %v12063_v22  ;;  %v9978_v7 = vld [vmem:[#allocation5 + $0x50] sm:$0xff]  ;;  %v9977_v9 = vld [vmem:[#allocation5 + $0x48] sm:$0xff] }
0x1121   :  { %6506 = vmatpush.msrb.mxu0 %v12063_v22 }
0x1122   :  { %6473 = vmatpush.msra.mxu3 %v12066_v2 }
0x1123   :  { %6507 = vmatpush.msrb.mxu0 %v12066_v2 }
0x1124   :  { %6432 = vmatpush.bf16.msrb.mxu2 %v9966_v59  ;;  %6474 = vmatpush.msra.mxu3 %v12069_v26 }
0x1125   :  { %6508 = vmatpush.msrb.mxu0 %v12069_v26 }
0x1126   :  { %6475 = vmatpush.msra.mxu3 %v12073_v4 }
0x1127   :  { %6509 = vmatpush.msrb.mxu0 %v12073_v4 }
0x1128   :  { %6433 = vmatpush.bf16.msrb.mxu2 %v9965_v11  ;;  %6476 = vmatpush.msra.mxu3 %v12079_v29 }
0x1129   :  { %6264 = vmatmul.bf16.vlgmr.msrb.gmra.mxu3 %v6206_v25  ;;  %6510 = vmatpush.msrb.mxu0 %v12079_v29  ;;  %v9976_v25 = vld [vmem:[#allocation5 + $0x40] sm:$0xff] }
0x112a   :  { %6477 = vmatpush.msra.mxu3 %v12083_v34 }
0x112b   :  { %6511 = vmatpush.msrb.mxu0 %v12083_v34 }
0x112c   :  { %6434 = vmatpush.bf16.msrb.mxu2 %v9964_v40  ;;  %6478 = vmatpush.msra.mxu3 %v12087_v58 }
0x112d   :  { %6512 = vmatpush.msrb.mxu0 %v12087_v58 }
0x112e   :  { %6700 = vmatpush.bf16.msrb.mxu3 %v9979_v16  ;;  %v9969_v16 = vld [vmem:[#allocation5 + $0x8] sm:$0xff] }
0x112f   :  { %6170 = vmatmul.bf16.vlgmr.msra.gmra.mxu2 %v6112_v21 }
0x1132   :  { %6701 = vmatpush.bf16.msrb.mxu3 %v9978_v7  ;;  %v9968_v7 = vld [vmem:[#allocation5] sm:$0xff] }
0x1136   :  { %6702 = vmatpush.bf16.msrb.mxu3 %v9977_v9 }
0x113a   :  { %6703 = vmatpush.bf16.msrb.mxu3 %v9976_v25 }
0x1198   :  { %v5999_v36 = vpop.f32.mrf.mxu0 }
0x119c   :  { %v5917_v32 = vpop.f32.mrf.mxu3  ;;  %v6084_v1 = vpop.f32.mrf.mxu1 }
0x11a0   :  { %v6001_v45 = vpop.f32.mrf.mxu0 }
0x11a2   :  { %v5855_v24 = vpop.f32.mrf.mxu2 }
0x11a3   :  { %v5918_v44 = vadd.f32 %v5917_v32, %v5855_v24 }
0x11a4   :  { %v5919_v30 = vpop.f32.mrf.mxu3  ;;  %v6086_v55 = vpop.f32.mrf.mxu1 }
0x11a5   :  { %v6004_v38 = vadd.f32 %v5999_v36, %v5918_v44 }
0x11a7   :  { %v6089_v5 = vadd.f32 %v6084_v1, %v6004_v38 }
0x11aa   :  { %v5857_v35 = vpop.f32.mrf.mxu2 }
0x11ab   :  { %v5920_v19 = vadd.f32 %v5919_v30, %v5857_v35 }
0x11ac   :  { %v6265_v3 = vpop.f32.mrf.mxu3 }
0x11ad   :  { %v6005_v63 = vadd.f32 %v6001_v45, %v5920_v19 }
0x11af   :  { %v6090_v56 = vadd.f32 %v6086_v55, %v6005_v63  ;;  %v12551_v55 = vld [vmem:[#allocation21_spill] sm:$0xff] }
0x11b2   :  { %v6171_v13 = vpop.f32.mrf.mxu2 }
0x11b3   :  { %v6176_v41 = vadd.f32 %v6171_v13, %v6089_v5 }
0x11b4   :  { %v6267_v14 = vpop.f32.mrf.mxu3 }
0x11b5   :  { %v12043_v52 = vadd.f32 %v6265_v3, %v6176_v41 }
0x11b7   :  { %v6276_v48 = vrot.slane %v12043_v52, 7 }
0x11b9   :  { %6281 = vst.msk [vmem:[#allocation2] sm:$0xfe] %vm12537_vm9, %v6276_v48 }
0x11ba   :  { %v6173_v57 = vpop.f32.mrf.mxu2 }
0x11bb   :  { %v6177_v15 = vadd.f32 %v6173_v57, %v6090_v56  ;;  %v9975_v56 = vld [vmem:[#allocation5 + $0x38] sm:$0xff] }
0x11bc   :  { %6609 = vmatpush.bf16.msrb.mxu1 %v9975_v56 }
0x11bd   :  { %v12047_v62 = vadd.f32 %v6267_v14, %v6177_v15 }
0x11bf   :  { %v6277_v33 = vrot.slane %v12047_v62, 7 }
0x11c0   :  { %v6283_v20 = vld [vmem:[#allocation2] sm:$0xff] }
0x11c1   :  { %v6278_v23 = vsel %vm12538_vm10, %v6276_v48, %v6277_v33  ;;  %6541 = vst.msk [vmem:[#allocation2] sm:$0x1] %vm677_vm6, %v12533_v46  ;;  %v12548_v48 = vld [vmem:[#allocation20_spill] sm:$0xff] }
0x11c2   :  { %6282 = vst.msk [vmem:[#allocation2 + $0x10] sm:$0x3f] %vm12539_vm2, %v6278_v23  ;;  %v9974_v33 = vld [vmem:[#allocation5 + $0x30] sm:$0xff]  ;;  %vm12552_vm2 = vcmask 1040384  }
0x11c3   :  { %6610 = vmatpush.bf16.msrb.mxu1 %v9974_v33 }
0x11c9   :  { %v6284_v27 = vld [vmem:[#allocation2 + $0x10] sm:$0x7f] }
0x11ca   :  { %v6285_v42 = vpack.c.bf16 %v6284_v27, %v6283_v20  ;;  %6542 = vst.msk [vmem:[#allocation2 + $0x16] sm:$0x1] %vm677_vm6, %v12533_v46  ;;  %vm12543_vm6 = vmmov %vm12542_vm0  ;;  %v9971_v27 = vld [vmem:[#allocation5 + $0x18] sm:$0xff] }
0x11cb   :  { %6649 = vmatpush.bf16.msra.mxu2 %v9971_v27 }
0x11cc   :  { %9355 = vmatmul.msk.bf16.vlgmr.msra.gmra.mxu1 %vm12540_vm1, %v6285_v42  ;;  %v6399_v18 = vrot.slane %v6285_v42, 1  ;;  %v6305_v51 = vshll.u32 %v6285_v42, 16  ;;  %v6303_v10 = vshrl.u32 %v6285_v42, 16  ;;  %vm12553_vm1 = vcmask 523265  }
0x11ce   :  { %9372 = vmatmul.msk.bf16.vlgmr.msrb.gmra.mxu2 %vm12541_vm12, %v6399_v18  ;;  %v6307_v12 = vrot.slane %v6305_v51, 1  ;;  %v9973_v18 = vld [vmem:[#allocation5 + $0x28] sm:$0xff]  ;;  %v9970_v51 = vld [vmem:[#allocation5 + $0x10] sm:$0xff]  ;;  %vm12554_vm12 = vcmask 521216  }
0x11cf   :  { %6611 = vmatpush.bf16.msrb.mxu1 %v9973_v18  ;;  %6650 = vmatpush.bf16.msra.mxu2 %v9970_v51 }
0x11d0   :  { %v6308_v28 = vor.u32 %v6307_v12, %v6303_v10  ;;  %v9972_v12 = vld [vmem:[#allocation5 + $0x20] sm:$0xff] }
0x11d2   :  { %9338 = vmatmul.msk.bf16.vlgmr.msra.gmra.mxu0 %vm12542_vm0, %v6308_v28  ;;  %vm12555_vm0 = vcmask 517120  }
0x11d3   :  { %6740 = vmatpush.msra.mxu0 %v12059_v60  ;;  %6612 = vmatpush.bf16.msrb.mxu1 %v9972_v12 }
0x11d4   :  { %6651 = vmatpush.bf16.msra.mxu2 %v9969_v16 }
0x11d5   :  { %6741 = vmatpush.msra.mxu0 %v12063_v22 }
0x11d7   :  { %6742 = vmatpush.msra.mxu0 %v12066_v2  ;;  %6774 = vmatpush.msra.mxu1 %v12059_v60 }
0x11d8   :  { %6652 = vmatpush.bf16.msra.mxu2 %v9968_v7 }
0x11d9   :  { %6743 = vmatpush.msra.mxu0 %v12069_v26  ;;  %6775 = vmatpush.msra.mxu1 %v12063_v22 }
0x11db   :  { %6744 = vmatpush.msra.mxu0 %v12073_v4  ;;  %6776 = vmatpush.msra.mxu1 %v12066_v2 }
0x11dd   :  { %6745 = vmatpush.msra.mxu0 %v12079_v29  ;;  %6777 = vmatpush.msra.mxu1 %v12069_v26 }
0x11df   :  { %6746 = vmatpush.msra.mxu0 %v12083_v34  ;;  %6778 = vmatpush.msra.mxu1 %v12073_v4 }
0x11e1   :  { %6747 = vmatpush.msra.mxu0 %v12087_v58  ;;  %6779 = vmatpush.msra.mxu1 %v12079_v29 }
0x11e3   :  { %6780 = vmatpush.msra.mxu1 %v12083_v34 }
0x11e5   :  { %6781 = vmatpush.msra.mxu1 %v12087_v58 }
0x1249   :  { %v6385_v54 = vpop.f32.mrf.mxu1 }
0x124f   :  { %v6345_v0 = vpop.f32.mrf.mxu0 }
0x1250   :  { %v6386_v32 = vadd.f32 %v6385_v54, %v6345_v0 }
0x1251   :  { %v6436_v21 = vpop.f32.mrf.mxu2  ;;  %v6387_v24 = vpop.f32.mrf.mxu1 }
0x1252   :  { %v12099_v50 = vadd.f32 %v6436_v21, %v6386_v32 }
0x1254   :  { %v6483_v59 = vmul.f32 %v12099_v50, %v12099_v50  ;;  %v6451_v8 = vsel %vm12543_vm6, %v12099_v50, 0.0  ;;  %vm12556_vm6 = vmmov %vm12547_vm4 }
0x1256   :  { %v6485_v44 = vsel %vm12545_vm11, %v6483_v59, 0.0  ;;  %vm12558_vm11 = vmmov %vm12547_vm4 }
0x1257   :  { %v6347_v47 = vpop.f32.mrf.mxu0 }
0x1258   :  { %v6388_v6 = vadd.f32 %v6387_v24, %v6347_v47 }
0x1259   :  { %v6438_v31 = vpop.f32.mrf.mxu2 }
0x125a   :  { %v12103_v61 = vadd.f32 %v6438_v31, %v6388_v6 }
0x125c   :  { %v6452_v30 = vsel %vm12544_vm5, %v12103_v61, 0.0  ;;  %v6484_v11 = vmul.f32 %v12103_v61, %v12103_v61  ;;  %vm12557_vm5 = vmmov %vm12547_vm4 }
0x125d   :  { %v6453_v53 = vadd.f32 %v6452_v30, %v6451_v8 }
0x125e   :  { %v6486_v36 = vsel %vm12546_vm7, %v6484_v11, 0.0  ;;  %vm12559_vm7 = vmmov %vm12549_vm14 }
0x125f   :  { %v6454_v35 = vrot.slane %v6453_v53, 4  ;;  %v6487_v39 = vadd.f32 %v6486_v36, %v6485_v44 }
0x1261   :  { %v6455_v40 = vadd.f32 %v6454_v35, %v6453_v53  ;;  %v6488_v38 = vrot.slane %v6487_v39, 4 }
0x1263   :  { %v6456_v1 = vrot.slane %v6455_v40, 2  ;;  %v6489_v17 = vadd.f32 %v6488_v38, %v6487_v39 }
0x1265   :  { %v6457_v19 = vadd.f32 %v6456_v1, %v6455_v40  ;;  %v6490_v5 = vrot.slane %v6489_v17, 2 }
0x1267   :  { %v6458_v3 = vrot.slane %v6457_v19, 1  ;;  %v6491_v13 = vadd.f32 %v6490_v5, %v6489_v17 }
0x1269   :  { %v6459_v41 = vadd.f32 %v6458_v3, %v6457_v19  ;;  %v6492_v45 = vrot.slane %v6491_v13, 1 }
0x126b   :  { %v6493_v63 = vadd.f32 %v6492_v45, %v6491_v13  ;;  %9373 = vmatmul.msk.f32.vlgmr.msra.gmra.mxu3 %vm12547_vm4, %v6459_v41 }
0x126c   :  { %9433 = vmatpush.msk.msra.mxu3 %vm12549_vm14, %v12548_v48  ;;  %vm12560_vm14 = vcmask 520192  }
0x126d   :  { %9374 = vmatmul.msk.f32.vlgmr.msrb.gmra.mxu0 %vm12550_vm8, %v6493_v63  ;;  %vm12561_vm8 = vmmov %vm12547_vm4 }
0x126e   :  { %6895 = vmatpush.msra.mxu3 %v12551_v55 }
0x12ea   :  { %v6514_v57 = vpop.f32.mrf.mxu0 }
0x12eb   :  { %v6518_v20 = vmul.f32 0.03846154, %v6514_v57 }
0x12ee   :  { %v6480_v15 = vpop.f32.mrf.mxu3 }
0x12ef   :  { %v6517_v14 = vmul.f32 0.03846154, %v6480_v15 }
0x12f1   :  { %v6519_v23 = vmul.f32 %v6517_v14, %v6517_v14  ;;  %v6522_v32 = vperm.slane %v6517_v14, 0 }
0x12f3   :  { %v6520_v42 = vsub.f32 %v6518_v20, %v6519_v23  ;;  %v6523_v6 = vsub.f32 %v12099_v50, %v6522_v32  ;;  %v6524_v31 = vsub.f32 %v12103_v61, %v6522_v32 }
0x12f5   :  { %v6521_v10 = vmax.f32 %v6520_v42, 0.0 }
0x12f7   :  { %v6525_v28 = vadd.f32 1e-05, %v6521_v10 }
0x12f9   :  { %10064 = vrsqrt.f32 %v6525_v28  ;;  %vm6532_vm9 = vweird.f32 %v6525_v28 }
0x12ff   :  { %v10065_v9 = vpop.eup %10064 }
0x1300   :  { %v6527_v25 = vmul.f32 %v10065_v9, %v6525_v28  ;;  %vm6533_vm3 = vweird.f32 %v10065_v9 }
0x1301   :  { %vm6534_vm10 = vmor %vm6532_vm9, %vm6533_vm3 }
0x1302   :  { %v6528_v54 = vmul.f32 %v10065_v9, %v6527_v25  ;;  %vm12562_vm3 = vmmov %vm12560_vm14 }
0x1303   :  { %vm12563_vm9 = vmmov %vm12547_vm4 }
0x1304   :  { %v6529_v0 = vmul.f32 0.5, %v6528_v54 }
0x1306   :  { %v6530_v21 = vsub.f32 1.5, %v6529_v0 }
0x1308   :  { %v6531_v24 = vmul.f32 %v10065_v9, %v6530_v21 }
0x130a   :  { %v6535_v47 = vsel %vm6534_vm10, %v10065_v9, %v6531_v24  ;;  %vm12564_vm10 = vmmov %vm12547_vm4 }
0x130b   :  { %v6536_v59 = vperm.slane %v6535_v47, 0 }
0x130d   :  { %v6537_v8 = vmul.f32 %v6536_v59, %v6523_v6  ;;  %v6538_v30 = vmul.f32 %v6536_v59, %v6524_v31 }
0x130f   :  { %v6539_v11 = vmax.f32 %v6537_v8, 0.0  ;;  %v6540_v53 = vmax.f32 %v6538_v30, 0.0  ;;  %v6816_v8 = vld [vmem:[%s12391_s14 + $0x2c] sm:$0xff] }
0x1311   :  { %v6545_v44 = vrot.slane %v6539_v11, 7  ;;  %v6546_v36 = vrot.slane %v6540_v53, 7  ;;  %v6820_v11 = vld [vmem:[%s12391_s14 + $0x48] sm:$0xff] }
0x1313   :  { %v6547_v35 = vsel %vm12552_vm2, %v6545_v44, %v6546_v36  ;;  %6550 = vst.msk [vmem:[#allocation2] sm:$0xfe] %vm12553_vm1, %v6545_v44  ;;  %vm6824_vm2 = vcmask 105472   ;;  %v6817_v44 = vld [vmem:[%s12391_s14 + $0x34] sm:$0xff] }
0x1314   :  { %6551 = vst.msk [vmem:[#allocation2 + $0x10] sm:$0x3f] %vm12554_vm12, %v6547_v35  ;;  %v6821_v36 = vld [vmem:[%s12391_s14 + $0x50] sm:$0xff] }
0x131a   :  { %v6552_v39 = vld [vmem:[#allocation2] sm:$0xff] }
0x131b   :  { %v6553_v40 = vld [vmem:[#allocation2 + $0x10] sm:$0x7f]  ;;  %7115 = vst.msk [vmem:[#allocation2] sm:$0x3] %vm12555_vm0, %v12533_v46 }
0x131c   :  { %v6554_v50 = vpack.c.bf16 %v6553_v40, %v6552_v39  ;;  %v6818_v40 = vld [vmem:[%s12391_s14 + $0x3c] sm:$0xff] }
0x131e   :  { %9408 = vmatmul.msk.bf16.vlgmr.msra.gmra.mxu2 %vm12556_vm6, %v6554_v50  ;;  %v6668_v61 = vrot.slane %v6554_v50, 1  ;;  %v6574_v38 = vshll.u32 %v6554_v50, 16  ;;  %v6572_v1 = vshrl.u32 %v6554_v50, 16  ;;  %vm12565_vm6 = vmmov %vm12559_vm7 }
0x1320   :  { %9425 = vmatmul.msk.bf16.vlgmr.msrb.gmra.mxu3 %vm12557_vm5, %v6668_v61  ;;  %v6576_v17 = vrot.slane %v6574_v38, 1  ;;  %vm12566_vm5 = vmmov %vm12565_vm6 }
0x1321   :  { %7073 = vmatpush.msrb.mxu3 %v12059_v60 }
0x1322   :  { %v6577_v19 = vor.u32 %v6576_v17, %v6572_v1  ;;  %v6822_v1 = vld [vmem:[%s12391_s14 + $0x58] sm:$0xff] }
0x1323   :  { %7074 = vmatpush.msrb.mxu3 %v12063_v22 }
0x1324   :  { %9391 = vmatmul.msk.bf16.vlgmr.msrb.gmra.mxu1 %vm12558_vm11, %v6577_v19 }
0x1325   :  { %9443 = vmatpush.msk.msrb.mxu1 %vm12559_vm7, %v12548_v48  ;;  %7075 = vmatpush.msrb.mxu3 %v12066_v2 }
0x1327   :  { %6965 = vmatpush.msrb.mxu1 %v12551_v55  ;;  %7076 = vmatpush.msrb.mxu3 %v12069_v26 }
0x1329   :  { %7077 = vmatpush.msrb.mxu3 %v12073_v4 }
0x132b   :  { %7078 = vmatpush.msrb.mxu3 %v12079_v29 }
0x132d   :  { %7079 = vmatpush.msrb.mxu3 %v12083_v34 }
0x132f   :  { %7080 = vmatpush.msrb.mxu3 %v12087_v58 }
0x1330   :  { %9434 = vmatmul.msk.f32.vlgmr.msra.gmra.mxu3 %vm6824_vm2, %v6816_v8 }
0x1338   :  { %9435 = vmatmul.msk.f32.gmra.mxu3 %vm6824_vm2, %v6817_v44 }
0x1340   :  { %9436 = vmatmul.msk.f32.gmra.mxu3 %vm6824_vm2, %v6818_v40 }
0x13a1   :  { %v6614_v46 = vpop.f32.mrf.mxu1  ;;  %v6654_v5 = vpop.f32.mrf.mxu2 }
0x13a2   :  { %v6655_v13 = vadd.f32 %v6654_v5, %v6614_v46  ;;  %v6819_v46 = vld [vmem:[%s12391_s14 + $0x44] sm:$0xf] }
0x13a3   :  { %v6705_v3 = vpop.f32.mrf.mxu3  ;;  %9437 = vmatmul.msk.f32.gmra.mxu3 %vm6824_vm2, %v6819_v46 }
0x13a4   :  { %v12147_v41 = vadd.f32 %v6705_v3, %v6655_v13 }
0x13a6   :  { %v6752_v56 = vmul.f32 %v12147_v41, %v12147_v41  ;;  %v6720_v15 = vsel %vm12547_vm4, %v12147_v41, 0.0 }
0x13a8   :  { %v6754_v23 = vsel %vm12561_vm8, %v6752_v56, 0.0  ;;  %vm6980_vm8 = vcmp.le.f32.partialorder %v11859_v43, 25.0 }
0x13a9   :  { %v6616_v45 = vpop.f32.mrf.mxu1  ;;  %v6656_v63 = vpop.f32.mrf.mxu2 }
0x13aa   :  { %v6657_v48 = vadd.f32 %v6656_v63, %v6616_v45 }
0x13ab   :  { %v6707_v55 = vpop.f32.mrf.mxu3 }
0x13ac   :  { %v6711_v57 = vadd.f32 %v6707_v55, %v6657_v48  ;;  %v6823_v55 = vld [vmem:[%s12391_s14 + $0x60] sm:$0xf] }
0x13ae   :  { %v6721_v14 = vsel %vm12560_vm14, %v6711_v57, 0.0  ;;  %v6753_v33 = vmul.f32 %v6711_v57, %v6711_v57 }
0x13af   :  { %v6722_v20 = vadd.f32 %v6721_v14, %v6720_v15 }
0x13b0   :  { %v6755_v27 = vsel %vm12562_vm3, %v6753_v33, 0.0 }
0x13b1   :  { %v6723_v42 = vrot.slane %v6722_v20, 4  ;;  %v6756_v18 = vadd.f32 %v6755_v27, %v6754_v23  ;;  %v9986_v23 = vld [vmem:[%s12389_s12 + $0x30] sm:$0xff] }
0x13b2   :  { %v9994_v27 = vld [vmem:[%s12389_s12 + $0x70] sm:$0xff] }
0x13b3   :  { %v6724_v51 = vadd.f32 %v6723_v42, %v6722_v20  ;;  %v6757_v10 = vrot.slane %v6756_v18, 4  ;;  %v6813_v20 = vadd.s32 24, %v12532_v37  ;;  %v9989_v42 = vld [vmem:[%s12389_s12 + $0x48] sm:$0xff] }
0x13b5   :  { %v6725_v12 = vrot.slane %v6724_v51, 2  ;;  %v6758_v28 = vadd.f32 %v6757_v10, %v6756_v18  ;;  %v6815_v18 = vcvt.s32.f32 %v6813_v20  ;;  %v9981_v20 = vld [vmem:[%s12389_s12 + $0x8] sm:$0xff] }
0x13b7   :  { %v6726_v16 = vadd.f32 %v6725_v12, %v6724_v51  ;;  %v6759_v7 = vrot.slane %v6758_v28, 2 }
0x13b9   :  { %v6727_v9 = vrot.slane %v6726_v16, 1  ;;  %v6760_v25 = vadd.f32 %v6759_v7, %v6758_v28 }
0x13bb   :  { %v6728_v54 = vadd.f32 %v6727_v9, %v6726_v16  ;;  %v6761_v0 = vrot.slane %v6760_v25, 1 }
0x13bd   :  { %v6762_v21 = vadd.f32 %v6761_v0, %v6760_v25  ;;  %9426 = vmatmul.msk.f32.vlgmr.msra.gmra.mxu0 %vm12563_vm9, %v6728_v54 }
0x13bf   :  { %9427 = vmatmul.msk.f32.vlgmr.msra.gmra.mxu1 %vm12564_vm10, %v6762_v21  ;;  %vm6979_vm10 = vcmp.le.f32.partialorder %v11491_v49, 25.0 }
0x13c7   :  { %9444 = vmatmul.msk.f32.vlgmr.msrb.gmra.mxu1 %vm6824_vm2, %v6820_v11 }
0x13cf   :  { %9445 = vmatmul.msk.f32.gmra.mxu1 %vm6824_vm2, %v6821_v36 }
0x13d7   :  { %9446 = vmatmul.msk.f32.gmra.mxu1 %vm6824_vm2, %v6822_v1 }
0x13df   :  { %9447 = vmatmul.msk.f32.gmra.mxu1 %vm6824_vm2, %v6823_v55 }
0x143a   :  { %v6749_v32 = vpop.f32.mrf.mxu0 }
0x143b   :  { %v6786_v24 = vmul.f32 0.03846154, %v6749_v32 }
0x143c   :  { %v6783_v47 = vpop.f32.mrf.mxu1 }
0x143d   :  { %v6788_v6 = vmul.f32 %v6786_v24, %v6786_v24  ;;  %v6787_v31 = vmul.f32 0.03846154, %v6783_v47  ;;  %v6791_v17 = vperm.slane %v6786_v24, 0 }
0x143f   :  { %v6789_v59 = vsub.f32 %v6787_v31, %v6788_v6  ;;  %v6792_v3 = vsub.f32 %v12147_v41, %v6791_v17  ;;  %v6793_v13 = vsub.f32 %v6711_v57, %v6791_v17 }
0x1441   :  { %v6790_v30 = vmax.f32 %v6789_v59, 0.0 }
0x1443   :  { %v6794_v53 = vadd.f32 1e-05, %v6790_v30 }
0x1445   :  { %10066 = vrsqrt.f32 %v6794_v53  ;;  %vm6801_vm12 = vweird.f32 %v6794_v53 }
0x144b   :  { %v10067_v35 = vpop.eup %10066 }
0x144c   :  { %v6796_v39 = vmul.f32 %v10067_v35, %v6794_v53  ;;  %vm6802_vm1 = vweird.f32 %v10067_v35 }
0x144d   :  { %vm6803_vm0 = vmor %vm6801_vm12, %vm6802_vm1 }
0x144e   :  { %v6797_v50 = vmul.f32 %v10067_v35, %v6796_v39 }
0x1450   :  { %v6798_v61 = vmul.f32 0.5, %v6797_v50 }
0x1452   :  { %v6799_v38 = vsub.f32 1.5, %v6798_v61 }
0x1454   :  { %v6800_v19 = vmul.f32 %v10067_v35, %v6799_v38 }
0x1456   :  { %v6804_v5 = vsel %vm6803_vm0, %v10067_v35, %v6800_v19 }
0x1457   :  { %v6805_v45 = vperm.slane %v6804_v5, 0 }
0x1459   :  { %v6807_v63 = vmul.f32 %v6805_v45, %v6793_v13  ;;  %v6806_v48 = vmul.f32 %v6805_v45, %v6792_v3 }
0x145b   :  { %v6809_v56 = vadd.f32 %v6807_v63, %v12047_v62  ;;  %v6808_v15 = vadd.f32 %v6806_v48, %v12043_v52  ;;  %v6967_v52 = vpop.f32.mrf.mxu1  ;;  %v6897_v62 = vpop.f32.mrf.mxu3 }
0x145c   :  { %vm6993_vm7 = vcmp.eq.f32.partialorder %v6967_v52, %v11491_v49 }
0x145d   :  { %v6811_v14 = vmax.f32 %v6809_v56, 0.0  ;;  %v6810_v41 = vmax.f32 %v6808_v15, 0.0  ;;  %vm12227_vm1 = vmand %vm5649_vm13, %vm6993_vm7  ;;  %vm6992_vm7 = vcmp.ge.f32.partialorder %v6815_v18, 2.0 }
0x145f   :  { %9428 = vmatpush.msk.msrb.mxu2 %vm12565_vm6, %v6811_v14  ;;  %9438 = vmatpush.msk.msrb.mxu0 %vm12566_vm5, %v6811_v14 }
0x1461   :  { %6855 = vmatpush.msrb.mxu2 %v6810_v41  ;;  %6936 = vmatpush.msrb.mxu0 %v6810_v41 }
0x1462   :  { %9429 = vmatmul.msk.f32.vlgmr.msrb.gmra.mxu2 %vm6824_vm2, %v6816_v8  ;;  %9439 = vmatmul.msk.f32.vlgmr.msrb.gmra.mxu0 %vm6824_vm2, %v6820_v11 }
0x1463   :  { %7033 = vmatpush.msra.mxu2 %v12059_v60  ;;  %v6970_v60 = vpop.f32.mrf.mxu1 }
0x1464   :  { %vm6994_vm11 = vcmp.eq.f32.partialorder %v6970_v60, %v11859_v43 }
0x1465   :  { %7034 = vmatpush.msra.mxu2 %v12063_v22  ;;  %vm12219_vm9 = vmand %vm5650_vm15, %vm6994_vm11 }
0x1467   :  { %7035 = vmatpush.msra.mxu2 %v12066_v2  ;;  %v6900_v2 = vpop.f32.mrf.mxu3 }
0x1468   :  { %vm6984_vm3 = vcmp.eq.f32.partialorder %v6900_v2, %v11859_v43 }
0x1469   :  { %7036 = vmatpush.msra.mxu2 %v12069_v26  ;;  %vm6988_vm15 = vmand %vm6980_vm8, %vm6984_vm3  ;;  %vm12575_vm3 = vcmask 523264  }
0x146a   :  { %9430 = vmatmul.msk.f32.gmra.mxu2 %vm6824_vm2, %v6817_v44  ;;  %9440 = vmatmul.msk.f32.gmra.mxu0 %vm6824_vm2, %v6821_v36 }
0x146b   :  { %7037 = vmatpush.msra.mxu2 %v12073_v4  ;;  %v6812_v4 = vadd.s32 16, %v12532_v37 }
0x146d   :  { %7038 = vmatpush.msra.mxu2 %v12079_v29  ;;  %v6814_v57 = vcvt.s32.f32 %v6812_v4 }
0x146f   :  { %7039 = vmatpush.msra.mxu2 %v12083_v34  ;;  %v6973_v34 = vpop.f32.mrf.mxu1  ;;  %vm6991_vm14 = vcmp.ge.f32.partialorder %v6814_v57, 2.0  ;;  %vm6981_vm12 = vcmp.le.f32.partialorder %v6814_v57, 25.0 }
0x1470   :  { %vm6995_vm4 = vcmp.eq.f32.partialorder %v6973_v34, %v6814_v57  ;;  %v9982_v34 = vld [vmem:[%s12389_s12 + $0x10] sm:$0xff] }
0x1471   :  { %7040 = vmatpush.msra.mxu2 %v12087_v58  ;;  %v6903_v58 = vpop.f32.mrf.mxu3  ;;  %vm12231_vm6 = vmand %vm6991_vm14, %vm6995_vm4  ;;  %vm6982_vm4 = vcmp.le.f32.partialorder %v6815_v18, 25.0 }
0x1472   :  { %9431 = vmatmul.msk.f32.gmra.mxu2 %vm6824_vm2, %v6818_v40  ;;  %9441 = vmatmul.msk.f32.gmra.mxu0 %vm6824_vm2, %v6822_v1  ;;  %vm6985_vm0 = vcmp.eq.f32.partialorder %v6903_v58, %v6814_v57  ;;  %v9987_v57 = vld [vmem:[%s12389_s12 + $0x38] sm:$0xff]  ;;  %v9990_v58 = vld [vmem:[%s12389_s12 + $0x50] sm:$0xff] }
0x1473   :  { %vm6989_vm13 = vmand %vm6981_vm12, %vm6985_vm0  ;;  %7209 = vmatpush.bf16.msra.mxu0 %v9987_v57 }
0x1477   :  { %v6976_v51 = vpop.f32.mrf.mxu1  ;;  %7210 = vmatpush.bf16.msra.mxu0 %v9986_v23 }
0x1478   :  { %vm6996_vm11 = vcmp.eq.f32.partialorder %v6976_v51, %v6815_v18 }
0x1479   :  { %v6906_v16 = vpop.f32.mrf.mxu3  ;;  %vm12249_vm8 = vmand %vm6992_vm7, %vm6996_vm11 }
0x147a   :  { %9432 = vmatmul.msk.f32.gmra.mxu2 %vm6824_vm2, %v6819_v46  ;;  %9442 = vmatmul.msk.f32.gmra.mxu0 %vm6824_vm2, %v6823_v55  ;;  %vm6983_vm2 = vcmp.eq.f32.partialorder %v6897_v62, %v11491_v49  ;;  %vm6986_vm14 = vcmp.eq.f32.partialorder %v6906_v16, %v6815_v18  ;;  %v9980_v18 = vld [vmem:[%s12389_s12] sm:$0xff]  ;;  %v9993_v16 = vld [vmem:[%s12389_s12 + $0x68] sm:$0xff] }
0x147b   :  { %vm6987_vm5 = vmand %vm6979_vm10, %vm6983_vm2 }
0x147c   :  { %vm12577_vm10 = vmmov %vm12575_vm3 }
0x147d   :  { %vm12578_vm2 = vmmov %vm12575_vm3 }
0x147e   :  { %vm12579_vm12 = vmmov %vm12578_vm2 }
0x147f   :  { %vm12580_vm0 = vmmov %vm12578_vm2 }
0x14df   :  { %v6938_v22 = vpop.f32.mrf.mxu0 }
0x14e0   :  { %v7001_v49 = vsel %vm12227_vm1, %v6938_v22, 0.0  ;;  %vm6990_vm1 = vmand %vm6982_vm4, %vm6986_vm14  ;;  %vm12585_vm14 = vcmask 523266  }
0x14e5   :  { %v6857_v26 = vpop.f32.mrf.mxu2 }
0x14e6   :  { %v12243_v7 = vsel %vm6987_vm5, %v6857_v26, %v7001_v49  ;;  %vm12583_vm5 = vmmov %vm12580_vm0  ;;  %v9983_v26 = vld [vmem:[%s12389_s12 + $0x18] sm:$0xff]  ;;  %v9985_v49 = vld [vmem:[%s12389_s12 + $0x28] sm:$0xff] }
0x14e7   :  { %v6941_v29 = vpop.f32.mrf.mxu0  ;;  %v7045_v21 = vmul.f32 %v12243_v7, %v12243_v7  ;;  %7256 = vmatpush.bf16.msra.mxu1 %v9983_v26  ;;  %7211 = vmatpush.bf16.msra.mxu0 %v9985_v49 }
0x14e8   :  { %v7002_v43 = vsel %vm12219_vm9, %v6941_v29, 0.0  ;;  %vm12576_vm9 = vmmov %vm12575_vm3  ;;  %v9991_v29 = vld [vmem:[%s12389_s12 + $0x58] sm:$0xff] }
0x14e9   :  { %v7009_v47 = vsel %vm12576_vm9, %v12243_v7, 0.0  ;;  %v7049_v30 = vsel %vm12579_vm12, %v7045_v21, 0.0  ;;  %7319 = vmatpush.bf16.msrb.mxu2 %v9991_v29  ;;  %v9984_v21 = vld [vmem:[%s12389_s12 + $0x20] sm:$0xff]  ;;  %vm12588_vm9 = vmmov %vm12580_vm0 }
0x14ea   :  { %vm12592_vm12 = vmmov %vm12580_vm0 }
0x14eb   :  { %7257 = vmatpush.bf16.msra.mxu1 %v9982_v34  ;;  %7212 = vmatpush.bf16.msra.mxu0 %v9984_v21 }
0x14ed   :  { %v6860_v33 = vpop.f32.mrf.mxu2  ;;  %7320 = vmatpush.bf16.msrb.mxu2 %v9990_v58 }
0x14ee   :  { %v12241_v12 = vsel %vm6988_vm15, %v6860_v33, %v7002_v43  ;;  %v9995_v33 = vld [vmem:[%s12389_s12 + $0x78] sm:$0xff] }
0x14ef   :  { %v6944_v37 = vpop.f32.mrf.mxu0  ;;  %v7046_v25 = vmul.f32 %v12241_v12, %v12241_v12  ;;  %v7010_v32 = vsel %vm12575_vm3, %v12241_v12, 0.0  ;;  %7388 = vmatpush.bf16.msra.mxu3 %v9995_v33  ;;  %7258 = vmatpush.bf16.msra.mxu1 %v9981_v20 }
0x14f0   :  { %v7003_v10 = vsel %vm12231_vm6, %v6944_v37, 0.0  ;;  %v7011_v8 = vadd.f32 %v7010_v32, %v7009_v47  ;;  %vm12581_vm6 = vcmask 519168   ;;  %v9992_v32 = vld [vmem:[%s12389_s12 + $0x60] sm:$0xff] }
0x14f1   :  { %v7050_v6 = vsel %vm12577_vm10, %v7046_v25, 0.0  ;;  %vm12582_vm15 = vmmov %vm12581_vm6  ;;  %7321 = vmatpush.bf16.msrb.mxu2 %v9989_v42 }
0x14f2   :  { %v7051_v44 = vadd.f32 %v7050_v6, %v7049_v30 }
0x14f3   :  { %7389 = vmatpush.bf16.msra.mxu3 %v9994_v27  ;;  %7259 = vmatpush.bf16.msra.mxu1 %v9980_v18 }
0x14f5   :  { %v6863_v28 = vpop.f32.mrf.mxu2 }
0x14f6   :  { %v12245_v9 = vsel %vm6989_vm13, %v6863_v28, %v7003_v10  ;;  %vm12584_vm13 = vmmov %vm12580_vm0  ;;  %v9988_v28 = vld [vmem:[%s12389_s12 + $0x40] sm:$0xff] }
0x14f7   :  { %v6947_v54 = vpop.f32.mrf.mxu0  ;;  %v7047_v24 = vmul.f32 %v12245_v9, %v12245_v9  ;;  %v7012_v31 = vsel %vm12578_vm2, %v12245_v9, 0.0  ;;  %7390 = vmatpush.bf16.msra.mxu3 %v9993_v16  ;;  %7322 = vmatpush.bf16.msrb.mxu2 %v9988_v28  ;;  %vm12590_vm2 = vmmov %vm12580_vm0 }
0x14f8   :  { %v7004_v59 = vsel %vm12249_vm8, %v6947_v54, 0.0  ;;  %v7013_v36 = vadd.f32 %v7012_v31, %v7011_v8  ;;  %vm12586_vm8 = vcmask 1041408  }
0x14f9   :  { %v7052_v11 = vsel %vm12580_vm0, %v7047_v24, 0.0  ;;  %vm12587_vm3 = vmmov %vm12586_vm8  ;;  %vm12593_vm0 = vcmask 1046528  }
0x14fa   :  { %v7053_v50 = vadd.f32 %v7052_v11, %v7051_v44  ;;  %vm12589_vm10 = vmmov %vm12587_vm3 }
0x14fb   :  { %7391 = vmatpush.bf16.msra.mxu3 %v9992_v32 }
0x14fd   :  { %v6866_v53 = vpop.f32.mrf.mxu2 }
0x14fe   :  { %v12268_v35 = vsel %vm6990_vm1, %v6866_v53, %v7004_v59  ;;  %vm12591_vm1 = vcmask 521216  }
0x14ff   :  { %v7014_v39 = vsel %vm12581_vm6, %v12268_v35, 0.0  ;;  %v7048_v40 = vmul.f32 %v12268_v35, %v12268_v35  ;;  %vm12594_vm6 = vmmov %vm12590_vm2 }
0x1500   :  { %v7015_v61 = vadd.f32 %v7014_v39, %v7013_v36 }
0x1501   :  { %v7054_v38 = vsel %vm12582_vm15, %v7048_v40, 0.0  ;;  %vm12595_vm15 = vsmask.f32 7424 }
0x1502   :  { %v7016_v1 = vrot.slane %v7015_v61, 4  ;;  %v7055_v17 = vadd.f32 %v7054_v38, %v7053_v50  ;;  %v9999_v38 = vld [vmem:[%s12389_s12 + $0x98] sm:$0xff] }
0x1503   :  { %7453 = vmatpush.bf16.msrb.mxu0 %v9999_v38 }
0x1504   :  { %v7017_v19 = vadd.f32 %v7016_v1, %v7015_v61  ;;  %v7056_v46 = vrot.slane %v7055_v17, 4 }
0x1506   :  { %v7018_v5 = vrot.slane %v7017_v19, 2  ;;  %v7057_v3 = vadd.f32 %v7056_v46, %v7055_v17 }
0x1508   :  { %v7019_v13 = vadd.f32 %v7018_v5, %v7017_v19  ;;  %v7058_v45 = vrot.slane %v7057_v3, 2  ;;  %v9998_v19 = vld [vmem:[%s12389_s12 + $0x90] sm:$0xff]  ;;  %v9997_v5 = vld [vmem:[%s12389_s12 + $0x88] sm:$0xff] }
0x1509   :  { %7454 = vmatpush.bf16.msrb.mxu0 %v9998_v19 }
0x150a   :  { %v7020_v63 = vrot.slane %v7019_v13, 1  ;;  %v7059_v48 = vadd.f32 %v7058_v45, %v7057_v3 }
0x150c   :  { %v7021_v55 = vadd.f32 %v7020_v63, %v7019_v13  ;;  %v7060_v56 = vrot.slane %v7059_v48, 1 }
0x150d   :  { %7455 = vmatpush.bf16.msrb.mxu0 %v9997_v5 }
0x150e   :  { %v7061_v15 = vadd.f32 %v7060_v56, %v7059_v48  ;;  %9448 = vmatmul.msk.f32.vlgmr.msra.gmra.mxu2 %vm12583_vm5, %v7021_v55  ;;  %vm12596_vm5 = vmmov %vm12590_vm2 }
0x1510   :  { %9449 = vmatmul.msk.f32.vlgmr.msrb.gmra.mxu3 %vm12584_vm13, %v7061_v15  ;;  %vm12597_vm13 = vsmask.f32 6400 }
0x1591   :  { %v7042_v14 = vpop.f32.mrf.mxu2 }
0x1592   :  { %v7085_v41 = vmul.f32 0.017857144, %v7042_v14  ;;  %v9996_v14 = vld [vmem:[%s12389_s12 + $0x80] sm:$0xff] }
0x1593   :  { %v7082_v52 = vpop.f32.mrf.mxu3  ;;  %7456 = vmatpush.bf16.msrb.mxu0 %v9996_v14 }
0x1594   :  { %v7087_v62 = vmul.f32 %v7085_v41, %v7085_v41  ;;  %v7086_v60 = vmul.f32 0.017857144, %v7082_v52  ;;  %v7090_v54 = vperm.slane %v7085_v41, 0 }
0x1596   :  { %v7088_v22 = vsub.f32 %v7086_v60, %v7087_v62  ;;  %v7091_v47 = vsub.f32 %v12243_v7, %v7090_v54  ;;  %v7092_v6 = vsub.f32 %v12241_v12, %v7090_v54  ;;  %v7093_v31 = vsub.f32 %v12245_v9, %v7090_v54 }
0x1597   :  { %v7094_v8 = vsub.f32 %v12268_v35, %v7090_v54 }
0x1598   :  { %v7089_v2 = vmax.f32 %v7088_v22, 0.0 }
0x159a   :  { %v7095_v4 = vadd.f32 1e-05, %v7089_v2 }
0x159c   :  { %10068 = vrsqrt.f32 %v7095_v4  ;;  %vm7102_vm7 = vweird.f32 %v7095_v4 }
0x15a2   :  { %v10069_v37 = vpop.eup %10068 }
0x15a3   :  { %v7097_v43 = vmul.f32 %v10069_v37, %v7095_v4  ;;  %vm7103_vm11 = vweird.f32 %v10069_v37 }
0x15a4   :  { %vm7104_vm4 = vmor %vm7102_vm7, %vm7103_vm11 }
0x15a5   :  { %v7098_v51 = vmul.f32 %v10069_v37, %v7097_v43  ;;  %vm12598_vm11 = vmmov %vm12590_vm2 }
0x15a6   :  { %vm12599_vm7 = vmmov %vm12590_vm2 }
0x15a7   :  { %v7099_v10 = vmul.f32 0.5, %v7098_v51 }
0x15a9   :  { %v7100_v25 = vsub.f32 1.5, %v7099_v10 }
0x15ab   :  { %v7101_v0 = vmul.f32 %v10069_v37, %v7100_v25 }
0x15ad   :  { %v7105_v24 = vsel %vm7104_vm4, %v10069_v37, %v7101_v0  ;;  %vm12600_vm4 = vmmov %vm12590_vm2 }
0x15ae   :  { %v7106_v59 = vperm.slane %v7105_v24, 0 }
0x15b0   :  { %v7107_v30 = vmul.f32 %v7106_v59, %v7091_v47  ;;  %v7108_v11 = vmul.f32 %v7106_v59, %v7092_v6  ;;  %v7109_v53 = vmul.f32 %v7106_v59, %v7093_v31  ;;  %v7110_v44 = vmul.f32 %v7106_v59, %v7094_v8 }
0x15b2   :  { %10070 = vtanh.f32 %v7107_v30 }
0x15b3   :  { %10072 = vtanh.f32 %v7108_v11 }
0x15b4   :  { %10074 = vtanh.f32 %v7109_v53 }
0x15b5   :  { %10076 = vtanh.f32 %v7110_v44 }
0x15b8   :  { %v10071_v36 = vpop.eup %10070 }
0x15b9   :  { %v10073_v39 = vpop.eup %10072  ;;  %v7122_v7 = vrot.slane %v10071_v36, 6 }
0x15ba   :  { %v10075_v40 = vpop.eup %10074  ;;  %v7123_v12 = vrot.slane %v10073_v39, 6 }
0x15bb   :  { %v10077_v50 = vpop.eup %10076  ;;  %v7125_v9 = vrot.slane %v10075_v40, 6  ;;  %7133 = vst.msk [vmem:[#allocation2] sm:$0xfc] %vm12585_vm14, %v7122_v7  ;;  %vm12601_vm14 = vmmov %vm12590_vm2 }
0x15bc   :  { %v7124_v61 = vsel %vm12586_vm8, %v7122_v7, %v7123_v12  ;;  %v7127_v35 = vrot.slane %v10077_v50, 6  ;;  %vm12602_vm8 = vmmov %vm12590_vm2 }
0x15bd   :  { %v7126_v1 = vsel %vm12587_vm3, %v7123_v12, %v7125_v9  ;;  %7134 = vst.msk [vmem:[#allocation2 + $0x10] sm:$0xff] %vm12588_vm9, %v7124_v61  ;;  %vm12603_vm3 = vcmask 1045504   ;;  %vm12604_vm9 = vmmov %vm12590_vm2 }
0x15be   :  { %v7128_v17 = vsel %vm12589_vm10, %v7125_v9, %v7127_v35  ;;  %7135 = vst.msk [vmem:[#allocation2 + $0x20] sm:$0xff] %vm12590_vm2, %v7126_v1  ;;  %vm12605_vm10 = vmmov %vm12590_vm2  ;;  %vm12606_vm2 = vcmask 15360  }
0x15bf   :  { %7136 = vst.msk [vmem:[#allocation2 + $0x30] sm:$0x3f] %vm12591_vm1, %v7128_v17  ;;  %vm12607_vm1 = vmmov %vm12606_vm2 }
0x15c2   :  { %v7137_v46 = vld [vmem:[#allocation2] sm:$0xff] }
0x15c4   :  { %v7138_v3 = vld [vmem:[#allocation2 + $0x10] sm:$0xff] }
0x15c5   :  { %v7141_v13 = vpack.c.bf16 %v7138_v3, %v7137_v46  ;;  %v7139_v45 = vld [vmem:[#allocation2 + $0x20] sm:$0xff] }
0x15c6   :  { %v7140_v63 = vld [vmem:[#allocation2 + $0x30] sm:$0xff] }
0x15c7   :  { %9492 = vmatmul.msk.bf16.vlgmr.msra.gmra.mxu1 %vm12592_vm12, %v7141_v13  ;;  %v7142_v48 = vpack.c.bf16 %v7140_v63, %v7139_v45  ;;  %v7282_v55 = vrot.slane %v7141_v13, 1  ;;  %v7161_v56 = vshrl.u32 %v7141_v13, 16  ;;  %v7163_v15 = vshll.u32 %v7141_v13, 16  ;;  %vm12608_vm12 = vmmov %vm12607_vm1 }
0x15c8   :  { %v7416_v37 = vrot.slane %v7141_v13, 2 }
0x15c9   :  { %v7283_v41 = vrot.slane %v7142_v48, 1  ;;  %v7165_v52 = vrot.slane %v7163_v15, 1  ;;  %v7168_v62 = vshll.u32 %v7142_v48, 16  ;;  %v7172_v60 = vshrl.u32 %v7142_v48, 16 }
0x15ca   :  { %v7347_v22 = vrot.slane %v7161_v56, 1  ;;  %v7348_v2 = vrot.slane %v7163_v15, 2  ;;  %v7417_v42 = vrot.slane %v7142_v48, 2 }
0x15cb   :  { %v7284_v26 = vsel %vm12593_vm0, %v7282_v55, %v7283_v41  ;;  %v7166_v4 = vor.u32 %v7165_v52, %v7161_v56  ;;  %v7170_v29 = vrot.slane %v7168_v62, 1  ;;  %v7350_v34 = vrot.slane %v7172_v60, 1 }
0x15cc   :  { %9518 = vmatmul.msk.bf16.vlgmr.msrb.gmra.mxu2 %vm12594_vm6, %v7284_v26  ;;  %v7349_v57 = vor.u32 %v7348_v2, %v7347_v22  ;;  %v7351_v58 = vrot.slane %v7168_v62, 2  ;;  %v7418_v43 = vsel %vm12603_vm3, %v7416_v37, %v7417_v42  ;;  %vm7475_vm0 = vcmask 11264  }
0x15cd   :  { %v7171_v33 = vsel %vm12595_vm15, %v7166_v4, %v7170_v29  ;;  %v7174_v27 = vor.u32 %v7172_v60, %v7170_v29 }
0x15ce   :  { %9474 = vmatmul.msk.bf16.vlgmr.msra.gmra.mxu0 %vm12596_vm5, %v7171_v33  ;;  %v7352_v20 = vor.u32 %v7351_v58, %v7350_v34 }
0x15d0   :  { %v7353_v23 = vsel %vm12597_vm13, %v7349_v57, %v7352_v20 }
0x15d1   :  { %9544 = vmatmul.msk.bf16.vlgmr.msra.gmra.mxu3 %vm12598_vm11, %v7353_v23 }
0x15d7   :  { %9493 = vmatmul.msk.bf16.gmra.mxu1 %vm12599_vm7, %v7142_v48 }
0x15dc   :  { %9519 = vmatmul.msk.bf16.gmra.mxu2 %vm12600_vm4, %v7283_v41 }
0x15de   :  { %9475 = vmatmul.msk.bf16.gmra.mxu0 %vm12601_vm14, %v7174_v27 }
0x15e1   :  { %9545 = vmatmul.msk.bf16.gmra.mxu3 %vm12602_vm8, %v7352_v20 }
0x15ee   :  { %9570 = vmatmul.msk.bf16.vlgmr.msrb.gmra.mxu0 %vm12604_vm9, %v7418_v43 }
0x15fe   :  { %9571 = vmatmul.msk.bf16.gmra.mxu0 %vm12605_vm10, %v7417_v42 }
0x1644   :  { %v7261_v10 = vpop.f32.mrf.mxu1 }
0x164b   :  { %v7214_v18 = vpop.f32.mrf.mxu0 }
0x164c   :  { %v7262_v54 = vadd.f32 %v7261_v10, %v7214_v18  ;;  %v7263_v0 = vpop.f32.mrf.mxu1 }
0x164f   :  { %v7324_v28 = vpop.f32.mrf.mxu2 }
0x1650   :  { %v7334_v21 = vadd.f32 %v7324_v28, %v7262_v54 }
0x1653   :  { %v7216_v51 = vpop.f32.mrf.mxu0 }
0x1654   :  { %v7393_v16 = vpop.f32.mrf.mxu3  ;;  %v7264_v31 = vadd.f32 %v7263_v0, %v7216_v51  ;;  %v7266_v30 = vpop.f32.mrf.mxu1 }
0x1655   :  { %v7403_v24 = vadd.f32 %v7393_v16, %v7334_v21 }
0x1657   :  { %v7326_v32 = vpop.f32.mrf.mxu2 }
0x1658   :  { %v7335_v8 = vadd.f32 %v7326_v32, %v7264_v31 }
0x165b   :  { %v7219_v49 = vpop.f32.mrf.mxu0 }
0x165c   :  { %v7395_v47 = vpop.f32.mrf.mxu3  ;;  %v7267_v36 = vadd.f32 %v7266_v30, %v7219_v49  ;;  %v7268_v50 = vpop.f32.mrf.mxu1 }
0x165d   :  { %v7404_v11 = vadd.f32 %v7395_v47, %v7335_v8 }
0x165f   :  { %v7329_v53 = vpop.f32.mrf.mxu2 }
0x1660   :  { %v7336_v40 = vadd.f32 %v7329_v53, %v7267_v36 }
0x1663   :  { %v7221_v25 = vpop.f32.mrf.mxu0 }
0x1664   :  { %v7398_v7 = vpop.f32.mrf.mxu3  ;;  %v7269_v61 = vadd.f32 %v7268_v50, %v7221_v25 }
0x1665   :  { %v7405_v12 = vadd.f32 %v7398_v7, %v7336_v40 }
0x1667   :  { %v7331_v38 = vpop.f32.mrf.mxu2 }
0x1668   :  { %v7337_v17 = vadd.f32 %v7331_v38, %v7269_v61 }
0x166b   :  { %v7458_v6 = vpop.f32.mrf.mxu0 }
0x166c   :  { %v7468_v59 = vadd.f32 %v7458_v6, %v7403_v24  ;;  %v7400_v1 = vpop.f32.mrf.mxu3 }
0x166d   :  { %v7406_v19 = vadd.f32 %v7400_v1, %v7337_v17 }
0x166e   :  { %7472 = vst.msk [vmem:[%s12392_s15] sm:$0xff] %vm12606_vm2, %v7468_v59 }
0x1673   :  { %v7460_v44 = vpop.f32.mrf.mxu0 }
0x1674   :  { %v7469_v39 = vadd.f32 %v7460_v44, %v7404_v11 }
0x1676   :  { %7473 = vst.msk [vmem:[%s12392_s15 + $0x8] sm:$0xff] %vm12607_vm1, %v7469_v39 }
0x167b   :  { %v7463_v9 = vpop.f32.mrf.mxu0 }
0x167c   :  { %v7470_v35 = vadd.f32 %v7463_v9, %v7405_v12 }
0x167e   :  { %7474 = vst.msk [vmem:[%s12392_s15 + $0x10] sm:$0xff] %vm12608_vm12, %v7470_v35 }
0x1683   :  { %v7465_v46 = vpop.f32.mrf.mxu0 }
0x1684   :  { %v7471_v5 = vadd.f32 %v7465_v46, %v7406_v19 }
0x1686   :  { %7476 = vst.msk [vmem:[%s12392_s15 + $0x18] sm:$0xf] %vm7475_vm0, %v7471_v5 }
0x1687   :  { %7481 = vsyncpa [#allocation4], 1 }
0x1688   :  { %7482 = vsyncpa [#allocation6], 1 }
0x1689   :  { %7483 = vsyncpa [#allocation9], 1 }

</bundles_post_ra>
